<compile_context>
chip_gen: v6e
topology: v6e:2x2x1
jax: 0.10.0
libtpu: 0.0.40
codegen_flags: <defaults>
</compile_context>

<pallas_src>
import jax
import jax.numpy as jnp
from jax.experimental import pallas as pl
from jax.experimental.pallas import tpu as pltpu


# -----------------------------------------------------------------------------
# Kernel
# -----------------------------------------------------------------------------
def _mlp_softmax_kernel(x_ref,
                        w1_ref, b1_ref,
                        w2_ref, b2_ref,
                        w3_ref, b3_ref,
                        w4_ref, b4_ref,
                        w5_ref, b5_ref,
                        o_ref):
    # bf16 operands on the MXU, f32 accumulation; only the bf16 activation
    # stays live between layers (fused bias + ReLU + downcast epilogue).
    h = x_ref[...].astype(jnp.bfloat16)
    for w_ref, b_ref in ((w1_ref, b1_ref), (w2_ref, b2_ref),
                         (w3_ref, b3_ref), (w4_ref, b4_ref)):
        acc = jnp.dot(h, w_ref[...], preferred_element_type=jnp.float32)
        h = jnp.maximum(acc + b_ref[...], 0.0).astype(jnp.bfloat16)

    # final layer: Linear(dim_mlp, out_channels), no ReLU
    logits = jnp.dot(h, w5_ref[...],
                     preferred_element_type=jnp.float32) + b5_ref[...]

    # output_activation = Softmax(dim=-1), numerically stable, exact divide.
    m = jnp.max(logits, axis=-1, keepdims=True)
    e = jnp.exp(logits - m)
    o_ref[...] = (e / jnp.sum(e, axis=-1, keepdims=True)).astype(o_ref.dtype)
    # TODO(synk): gate-on-profile — if the writeback tail ever dominates
    # (out_ch=16 -> masked 16-lane stores), repack to a lane-dense [tile/8,128]
    # slab or emit bf16 output; kernel is MXU-bound at large N so not done here.


# -----------------------------------------------------------------------------
# Generation-aware tiling
# -----------------------------------------------------------------------------
_ROW_GRANULE = 128  # MXU-friendly M granule; also satisfies the (8,128) rule.


def _tpu_is_dual_tensorcore():
    """True for parts with two TensorCores per chip (v7x)."""
    try:
        kind = jax.devices()[0].device_kind.lower()
    except Exception:
        return False
    return ("v7" in kind) or ("7x" in kind)


def _choose_tiling(n, dual_tc):
    """Pick (tile_rows, n_pad).

    Single-TC (v5e/v6e): one grid step for small/medium N, 16K-row cap for
    large N. Dual-TC (v7x): keep >= 2 grid steps so both TensorCores get a
    slice; 8K-row cap against the smaller 64 MiB VMEM.
    """
    n_g = pl.cdiv(n, _ROW_GRANULE) * _ROW_GRANULE
    if dual_tc:
        cap = 8192
        if n_g <= 2 * cap:
            tile = max(_ROW_GRANULE,
                       pl.cdiv(n_g, 2 * _ROW_GRANULE) * _ROW_GRANULE)
        else:
            tile = cap
    else:
        cap = 16384
        tile = min(n_g, cap)
    n_pad = pl.cdiv(n, tile) * tile
    return tile, n_pad


# -----------------------------------------------------------------------------
# Wrapper
# -----------------------------------------------------------------------------
def mlp_render_instance_feature(xyz, feat_xyz, params, *, tile_rows=None):
    """Forward pass of MLPRenderInstanceFeature.

    xyz:      [N, C_xyz]   float32
    feat_xyz: [N, C_feat]  float32
    params:   dict with W1..W5 ([in, out], f32) and b1..b5 ([1, out], f32)
    returns:  [N, out_channels] softmax probabilities (float32)

    Note: matmuls run with bf16 operands / f32 accumulation on the MXU (the
    intended deviation from torch's f32 semantics, checked loosely below).
    """
    n, c_xyz = xyz.shape
    _, c_feat = feat_xyz.shape
    in_ch, dim_mlp = params["W1"].shape
    out_ch = params["W5"].shape[1]
    assert in_ch == c_xyz + c_feat, "W1 must match concat(xyz, feat_xyz) width"

    dual_tc = _tpu_is_dual_tensorcore()
    if tile_rows is None:
        tile_rows, n_pad = _choose_tiling(n, dual_tc)
    else:
        n_pad = pl.cdiv(n, tile_rows) * tile_rows

    # Layer-1 input: single K=32 operand (concat in the wrapper; the [N,32]
    # intermediate is ~128 B/row of HBM traffic — negligible vs compute).
    x = jnp.concatenate([xyz, feat_xyz], axis=-1)
    if n_pad != n:
        x = jnp.pad(x, ((0, n_pad - n), (0, 0)))

    # Cast weights to bf16 once, outside the grid. Biases stay f32 (added into
    # the f32 accumulator before the ReLU/downcast epilogue).
    w1 = params["W1"].astype(jnp.bfloat16)
    w2 = params["W2"].astype(jnp.bfloat16)
    w3 = params["W3"].astype(jnp.bfloat16)
    w4 = params["W4"].astype(jnp.bfloat16)
    w5 = params["W5"].astype(jnp.bfloat16)
    b1, b2, b3, b4, b5 = (params[f"b{i}"].astype(jnp.float32) for i in range(1, 6))
    # TODO(synk): accuracy-gated v7x option — fp8 weights for W2..W4 on the fp8
    # MXU path (not applicable to v5e/v6e).

    grid = (n_pad // tile_rows,)

    def full_spec(shape):
        # Whole weight / bias resident for every grid step (constant index map).
        return pl.BlockSpec(shape, lambda i: (0,) * len(shape))

    in_specs = [
        pl.BlockSpec((tile_rows, in_ch), lambda i: (i, 0)),
        full_spec(w1.shape), full_spec(b1.shape),
        full_spec(w2.shape), full_spec(b2.shape),
        full_spec(w3.shape), full_spec(b3.shape),
        full_spec(w4.shape), full_spec(b4.shape),
        full_spec(w5.shape), full_spec(b5.shape),
    ]
    out_specs = pl.BlockSpec((tile_rows, out_ch), lambda i: (i, 0))

    flops = 2 * n_pad * (in_ch * dim_mlp + 3 * dim_mlp * dim_mlp + dim_mlp * out_ch)
    weight_bytes = 2 * (in_ch * dim_mlp + 3 * dim_mlp * dim_mlp + dim_mlp * out_ch) \
        + 4 * (4 * dim_mlp + out_ch)
    bytes_accessed = 4 * n_pad * in_ch + weight_bytes + 4 * n_pad * out_ch
    cost = pl.CostEstimate(flops=int(flops),
                           transcendentals=int(n_pad * out_ch),
                           bytes_accessed=int(bytes_accessed))

    # VMEM budget: ~2 KB/row peak (bf16 h + f32 acc + double-buffered in/out
    # tiles) + ~1 MB of double-buffered weights.
    vmem_limit = (48 if dual_tc else 64) * 1024 * 1024
    # TODO(synk): verify in the Mosaic dump that "parallel" actually shards the
    # row axis across both v7x TensorCores; if not, switch to
    # pltpu.CORE_PARALLEL / an explicit core_map leading axis.

    fn = pl.pallas_call(
        _mlp_softmax_kernel,
        out_shape=jax.ShapeDtypeStruct((n_pad, out_ch), jnp.float32),
        grid_spec=pltpu.PrefetchScalarGridSpec(
            num_scalar_prefetch=0,
            grid=grid,
            in_specs=in_specs,
            out_specs=out_specs,
        ),
        compiler_params=pltpu.CompilerParams(
            dimension_semantics=("parallel",),
            vmem_limit_bytes=vmem_limit,
        ),
        cost_estimate=cost,
    )
    out = fn(x, w1, b1, w2, b2, w3, b3, w4, b4, w5, b5)
    return out[:n]


# -----------------------------------------------------------------------------
# Params / references / test
# -----------------------------------------------------------------------------
def init_params(key, in_channels, out_channels, num_mlp_layers=5, dim_mlp=256):
    """torch.nn.Linear-style init (U(-1/sqrt(fan_in), +1/sqrt(fan_in))); final
    layer bias zero (torch.nn.init.constant_(self.mlp[-1].bias, 0)). Weights
    stored [in, out]."""
    assert num_mlp_layers == 5, "kernel is specialized to the default 5-layer MLP"
    dims = [in_channels] + [dim_mlp] * (num_mlp_layers - 1) + [out_channels]
    params = {}
    keys = jax.random.split(key, 2 * (len(dims) - 1))
    for li in range(len(dims) - 1):
        fan_in, fan_out = dims[li], dims[li + 1]
        bound = 1.0 / jnp.sqrt(fan_in)
        w = jax.random.uniform(keys[2 * li], (fan_in, fan_out),
                               minval=-bound, maxval=bound, dtype=jnp.float32)
        if li == len(dims) - 2:
            b = jnp.zeros((1, fan_out), dtype=jnp.float32)
        else:
            b = jax.random.uniform(keys[2 * li + 1], (1, fan_out),
                                   minval=-bound, maxval=bound, dtype=jnp.float32)
        params[f"W{li + 1}"] = w
        params[f"b{li + 1}"] = b
    return params


def _reference_bf16(xyz, feat_xyz, params):
    """Pure-JAX reference mirroring the kernel's bf16-operand / f32-accum path
    (bf16 activation between layers)."""
    h = jnp.concatenate([xyz, feat_xyz], axis=-1).astype(jnp.bfloat16)
    for li in range(1, 5):
        acc = jnp.dot(h, params[f"W{li}"].astype(jnp.bfloat16),
                      preferred_element_type=jnp.float32) + params[f"b{li}"]
        h = jnp.maximum(acc, 0.0).astype(jnp.bfloat16)
    logits = jnp.dot(h, params["W5"].astype(jnp.bfloat16),
                     preferred_element_type=jnp.float32) + params["b5"]
    return jax.nn.softmax(logits, axis=-1)


def _reference_f32(xyz, feat_xyz, params):
    """Full-precision reference matching the original torch module semantics."""
    h = jnp.concatenate([xyz, feat_xyz], axis=-1)
    for li in range(1, 6):
        h = h @ params[f"W{li}"] + params[f"b{li}"]
        if li < 5:
            h = jnp.maximum(h, 0.0)
    return jax.nn.softmax(h, axis=-1)


if __name__ == "__main__":
    key = jax.random.PRNGKey(0)
    k_xyz, k_feat, k_param = jax.random.split(key, 3)

    # Small but representative: ragged N (exercises padding), xyz (3) + 29-dim
    # features = 32 in, 16 instance classes, dim_mlp = 256.
    N = 1000
    C_XYZ, C_FEAT = 3, 29
    IN_CH = C_XYZ + C_FEAT
    OUT_CH = 16

    xyz = jax.random.normal(k_xyz, (N, C_XYZ), dtype=jnp.float32)
    feat_xyz = jax.random.normal(k_feat, (N, C_FEAT), dtype=jnp.float32)
    params = init_params(k_param, IN_CH, OUT_CH, num_mlp_layers=5, dim_mlp=256)

    out = mlp_render_instance_feature(xyz, feat_xyz, params)
    out = jax.block_until_ready(out)

    assert out.shape == (N, OUT_CH)

    # Tight check vs a reference using the same bf16-operand / f32-accum path.
    ref16 = _reference_bf16(xyz, feat_xyz, params)
    assert jnp.allclose(out, ref16, atol=2e-3, rtol=2e-3), "mismatch vs bf16 reference"

    # Loose check vs the full f32 semantics of the original torch module.
    ref32 = _reference_f32(xyz, feat_xyz, params)
    assert jnp.allclose(out, ref32, atol=3e-2, rtol=3e-2), "mismatch vs f32 reference"

    # Exact softmax divide -> rows sum to 1 to f32 precision.
    assert jnp.allclose(jnp.sum(out, axis=-1), 1.0, atol=1e-5), "softmax rows must sum to 1"

    print("KERNEL_OK")
</pallas_src>

<mosaic_0001>
module attributes {stable_mosaic.version = 11 : i64} {
  func.func @_mlp_softmax_kernel(%arg0: i32, %arg1: memref<1024x32xf32, #tpu.memory_space<vmem>>, %arg2: memref<32x256xbf16, #tpu.memory_space<vmem>>, %arg3: memref<1x256xf32, #tpu.memory_space<vmem>>, %arg4: memref<256x256xbf16, #tpu.memory_space<vmem>>, %arg5: memref<1x256xf32, #tpu.memory_space<vmem>>, %arg6: memref<256x256xbf16, #tpu.memory_space<vmem>>, %arg7: memref<1x256xf32, #tpu.memory_space<vmem>>, %arg8: memref<256x256xbf16, #tpu.memory_space<vmem>>, %arg9: memref<1x256xf32, #tpu.memory_space<vmem>>, %arg10: memref<256x16xbf16, #tpu.memory_space<vmem>>, %arg11: memref<1x16xf32, #tpu.memory_space<vmem>>, %arg12: memref<1024x16xf32, #tpu.memory_space<vmem>>) attributes {dimension_semantics = [#tpu.dimension_semantics<parallel>], iteration_bounds = array<i64: 1>, scalar_prefetch = 0 : i64, scratch_operands = 0 : i64, tpu.core_type = #tpu.core_type<tc>, window_params = [{transform_indices = @transform_0, window_bounds = array<i64: 1024, 32>}, {pipeline_mode = #tpu.pipeline_mode<synchronous>, transform_indices = @transform_1, window_bounds = array<i64: 32, 256>}, {pipeline_mode = #tpu.pipeline_mode<synchronous>, transform_indices = @transform_2, window_bounds = array<i64: 1, 256>}, {pipeline_mode = #tpu.pipeline_mode<synchronous>, transform_indices = @transform_3, window_bounds = array<i64: 256, 256>}, {pipeline_mode = #tpu.pipeline_mode<synchronous>, transform_indices = @transform_4, window_bounds = array<i64: 1, 256>}, {pipeline_mode = #tpu.pipeline_mode<synchronous>, transform_indices = @transform_5, window_bounds = array<i64: 256, 256>}, {pipeline_mode = #tpu.pipeline_mode<synchronous>, transform_indices = @transform_6, window_bounds = array<i64: 1, 256>}, {pipeline_mode = #tpu.pipeline_mode<synchronous>, transform_indices = @transform_7, window_bounds = array<i64: 256, 256>}, {pipeline_mode = #tpu.pipeline_mode<synchronous>, transform_indices = @transform_8, window_bounds = array<i64: 1, 256>}, {pipeline_mode = #tpu.pipeline_mode<synchronous>, transform_indices = @transform_9, window_bounds = array<i64: 256, 16>}, {pipeline_mode = #tpu.pipeline_mode<synchronous>, transform_indices = @transform_10, window_bounds = array<i64: 1, 16>}, {transform_indices = @transform_11, window_bounds = array<i64: 1024, 16>}]} {
    %c0 = arith.constant 0 : index
    %c0_0 = arith.constant 0 : index
    %0 = vector.load %arg1[%c0, %c0_0] : memref<1024x32xf32, #tpu.memory_space<vmem>>, vector<1024x32xf32>
    %1 = arith.truncf %0 : vector<1024x32xf32> to vector<1024x32xbf16>
    %c0_1 = arith.constant 0 : index
    %c0_2 = arith.constant 0 : index
    %2 = vector.load %arg2[%c0_1, %c0_2] : memref<32x256xbf16, #tpu.memory_space<vmem>>, vector<32x256xbf16>
    %cst = arith.constant dense<0.000000e+00> : vector<1024x256xf32>
    %3 = tpu.matmul %1, %2, %cst {dimension_numbers = #tpu.dot_dimension_numbers<[1], [0], [0], [1], [0, 0, 1, 1], [], []>} : vector<1024x32xbf16>, vector<32x256xbf16>, vector<1024x256xf32> -> vector<1024x256xf32>
    %c0_3 = arith.constant 0 : index
    %c0_4 = arith.constant 0 : index
    %4 = vector.load %arg3[%c0_3, %c0_4] : memref<1x256xf32, #tpu.memory_space<vmem>>, vector<1x256xf32>
    %5 = vector.broadcast %4 : vector<1x256xf32> to vector<1024x256xf32>
    %6 = arith.addf %3, %5 : vector<1024x256xf32>
    %cst_5 = arith.constant 0.000000e+00 : f32
    %7 = vector.broadcast %cst_5 : f32 to vector<1024x256xf32>
    %8 = arith.maximumf %6, %7 : vector<1024x256xf32>
    %9 = arith.truncf %8 : vector<1024x256xf32> to vector<1024x256xbf16>
    %c0_6 = arith.constant 0 : index
    %c0_7 = arith.constant 0 : index
    %10 = vector.load %arg4[%c0_6, %c0_7] : memref<256x256xbf16, #tpu.memory_space<vmem>>, vector<256x256xbf16>
    %cst_8 = arith.constant dense<0.000000e+00> : vector<1024x256xf32>
    %11 = tpu.matmul %9, %10, %cst_8 {dimension_numbers = #tpu.dot_dimension_numbers<[1], [0], [0], [1], [0, 0, 1, 1], [], []>} : vector<1024x256xbf16>, vector<256x256xbf16>, vector<1024x256xf32> -> vector<1024x256xf32>
    %c0_9 = arith.constant 0 : index
    %c0_10 = arith.constant 0 : index
    %12 = vector.load %arg5[%c0_9, %c0_10] : memref<1x256xf32, #tpu.memory_space<vmem>>, vector<1x256xf32>
    %13 = vector.broadcast %12 : vector<1x256xf32> to vector<1024x256xf32>
    %14 = arith.addf %11, %13 : vector<1024x256xf32>
    %cst_11 = arith.constant 0.000000e+00 : f32
    %15 = vector.broadcast %cst_11 : f32 to vector<1024x256xf32>
    %16 = arith.maximumf %14, %15 : vector<1024x256xf32>
    %17 = arith.truncf %16 : vector<1024x256xf32> to vector<1024x256xbf16>
    %c0_12 = arith.constant 0 : index
    %c0_13 = arith.constant 0 : index
    %18 = vector.load %arg6[%c0_12, %c0_13] : memref<256x256xbf16, #tpu.memory_space<vmem>>, vector<256x256xbf16>
    %cst_14 = arith.constant dense<0.000000e+00> : vector<1024x256xf32>
    %19 = tpu.matmul %17, %18, %cst_14 {dimension_numbers = #tpu.dot_dimension_numbers<[1], [0], [0], [1], [0, 0, 1, 1], [], []>} : vector<1024x256xbf16>, vector<256x256xbf16>, vector<1024x256xf32> -> vector<1024x256xf32>
    %c0_15 = arith.constant 0 : index
    %c0_16 = arith.constant 0 : index
    %20 = vector.load %arg7[%c0_15, %c0_16] : memref<1x256xf32, #tpu.memory_space<vmem>>, vector<1x256xf32>
    %21 = vector.broadcast %20 : vector<1x256xf32> to vector<1024x256xf32>
    %22 = arith.addf %19, %21 : vector<1024x256xf32>
    %cst_17 = arith.constant 0.000000e+00 : f32
    %23 = vector.broadcast %cst_17 : f32 to vector<1024x256xf32>
    %24 = arith.maximumf %22, %23 : vector<1024x256xf32>
    %25 = arith.truncf %24 : vector<1024x256xf32> to vector<1024x256xbf16>
    %c0_18 = arith.constant 0 : index
    %c0_19 = arith.constant 0 : index
    %26 = vector.load %arg8[%c0_18, %c0_19] : memref<256x256xbf16, #tpu.memory_space<vmem>>, vector<256x256xbf16>
    %cst_20 = arith.constant dense<0.000000e+00> : vector<1024x256xf32>
    %27 = tpu.matmul %25, %26, %cst_20 {dimension_numbers = #tpu.dot_dimension_numbers<[1], [0], [0], [1], [0, 0, 1, 1], [], []>} : vector<1024x256xbf16>, vector<256x256xbf16>, vector<1024x256xf32> -> vector<1024x256xf32>
    %c0_21 = arith.constant 0 : index
    %c0_22 = arith.constant 0 : index
    %28 = vector.load %arg9[%c0_21, %c0_22] : memref<1x256xf32, #tpu.memory_space<vmem>>, vector<1x256xf32>
    %29 = vector.broadcast %28 : vector<1x256xf32> to vector<1024x256xf32>
    %30 = arith.addf %27, %29 : vector<1024x256xf32>
    %cst_23 = arith.constant 0.000000e+00 : f32
    %31 = vector.broadcast %cst_23 : f32 to vector<1024x256xf32>
    %32 = arith.maximumf %30, %31 : vector<1024x256xf32>
    %33 = arith.truncf %32 : vector<1024x256xf32> to vector<1024x256xbf16>
    %c0_24 = arith.constant 0 : index
    %c0_25 = arith.constant 0 : index
    %34 = vector.load %arg10[%c0_24, %c0_25] : memref<256x16xbf16, #tpu.memory_space<vmem>>, vector<256x16xbf16>
    %cst_26 = arith.constant dense<0.000000e+00> : vector<1024x16xf32>
    %35 = tpu.matmul %33, %34, %cst_26 {dimension_numbers = #tpu.dot_dimension_numbers<[1], [0], [0], [1], [0, 0, 1, 1], [], []>} : vector<1024x256xbf16>, vector<256x16xbf16>, vector<1024x16xf32> -> vector<1024x16xf32>
    %c0_27 = arith.constant 0 : index
    %c0_28 = arith.constant 0 : index
    %36 = vector.load %arg11[%c0_27, %c0_28] : memref<1x16xf32, #tpu.memory_space<vmem>>, vector<1x16xf32>
    %37 = vector.broadcast %36 : vector<1x16xf32> to vector<1024x16xf32>
    %38 = arith.addf %35, %37 : vector<1024x16xf32>
    %cst_29 = arith.constant dense<0xFF800000> : vector<1024xf32>
    %39 = vector.multi_reduction <maximumf>, %38, %cst_29 [1] : vector<1024x16xf32> to vector<1024xf32>
    %40 = vector.shape_cast %39 : vector<1024xf32> to vector<1024x1xf32>
    %41 = vector.broadcast %40 : vector<1024x1xf32> to vector<1024x16xf32>
    %42 = arith.subf %38, %41 : vector<1024x16xf32>
    %43 = math.exp %42 : vector<1024x16xf32>
    %cst_30 = arith.constant dense<0.000000e+00> : vector<1024xf32>
    %44 = vector.multi_reduction <add>, %43, %cst_30 [1] : vector<1024x16xf32> to vector<1024xf32>
    %45 = vector.shape_cast %44 : vector<1024xf32> to vector<1024x1xf32>
    %46 = vector.broadcast %45 : vector<1024x1xf32> to vector<1024x16xf32>
    %47 = arith.divf %43, %46 : vector<1024x16xf32>
    %c0_31 = arith.constant 0 : index
    %c0_32 = arith.constant 0 : index
    %48 = vector.load %arg12[%c0_31, %c0_32] : memref<1024x16xf32, #tpu.memory_space<vmem>>, vector<1024x16xf32>
    tpu.vector_store %arg12[%c0_31, %c0_32], %47 {strides = array<i32>} : memref<1024x16xf32, #tpu.memory_space<vmem>>, vector<1024x16xf32>,
    return
  }
  func.func @transform_0(%arg0: i32) -> (i32, i32) {
    %c0_i32 = arith.constant 0 : i32
    %c0_i32_0 = arith.constant 0 : i32
    return %arg0, %c0_i32 : i32, i32
  }
  func.func @transform_1(%arg0: i32) -> (i32, i32) {
    %c0_i32 = arith.constant 0 : i32
    %c0_i32_0 = arith.constant 0 : i32
    %c0_i32_1 = arith.constant 0 : i32
    return %c0_i32, %c0_i32_0 : i32, i32
  }
  func.func @transform_2(%arg0: i32) -> (i32, i32) {
    %c0_i32 = arith.constant 0 : i32
    %c0_i32_0 = arith.constant 0 : i32
    %c0_i32_1 = arith.constant 0 : i32
    return %c0_i32, %c0_i32_0 : i32, i32
  }
  func.func @transform_3(%arg0: i32) -> (i32, i32) {
    %c0_i32 = arith.constant 0 : i32
    %c0_i32_0 = arith.constant 0 : i32
    %c0_i32_1 = arith.constant 0 : i32
    return %c0_i32, %c0_i32_0 : i32, i32
  }
  func.func @transform_4(%arg0: i32) -> (i32, i32) {
    %c0_i32 = arith.constant 0 : i32
    %c0_i32_0 = arith.constant 0 : i32
    %c0_i32_1 = arith.constant 0 : i32
    return %c0_i32, %c0_i32_0 : i32, i32
  }
  func.func @transform_5(%arg0: i32) -> (i32, i32) {
    %c0_i32 = arith.constant 0 : i32
    %c0_i32_0 = arith.constant 0 : i32
    %c0_i32_1 = arith.constant 0 : i32
    return %c0_i32, %c0_i32_0 : i32, i32
  }
  func.func @transform_6(%arg0: i32) -> (i32, i32) {
    %c0_i32 = arith.constant 0 : i32
    %c0_i32_0 = arith.constant 0 : i32
    %c0_i32_1 = arith.constant 0 : i32
    return %c0_i32, %c0_i32_0 : i32, i32
  }
  func.func @transform_7(%arg0: i32) -> (i32, i32) {
    %c0_i32 = arith.constant 0 : i32
    %c0_i32_0 = arith.constant 0 : i32
    %c0_i32_1 = arith.constant 0 : i32
    return %c0_i32, %c0_i32_0 : i32, i32
  }
  func.func @transform_8(%arg0: i32) -> (i32, i32) {
    %c0_i32 = arith.constant 0 : i32
    %c0_i32_0 = arith.constant 0 : i32
    %c0_i32_1 = arith.constant 0 : i32
    return %c0_i32, %c0_i32_0 : i32, i32
  }
  func.func @transform_9(%arg0: i32) -> (i32, i32) {
    %c0_i32 = arith.constant 0 : i32
    %c0_i32_0 = arith.constant 0 : i32
    %c0_i32_1 = arith.constant 0 : i32
    return %c0_i32, %c0_i32_0 : i32, i32
  }
  func.func @transform_10(%arg0: i32) -> (i32, i32) {
    %c0_i32 = arith.constant 0 : i32
    %c0_i32_0 = arith.constant 0 : i32
    %c0_i32_1 = arith.constant 0 : i32
    return %c0_i32, %c0_i32_0 : i32, i32
  }
  func.func @transform_11(%arg0: i32) -> (i32, i32) {
    %c0_i32 = arith.constant 0 : i32
    %c0_i32_0 = arith.constant 0 : i32
    return %arg0, %c0_i32 : i32, i32
  }
}

</mosaic_0001>

<bundles_post_ra>
// kernel: tpu_custom_call.1
= control target key start
LH: loop header
LB: loop body
LE: loop exit
PB: predicated region body
PF: predicated region fallthrough
CT: control target
= control target key end

     0   :  { %v13298_v1 = vmov 0   ;;  %vm267_vm0 = vcmask 261120   ;;  %vm5980_vm1 = vcmask 130048   ;;  %s13286_s1 = inlined_call_operand.vmem [shape: bf16[32,256], index: 1, kind: input, shape index: {}]   ;;  %s13287_s0 = inlined_call_operand.vmem [shape: f32[1024,32], index: 0, kind: input, shape index: {}]   ;;  %s13288_s3 = inlined_call_operand.vmem [shape: bf16[256,256], index: 3, kind: input, shape index: {}]   ;;  %s13289_s5 = inlined_call_operand.vmem [shape: bf16[256,256], index: 5, kind: input, shape index: {}]   ;;  %s13290_s7 = inlined_call_operand.vmem [shape: bf16[256,256], index: 7, kind: input, shape index: {}]   ;;  %s13291_s2 = inlined_call_operand.vmem [shape: f32[1,256], index: 2, kind: input, shape index: {}]   ;;  %s13292_s9 = inlined_call_operand.vmem [shape: bf16[256,16], index: 9, kind: input, shape index: {}]   ;;  %s13293_s4 = inlined_call_operand.vmem [shape: f32[1,256], index: 4, kind: input, shape index: {}]   ;;  %s13294_s6 = inlined_call_operand.vmem [shape: f32[1,256], index: 6, kind: input, shape index: {}]   ;;  %s13295_s8 = inlined_call_operand.vmem [shape: f32[1,256], index: 8, kind: input, shape index: {}]   ;;  %s13296_s10 = inlined_call_operand.vmem [shape: f32[1,16], index: 10, kind: input, shape index: {}]   ;;  %s13297_s11 = inlined_call_operand.vmem [shape: f32[1024,16], index: 11, kind: output, shape index: {}]  }
   0x1   :  { %v7707_v0 = vld [vmem:[%s13286_s1 + $0x14] ss:$8 sps:$4 sm:$0xff]   ;;  %812 = vmatprep.mubr.bf16.mxu1 %v13298_v1  ;;  %492 = vmatprep.mubr.bf16.mxu0 %v13298_v1  ;;  %v7709_v2 = vld [vmem:[%s13286_s1 + $0x10] ss:$8 sps:$4 sm:$0xff]   ;;  %v7710_v3 = vld [vmem:[%s13286_s1 + $0x4] ss:$8 sps:$4 sm:$0xff]  }
   0x2   :  { %7702 = vmatprep.subr.bf16.mxu1 %v7707_v0  ;;  %v7712_v4 = vld [vmem:[%s13286_s1] ss:$8 sps:$4 sm:$0xff]   ;;  %472 = vmatprep.subr.bf16.mxu0 %v7707_v0  ;;  %v7715_v7 = vld [vmem:[%s13288_s3 + $0x74] ss:$8 sps:$4 sm:$0xff]   ;;  %v7713_v9 = vld [vmem:[%s13288_s3 + $0x70] ss:$8 sps:$4 sm:$0xff]  }
   0x3   :  { %v103_v5 = vld [vmem:[%s13287_s0 + $0x200] sm:$0xff]  ;;  %7704 = vmatpush1.bf16.msra.mxu1 %v7709_v2  ;;  %v104_v6 = vld [vmem:[%s13287_s0 + $0x208] sm:$0xff]  ;;  %473 = vmatpush1.bf16.msra.mxu0 %v7709_v2  ;;  %v105_v11 = vld [vmem:[%s13287_s0 + $0x210] sm:$0xff] }
   0x4   :  { %7703 = vmatprep.subr.bf16.mxu1 %v7710_v3  ;;  %474 = vmatprep.subr.bf16.mxu0 %v7710_v3  ;;  %v199_v8 = vpack.c.bf16 %v104_v6, %v103_v5  ;;  %v7718_v10 = vld [vmem:[%s13288_s3 + $0x64] ss:$8 sps:$4 sm:$0xff]   ;;  %v106_v13 = vld [vmem:[%s13287_s0 + $0x218] sm:$0xff]  ;;  %v7716_v14 = vld [vmem:[%s13288_s3 + $0x60] ss:$8 sps:$4 sm:$0xff]  }
   0x5   :  { %v39_v12 = vld [vmem:[%s13287_s0] sm:$0xff]  ;;  %v40_v15 = vld [vmem:[%s13287_s0 + $0x8] sm:$0xff]  ;;  %v7721_v16 = vld [vmem:[%s13288_s3 + $0x54] ss:$8 sps:$4 sm:$0xff]   ;;  %v200_v18 = vpack.c.bf16 %v106_v13, %v105_v11 }
   0x6   :  { %v167_v17 = vpack.c.bf16 %v40_v15, %v39_v12  ;;  %v7719_v19 = vld [vmem:[%s13288_s3 + $0x50] ss:$8 sps:$4 sm:$0xff]   ;;  %v7724_v22 = vld [vmem:[%s13288_s3 + $0x44] ss:$8 sps:$4 sm:$0xff]   ;;  %v7722_v26 = vld [vmem:[%s13288_s3 + $0x40] ss:$8 sps:$4 sm:$0xff]  }
   0x7   :  { %7705 = vmatpush1.bf16.msra.mxu1 %v7712_v4  ;;  %475 = vmatpush1.bf16.msra.mxu0 %v7712_v4  ;;  %v41_v20 = vld [vmem:[%s13287_s0 + $0x10] sm:$0xff]  ;;  %v42_v21 = vld [vmem:[%s13287_s0 + $0x18] sm:$0xff]  ;;  %v107_v24 = vld [vmem:[%s13287_s0 + $0x220] sm:$0xff] }
   0x8   :  { %1721 = vmatprep.subr.bf16.mxu1 %v7715_v7  ;;  %v168_v23 = vpack.c.bf16 %v42_v21, %v41_v20  ;;  %v108_v25 = vld [vmem:[%s13287_s0 + $0x228] sm:$0xff]  ;;  %v7727_v27 = vld [vmem:[%s13288_s3 + $0x34] ss:$8 sps:$4 sm:$0xff]   ;;  %v43_v29 = vld [vmem:[%s13287_s0 + $0x20] sm:$0xff] }
   0x9   :  { %v201_v28 = vpack.c.bf16 %v108_v25, %v107_v24  ;;  %v44_v30 = vld [vmem:[%s13287_s0 + $0x28] sm:$0xff]  ;;  %v7725_v31 = vld [vmem:[%s13288_s3 + $0x30] ss:$8 sps:$4 sm:$0xff]   ;;  %v7733_v37 = vld [vmem:[%s13288_s3 + $0x14] ss:$8 sps:$4 sm:$0xff]  }
   0xa   :  { %7557 = vmatmul.mubr.msk.bf16.vlgmr.msra.gmra.mxu1 %vm267_vm0, %v199_v8  ;;  %7525 = vmatmul.mubr.msk.bf16.vlgmr.msra.gmra.mxu0 %vm267_vm0, %v167_v17  ;;  %v7730_v32 = vld [vmem:[%s13288_s3 + $0x24] ss:$8 sps:$4 sm:$0xff]   ;;  %v169_v33 = vpack.c.bf16 %v44_v30, %v43_v29  ;;  %v109_v34 = vld [vmem:[%s13287_s0 + $0x230] sm:$0xff]  ;;  %v110_v35 = vld [vmem:[%s13287_s0 + $0x238] sm:$0xff] }
   0xb   :  { %1722 = vmatpush1.bf16.msra.mxu1 %v7713_v9  ;;  %822 = vmatprep.mubr.bf16.mxu1 %v13298_v1  ;;  %v7728_v36 = vld [vmem:[%s13288_s3 + $0x20] ss:$8 sps:$4 sm:$0xff]   ;;  %v202_v38 = vpack.c.bf16 %v110_v35, %v109_v34  ;;  %v45_v39 = vld [vmem:[%s13287_s0 + $0x30] sm:$0xff]  ;;  %v46_v40 = vld [vmem:[%s13287_s0 + $0x38] sm:$0xff] }
   0xc   :  { %1723 = vmatprep.subr.bf16.mxu1 %v7718_v10  ;;  %502 = vmatprep.mubr.bf16.mxu0 %v13298_v1  ;;  %v7731_v41 = vld [vmem:[%s13288_s3 + $0x10] ss:$8 sps:$4 sm:$0xff]   ;;  %v7736_v42 = vld [vmem:[%s13288_s3 + $0x4] ss:$8 sps:$4 sm:$0xff]   ;;  %v170_v43 = vpack.c.bf16 %v46_v40, %v45_v39  ;;  %v7734_v46 = vld [vmem:[%s13288_s3] ss:$8 sps:$4 sm:$0xff]  }
   0xd   :  { %v111_v44 = vld [vmem:[%s13287_s0 + $0x240] sm:$0xff]  ;;  %v112_v45 = vld [vmem:[%s13287_s0 + $0x248] sm:$0xff]  ;;  %v7739_v47 = vld [vmem:[%s13288_s3 + $0xf4] ss:$8 sps:$4 sm:$0xff]  }
   0xe   :  { %v203_v48 = vpack.c.bf16 %v112_v45, %v111_v44  ;;  %v47_v49 = vld [vmem:[%s13287_s0 + $0x40] sm:$0xff]  ;;  %v48_v50 = vld [vmem:[%s13287_s0 + $0x48] sm:$0xff]  ;;  %v7737_v51 = vld [vmem:[%s13288_s3 + $0xf0] ss:$8 sps:$4 sm:$0xff]  }
   0xf   :  { %1724 = vmatpush1.bf16.msra.mxu1 %v7716_v14  ;;  %v7742_v52 = vld [vmem:[%s13288_s3 + $0xe4] ss:$8 sps:$4 sm:$0xff]   ;;  %v113_v53 = vld [vmem:[%s13287_s0 + $0x250] sm:$0xff]  ;;  %v171_v54 = vpack.c.bf16 %v48_v50, %v47_v49  ;;  %v114_v55 = vld [vmem:[%s13287_s0 + $0x258] sm:$0xff] }
  0x10   :  { %1725 = vmatprep.subr.bf16.mxu1 %v7721_v16  ;;  %v7740_v56 = vld [vmem:[%s13288_s3 + $0xe0] ss:$8 sps:$4 sm:$0xff]   ;;  %v7745_v57 = vld [vmem:[%s13288_s3 + $0xd4] ss:$8 sps:$4 sm:$0xff]   ;;  %v204_v58 = vpack.c.bf16 %v114_v55, %v113_v53  ;;  %v7743_v61 = vld [vmem:[%s13288_s3 + $0xd0] ss:$8 sps:$4 sm:$0xff]  }
  0x11   :  { %v49_v59 = vld [vmem:[%s13287_s0 + $0x50] sm:$0xff]  ;;  %v50_v60 = vld [vmem:[%s13287_s0 + $0x58] sm:$0xff]  ;;  %v115_v63 = vld [vmem:[%s13287_s0 + $0x260] sm:$0xff] }
  0x12   :  { %7558 = vmatmul.mubr.msk.bf16.gmra.mxu1 %vm267_vm0, %v200_v18  ;;  %7526 = vmatmul.mubr.msk.bf16.gmra.mxu0 %vm267_vm0, %v168_v23  ;;  %v172_v62 = vpack.c.bf16 %v50_v60, %v49_v59  ;;  %v116_v0 = vld [vmem:[%s13287_s0 + $0x268] sm:$0xff]  ;;  %v51_v3 = vld [vmem:[%s13287_s0 + $0x60] sm:$0xff]  ;;  %v117_v8 = vld [vmem:[%s13287_s0 + $0x270] sm:$0xff] }
  0x13   :  { %832 = vmatprep.mubr.bf16.mxu1 %v13298_v1  ;;  %1726 = vmatpush1.bf16.msra.mxu1 %v7719_v19  ;;  %v205_v2 = vpack.c.bf16 %v116_v0, %v115_v63  ;;  %v52_v4 = vld [vmem:[%s13287_s0 + $0x68] sm:$0xff]  ;;  %v118_v9 = vld [vmem:[%s13287_s0 + $0x278] sm:$0xff]  ;;  %v53_v11 = vld [vmem:[%s13287_s0 + $0x70] sm:$0xff] }
  0x14   :  { %1727 = vmatprep.subr.bf16.mxu1 %v7724_v22  ;;  %512 = vmatprep.mubr.bf16.mxu0 %v13298_v1  ;;  %v173_v5 = vpack.c.bf16 %v52_v4, %v51_v3  ;;  %v7746_v6 = vld [vmem:[%s13288_s3 + $0xc0] ss:$8 sps:$4 sm:$0xff]   ;;  %v7748_v7 = vld [vmem:[%s13288_s3 + $0xc4] ss:$8 sps:$4 sm:$0xff]   ;;  %v206_v10 = vpack.c.bf16 %v118_v9, %v117_v8  ;;  %v54_v12 = vld [vmem:[%s13287_s0 + $0x78] sm:$0xff] }
  0x15   :  { %v174_v13 = vpack.c.bf16 %v54_v12, %v53_v11  ;;  %v119_v14 = vld [vmem:[%s13287_s0 + $0x280] sm:$0xff]  ;;  %v120_v15 = vld [vmem:[%s13287_s0 + $0x288] sm:$0xff]  ;;  %v121_v20 = vld [vmem:[%s13287_s0 + $0x290] sm:$0xff] }
  0x16   :  { %v207_v16 = vpack.c.bf16 %v120_v15, %v119_v14  ;;  %v55_v17 = vld [vmem:[%s13287_s0 + $0x80] sm:$0xff]  ;;  %v56_v18 = vld [vmem:[%s13287_s0 + $0x88] sm:$0xff]  ;;  %v122_v21 = vld [vmem:[%s13287_s0 + $0x298] sm:$0xff] }
  0x17   :  { %1728 = vmatpush1.bf16.msra.mxu1 %v7722_v26  ;;  %v175_v19 = vpack.c.bf16 %v56_v18, %v55_v17  ;;  %v7749_v22 = vld [vmem:[%s13288_s3 + $0xb0] ss:$8 sps:$4 sm:$0xff]   ;;  %v7751_v23 = vld [vmem:[%s13288_s3 + $0xb4] ss:$8 sps:$4 sm:$0xff]   ;;  %v208_v24 = vpack.c.bf16 %v122_v21, %v121_v20  ;;  %v124_v29 = vld [vmem:[%s13287_s0 + $0x2a8] sm:$0xff] }
  0x18   :  { %1729 = vmatprep.subr.bf16.mxu1 %v7727_v27  ;;  %v57_v25 = vld [vmem:[%s13287_s0 + $0x90] sm:$0xff]  ;;  %v58_v26 = vld [vmem:[%s13287_s0 + $0x98] sm:$0xff]  ;;  %v7757_v39 = vld [vmem:[%s13288_s3 + $0xa4] ss:$8 sps:$4 sm:$0xff]  }
  0x19   :  { %v176_v27 = vpack.c.bf16 %v58_v26, %v57_v25  ;;  %v125_v34 = vld [vmem:[%s13287_s0 + $0x2b0] sm:$0xff]  ;;  %v126_v35 = vld [vmem:[%s13287_s0 + $0x2b8] sm:$0xff]  ;;  %v127_v44 = vld [vmem:[%s13287_s0 + $0x2c0] sm:$0xff] }
  0x1a   :  { %7559 = vmatmul.mubr.msk.bf16.gmra.mxu1 %vm267_vm0, %v201_v28  ;;  %7527 = vmatmul.mubr.msk.bf16.gmra.mxu0 %vm267_vm0, %v169_v33  ;;  %v123_v28 = vld [vmem:[%s13287_s0 + $0x2a0] sm:$0xff]  ;;  %v210_v40 = vpack.c.bf16 %v126_v35, %v125_v34  ;;  %v128_v45 = vld [vmem:[%s13287_s0 + $0x2c8] sm:$0xff]  ;;  %v129_v49 = vld [vmem:[%s13287_s0 + $0x2d0] sm:$0xff] }
  0x1b   :  { %842 = vmatprep.mubr.bf16.mxu1 %v13298_v1  ;;  %1730 = vmatpush1.bf16.msra.mxu1 %v7725_v31  ;;  %v209_v30 = vpack.c.bf16 %v124_v29, %v123_v28  ;;  %v59_v31 = vld [vmem:[%s13287_s0 + $0xa0] sm:$0xff]  ;;  %v7763_v55 = vld [vmem:[%s13288_s3 + $0x94] ss:$8 sps:$4 sm:$0xff]   ;;  %v68_v0 = vld [vmem:[%s13287_s0 + $0xe8] sm:$0xff] }
  0x1c   :  { %1731 = vmatprep.subr.bf16.mxu1 %v7730_v32  ;;  %522 = vmatprep.mubr.bf16.mxu0 %v13298_v1  ;;  %v60_v32 = vld [vmem:[%s13287_s0 + $0xa8] sm:$0xff]  ;;  %v131_v60 = vld [vmem:[%s13287_s0 + $0x2e0] sm:$0xff]  ;;  %v134_v4 = vld [vmem:[%s13287_s0 + $0x2f8] sm:$0xff] }
  0x1d   :  { %v177_v33 = vpack.c.bf16 %v60_v32, %v59_v31  ;;  %v7760_v53 = vld [vmem:[%s13289_s5 + $0x64] ss:$8 sps:$4 sm:$0xff]   ;;  %v70_v11 = vld [vmem:[%s13287_s0 + $0xf8] sm:$0xff]  ;;  %v137_v18 = vld [vmem:[%s13287_s0 + $0x310] sm:$0xff] }
  0x1e   :  { %v67_v63 = vld [vmem:[%s13287_s0 + $0xe0] sm:$0xff]  ;;  %v136_v14 = vld [vmem:[%s13287_s0 + $0x308] sm:$0xff]  ;;  %v138_v20 = vld [vmem:[%s13287_s0 + $0x318] sm:$0xff] }
  0x1f   :  { %1732 = vmatpush1.bf16.msra.mxu1 %v7728_v36  ;;  %v7752_v36 = vld [vmem:[%s13289_s5 + $0x70] ss:$8 sps:$4 sm:$0xff]   ;;  %v181_v3 = vpack.c.bf16 %v68_v0, %v67_v63  ;;  %v7769_v8 = vld [vmem:[%s13288_s3 + $0x84] ss:$8 sps:$4 sm:$0xff]   ;;  %v7770_v21 = vld [vmem:[%s13289_s5 + $0x40] ss:$8 sps:$4 sm:$0xff]  }
  0x20   :  { %1733 = vmatprep.subr.bf16.mxu1 %v7733_v37  ;;  %v7754_v37 = vld [vmem:[%s13289_s5 + $0x74] ss:$8 sps:$4 sm:$0xff]   ;;  %v72_v17 = vld [vmem:[%s13287_s0 + $0x108] sm:$0xff]  ;;  %v139_v28 = vld [vmem:[%s13287_s0 + $0x320] sm:$0xff] }
  0x21   :  { %2982 = vmatprep.subr.bf16.mxu0 %v7754_v37  ;;  %v74_v25 = vld [vmem:[%s13287_s0 + $0x118] sm:$0xff]  ;;  %v140_v29 = vld [vmem:[%s13287_s0 + $0x328] sm:$0xff] }
  0x22   :  { %7560 = vmatmul.mubr.msk.bf16.gmra.mxu1 %vm267_vm0, %v202_v38  ;;  %7528 = vmatmul.mubr.msk.bf16.gmra.mxu0 %vm267_vm0, %v170_v43  ;;  %v7755_v38 = vld [vmem:[%s13288_s3 + $0xa0] ss:$8 sps:$4 sm:$0xff]   ;;  %v7775_v26 = vld [vmem:[%s13290_s7 + $0x74] ss:$8 sps:$4 sm:$0xff]   ;;  %v217_v32 = vpack.c.bf16 %v140_v29, %v139_v28  ;;  %v7785_v0 = vld [vmem:[%s13289_s5 + $0x10] ss:$8 sps:$4 sm:$0xff]  }
  0x23   :  { %852 = vmatprep.mubr.bf16.mxu1 %v13298_v1  ;;  %1734 = vmatpush1.bf16.msra.mxu1 %v7731_v41  ;;  %v61_v41 = vld [vmem:[%s13287_s0 + $0xb0] sm:$0xff]  ;;  %v76_v31 = vld [vmem:[%s13287_s0 + $0x128] sm:$0xff]  ;;  %v142_v35 = vld [vmem:[%s13287_s0 + $0x338] sm:$0xff] }
  0x24   :  { %1735 = vmatprep.subr.bf16.mxu1 %v7736_v42  ;;  %532 = vmatprep.mubr.bf16.mxu0 %v13298_v1  ;;  %v62_v42 = vld [vmem:[%s13287_s0 + $0xb8] sm:$0xff] }
  0x25   :  { %2983 = vmatpush1.bf16.msra.mxu0 %v7752_v36  ;;  %v178_v43 = vpack.c.bf16 %v62_v42, %v61_v41  ;;  %v7776_v36 = vld [vmem:[%s13289_s5 + $0x30] ss:$8 sps:$4 sm:$0xff]   ;;  %v7778_v37 = vld [vmem:[%s13289_s5 + $0x34] ss:$8 sps:$4 sm:$0xff]   ;;  %v143_v42 = vld [vmem:[%s13287_s0 + $0x340] sm:$0xff] }
  0x26   :  { %2984 = vmatprep.subr.bf16.mxu0 %v7760_v53  ;;  %v81_v53 = vld [vmem:[%s13287_s0 + $0x150] sm:$0xff]  ;;  %v150_v63 = vld [vmem:[%s13287_s0 + $0x378] sm:$0xff] }
  0x27   :  { %1736 = vmatpush1.bf16.msra.mxu1 %v7734_v46  ;;  %v211_v46 = vpack.c.bf16 %v128_v45, %v127_v44  ;;  %v79_v45 = vld [vmem:[%s13287_s0 + $0x140] sm:$0xff] }
  0x28   :  { %1737 = vmatprep.subr.bf16.mxu1 %v7739_v47  ;;  %v63_v47 = vld [vmem:[%s13287_s0 + $0xc0] sm:$0xff] }
  0x2a   :  { %7561 = vmatmul.mubr.msk.bf16.gmra.mxu1 %vm267_vm0, %v203_v48  ;;  %7529 = vmatmul.mubr.msk.bf16.gmra.mxu0 %vm267_vm0, %v171_v54  ;;  %v64_v48 = vld [vmem:[%s13287_s0 + $0xc8] sm:$0xff]  ;;  %v7761_v54 = vld [vmem:[%s13288_s3 + $0x90] ss:$8 sps:$4 sm:$0xff]  }
  0x2b   :  { %862 = vmatprep.mubr.bf16.mxu1 %v13298_v1  ;;  %1738 = vmatpush2.bf16.msra.mxu1 %v7737_v51  ;;  %v179_v50 = vpack.c.bf16 %v64_v48, %v63_v47  ;;  %v130_v51 = vld [vmem:[%s13287_s0 + $0x2d8] sm:$0xff]  ;;  %v145_v47 = vld [vmem:[%s13287_s0 + $0x350] sm:$0xff] }
  0x2c   :  { %1739 = vmatprep.subr.bf16.mxu1 %v7742_v52  ;;  %542 = vmatprep.mubr.bf16.mxu0 %v13298_v1  ;;  %v7758_v52 = vld [vmem:[%s13289_s5 + $0x60] ss:$8 sps:$4 sm:$0xff]  }
  0x2d   :  { %2985 = vmatpush1.bf16.msra.mxu0 %v7758_v52 }
  0x2f   :  { %1740 = vmatpush2.bf16.msra.mxu1 %v7740_v56  ;;  %v212_v56 = vpack.c.bf16 %v130_v51, %v129_v49  ;;  %v146_v49 = vld [vmem:[%s13287_s0 + $0x358] sm:$0xff]  ;;  %v7781_v51 = vld [vmem:[%s13289_s5 + $0x24] ss:$8 sps:$4 sm:$0xff]  }
  0x30   :  { %1741 = vmatprep.subr.bf16.mxu1 %v7745_v57  ;;  %v65_v57 = vld [vmem:[%s13287_s0 + $0xd0] sm:$0xff]  ;;  %v220_v52 = vpack.c.bf16 %v146_v49, %v145_v47 }
  0x32   :  { %7562 = vmatmul.mubr.msk.bf16.gmra.mxu1 %vm267_vm0, %v204_v58  ;;  %7530 = vmatmul.mubr.msk.bf16.gmra.mxu0 %vm267_vm0, %v172_v62  ;;  %v66_v58 = vld [vmem:[%s13287_s0 + $0xd8] sm:$0xff] }
  0x33   :  { %872 = vmatprep.mubr.bf16.mxu1 %v13298_v1  ;;  %1742 = vmatpush2.bf16.msra.mxu1 %v7743_v61  ;;  %v180_v59 = vpack.c.bf16 %v66_v58, %v65_v57  ;;  %v132_v61 = vld [vmem:[%s13287_s0 + $0x2e8] sm:$0xff] }
  0x34   :  { %552 = vmatprep.mubr.bf16.mxu0 %v13298_v1  ;;  %1743 = vmatprep.subr.bf16.mxu1 %v7748_v7  ;;  %v213_v62 = vpack.c.bf16 %v132_v61, %v131_v60  ;;  %v7767_v7 = vld [vmem:[%s13288_s3 + $0x80] ss:$8 sps:$4 sm:$0xff]   ;;  %v149_v61 = vld [vmem:[%s13287_s0 + $0x370] sm:$0xff] }
  0x35   :  { %v148_v57 = vld [vmem:[%s13287_s0 + $0x368] sm:$0xff] }
  0x36   :  { %v84_v60 = vld [vmem:[%s13287_s0 + $0x168] sm:$0xff] }
  0x37   :  { %1744 = vmatpush2.bf16.msra.mxu1 %v7746_v6  ;;  %v7766_v6 = vld [vmem:[%s13289_s5 + $0x54] ss:$8 sps:$4 sm:$0xff]  }
  0x38   :  { %1745 = vmatprep.subr.bf16.mxu1 %v7751_v23  ;;  %2986 = vmatprep.subr.bf16.mxu0 %v7766_v6  ;;  %v73_v23 = vld [vmem:[%s13287_s0 + $0x110] sm:$0xff]  ;;  %v86_v6 = vld [vmem:[%s13287_s0 + $0x178] sm:$0xff] }
  0x3a   :  { %7563 = vmatmul.mubr.msk.bf16.gmra.mxu1 %vm267_vm0, %v205_v2  ;;  %7531 = vmatmul.mubr.msk.bf16.gmra.mxu0 %vm267_vm0, %v173_v5  ;;  %v133_v2 = vld [vmem:[%s13287_s0 + $0x2f0] sm:$0xff] }
  0x3b   :  { %882 = vmatprep.mubr.bf16.mxu1 %v13298_v1  ;;  %562 = vmatprep.mubr.bf16.mxu0 %v13298_v1  ;;  %v7764_v5 = vld [vmem:[%s13289_s5 + $0x50] ss:$8 sps:$4 sm:$0xff]   ;;  %v214_v9 = vpack.c.bf16 %v134_v4, %v133_v2  ;;  %v7787_v2 = vld [vmem:[%s13289_s5 + $0x14] ss:$8 sps:$4 sm:$0xff]   ;;  %v222_v4 = vpack.c.bf16 %v150_v63, %v149_v61 }
  0x3c   :  { %1746 = vmatpush2.bf16.msra.mxu1 %v7749_v22  ;;  %2987 = vmatpush1.bf16.msra.mxu0 %v7764_v5  ;;  %v7772_v22 = vld [vmem:[%s13289_s5 + $0x44] ss:$8 sps:$4 sm:$0xff]   ;;  %v85_v5 = vld [vmem:[%s13287_s0 + $0x170] sm:$0xff] }
  0x3d   :  { %1747 = vmatprep.subr.bf16.mxu1 %v7757_v39  ;;  %2988 = vmatprep.subr.bf16.mxu0 %v7772_v22  ;;  %v77_v39 = vld [vmem:[%s13287_s0 + $0x130] sm:$0xff]  ;;  %v154_v22 = vld [vmem:[%s13287_s0 + $0x398] sm:$0xff] }
  0x40   :  { %1748 = vmatpush2.bf16.msra.mxu1 %v7755_v38  ;;  %2989 = vmatpush1.bf16.msra.mxu0 %v7770_v21 }
  0x41   :  { %1749 = vmatprep.subr.bf16.mxu1 %v7763_v55  ;;  %2990 = vmatprep.subr.bf16.mxu0 %v7778_v37 }
  0x42   :  { %7564 = vmatmul.mubr.msk.bf16.gmra.mxu1 %vm267_vm0, %v206_v10  ;;  %7532 = vmatmul.mubr.msk.bf16.gmra.mxu0 %vm267_vm0, %v174_v13  ;;  %v69_v10 = vld [vmem:[%s13287_s0 + $0xf0] sm:$0xff]  ;;  %v135_v13 = vld [vmem:[%s13287_s0 + $0x300] sm:$0xff] }
  0x43   :  { %892 = vmatprep.mubr.bf16.mxu1 %v13298_v1  ;;  %572 = vmatprep.mubr.bf16.mxu0 %v13298_v1  ;;  %v182_v12 = vpack.c.bf16 %v70_v11, %v69_v10  ;;  %v215_v15 = vpack.c.bf16 %v136_v14, %v135_v13  ;;  %v152_v10 = vld [vmem:[%s13287_s0 + $0x388] sm:$0xff] }
  0x44   :  { %1750 = vmatpush2.bf16.msra.mxu1 %v7761_v54  ;;  %2991 = vmatpush1.bf16.msra.mxu0 %v7776_v36  ;;  %v82_v54 = vld [vmem:[%s13287_s0 + $0x158] sm:$0xff] }
  0x45   :  { %1751 = vmatprep.subr.bf16.mxu1 %v7769_v8  ;;  %2992 = vmatprep.subr.bf16.mxu0 %v7781_v51  ;;  %v188_v55 = vpack.c.bf16 %v82_v54, %v81_v53  ;;  %v190_v8 = vpack.c.bf16 %v86_v6, %v85_v5 }
  0x48   :  { %1752 = vmatpush2.bf16.msra.mxu1 %v7767_v7 }
  0x49   :  { %4243 = vmatprep.subr.bf16.mxu1 %v7775_v26 }
  0x4a   :  { %7565 = vmatmul.mubr.msk.bf16.gmra.mxu1 %vm267_vm0, %v207_v16  ;;  %7533 = vmatmul.mubr.msk.bf16.gmra.mxu0 %vm267_vm0, %v175_v19  ;;  %v71_v16 = vld [vmem:[%s13287_s0 + $0x100] sm:$0xff] }
  0x4b   :  { %902 = vmatprep.mubr.bf16.mxu1 %v13298_v1  ;;  %582 = vmatprep.mubr.bf16.mxu0 %v13298_v1  ;;  %v183_v19 = vpack.c.bf16 %v72_v17, %v71_v16  ;;  %v88_v16 = vld [vmem:[%s13287_s0 + $0x188] sm:$0xff] }
  0x52   :  { %7566 = vmatmul.mubr.msk.bf16.gmra.mxu1 %vm267_vm0, %v208_v24  ;;  %7534 = vmatmul.mubr.msk.bf16.gmra.mxu0 %vm267_vm0, %v176_v27  ;;  %v216_v24 = vpack.c.bf16 %v138_v20, %v137_v18  ;;  %v184_v27 = vpack.c.bf16 %v74_v25, %v73_v23  ;;  %v7788_v23 = vld [vmem:[%s13289_s5] ss:$8 sps:$4 sm:$0xff]  }
  0x53   :  { %912 = vmatprep.mubr.bf16.mxu1 %v13298_v1  ;;  %592 = vmatprep.mubr.bf16.mxu0 %v13298_v1 }
  0x5a   :  { %7567 = vmatmul.mubr.msk.bf16.gmra.mxu1 %vm267_vm0, %v209_v30  ;;  %7535 = vmatmul.mubr.msk.bf16.gmra.mxu0 %vm267_vm0, %v177_v33  ;;  %v75_v30 = vld [vmem:[%s13287_s0 + $0x120] sm:$0xff]  ;;  %v141_v33 = vld [vmem:[%s13287_s0 + $0x330] sm:$0xff] }
  0x5b   :  { %922 = vmatprep.mubr.bf16.mxu1 %v13298_v1  ;;  %602 = vmatprep.mubr.bf16.mxu0 %v13298_v1  ;;  %v185_v34 = vpack.c.bf16 %v76_v31, %v75_v30  ;;  %v218_v38 = vpack.c.bf16 %v142_v35, %v141_v33  ;;  %v90_v33 = vld [vmem:[%s13287_s0 + $0x198] sm:$0xff] }
  0x62   :  { %7568 = vmatmul.mubr.msk.bf16.gmra.mxu1 %vm267_vm0, %v210_v40  ;;  %7536 = vmatmul.mubr.msk.bf16.gmra.mxu0 %vm267_vm0, %v178_v43  ;;  %v78_v40 = vld [vmem:[%s13287_s0 + $0x138] sm:$0xff]  ;;  %v144_v43 = vld [vmem:[%s13287_s0 + $0x348] sm:$0xff] }
  0x63   :  { %932 = vmatprep.mubr.bf16.mxu1 %v13298_v1  ;;  %612 = vmatprep.mubr.bf16.mxu0 %v13298_v1  ;;  %v186_v41 = vpack.c.bf16 %v78_v40, %v77_v39  ;;  %v219_v44 = vpack.c.bf16 %v144_v43, %v143_v42 }
  0x6a   :  { %7569 = vmatmul.mubr.msk.bf16.gmra.mxu1 %vm267_vm0, %v211_v46  ;;  %7537 = vmatmul.mubr.msk.bf16.gmra.mxu0 %vm267_vm0, %v179_v50  ;;  %v80_v46 = vld [vmem:[%s13287_s0 + $0x148] sm:$0xff] }
  0x6b   :  { %942 = vmatprep.mubr.bf16.mxu1 %v13298_v1  ;;  %622 = vmatprep.mubr.bf16.mxu0 %v13298_v1  ;;  %v187_v48 = vpack.c.bf16 %v80_v46, %v79_v45  ;;  %v7779_v50 = vld [vmem:[%s13289_s5 + $0x20] ss:$8 sps:$4 sm:$0xff]  }
  0x6c   :  { %2993 = vmatpush1.bf16.msra.mxu0 %v7779_v50  ;;  %v155_v45 = vld [vmem:[%s13287_s0 + $0x3a0] sm:$0xff]  ;;  %v156_v46 = vld [vmem:[%s13287_s0 + $0x3a8] sm:$0xff] }
  0x6d   :  { %2994 = vmatprep.subr.bf16.mxu0 %v7787_v2  ;;  %v158_v2 = vld [vmem:[%s13287_s0 + $0x3b8] sm:$0xff] }
  0x70   :  { %2995 = vmatpush1.bf16.msra.mxu0 %v7785_v0  ;;  %v157_v0 = vld [vmem:[%s13287_s0 + $0x3b0] sm:$0xff] }
  0x72   :  { %7570 = vmatmul.mubr.msk.bf16.gmra.mxu1 %vm267_vm0, %v212_v56  ;;  %7538 = vmatmul.mubr.msk.bf16.gmra.mxu0 %vm267_vm0, %v180_v59  ;;  %v147_v56 = vld [vmem:[%s13287_s0 + $0x360] sm:$0xff] }
  0x73   :  { %952 = vmatprep.mubr.bf16.mxu1 %v13298_v1  ;;  %632 = vmatprep.mubr.bf16.mxu0 %v13298_v1  ;;  %v221_v58 = vpack.c.bf16 %v148_v57, %v147_v56  ;;  %v83_v59 = vld [vmem:[%s13287_s0 + $0x160] sm:$0xff]  ;;  %v92_v57 = vld [vmem:[%s13287_s0 + $0x1a8] sm:$0xff] }
  0x74   :  { %v91_v56 = vld [vmem:[%s13287_s0 + $0x1a0] sm:$0xff] }
  0x7a   :  { %7571 = vmatmul.mubr.msk.bf16.gmra.mxu1 %vm267_vm0, %v213_v62  ;;  %7539 = vmatmul.mubr.msk.bf16.gmra.mxu0 %vm267_vm0, %v181_v3  ;;  %v189_v62 = vpack.c.bf16 %v84_v60, %v83_v59  ;;  %v237_v3 = vlaneseq }
  0x7b   :  { %962 = vmatprep.mubr.bf16.mxu1 %v13298_v1  ;;  %642 = vmatprep.mubr.bf16.mxu0 %v13298_v1 }
  0x7c   :  { %v238_v7 = vshrl.u32 %v237_v3, 7 }
  0x7e   :  { %v8993_v11 = vsub.s32 0, %v238_v7  ;;  %v8999_v14 = vsub.s32 1, %v238_v7 }
  0x82   :  { %7572 = vmatmul.mubr.msk.bf16.gmra.mxu1 %vm267_vm0, %v214_v9  ;;  %7540 = vmatmul.mubr.msk.bf16.gmra.mxu0 %vm267_vm0, %v182_v12  ;;  %v151_v9 = vld [vmem:[%s13287_s0 + $0x380] sm:$0xff] }
  0x83   :  { %972 = vmatprep.mubr.bf16.mxu1 %v13298_v1  ;;  %652 = vmatprep.mubr.bf16.mxu0 %v13298_v1  ;;  %v235_v12 = vld [vmem:[%s13291_s2] sm:$0x3]  ;;  %v223_v13 = vpack.c.bf16 %v152_v10, %v151_v9  ;;  %v7796_v9 = vld [vmem:[%s13289_s5 + $0xf4] ss:$8 sps:$4 sm:$0xff]  }
  0x84   :  { %v9009_v17 = vrot.slane %v235_v12, %v8993_v11  ;;  %v9016_v21 = vrot.slane %v235_v12, %v8999_v14 }
  0x8a   :  { %7573 = vmatmul.mubr.msk.bf16.gmra.mxu1 %vm267_vm0, %v215_v15  ;;  %7541 = vmatmul.mubr.msk.bf16.gmra.mxu0 %vm267_vm0, %v183_v19  ;;  %v87_v15 = vld [vmem:[%s13287_s0 + $0x180] sm:$0xff]  ;;  %v153_v19 = vld [vmem:[%s13287_s0 + $0x390] sm:$0xff] }
  0x8b   :  { %982 = vmatprep.mubr.bf16.mxu1 %v13298_v1  ;;  %662 = vmatprep.mubr.bf16.mxu0 %v13298_v1  ;;  %v191_v20 = vpack.c.bf16 %v88_v16, %v87_v15  ;;  %v224_v28 = vpack.c.bf16 %v154_v22, %v153_v19 }
  0x92   :  { %7574 = vmatmul.mubr.msk.bf16.gmra.mxu1 %vm267_vm0, %v216_v24  ;;  %7542 = vmatmul.mubr.msk.bf16.gmra.mxu0 %vm267_vm0, %v184_v27  ;;  %v7790_v24 = vld [vmem:[%s13289_s5 + $0x4] ss:$8 sps:$4 sm:$0xff]  }
  0x93   :  { %992 = vmatprep.mubr.bf16.mxu1 %v13298_v1  ;;  %672 = vmatprep.mubr.bf16.mxu0 %v13298_v1 }
  0x94   :  { %2996 = vmatprep.subr.bf16.mxu0 %v7790_v24  ;;  %v94_v24 = vld [vmem:[%s13287_s0 + $0x1b8] sm:$0xff] }
  0x95   :  { %2997 = vmatpush1.bf16.msra.mxu0 %v7788_v23  ;;  %v93_v23 = vld [vmem:[%s13287_s0 + $0x1b0] sm:$0xff] }
  0x96   :  { %2998 = vmatprep.subr.bf16.mxu0 %v7796_v9  ;;  %v7797_v9 = vld [vmem:[%s13289_s5 + $0xe0] ss:$8 sps:$4 sm:$0xff]  }
  0x9a   :  { %7575 = vmatmul.mubr.msk.bf16.gmra.mxu1 %vm267_vm0, %v217_v32  ;;  %7543 = vmatmul.mubr.msk.bf16.gmra.mxu0 %vm267_vm0, %v185_v34  ;;  %v89_v32 = vld [vmem:[%s13287_s0 + $0x190] sm:$0xff] }
  0x9b   :  { %1002 = vmatprep.mubr.bf16.mxu1 %v13298_v1  ;;  %682 = vmatprep.mubr.bf16.mxu0 %v13298_v1 }
  0xa2   :  { %7576 = vmatmul.mubr.msk.bf16.gmra.mxu1 %vm267_vm0, %v218_v38  ;;  %7544 = vmatmul.mubr.msk.bf16.gmra.mxu0 %vm267_vm0, %v186_v41  ;;  %v192_v41 = vpack.c.bf16 %v90_v33, %v89_v32  ;;  %v194_v33 = vpack.c.bf16 %v94_v24, %v93_v23 }
  0xa3   :  { %1012 = vmatprep.mubr.bf16.mxu1 %v13298_v1  ;;  %692 = vmatprep.mubr.bf16.mxu0 %v13298_v1 }
  0xaa   :  { %7577 = vmatmul.mubr.msk.bf16.gmra.mxu1 %vm267_vm0, %v219_v44  ;;  %7545 = vmatmul.mubr.msk.bf16.gmra.mxu0 %vm267_vm0, %v187_v48 }
  0xab   :  { %1022 = vmatprep.mubr.bf16.mxu1 %v13298_v1  ;;  %702 = vmatprep.mubr.bf16.mxu0 %v13298_v1 }
  0xb2   :  { %7578 = vmatmul.mubr.msk.bf16.gmra.mxu1 %vm267_vm0, %v220_v52  ;;  %7546 = vmatmul.mubr.msk.bf16.gmra.mxu0 %vm267_vm0, %v188_v55  ;;  %v225_v52 = vpack.c.bf16 %v156_v46, %v155_v45 }
  0xb3   :  { %1032 = vmatprep.mubr.bf16.mxu1 %v13298_v1  ;;  %712 = vmatprep.mubr.bf16.mxu0 %v13298_v1 }
  0xba   :  { %7579 = vmatmul.mubr.msk.bf16.gmra.mxu1 %vm267_vm0, %v221_v58  ;;  %7547 = vmatmul.mubr.msk.bf16.gmra.mxu0 %vm267_vm0, %v189_v62 }
  0xbb   :  { %1042 = vmatprep.mubr.bf16.mxu1 %v13298_v1  ;;  %722 = vmatprep.mubr.bf16.mxu0 %v13298_v1 }
  0xc2   :  { %7580 = vmatmul.mubr.msk.bf16.gmra.mxu1 %vm267_vm0, %v222_v4  ;;  %7548 = vmatmul.mubr.msk.bf16.gmra.mxu0 %vm267_vm0, %v190_v8  ;;  %v193_v4 = vpack.c.bf16 %v92_v57, %v91_v56  ;;  %v7794_v8 = vld [vmem:[%s13289_s5 + $0xf0] ss:$8 sps:$4 sm:$0xff]  }
  0xc3   :  { %1052 = vmatprep.mubr.bf16.mxu1 %v13298_v1  ;;  %732 = vmatprep.mubr.bf16.mxu0 %v13298_v1 }
  0xc4   :  { %2999 = vmatpush2.bf16.msra.mxu0 %v7794_v8 }
  0xca   :  { %v814_v18 = vpop.f32.mrf.mxu1  ;;  %7581 = vmatmul.mubr.msk.bf16.gmra.mxu1 %vm267_vm0, %v223_v13  ;;  %v9029_v29 = vpop.f32.mrf.mxu0  ;;  %7549 = vmatmul.mubr.msk.bf16.gmra.mxu0 %vm267_vm0, %v191_v20 }
  0xcb   :  { %1062 = vmatprep.mubr.bf16.mxu1 %v13298_v1  ;;  %v815_v26 = vadd.f32 %v814_v18, %v9009_v17  ;;  %742 = vmatprep.mubr.bf16.mxu0 %v13298_v1  ;;  %v226_v18 = vpack.c.bf16 %v158_v2, %v157_v0  ;;  %v162_v0 = vld [vmem:[%s13287_s0 + $0x3d8] sm:$0xff] }
  0xcc   :  { %v816_v25 = vpop.f32.mrf.mxu1  ;;  %v9041_v35 = vpop.f32.mrf.mxu0 }
  0xcd   :  { %v817_v30 = vadd.f32 %v816_v25, %v9016_v21  ;;  %v1261_v36 = vmax.f32 %v815_v26, 0.0 }
  0xce   :  { %v818_v27 = vpop.f32.mrf.mxu1  ;;  %v9045_v40 = vpop.f32.mrf.mxu0 }
  0xcf   :  { %v819_v31 = vadd.f32 %v818_v27, %v9009_v17  ;;  %v1262_v42 = vmax.f32 %v817_v30, 0.0 }
  0xd0   :  { %v820_v34 = vpop.f32.mrf.mxu1  ;;  %v9056_v48 = vpop.f32.mrf.mxu0 }
  0xd1   :  { %v1263_v37 = vmax.f32 %v819_v31, 0.0  ;;  %v821_v38 = vadd.f32 %v820_v34, %v9016_v21 }
  0xd2   :  { %v824_v39 = vpop.f32.mrf.mxu1  ;;  %7582 = vmatmul.mubr.msk.bf16.gmra.mxu1 %vm267_vm0, %v224_v28  ;;  %v9061_v53 = vpop.f32.mrf.mxu0  ;;  %7550 = vmatmul.mubr.msk.bf16.gmra.mxu0 %vm267_vm0, %v192_v41 }
  0xd3   :  { %v9047_v43 = vpack.c.bf16 %v1263_v37, %v1261_v36  ;;  %v1264_v44 = vmax.f32 %v821_v38, 0.0  ;;  %1072 = vmatprep.mubr.bf16.mxu1 %v13298_v1  ;;  %v825_v49 = vadd.f32 %v824_v39, %v9009_v17  ;;  %752 = vmatprep.mubr.bf16.mxu0 %v13298_v1  ;;  %v159_v38 = vld [vmem:[%s13287_s0 + $0x3c0] sm:$0xff]  ;;  %v160_v39 = vld [vmem:[%s13287_s0 + $0x3c8] sm:$0xff] }
  0xd4   :  { %v826_v47 = vpop.f32.mrf.mxu1  ;;  %v9073_v59 = vpop.f32.mrf.mxu0 }
  0xd5   :  { %v9059_v50 = vpack.c.bf16 %v1264_v44, %v1262_v42  ;;  %v827_v54 = vadd.f32 %v826_v47, %v9016_v21  ;;  %v1265_v60 = vmax.f32 %v825_v49, 0.0  ;;  %v227_v47 = vpack.c.bf16 %v160_v39, %v159_v38 }
  0xd6   :  { %v828_v51 = vpop.f32.mrf.mxu1  ;;  %v9083_v3 = vpop.f32.mrf.mxu0 }
  0xd7   :  { %v829_v55 = vadd.f32 %v828_v51, %v9009_v17  ;;  %v1266_v5 = vmax.f32 %v827_v54, 0.0  ;;  %v95_v54 = vld [vmem:[%s13287_s0 + $0x1c0] sm:$0xff] }
  0xd8   :  { %v830_v58 = vpop.f32.mrf.mxu1  ;;  %v9094_v12 = vpop.f32.mrf.mxu0 }
  0xd9   :  { %v1267_v61 = vmax.f32 %v829_v55, 0.0  ;;  %v831_v62 = vadd.f32 %v830_v58, %v9016_v21  ;;  %v96_v55 = vld [vmem:[%s13287_s0 + $0x1c8] sm:$0xff] }
  0xda   :  { %v834_v63 = vpop.f32.mrf.mxu1  ;;  %7583 = vmatmul.mubr.msk.bf16.gmra.mxu1 %vm267_vm0, %v225_v52  ;;  %v9099_v19 = vpop.f32.mrf.mxu0  ;;  %7551 = vmatmul.mubr.msk.bf16.gmra.mxu0 %vm267_vm0, %v193_v4  ;;  %v195_v4 = vpack.c.bf16 %v96_v55, %v95_v54  ;;  %v164_v54 = vld [vmem:[%s13287_s0 + $0x3e8] sm:$0xff] }
  0xdb   :  { %v9085_v6 = vpack.c.bf16 %v1267_v61, %v1265_v60  ;;  %v1268_v7 = vmax.f32 %v831_v62, 0.0  ;;  %1082 = vmatprep.mubr.bf16.mxu1 %v13298_v1  ;;  %v835_v13 = vadd.f32 %v834_v63, %v9009_v17  ;;  %762 = vmatprep.mubr.bf16.mxu0 %v13298_v1  ;;  %v161_v63 = vld [vmem:[%s13287_s0 + $0x3d0] sm:$0xff] }
  0xdc   :  { %v836_v10 = vpop.f32.mrf.mxu1  ;;  %v9111_v26 = vpop.f32.mrf.mxu0  ;;  %v228_v23 = vpack.c.bf16 %v162_v0, %v161_v63  ;;  %v501_v0 = vadd.f32 %v9056_v48, %v9016_v21 }
  0xdd   :  { %v9097_v15 = vpack.c.bf16 %v1268_v7, %v1266_v5  ;;  %v837_v20 = vadd.f32 %v836_v10, %v9016_v21  ;;  %v1269_v27 = vmax.f32 %v835_v13, 0.0  ;;  %v7799_v10 = vld [vmem:[%s13289_s5 + $0xe4] ss:$8 sps:$4 sm:$0xff]  }
  0xde   :  { %v838_v16 = vpop.f32.mrf.mxu1  ;;  %v9115_v32 = vpop.f32.mrf.mxu0  ;;  %3000 = vmatprep.subr.bf16.mxu0 %v7799_v10 }
  0xdf   :  { %v839_v22 = vadd.f32 %v838_v16, %v9009_v17  ;;  %v1270_v34 = vmax.f32 %v837_v20, 0.0  ;;  %3001 = vmatpush2.bf16.msra.mxu0 %v7797_v9  ;;  %v99_v9 = vld [vmem:[%s13287_s0 + $0x1e0] sm:$0xff] }
  0xe0   :  { %v840_v25 = vpop.f32.mrf.mxu1  ;;  %v9126_v42 = vpop.f32.mrf.mxu0 }
  0xe1   :  { %v1271_v28 = vmax.f32 %v839_v22, 0.0  ;;  %v841_v30 = vadd.f32 %v840_v25, %v9016_v21 }
  0xe2   :  { %v844_v31 = vpop.f32.mrf.mxu1  ;;  %7584 = vmatmul.mubr.msk.bf16.gmra.mxu1 %vm267_vm0, %v226_v18  ;;  %v9131_v49 = vpop.f32.mrf.mxu0  ;;  %7552 = vmatmul.mubr.msk.bf16.gmra.mxu0 %vm267_vm0, %v194_v33 }
  0xe3   :  { %v9117_v36 = vpack.c.bf16 %v1271_v28, %v1269_v27  ;;  %v1272_v37 = vmax.f32 %v841_v30, 0.0  ;;  %1092 = vmatprep.mubr.bf16.mxu1 %v13298_v1  ;;  %v845_v44 = vadd.f32 %v844_v31, %v9009_v17  ;;  %772 = vmatprep.mubr.bf16.mxu0 %v13298_v1  ;;  %v97_v28 = vld [vmem:[%s13287_s0 + $0x1d0] sm:$0xff]  ;;  %v98_v30 = vld [vmem:[%s13287_s0 + $0x1d8] sm:$0xff] }
  0xe4   :  { %v846_v41 = vpop.f32.mrf.mxu1  ;;  %v9143_v57 = vpop.f32.mrf.mxu0 }
  0xe5   :  { %v9129_v45 = vpack.c.bf16 %v1272_v37, %v1270_v34  ;;  %v847_v51 = vadd.f32 %v846_v41, %v9016_v21  ;;  %v1273_v58 = vmax.f32 %v845_v44, 0.0  ;;  %v196_v44 = vpack.c.bf16 %v98_v30, %v97_v28  ;;  %v165_v28 = vld [vmem:[%s13287_s0 + $0x3f0] sm:$0xff]  ;;  %v166_v30 = vld [vmem:[%s13287_s0 + $0x3f8] sm:$0xff] }
  0xe6   :  { %v848_v46 = vpop.f32.mrf.mxu1  ;;  %v9153_v2 = vpop.f32.mrf.mxu0 }
  0xe7   :  { %v849_v52 = vadd.f32 %v848_v46, %v9009_v17  ;;  %v1274_v5 = vmax.f32 %v847_v51, 0.0 }
  0xe8   :  { %v850_v56 = vpop.f32.mrf.mxu1  ;;  %v9164_v16 = vpop.f32.mrf.mxu0 }
  0xe9   :  { %v1275_v60 = vmax.f32 %v849_v52, 0.0  ;;  %v851_v61 = vadd.f32 %v850_v56, %v9016_v21  ;;  %v163_v52 = vld [vmem:[%s13287_s0 + $0x3e0] sm:$0xff] }
  0xea   :  { %v854_v62 = vpop.f32.mrf.mxu1  ;;  %7585 = vmatmul.mubr.msk.bf16.gmra.mxu1 %vm267_vm0, %v227_v47  ;;  %v9169_v24 = vpop.f32.mrf.mxu0  ;;  %7553 = vmatmul.mubr.msk.bf16.gmra.mxu0 %vm267_vm0, %v195_v4  ;;  %v229_v63 = vpack.c.bf16 %v164_v54, %v163_v52 }
  0xeb   :  { %v9155_v7 = vpack.c.bf16 %v1275_v60, %v1273_v58  ;;  %v1276_v8 = vmax.f32 %v851_v61, 0.0  ;;  %1102 = vmatprep.mubr.bf16.mxu1 %v13298_v1  ;;  %v855_v18 = vadd.f32 %v854_v62, %v9009_v17  ;;  %782 = vmatprep.mubr.bf16.mxu0 %v13298_v1  ;;  %v497_v62 = vadd.f32 %v9041_v35, %v9016_v21  ;;  %v100_v35 = vld [vmem:[%s13287_s0 + $0x1e8] sm:$0xff] }
  0xec   :  { %v856_v13 = vpop.f32.mrf.mxu1  ;;  %v9181_v33 = vpop.f32.mrf.mxu0 }
  0xed   :  { %v9167_v20 = vpack.c.bf16 %v1276_v8, %v1274_v5  ;;  %v857_v25 = vadd.f32 %v856_v13, %v9016_v21  ;;  %v1277_v34 = vmax.f32 %v855_v18, 0.0 }
  0xee   :  { %v858_v22 = vpop.f32.mrf.mxu1  ;;  %v9185_v41 = vpop.f32.mrf.mxu0 }
  0xef   :  { %v859_v27 = vadd.f32 %v858_v22, %v9009_v17  ;;  %v1278_v46 = vmax.f32 %v857_v25, 0.0 }
  0xf0   :  { %v860_v31 = vpop.f32.mrf.mxu1  ;;  %v9196_v56 = vpop.f32.mrf.mxu0 }
  0xf1   :  { %v1279_v37 = vmax.f32 %v859_v27, 0.0  ;;  %v861_v38 = vadd.f32 %v860_v31, %v9016_v21  ;;  %v1136_v27 = vmax.f32 %v501_v0, 0.0 }
  0xf2   :  { %v864_v39 = vpop.f32.mrf.mxu1  ;;  %7586 = vmatmul.mubr.msk.bf16.gmra.mxu1 %vm267_vm0, %v228_v23  ;;  %v9205_v4 = vpop.f32.mrf.mxu0  ;;  %7554 = vmatmul.mubr.msk.bf16.gmra.mxu0 %vm267_vm0, %v196_v44  ;;  %v1134_v23 = vmax.f32 %v497_v62, 0.0  ;;  %v7803_v44 = vld [vmem:[%s13289_s5 + $0xd0] ss:$8 sps:$4 sm:$0xff]   ;;  %v230_v62 = vpack.c.bf16 %v166_v30, %v165_v28 }
  0xf3   :  { %v9187_v47 = vpack.c.bf16 %v1279_v37, %v1277_v34  ;;  %v1280_v51 = vmax.f32 %v861_v38, 0.0  ;;  %1112 = vmatprep.mubr.bf16.mxu1 %v13298_v1  ;;  %v865_v58 = vadd.f32 %v864_v39, %v9009_v17  ;;  %792 = vmatprep.mubr.bf16.mxu0 %v13298_v1  ;;  %v197_v34 = vpack.c.bf16 %v100_v35, %v99_v9  ;;  %v101_v35 = vld [vmem:[%s13287_s0 + $0x1f0] sm:$0xff] }
  0xf4   :  { %v866_v55 = vpop.f32.mrf.mxu1  ;;  %v9217_v48 = vpop.f32.mrf.mxu0  ;;  %v511_v9 = vadd.f32 %v9094_v12, %v9016_v21 }
  0xf5   :  { %v9199_v60 = vpack.c.bf16 %v1280_v51, %v1278_v46  ;;  %v867_v5 = vadd.f32 %v866_v55, %v9016_v21  ;;  %v1281_v13 = vmax.f32 %v865_v58, 0.0  ;;  %v7805_v46 = vld [vmem:[%s13289_s5 + $0xd4] ss:$8 sps:$4 sm:$0xff]  }
  0xf6   :  { %v868_v61 = vpop.f32.mrf.mxu1  ;;  %v9227_v31 = vpop.f32.mrf.mxu0  ;;  %3002 = vmatprep.subr.bf16.mxu0 %v7805_v46 }
  0xf7   :  { %v869_v8 = vadd.f32 %v868_v61, %v9009_v17  ;;  %v1282_v37 = vmax.f32 %v867_v5, 0.0  ;;  %v507_v61 = vadd.f32 %v9073_v59, %v9016_v21  ;;  %v102_v59 = vld [vmem:[%s13287_s0 + $0x1f8] sm:$0xff]  ;;  %3003 = vmatpush2.bf16.msra.mxu0 %v7803_v44 }
  0xf8   :  { %v870_v10 = vpop.f32.mrf.mxu1  ;;  %v9238_v52 = vpop.f32.mrf.mxu0 }
  0xf9   :  { %v1283_v18 = vmax.f32 %v869_v8, 0.0  ;;  %v871_v22 = vadd.f32 %v870_v10, %v9016_v21  ;;  %v495_v10 = vadd.f32 %v9029_v29, %v9009_v17 }
  0xfa   :  { %v874_v25 = vpop.f32.mrf.mxu1  ;;  %7587 = vmatmul.mubr.msk.bf16.gmra.mxu1 %vm267_vm0, %v229_v63  ;;  %v1390_v63 = vpack.c.bf16 %v1136_v27, %v1134_v23  ;;  %v9245_v0 = vpop.f32.mrf.mxu0  ;;  %7555 = vmatmul.mubr.msk.bf16.gmra.mxu0 %vm267_vm0, %v197_v34  ;;  %v1138_v27 = vmax.f32 %v507_v61, 0.0  ;;  %v198_v34 = vpack.c.bf16 %v102_v59, %v101_v35  ;;  %v7773_v59 = vld [vmem:[%s13290_s7 + $0x70] ss:$8 sps:$4 sm:$0xff]  }
  0xfb   :  { %v9229_v38 = vpack.c.bf16 %v1283_v18, %v1281_v13  ;;  %v1284_v39 = vmax.f32 %v871_v22, 0.0  ;;  %1122 = vmatprep.mubr.bf16.mxu1 %v13298_v1  ;;  %v875_v54 = vadd.f32 %v874_v25, %v9009_v17  ;;  %802 = vmatprep.mubr.bf16.mxu0 %v13298_v1  ;;  %v499_v13 = vadd.f32 %v9045_v40, %v9009_v17 }
  0xfc   :  { %v876_v51 = vpop.f32.mrf.mxu1  ;;  %v9263_v22 = vpop.f32.mrf.mxu0  ;;  %v1140_v40 = vmax.f32 %v511_v9, 0.0  ;;  %v1133_v44 = vmax.f32 %v495_v10, 0.0 }
  0xfd   :  { %v9241_v55 = vpack.c.bf16 %v1284_v39, %v1282_v37  ;;  %v877_v5 = vadd.f32 %v876_v51, %v9016_v21  ;;  %v1285_v12 = vmax.f32 %v875_v54, 0.0  ;;  %v1135_v46 = vmax.f32 %v499_v13, 0.0 }
  0xfe   :  { %v878_v58 = vpop.f32.mrf.mxu1  ;;  %v9267_v30 = vpop.f32.mrf.mxu0  ;;  %v1392_v10 = vpack.c.bf16 %v1140_v40, %v1138_v27 }
  0xff   :  { %v879_v8 = vadd.f32 %v878_v58, %v9009_v17  ;;  %v1286_v37 = vmax.f32 %v877_v5, 0.0  ;;  %v521_v5 = vadd.f32 %v9126_v42, %v9016_v21  ;;  %v1389_v13 = vpack.c.bf16 %v1135_v46, %v1133_v44 }
 0x100   :  { %v880_v18 = vpop.f32.mrf.mxu1  ;;  %v9271_v54 = vpop.f32.mrf.mxu0  ;;  %v509_v42 = vadd.f32 %v9083_v3, %v9009_v17 }
 0x101   :  { %v1287_v23 = vmax.f32 %v879_v8, 0.0  ;;  %v881_v25 = vadd.f32 %v880_v18, %v9016_v21 }
 0x102   :  { %v884_v28 = vpop.f32.mrf.mxu1  ;;  %7588 = vmatmul.mubr.msk.bf16.gmra.mxu1 %vm267_vm0, %v230_v62  ;;  %v517_v62 = vadd.f32 %v9111_v26, %v9016_v21  ;;  %v9280_v35 = vpop.f32.mrf.mxu0  ;;  %7556 = vmatmul.mubr.msk.bf16.gmra.mxu0 %vm267_vm0, %v198_v34  ;;  %v505_v26 = vadd.f32 %v9061_v53, %v9009_v17  ;;  %v7782_v53 = vld [vmem:[%s13290_s7 + $0x60] ss:$8 sps:$4 sm:$0xff]  }
 0x103   :  { %v9269_v39 = vpack.c.bf16 %v1287_v23, %v1285_v12  ;;  %v1288_v29 = vmax.f32 %v881_v25, 0.0  ;;  %1753 = vmatprep.mubr.bf16.mxu1 %v1390_v63  ;;  %v885_v58 = vadd.f32 %v884_v28, %v9009_v17  ;;  %v7784_v12 = vld [vmem:[%s13290_s7 + $0x64] ss:$8 sps:$4 sm:$0xff]  }
 0x104   :  { %v886_v51 = vpop.f32.mrf.mxu1  ;;  %v9295_v23 = vpop.f32.mrf.mxu0 }
 0x105   :  { %v9274_v61 = vpack.c.bf16 %v1288_v29, %v1286_v37  ;;  %v887_v63 = vadd.f32 %v886_v51, %v9016_v21  ;;  %v1289_v25 = vmax.f32 %v885_v58, 0.0  ;;  %v1142_v37 = vmax.f32 %v517_v62, 0.0  ;;  %v7806_v51 = vld [vmem:[%s13289_s5 + $0xc0] ss:$8 sps:$4 sm:$0xff]   ;;  %v7808_v58 = vld [vmem:[%s13289_s5 + $0xc4] ss:$8 sps:$4 sm:$0xff]  }
 0x106   :  { %v888_v8 = vpop.f32.mrf.mxu1  ;;  %v1144_v29 = vmax.f32 %v521_v5, 0.0  ;;  %v9301_v3 = vpop.f32.mrf.mxu0  ;;  %v1139_v62 = vmax.f32 %v509_v42, 0.0  ;;  %3004 = vmatprep.subr.bf16.mxu0 %v7808_v58 }
 0x107   :  { %v889_v9 = vadd.f32 %v888_v8, %v9009_v17  ;;  %v1290_v40 = vmax.f32 %v887_v63, 0.0  ;;  %v1137_v8 = vmax.f32 %v505_v26, 0.0  ;;  %v7793_v63 = vld [vmem:[%s13290_s7 + $0x54] ss:$8 sps:$4 sm:$0xff]   ;;  %3005 = vmatpush2.bf16.msra.mxu0 %v7806_v51 }
 0x108   :  { %v890_v18 = vpop.f32.mrf.mxu1 }
 0x109   :  { %v1291_v28 = vmax.f32 %v889_v9, 0.0  ;;  %v891_v34 = vadd.f32 %v890_v18, %v9016_v21  ;;  %v9311_v9 = vpop.f32.mrf.mxu0  ;;  %v527_v18 = vadd.f32 %v9143_v57, %v9016_v21  ;;  %v515_v57 = vadd.f32 %v9099_v19, %v9009_v17 }
 0x10a   :  { %v894_v27 = vpop.f32.mrf.mxu1  ;;  %1754 = vmatmul.mubr.bf16.vlgmr.msra.gmra.mxu1 %v1389_v13 }
 0x10b   :  { %v9303_v44 = vpack.c.bf16 %v1291_v28, %v1289_v25  ;;  %v1292_v46 = vmax.f32 %v891_v34, 0.0  ;;  %4244 = vmatpush1.bf16.msra.mxu1 %v7773_v59  ;;  %1763 = vmatprep.mubr.bf16.mxu1 %v1392_v10  ;;  %v895_v59 = vadd.f32 %v894_v27, %v9009_v17  ;;  %v9321_v25 = vpop.f32.mrf.mxu0  ;;  %v531_v28 = vadd.f32 %v9164_v16, %v9016_v21  ;;  %v7791_v34 = vld [vmem:[%s13290_s7 + $0x50] ss:$8 sps:$4 sm:$0xff]   ;;  %v7802_v16 = vld [vmem:[%s13290_s7 + $0x44] ss:$8 sps:$4 sm:$0xff]  }
 0x10c   :  { %v896_v5 = vpop.f32.mrf.mxu1  ;;  %4245 = vmatprep.subr.bf16.mxu1 %v7784_v12  ;;  %v1394_v12 = vpack.c.bf16 %v1144_v29, %v1142_v37  ;;  %v1391_v27 = vpack.c.bf16 %v1139_v62, %v1137_v8  ;;  %v1146_v58 = vmax.f32 %v527_v18, 0.0  ;;  %v7811_v18 = vld [vmem:[%s13290_s7 + $0x34] ss:$8 sps:$4 sm:$0xff]  }
 0x10d   :  { %13361 = vst [vmem:[#allocation2_spill] sm:$0xff] %v9303_v44  ;;  %v9317_v10 = vpack.c.bf16 %v1292_v46, %v1290_v40  ;;  %v897_v26 = vadd.f32 %v896_v5, %v9016_v21  ;;  %v519_v40 = vadd.f32 %v9115_v32, %v9009_v17  ;;  %v9334_v51 = vpop.f32.mrf.mxu0  ;;  %v1293_v37 = vmax.f32 %v895_v59, 0.0 }
 0x10e   :  { %v898_v13 = vpop.f32.mrf.mxu1  ;;  %v1141_v59 = vmax.f32 %v515_v57, 0.0 }
 0x10f   :  { %13362 = vst [vmem:[#allocation3_spill] sm:$0xff] %v9317_v10  ;;  %v899_v42 = vadd.f32 %v898_v13, %v9009_v17  ;;  %4246 = vmatpush1.bf16.msra.mxu1 %v7782_v53  ;;  %v9340_v62 = vpop.f32.mrf.mxu0  ;;  %v1294_v19 = vmax.f32 %v897_v26, 0.0  ;;  %v1148_v13 = vmax.f32 %v531_v28, 0.0  ;;  %v537_v28 = vadd.f32 %v9181_v33, %v9016_v21 }
 0x110   :  { %v900_v46 = vpop.f32.mrf.mxu1  ;;  %4247 = vmatprep.subr.bf16.mxu1 %v7793_v63  ;;  %v7800_v63 = vld [vmem:[%s13290_s7 + $0x40] ss:$8 sps:$4 sm:$0xff]   ;;  %v529_v33 = vadd.f32 %v9153_v2, %v9009_v17  ;;  %v7812_v2 = vld [vmem:[%s13289_s5 + $0xb0] ss:$8 sps:$4 sm:$0xff]  }
 0x111   :  { %v1295_v29 = vmax.f32 %v899_v42, 0.0  ;;  %v901_v53 = vadd.f32 %v900_v46, %v9016_v21  ;;  %v1143_v42 = vmax.f32 %v519_v40, 0.0  ;;  %v9347_v46 = vpop.f32.mrf.mxu0 }
 0x112   :  { %v904_v8 = vpop.f32.mrf.mxu1  ;;  %1764 = vmatmul.mubr.bf16.gmra.mxu1 %v1391_v27 }
 0x113   :  { %v9342_v5 = vpack.c.bf16 %v1295_v29, %v1293_v37  ;;  %v1296_v32 = vmax.f32 %v901_v53, 0.0  ;;  %1773 = vmatprep.mubr.bf16.mxu1 %v1394_v12  ;;  %4248 = vmatpush1.bf16.msra.mxu1 %v7791_v34  ;;  %v905_v26 = vadd.f32 %v904_v8, %v9009_v17  ;;  %v541_v34 = vadd.f32 %v9196_v56, %v9016_v21  ;;  %v9359_v57 = vpop.f32.mrf.mxu0  ;;  %v7809_v29 = vld [vmem:[%s13290_s7 + $0x30] ss:$8 sps:$4 sm:$0xff]  }
 0x114   :  { %v906_v1 = vpop.f32.mrf.mxu1  ;;  %4249 = vmatprep.subr.bf16.mxu1 %v7802_v16  ;;  %v1396_v37 = vpack.c.bf16 %v1148_v13, %v1146_v58  ;;  %v1393_v53 = vpack.c.bf16 %v1143_v42, %v1141_v59  ;;  %v525_v8 = vadd.f32 %v9131_v49, %v9009_v17  ;;  %v1150_v13 = vmax.f32 %v537_v28, 0.0 }
 0x115   :  { %13363 = vst [vmem:[#allocation4_spill] sm:$0xff] %v9342_v5  ;;  %v9353_v27 = vpack.c.bf16 %v1296_v32, %v1294_v19  ;;  %v907_v40 = vadd.f32 %v906_v1, %v9016_v21  ;;  %v9370_v19 = vpop.f32.mrf.mxu0  ;;  %v1297_v1 = vmax.f32 %v905_v26, 0.0  ;;  %v1147_v28 = vmax.f32 %v529_v33, 0.0 }
 0x116   :  { %v908_v12 = vpop.f32.mrf.mxu1  ;;  %v1145_v26 = vmax.f32 %v525_v8, 0.0 }
 0x117   :  { %13364 = vst [vmem:[#allocation5_spill] sm:$0xff] %v9353_v27  ;;  %v909_v16 = vadd.f32 %v908_v12, %v9009_v17  ;;  %4250 = vmatpush1.bf16.msra.mxu1 %v7800_v63  ;;  %v1152_v12 = vmax.f32 %v541_v34, 0.0  ;;  %v9373_v5 = vpop.f32.mrf.mxu0  ;;  %v1298_v59 = vmax.f32 %v907_v40, 0.0 }
 0x118   :  { %v910_v56 = vpop.f32.mrf.mxu1  ;;  %4251 = vmatprep.subr.bf16.mxu1 %v7811_v18  ;;  %v7814_v18 = vld [vmem:[%s13289_s5 + $0xb4] ss:$8 sps:$4 sm:$0xff]  }
 0x119   :  { %v1299_v32 = vmax.f32 %v909_v16, 0.0  ;;  %v911_v58 = vadd.f32 %v910_v56, %v9016_v21  ;;  %v9383_v34 = vpop.f32.mrf.mxu0  ;;  %3006 = vmatprep.subr.bf16.mxu0 %v7814_v18  ;;  %v1398_v33 = vpack.c.bf16 %v1152_v12, %v1150_v13 }
 0x11a   :  { %v914_v63 = vpop.f32.mrf.mxu1  ;;  %1774 = vmatmul.mubr.bf16.gmra.mxu1 %v1393_v53  ;;  %3007 = vmatpush2.bf16.msra.mxu0 %v7812_v2 }
 0x11b   :  { %v9375_v42 = vpack.c.bf16 %v1299_v32, %v1297_v1  ;;  %v1300_v49 = vmax.f32 %v911_v58, 0.0  ;;  %1783 = vmatprep.mubr.bf16.mxu1 %v1396_v37  ;;  %4252 = vmatpush1.bf16.msra.mxu1 %v7809_v29  ;;  %v915_v40 = vadd.f32 %v914_v63, %v9009_v17  ;;  %v547_v29 = vadd.f32 %v9217_v48, %v9016_v21  ;;  %v9390_v56 = vpop.f32.mrf.mxu0 }
 0x11c   :  { %v916_v16 = vpop.f32.mrf.mxu1  ;;  %v551_v32 = vadd.f32 %v9238_v52, %v9016_v21  ;;  %v1395_v58 = vpack.c.bf16 %v1147_v28, %v1145_v26  ;;  %v535_v63 = vadd.f32 %v9169_v24, %v9009_v17 }
 0x11d   :  { %13365 = vst [vmem:[#allocation6_spill] sm:$0xff] %v9375_v42  ;;  %v9386_v53 = vpack.c.bf16 %v1300_v49, %v1298_v59  ;;  %v917_v1 = vadd.f32 %v916_v16, %v9016_v21  ;;  %v539_v59 = vadd.f32 %v9185_v41, %v9009_v17  ;;  %v9400_v48 = vpop.f32.mrf.mxu0  ;;  %v1301_v18 = vmax.f32 %v915_v40, 0.0 }
 0x11e   :  { %v918_v37 = vpop.f32.mrf.mxu1  ;;  %v1154_v42 = vmax.f32 %v547_v29, 0.0  ;;  %v1156_v24 = vmax.f32 %v551_v32, 0.0  ;;  %v1149_v28 = vmax.f32 %v535_v63, 0.0 }
 0x11f   :  { %13366 = vst [vmem:[#allocation7_spill] sm:$0xff] %v9386_v53  ;;  %v919_v8 = vadd.f32 %v918_v37, %v9009_v17  ;;  %v9403_v13 = vpop.f32.mrf.mxu0  ;;  %v1302_v52 = vmax.f32 %v917_v1, 0.0  ;;  %v1151_v41 = vmax.f32 %v539_v59, 0.0  ;;  %v561_v1 = vadd.f32 %v9271_v54, %v9016_v21 }
 0x120   :  { %v920_v49 = vpop.f32.mrf.mxu1  ;;  %v1400_v63 = vpack.c.bf16 %v1156_v24, %v1154_v42 }
 0x121   :  { %v1303_v2 = vmax.f32 %v919_v8, 0.0  ;;  %v921_v16 = vadd.f32 %v920_v49, %v9016_v21  ;;  %v9407_v27 = vpop.f32.mrf.mxu0  ;;  %v1397_v59 = vpack.c.bf16 %v1151_v41, %v1149_v28  ;;  %v7817_v28 = vld [vmem:[%s13289_s5 + $0xa4] ss:$8 sps:$4 sm:$0xff]  }
 0x122   :  { %v924_v37 = vpop.f32.mrf.mxu1  ;;  %1784 = vmatmul.mubr.bf16.gmra.mxu1 %v1395_v58  ;;  %v557_v58 = vadd.f32 %v9263_v22, %v9016_v21  ;;  %3008 = vmatprep.subr.bf16.mxu0 %v7817_v28 }
 0x123   :  { %v9405_v12 = vpack.c.bf16 %v1303_v2, %v1301_v18  ;;  %v1304_v26 = vmax.f32 %v921_v16, 0.0  ;;  %1793 = vmatprep.mubr.bf16.mxu1 %v1398_v33  ;;  %v925_v40 = vadd.f32 %v924_v37, %v9009_v17  ;;  %v9416_v49 = vpop.f32.mrf.mxu0  ;;  %v545_v18 = vadd.f32 %v9205_v4, %v9009_v17 }
 0x124   :  { %v926_v53 = vpop.f32.mrf.mxu1  ;;  %v549_v2 = vadd.f32 %v9227_v31, %v9009_v17  ;;  %v7815_v31 = vld [vmem:[%s13289_s5 + $0xa0] ss:$8 sps:$4 sm:$0xff]  }
 0x125   :  { %13367 = vst [vmem:[#allocation8_spill] sm:$0xff] %v9405_v12  ;;  %v9410_v8 = vpack.c.bf16 %v1304_v26, %v1302_v52  ;;  %v927_v33 = vadd.f32 %v926_v53, %v9016_v21  ;;  %v9424_v37 = vpop.f32.mrf.mxu0  ;;  %v1305_v22 = vmax.f32 %v925_v40, 0.0  ;;  %v1158_v26 = vmax.f32 %v557_v58, 0.0  ;;  %3009 = vmatpush2.bf16.msra.mxu0 %v7815_v31 }
 0x126   :  { %v928_v29 = vpop.f32.mrf.mxu1  ;;  %v1160_v53 = vmax.f32 %v561_v1, 0.0  ;;  %v1153_v41 = vmax.f32 %v545_v18, 0.0  ;;  %v1155_v40 = vmax.f32 %v549_v2, 0.0  ;;  %v567_v18 = vadd.f32 %v9295_v23, %v9016_v21 }
 0x127   :  { %13368 = vst [vmem:[#allocation9_spill] sm:$0xff] %v9410_v8  ;;  %v929_v32 = vadd.f32 %v928_v29, %v9009_v17  ;;  %v9427_v29 = vpop.f32.mrf.mxu0  ;;  %v1306_v42 = vmax.f32 %v927_v33, 0.0  ;;  %v7818_v33 = vld [vmem:[%s13290_s7 + $0x20] ss:$8 sps:$4 sm:$0xff]  }
 0x128   :  { %v930_v16 = vpop.f32.mrf.mxu1  ;;  %v1399_v28 = vpack.c.bf16 %v1155_v40, %v1153_v41 }
 0x129   :  { %v1307_v52 = vmax.f32 %v929_v32, 0.0  ;;  %v931_v54 = vadd.f32 %v930_v16, %v9016_v21  ;;  %v9437_v32 = vpop.f32.mrf.mxu0 }
 0x12a   :  { %v934_v12 = vpop.f32.mrf.mxu1  ;;  %1794 = vmatmul.mubr.bf16.gmra.mxu1 %v1397_v59 }
 0x12b   :  { %v9429_v24 = vpack.c.bf16 %v1307_v52, %v1305_v22  ;;  %v1308_v4 = vmax.f32 %v931_v54, 0.0  ;;  %1803 = vmatprep.mubr.bf16.mxu1 %v1400_v63  ;;  %v935_v1 = vadd.f32 %v934_v12, %v9009_v17  ;;  %v7820_v63 = vld [vmem:[%s13290_s7 + $0x24] ss:$8 sps:$4 sm:$0xff]   ;;  %v9450_v2 = vpop.f32.mrf.mxu0  ;;  %v1402_v52 = vpack.c.bf16 %v1160_v53, %v1158_v26 }
 0x12c   :  { %v936_v58 = vpop.f32.mrf.mxu1  ;;  %v571_v54 = vadd.f32 %v9311_v9, %v9016_v21  ;;  %4253 = vmatprep.subr.bf16.mxu1 %v7820_v63  ;;  %v1162_v26 = vmax.f32 %v567_v18, 0.0 }
 0x12d   :  { %13369 = vst [vmem:[#allocation10_spill] sm:$0xff] %v9429_v24  ;;  %v9446_v59 = vpack.c.bf16 %v1308_v4, %v1306_v42  ;;  %v937_v12 = vadd.f32 %v936_v58, %v9016_v21  ;;  %v555_v42 = vadd.f32 %v9245_v0, %v9009_v17  ;;  %v559_v4 = vadd.f32 %v9267_v30, %v9009_v17  ;;  %v9460_v24 = vpop.f32.mrf.mxu0 }
 0x12e   :  { %v938_v16 = vpop.f32.mrf.mxu1  ;;  %4254 = vmatpush1.bf16.msra.mxu1 %v7818_v33  ;;  %v1309_v31 = vmax.f32 %v935_v1, 0.0  ;;  %v1164_v63 = vmax.f32 %v571_v54, 0.0 }
 0x12f   :  { %13370 = vst [vmem:[#allocation11_spill] sm:$0xff] %v9446_v59  ;;  %v939_v22 = vadd.f32 %v938_v16, %v9009_v17  ;;  %v9463_v9 = vpop.f32.mrf.mxu0  ;;  %v1310_v41 = vmax.f32 %v937_v12, 0.0  ;;  %v1157_v30 = vmax.f32 %v555_v42, 0.0  ;;  %v1159_v59 = vmax.f32 %v559_v4, 0.0 }
 0x130   :  { %v940_v23 = vpop.f32.mrf.mxu1  ;;  %v581_v12 = vadd.f32 %v9347_v46, %v9016_v21  ;;  %v1404_v42 = vpack.c.bf16 %v1164_v63, %v1162_v26  ;;  %v7823_v63 = vld [vmem:[%s13289_s5 + $0x94] ss:$8 sps:$4 sm:$0xff]  }
 0x131   :  { %v1311_v58 = vmax.f32 %v939_v22, 0.0  ;;  %v941_v16 = vadd.f32 %v940_v23, %v9016_v21  ;;  %v9467_v44 = vpop.f32.mrf.mxu0  ;;  %v577_v22 = vadd.f32 %v9334_v51, %v9016_v21  ;;  %v1401_v4 = vpack.c.bf16 %v1159_v59, %v1157_v30  ;;  %3010 = vmatprep.subr.bf16.mxu0 %v7823_v63 }
 0x132   :  { %v944_v53 = vpop.f32.mrf.mxu1  ;;  %1804 = vmatmul.mubr.bf16.gmra.mxu1 %v1399_v28  ;;  %v565_v23 = vadd.f32 %v9280_v35, %v9009_v17 }
 0x133   :  { %v9465_v40 = vpack.c.bf16 %v1311_v58, %v1309_v31  ;;  %v1312_v0 = vmax.f32 %v941_v16, 0.0  ;;  %1813 = vmatprep.mubr.bf16.mxu1 %v1402_v52  ;;  %v945_v1 = vadd.f32 %v944_v53, %v9009_v17  ;;  %v9476_v28 = vpop.f32.mrf.mxu0  ;;  %v569_v31 = vadd.f32 %v9301_v3, %v9009_v17  ;;  %v7821_v3 = vld [vmem:[%s13289_s5 + $0x90] ss:$8 sps:$4 sm:$0xff]  }
 0x134   :  { %v946_v8 = vpop.f32.mrf.mxu1  ;;  %v1161_v30 = vmax.f32 %v565_v23, 0.0  ;;  %3011 = vmatpush2.bf16.msra.mxu0 %v7821_v3 }
 0x135   :  { %13371 = vst [vmem:[#allocation12_spill] sm:$0xff] %v9465_v40  ;;  %v9470_v33 = vpack.c.bf16 %v1312_v0, %v1310_v41  ;;  %v947_v52 = vadd.f32 %v946_v8, %v9016_v21  ;;  %v9484_v16 = vpop.f32.mrf.mxu0  ;;  %v1313_v51 = vmax.f32 %v945_v1, 0.0  ;;  %v1166_v41 = vmax.f32 %v577_v22, 0.0 }
 0x136   :  { %v948_v18 = vpop.f32.mrf.mxu1  ;;  %v1168_v8 = vmax.f32 %v581_v12, 0.0  ;;  %v1163_v1 = vmax.f32 %v569_v31, 0.0 }
 0x137   :  { %13372 = vst [vmem:[#allocation13_spill] sm:$0xff] %v9470_v33  ;;  %v949_v54 = vadd.f32 %v948_v18, %v9009_v17  ;;  %v9487_v18 = vpop.f32.mrf.mxu0  ;;  %v1314_v59 = vmax.f32 %v947_v52, 0.0 }
 0x138   :  { %v950_v58 = vpop.f32.mrf.mxu1  ;;  %v1406_v31 = vpack.c.bf16 %v1168_v8, %v1166_v41 }
 0x139   :  { %v1315_v53 = vmax.f32 %v949_v54, 0.0  ;;  %v951_v46 = vadd.f32 %v950_v58, %v9016_v21  ;;  %v9497_v54 = vpop.f32.mrf.mxu0 }
 0x13a   :  { %v954_v0 = vpop.f32.mrf.mxu1  ;;  %1814 = vmatmul.mubr.bf16.gmra.mxu1 %v1401_v4 }
 0x13b   :  { %v9489_v26 = vpack.c.bf16 %v1315_v53, %v1313_v51  ;;  %v1316_v35 = vmax.f32 %v951_v46, 0.0  ;;  %1823 = vmatprep.mubr.bf16.mxu1 %v1404_v42  ;;  %v955_v12 = vadd.f32 %v954_v0, %v9009_v17  ;;  %v587_v42 = vadd.f32 %v9370_v19, %v9016_v21  ;;  %v9504_v58 = vpop.f32.mrf.mxu0 }
 0x13c   :  { %v956_v22 = vpop.f32.mrf.mxu1  ;;  %v591_v53 = vadd.f32 %v9383_v34, %v9016_v21  ;;  %v1403_v46 = vpack.c.bf16 %v1163_v1, %v1161_v30  ;;  %v575_v0 = vadd.f32 %v9321_v25, %v9009_v17 }
 0x13d   :  { %13373 = vst [vmem:[#allocation14_spill] sm:$0xff] %v9489_v26  ;;  %v9500_v52 = vpack.c.bf16 %v1316_v35, %v1314_v59  ;;  %v957_v51 = vadd.f32 %v956_v22, %v9016_v21  ;;  %v579_v59 = vadd.f32 %v9340_v62, %v9009_v17  ;;  %v9514_v19 = vpop.f32.mrf.mxu0  ;;  %v1317_v63 = vmax.f32 %v955_v12, 0.0 }
 0x13e   :  { %v958_v4 = vpop.f32.mrf.mxu1  ;;  %v1170_v26 = vmax.f32 %v587_v42, 0.0  ;;  %v1172_v25 = vmax.f32 %v591_v53, 0.0  ;;  %v1165_v1 = vmax.f32 %v575_v0, 0.0 }
 0x13f   :  { %13374 = vst [vmem:[#allocation15_spill] sm:$0xff] %v9500_v52  ;;  %v959_v23 = vadd.f32 %v958_v4, %v9009_v17  ;;  %v9517_v41 = vpop.f32.mrf.mxu0  ;;  %v1318_v34 = vmax.f32 %v957_v51, 0.0  ;;  %v1167_v62 = vmax.f32 %v579_v59, 0.0  ;;  %v601_v51 = vadd.f32 %v9407_v27, %v9016_v21 }
 0x140   :  { %v960_v35 = vpop.f32.mrf.mxu1  ;;  %v1408_v0 = vpack.c.bf16 %v1172_v25, %v1170_v26 }
 0x141   :  { %v1319_v3 = vmax.f32 %v959_v23, 0.0  ;;  %v961_v22 = vadd.f32 %v960_v35, %v9016_v21  ;;  %v9521_v40 = vpop.f32.mrf.mxu0  ;;  %v1405_v59 = vpack.c.bf16 %v1167_v62, %v1165_v1  ;;  %v7826_v1 = vld [vmem:[%s13289_s5 + $0x84] ss:$8 sps:$4 sm:$0xff]  }
 0x142   :  { %v964_v4 = vpop.f32.mrf.mxu1  ;;  %1824 = vmatmul.mubr.bf16.gmra.mxu1 %v1403_v46  ;;  %v597_v46 = vadd.f32 %v9400_v48, %v9016_v21  ;;  %3012 = vmatprep.subr.bf16.mxu0 %v7826_v1  ;;  %v13379_v1 = vmov 0  }
 0x143   :  { %v9519_v8 = vpack.c.bf16 %v1319_v3, %v1317_v63  ;;  %v1320_v30 = vmax.f32 %v961_v22, 0.0  ;;  %1833 = vmatprep.mubr.bf16.mxu1 %v1406_v31  ;;  %v965_v12 = vadd.f32 %v964_v4, %v9009_v17  ;;  %v9530_v35 = vpop.f32.mrf.mxu0  ;;  %v585_v63 = vadd.f32 %v9359_v57, %v9009_v17 }
 0x144   :  { %v966_v52 = vpop.f32.mrf.mxu1  ;;  %v589_v3 = vadd.f32 %v9373_v5, %v9009_v17  ;;  %v7824_v5 = vld [vmem:[%s13289_s5 + $0x80] ss:$8 sps:$4 sm:$0xff]  }
 0x145   :  { %13375 = vst [vmem:[#allocation16_spill] sm:$0xff] %v9519_v8  ;;  %v9524_v23 = vpack.c.bf16 %v1320_v30, %v1318_v34  ;;  %v967_v31 = vadd.f32 %v966_v52, %v9016_v21  ;;  %v9538_v4 = vpop.f32.mrf.mxu0  ;;  %v1321_v48 = vmax.f32 %v965_v12, 0.0  ;;  %v1174_v30 = vmax.f32 %v597_v46, 0.0  ;;  %3013 = vmatpush2.bf16.msra.mxu0 %v7824_v5 }
 0x146   :  { %v968_v42 = vpop.f32.mrf.mxu1  ;;  %v1176_v52 = vmax.f32 %v601_v51, 0.0  ;;  %v1169_v62 = vmax.f32 %v585_v63, 0.0  ;;  %v1171_v12 = vmax.f32 %v589_v3, 0.0  ;;  %v607_v63 = vadd.f32 %v9424_v37, %v9016_v21  ;;  %5435 = vmatprep.subr.bf16.mxu0 %v13379_v1 }
 0x147   :  { %13376 = vst [vmem:[#allocation17_spill] sm:$0xff] %v9524_v23  ;;  %v969_v53 = vadd.f32 %v968_v42, %v9009_v17  ;;  %v9541_v42 = vpop.f32.mrf.mxu0  ;;  %v1322_v26 = vmax.f32 %v967_v31, 0.0  ;;  %v7827_v31 = vld [vmem:[%s13290_s7 + $0x10] ss:$8 sps:$4 sm:$0xff]   ;;  %v599_v37 = vadd.f32 %v9403_v13, %v9009_v17 }
 0x148   :  { %v970_v22 = vpop.f32.mrf.mxu1  ;;  %v1410_v3 = vpack.c.bf16 %v1176_v52, %v1174_v30 }
 0x149   :  { %v1323_v34 = vmax.f32 %v969_v53, 0.0  ;;  %v971_v27 = vadd.f32 %v970_v22, %v9016_v21  ;;  %v9551_v53 = vpop.f32.mrf.mxu0  ;;  %v1175_v23 = vmax.f32 %v599_v37, 0.0 }
 0x14a   :  { %v974_v8 = vpop.f32.mrf.mxu1  ;;  %1834 = vmatmul.mubr.bf16.gmra.mxu1 %v1405_v59 }
 0x14b   :  { %v9543_v25 = vpack.c.bf16 %v1323_v34, %v1321_v48  ;;  %v1324_v57 = vmax.f32 %v971_v27, 0.0  ;;  %1843 = vmatprep.mubr.bf16.mxu1 %v1408_v0  ;;  %v975_v51 = vadd.f32 %v974_v8, %v9009_v17  ;;  %v7829_v0 = vld [vmem:[%s13290_s7 + $0x14] ss:$8 sps:$4 sm:$0xff]   ;;  %v9564_v48 = vpop.f32.mrf.mxu0  ;;  %v611_v27 = vadd.f32 %v9437_v32, %v9016_v21 }
 0x14c   :  { %v976_v46 = vpop.f32.mrf.mxu1  ;;  %4255 = vmatprep.subr.bf16.mxu1 %v7829_v0 }
 0x14d   :  { %13377 = vst [vmem:[#allocation18_spill] sm:$0xff] %v9543_v25  ;;  %v9560_v59 = vpack.c.bf16 %v1324_v57, %v1322_v26  ;;  %v977_v8 = vadd.f32 %v976_v46, %v9016_v21  ;;  %v1407_v26 = vpack.c.bf16 %v1171_v12, %v1169_v62  ;;  %v595_v57 = vadd.f32 %v9390_v56, %v9009_v17  ;;  %v9575_v52 = vpop.f32.mrf.mxu0 }
 0x14e   :  { %v978_v22 = vpop.f32.mrf.mxu1  ;;  %4256 = vmatpush1.bf16.msra.mxu1 %v7827_v31  ;;  %v1325_v5 = vmax.f32 %v975_v51, 0.0  ;;  %v1178_v25 = vmax.f32 %v607_v63, 0.0 }
 0x14f   :  { %13378 = vst [vmem:[#allocation19_spill] sm:$0xff] %v9560_v59  ;;  %v979_v34 = vadd.f32 %v978_v22, %v9009_v17  ;;  %v9578_v0 = vpop.f32.mrf.mxu0  ;;  %v1326_v62 = vmax.f32 %v977_v8, 0.0  ;;  %v1180_v59 = vmax.f32 %v611_v27, 0.0  ;;  %v1173_v13 = vmax.f32 %v595_v57, 0.0 }
 0x150   :  { %v980_v30 = vpop.f32.mrf.mxu1  ;;  %v621_v8 = vadd.f32 %v9467_v44, %v9016_v21  ;;  %v615_v44 = vadd.f32 %v9450_v2, %v9009_v17  ;;  %v631_v2 = vadd.f32 %v9497_v54, %v9016_v21 }
 0x151   :  { %v1327_v46 = vmax.f32 %v979_v34, 0.0  ;;  %v981_v22 = vadd.f32 %v980_v30, %v9016_v21  ;;  %v9582_v10 = vpop.f32.mrf.mxu0  ;;  %v617_v34 = vadd.f32 %v9460_v24, %v9016_v21  ;;  %v1412_v57 = vpack.c.bf16 %v1180_v59, %v1178_v25 }
 0x152   :  { %v984_v32 = vpop.f32.mrf.mxu1  ;;  %1844 = vmatmul.mubr.bf16.gmra.mxu1 %v1407_v26  ;;  %v1409_v37 = vpack.c.bf16 %v1175_v23, %v1173_v13  ;;  %v605_v30 = vadd.f32 %v9416_v49, %v9009_v17  ;;  %v619_v23 = vadd.f32 %v9463_v9, %v9009_v17  ;;  %v1184_v49 = vmax.f32 %v621_v8, 0.0 }
 0x153   :  { %v9580_v12 = vpack.c.bf16 %v1327_v46, %v1325_v5  ;;  %v1328_v56 = vmax.f32 %v981_v22, 0.0  ;;  %1853 = vmatprep.mubr.bf16.mxu1 %v1410_v3  ;;  %v985_v51 = vadd.f32 %v984_v32, %v9009_v17  ;;  %v9591_v26 = vpop.f32.mrf.mxu0  ;;  %v609_v5 = vadd.f32 %v9427_v29, %v9009_v17 }
 0x154   :  { %v986_v33 = vpop.f32.mrf.mxu1  ;;  %v627_v29 = vadd.f32 %v9484_v16, %v9016_v21  ;;  %v1181_v16 = vmax.f32 %v615_v44, 0.0 }
 0x155   :  { %13380 = vst [vmem:[#allocation20_spill] sm:$0xff] %v9580_v12  ;;  %v9585_v31 = vpack.c.bf16 %v1328_v56, %v1326_v62  ;;  %v987_v3 = vadd.f32 %v986_v33, %v9016_v21  ;;  %v9599_v22 = vpop.f32.mrf.mxu0  ;;  %v1329_v24 = vmax.f32 %v985_v51, 0.0  ;;  %v1182_v62 = vmax.f32 %v617_v34, 0.0 }
 0x156   :  { %v988_v63 = vpop.f32.mrf.mxu1  ;;  %v1179_v34 = vmax.f32 %v609_v5, 0.0  ;;  %v1186_v54 = vmax.f32 %v627_v29, 0.0 }
 0x157   :  { %13381 = vst [vmem:[#allocation21_spill] sm:$0xff] %v9585_v31  ;;  %v989_v27 = vadd.f32 %v988_v63, %v9009_v17  ;;  %v9608_v25 = vpop.f32.mrf.mxu0  ;;  %v1330_v59 = vmax.f32 %v987_v3, 0.0  ;;  %v1177_v63 = vmax.f32 %v605_v30, 0.0  ;;  %v1414_v3 = vpack.c.bf16 %v1184_v49, %v1182_v62 }
 0x158   :  { %v990_v46 = vpop.f32.mrf.mxu1  ;;  %v1188_v30 = vmax.f32 %v631_v2, 0.0 }
 0x159   :  { %v1331_v32 = vmax.f32 %v989_v27, 0.0  ;;  %v991_v33 = vadd.f32 %v990_v46, %v9016_v21  ;;  %v1183_v46 = vmax.f32 %v619_v23, 0.0  ;;  %v1411_v5 = vpack.c.bf16 %v1179_v34, %v1177_v63 }
 0x15a   :  { %v994_v56 = vpop.f32.mrf.mxu1  ;;  %1854 = vmatmul.mubr.bf16.gmra.mxu1 %v1409_v37  ;;  %v9614_v37 = vpop.f32.mrf.mxu0 }
 0x15b   :  { %v9610_v13 = vpack.c.bf16 %v1331_v32, %v1329_v24  ;;  %v1332_v51 = vmax.f32 %v991_v33, 0.0  ;;  %1863 = vmatprep.mubr.bf16.mxu1 %v1412_v57  ;;  %v995_v9 = vadd.f32 %v994_v56, %v9009_v17 }
 0x15c   :  { %v996_v27 = vpop.f32.mrf.mxu1  ;;  %v9619_v24 = vpop.f32.mrf.mxu0 }
 0x15d   :  { %13382 = vst [vmem:[#allocation22_spill] sm:$0xff] %v9610_v13  ;;  %v9617_v8 = vpack.c.bf16 %v1332_v51, %v1330_v59  ;;  %v997_v57 = vadd.f32 %v996_v27, %v9016_v21  ;;  %v1333_v31 = vmax.f32 %v995_v9, 0.0  ;;  %v637_v27 = vadd.f32 %v9514_v19, %v9016_v21 }
 0x15e   :  { %v998_v12 = vpop.f32.mrf.mxu1  ;;  %v9623_v13 = vpop.f32.mrf.mxu0 }
 0x15f   :  { %13383 = vst [vmem:[#allocation23_spill] sm:$0xff] %v9617_v8  ;;  %v999_v32 = vadd.f32 %v998_v12, %v9009_v17  ;;  %v1334_v62 = vmax.f32 %v997_v57, 0.0  ;;  %v1416_v57 = vpack.c.bf16 %v1188_v30, %v1186_v54 }
 0x160   :  { %v1000_v33 = vpop.f32.mrf.mxu1  ;;  %v9626_v23 = vpop.f32.mrf.mxu0 }
 0x161   :  { %v1335_v56 = vmax.f32 %v999_v32, 0.0  ;;  %v1001_v59 = vadd.f32 %v1000_v33, %v9016_v21  ;;  %v625_v33 = vadd.f32 %v9476_v28, %v9009_v17 }
 0x162   :  { %v1004_v44 = vpop.f32.mrf.mxu1  ;;  %1864 = vmatmul.mubr.bf16.gmra.mxu1 %v1411_v5  ;;  %v9630_v29 = vpop.f32.mrf.mxu0  ;;  %v1413_v5 = vpack.c.bf16 %v1183_v46, %v1181_v16 }
 0x163   :  { %v9628_v49 = vpack.c.bf16 %v1335_v56, %v1333_v31  ;;  %v1336_v51 = vmax.f32 %v1001_v59, 0.0  ;;  %1873 = vmatprep.mubr.bf16.mxu1 %v1414_v3  ;;  %v1005_v2 = vadd.f32 %v1004_v44, %v9009_v17  ;;  %v641_v3 = vadd.f32 %v9521_v40, %v9016_v21 }
 0x164   :  { %v1006_v12 = vpop.f32.mrf.mxu1  ;;  %v9637_v9 = vpop.f32.mrf.mxu0  ;;  %v629_v56 = vadd.f32 %v9487_v18, %v9009_v17  ;;  %v1185_v30 = vmax.f32 %v625_v33, 0.0 }
 0x165   :  { %13384 = vst [vmem:[#allocation24_spill] sm:$0xff] %v9628_v49  ;;  %v9633_v63 = vpack.c.bf16 %v1336_v51, %v1334_v62  ;;  %v1007_v32 = vadd.f32 %v1006_v12, %v9016_v21  ;;  %v1337_v19 = vmax.f32 %v1005_v2, 0.0  ;;  %v1190_v12 = vmax.f32 %v637_v27, 0.0  ;;  %v7831_v27 = vld [vmem:[%s13290_s7] ss:$8 sps:$4 sm:$0xff]  }
 0x166   :  { %v1008_v34 = vpop.f32.mrf.mxu1  ;;  %v9647_v44 = vpop.f32.mrf.mxu0  ;;  %v1192_v28 = vmax.f32 %v641_v3, 0.0  ;;  %v1187_v18 = vmax.f32 %v629_v56, 0.0 }
 0x167   :  { %13385 = vst [vmem:[#allocation25_spill] sm:$0xff] %v9633_v63  ;;  %v1009_v31 = vadd.f32 %v1008_v34, %v9009_v17  ;;  %v1338_v40 = vmax.f32 %v1007_v32, 0.0  ;;  %v7833_v32 = vld [vmem:[%s13290_s7 + $0x4] ss:$8 sps:$4 sm:$0xff]  }
 0x168   :  { %v1010_v59 = vpop.f32.mrf.mxu1  ;;  %v9650_v54 = vpop.f32.mrf.mxu0  ;;  %4257 = vmatprep.subr.bf16.mxu1 %v7833_v32 }
 0x169   :  { %v1339_v62 = vmax.f32 %v1009_v31, 0.0  ;;  %v1011_v51 = vadd.f32 %v1010_v59, %v9016_v21  ;;  %v1418_v59 = vpack.c.bf16 %v1192_v28, %v1190_v12  ;;  %4258 = vmatpush1.bf16.msra.mxu1 %v7831_v27 }
 0x16a   :  { %v1014_v34 = vpop.f32.mrf.mxu1  ;;  %1874 = vmatmul.mubr.bf16.gmra.mxu1 %v1413_v5  ;;  %v9654_v63 = vpop.f32.mrf.mxu0 }
 0x16b   :  { %v9652_v16 = vpack.c.bf16 %v1339_v62, %v1337_v19  ;;  %v1340_v46 = vmax.f32 %v1011_v51, 0.0  ;;  %1883 = vmatprep.mubr.bf16.mxu1 %v1416_v57  ;;  %v1015_v2 = vadd.f32 %v1014_v34, %v9009_v17  ;;  %v647_v57 = vadd.f32 %v9538_v4, %v9016_v21 }
 0x16c   :  { %v1016_v49 = vpop.f32.mrf.mxu1  ;;  %v9667_v3 = vpop.f32.mrf.mxu0  ;;  %v651_v19 = vadd.f32 %v9551_v53, %v9016_v21  ;;  %v1415_v62 = vpack.c.bf16 %v1187_v18, %v1185_v30  ;;  %v635_v51 = vadd.f32 %v9504_v58, %v9009_v17  ;;  %v639_v34 = vadd.f32 %v9517_v41, %v9009_v17 }
 0x16d   :  { %13386 = vst [vmem:[#allocation26_spill] sm:$0xff] %v9652_v16  ;;  %v9663_v31 = vpack.c.bf16 %v1340_v46, %v1338_v40  ;;  %v1017_v33 = vadd.f32 %v1016_v49, %v9016_v21  ;;  %v1341_v46 = vmax.f32 %v1015_v2, 0.0  ;;  %v1194_v12 = vmax.f32 %v647_v57, 0.0 }
 0x16e   :  { %v1018_v5 = vpop.f32.mrf.mxu1  ;;  %v9677_v4 = vpop.f32.mrf.mxu0  ;;  %v1196_v32 = vmax.f32 %v651_v19, 0.0  ;;  %v1189_v41 = vmax.f32 %v635_v51, 0.0  ;;  %v1191_v16 = vmax.f32 %v639_v34, 0.0  ;;  %v661_v51 = vadd.f32 %v9582_v10, %v9016_v21 }
 0x16f   :  { %13387 = vst [vmem:[#allocation27_spill] sm:$0xff] %v9663_v31  ;;  %v1019_v56 = vadd.f32 %v1018_v5, %v9009_v17  ;;  %v1342_v30 = vmax.f32 %v1017_v33, 0.0 }
 0x170   :  { %v1020_v40 = vpop.f32.mrf.mxu1  ;;  %v9680_v53 = vpop.f32.mrf.mxu0  ;;  %v1420_v19 = vpack.c.bf16 %v1196_v32, %v1194_v12  ;;  %v1417_v34 = vpack.c.bf16 %v1191_v16, %v1189_v41 }
 0x171   :  { %v1343_v49 = vmax.f32 %v1019_v56, 0.0  ;;  %v1021_v5 = vadd.f32 %v1020_v40, %v9016_v21  ;;  %v657_v56 = vadd.f32 %v9575_v52, %v9016_v21  ;;  %v645_v40 = vadd.f32 %v9530_v35, %v9009_v17 }
 0x172   :  { %v1024_v28 = vpop.f32.mrf.mxu1  ;;  %1884 = vmatmul.mubr.bf16.gmra.mxu1 %v1415_v62  ;;  %v9684_v8 = vpop.f32.mrf.mxu0  ;;  %v1200_v35 = vmax.f32 %v661_v51, 0.0 }
 0x173   :  { %v9682_v18 = vpack.c.bf16 %v1343_v49, %v1341_v46  ;;  %v1344_v58 = vmax.f32 %v1021_v5, 0.0  ;;  %1893 = vmatprep.mubr.bf16.mxu1 %v1418_v59  ;;  %v1025_v2 = vadd.f32 %v1024_v28, %v9009_v17  ;;  %v649_v46 = vadd.f32 %v9541_v42, %v9009_v17 }
 0x174   :  { %v1026_v31 = vpop.f32.mrf.mxu1  ;;  %v9691_v62 = vpop.f32.mrf.mxu0  ;;  %v1193_v41 = vmax.f32 %v645_v40, 0.0  ;;  %v671_v40 = vadd.f32 %v9614_v37, %v9016_v21 }
 0x175   :  { %13388 = vst [vmem:[#allocation28_spill] sm:$0xff] %v9682_v18  ;;  %v9687_v27 = vpack.c.bf16 %v1344_v58, %v1342_v30  ;;  %v1027_v33 = vadd.f32 %v1026_v31, %v9016_v21  ;;  %v1345_v52 = vmax.f32 %v1025_v2, 0.0  ;;  %v1198_v30 = vmax.f32 %v657_v56, 0.0 }
 0x176   :  { %v1028_v57 = vpop.f32.mrf.mxu1  ;;  %v9701_v5 = vpop.f32.mrf.mxu0  ;;  %v1195_v42 = vmax.f32 %v649_v46, 0.0 }
 0x177   :  { %13389 = vst [vmem:[#allocation29_spill] sm:$0xff] %v9687_v27  ;;  %v1029_v59 = vadd.f32 %v1028_v57, %v9009_v17  ;;  %v1346_v10 = vmax.f32 %v1027_v33, 0.0  ;;  %v1422_v51 = vpack.c.bf16 %v1200_v35, %v1198_v30 }
 0x178   :  { %v1030_v49 = vpop.f32.mrf.mxu1  ;;  %v9704_v12 = vpop.f32.mrf.mxu0  ;;  %v1419_v46 = vpack.c.bf16 %v1195_v42, %v1193_v41 }
 0x179   :  { %v1347_v28 = vmax.f32 %v1029_v59, 0.0  ;;  %v1031_v31 = vadd.f32 %v1030_v49, %v9016_v21 }
 0x17a   :  { %v1034_v58 = vpop.f32.mrf.mxu1  ;;  %1894 = vmatmul.mubr.bf16.gmra.mxu1 %v1417_v34  ;;  %v9708_v18 = vpop.f32.mrf.mxu0  ;;  %v667_v34 = vadd.f32 %v9599_v22, %v9016_v21 }
 0x17b   :  { %v9706_v16 = vpack.c.bf16 %v1347_v28, %v1345_v52  ;;  %v1348_v32 = vmax.f32 %v1031_v31, 0.0  ;;  %1903 = vmatprep.mubr.bf16.mxu1 %v1420_v19  ;;  %v1035_v2 = vadd.f32 %v1034_v58, %v9009_v17  ;;  %v655_v52 = vadd.f32 %v9564_v48, %v9009_v17 }
 0x17c   :  { %v1036_v57 = vpop.f32.mrf.mxu1  ;;  %v9715_v49 = vpop.f32.mrf.mxu0  ;;  %v659_v28 = vadd.f32 %v9578_v0, %v9009_v17  ;;  %v1204_v48 = vmax.f32 %v671_v40, 0.0 }
 0x17d   :  { %13390 = vst [vmem:[#allocation30_spill] sm:$0xff] %v9706_v16  ;;  %v9711_v59 = vpack.c.bf16 %v1348_v32, %v1346_v10  ;;  %v1037_v33 = vadd.f32 %v1036_v57, %v9016_v21  ;;  %v1349_v22 = vmax.f32 %v1035_v2, 0.0  ;;  %v1202_v57 = vmax.f32 %v667_v34, 0.0 }
 0x17e   :  { %v1038_v56 = vpop.f32.mrf.mxu1  ;;  %v9725_v58 = vpop.f32.mrf.mxu0  ;;  %v1197_v42 = vmax.f32 %v655_v52, 0.0  ;;  %v1199_v0 = vmax.f32 %v659_v28, 0.0  ;;  %v681_v52 = vadd.f32 %v9630_v29, %v9016_v21 }
 0x17f   :  { %13391 = vst [vmem:[#allocation31_spill] sm:$0xff] %v9711_v59  ;;  %v1039_v19 = vadd.f32 %v1038_v56, %v9009_v17  ;;  %v1350_v37 = vmax.f32 %v1037_v33, 0.0  ;;  %v1424_v40 = vpack.c.bf16 %v1204_v48, %v1202_v57 }
 0x180   :  { %v1040_v31 = vpop.f32.mrf.mxu1  ;;  %v9728_v30 = vpop.f32.mrf.mxu0  ;;  %v1421_v28 = vpack.c.bf16 %v1199_v0, %v1197_v42 }
 0x181   :  { %v1351_v10 = vmax.f32 %v1039_v19, 0.0  ;;  %v1041_v32 = vadd.f32 %v1040_v31, %v9016_v21 }
 0x182   :  { %v1044_v56 = vpop.f32.mrf.mxu1  ;;  %1904 = vmatmul.mubr.bf16.gmra.mxu1 %v1419_v46  ;;  %v9732_v59 = vpop.f32.mrf.mxu0  ;;  %v677_v46 = vadd.f32 %v9623_v13, %v9016_v21 }
 0x183   :  { %v9730_v35 = vpack.c.bf16 %v1351_v10, %v1349_v22  ;;  %v1352_v41 = vmax.f32 %v1041_v32, 0.0  ;;  %1913 = vmatprep.mubr.bf16.mxu1 %v1422_v51  ;;  %v1045_v2 = vadd.f32 %v1044_v56, %v9009_v17  ;;  %v665_v22 = vadd.f32 %v9591_v26, %v9009_v17 }
 0x184   :  { %v1046_v16 = vpop.f32.mrf.mxu1  ;;  %v9739_v31 = vpop.f32.mrf.mxu0  ;;  %v669_v10 = vadd.f32 %v9608_v25, %v9009_v17  ;;  %v1208_v26 = vmax.f32 %v681_v52, 0.0 }
 0x185   :  { %13392 = vst [vmem:[#allocation32_spill] sm:$0xff] %v9730_v35  ;;  %v9735_v19 = vpack.c.bf16 %v1352_v41, %v1350_v37  ;;  %v1047_v33 = vadd.f32 %v1046_v16, %v9016_v21  ;;  %v1353_v13 = vmax.f32 %v1045_v2, 0.0  ;;  %v1206_v41 = vmax.f32 %v677_v46, 0.0  ;;  %v7835_v46 = vld [vmem:[%s13290_s7 + $0xf0] ss:$8 sps:$4 sm:$0xff]  }
 0x186   :  { %v1048_v34 = vpop.f32.mrf.mxu1  ;;  %v9749_v56 = vpop.f32.mrf.mxu0  ;;  %v1201_v0 = vmax.f32 %v665_v22, 0.0  ;;  %v1203_v25 = vmax.f32 %v669_v10, 0.0 }
 0x187   :  { %13393 = vst [vmem:[#allocation33_spill] sm:$0xff] %v9735_v19  ;;  %v1049_v51 = vadd.f32 %v1048_v34, %v9009_v17  ;;  %v1354_v29 = vmax.f32 %v1047_v33, 0.0  ;;  %v7837_v33 = vld [vmem:[%s13290_s7 + $0xf4] ss:$8 sps:$4 sm:$0xff]  }
 0x188   :  { %v1050_v32 = vpop.f32.mrf.mxu1  ;;  %v9752_v57 = vpop.f32.mrf.mxu0  ;;  %4259 = vmatprep.subr.bf16.mxu1 %v7837_v33 }
 0x189   :  { %v1355_v37 = vmax.f32 %v1049_v51, 0.0  ;;  %v1051_v16 = vadd.f32 %v1050_v32, %v9016_v21  ;;  %v1426_v32 = vpack.c.bf16 %v1208_v26, %v1206_v41  ;;  %4260 = vmatpush2.bf16.msra.mxu1 %v7835_v46 }
 0x18a   :  { %v1054_v34 = vpop.f32.mrf.mxu1  ;;  %1914 = vmatmul.mubr.bf16.gmra.mxu1 %v1421_v28  ;;  %v9756_v19 = vpop.f32.mrf.mxu0 }
 0x18b   :  { %v9754_v48 = vpack.c.bf16 %v1355_v37, %v1353_v13  ;;  %v1356_v42 = vmax.f32 %v1051_v16, 0.0  ;;  %1923 = vmatprep.mubr.bf16.mxu1 %v1424_v40  ;;  %v1055_v2 = vadd.f32 %v1054_v34, %v9009_v17  ;;  %v687_v40 = vadd.f32 %v9647_v44, %v9016_v21 }
 0x18c   :  { %v1056_v35 = vpop.f32.mrf.mxu1  ;;  %v9769_v52 = vpop.f32.mrf.mxu0  ;;  %v691_v13 = vadd.f32 %v9654_v63, %v9016_v21  ;;  %v1423_v37 = vpack.c.bf16 %v1203_v25, %v1201_v0  ;;  %v675_v16 = vadd.f32 %v9619_v24, %v9009_v17  ;;  %v679_v34 = vadd.f32 %v9626_v23, %v9009_v17 }
 0x18d   :  { %13394 = vst [vmem:[#allocation34_spill] sm:$0xff] %v9754_v48  ;;  %v9765_v51 = vpack.c.bf16 %v1356_v42, %v1354_v29  ;;  %v1057_v22 = vadd.f32 %v1056_v35, %v9016_v21  ;;  %v1357_v42 = vmax.f32 %v1055_v2, 0.0  ;;  %v1210_v41 = vmax.f32 %v687_v40, 0.0 }
 0x18e   :  { %v1058_v28 = vpop.f32.mrf.mxu1  ;;  %v9779_v44 = vpop.f32.mrf.mxu0  ;;  %v1212_v33 = vmax.f32 %v691_v13, 0.0  ;;  %v1205_v23 = vmax.f32 %v675_v16, 0.0  ;;  %v1207_v48 = vmax.f32 %v679_v34, 0.0  ;;  %v701_v16 = vadd.f32 %v9684_v8, %v9016_v21 }
 0x18f   :  { %13395 = vst [vmem:[#allocation35_spill] sm:$0xff] %v9765_v51  ;;  %v1059_v10 = vadd.f32 %v1058_v28, %v9009_v17  ;;  %v1358_v0 = vmax.f32 %v1057_v22, 0.0 }
 0x190   :  { %v1060_v29 = vpop.f32.mrf.mxu1  ;;  %v9782_v63 = vpop.f32.mrf.mxu0  ;;  %v1428_v13 = vpack.c.bf16 %v1212_v33, %v1210_v41  ;;  %v1425_v34 = vpack.c.bf16 %v1207_v48, %v1205_v23 }
 0x191   :  { %v1359_v35 = vmax.f32 %v1059_v10, 0.0  ;;  %v1061_v28 = vadd.f32 %v1060_v29, %v9016_v21  ;;  %v697_v10 = vadd.f32 %v9677_v4, %v9016_v21  ;;  %v685_v29 = vadd.f32 %v9637_v9, %v9009_v17 }
 0x192   :  { %v1064_v26 = vpop.f32.mrf.mxu1  ;;  %1924 = vmatmul.mubr.bf16.gmra.mxu1 %v1423_v37  ;;  %v9786_v27 = vpop.f32.mrf.mxu0  ;;  %v1216_v9 = vmax.f32 %v701_v16, 0.0 }
 0x193   :  { %v9784_v25 = vpack.c.bf16 %v1359_v35, %v1357_v42  ;;  %v1360_v24 = vmax.f32 %v1061_v28, 0.0  ;;  %1933 = vmatprep.mubr.bf16.mxu1 %v1426_v32  ;;  %v1065_v2 = vadd.f32 %v1064_v26, %v9009_v17  ;;  %v689_v42 = vadd.f32 %v9650_v54, %v9009_v17 }
 0x194   :  { %v1066_v51 = vpop.f32.mrf.mxu1  ;;  %v9793_v37 = vpop.f32.mrf.mxu0  ;;  %v1209_v23 = vmax.f32 %v685_v29, 0.0  ;;  %v711_v29 = vadd.f32 %v9708_v18, %v9016_v21 }
 0x195   :  { %13396 = vst [vmem:[#allocation36_spill] sm:$0xff] %v9784_v25  ;;  %v9789_v46 = vpack.c.bf16 %v1360_v24, %v1358_v0  ;;  %v1067_v22 = vadd.f32 %v1066_v51, %v9016_v21  ;;  %v1361_v4 = vmax.f32 %v1065_v2, 0.0  ;;  %v1214_v0 = vmax.f32 %v697_v10, 0.0 }
 0x196   :  { %v1068_v40 = vpop.f32.mrf.mxu1  ;;  %v9803_v28 = vpop.f32.mrf.mxu0  ;;  %v1211_v54 = vmax.f32 %v689_v42, 0.0 }
 0x197   :  { %v1069_v32 = vadd.f32 %v1068_v40, %v9009_v17  ;;  %v1362_v8 = vmax.f32 %v1067_v22, 0.0  ;;  %v1430_v16 = vpack.c.bf16 %v1216_v9, %v1214_v0 }
 0x198   :  { %v1070_v35 = vpop.f32.mrf.mxu1  ;;  %v9806_v41 = vpop.f32.mrf.mxu0  ;;  %v1427_v42 = vpack.c.bf16 %v1211_v54, %v1209_v23 }
 0x199   :  { %v1363_v26 = vmax.f32 %v1069_v32, 0.0  ;;  %v1071_v51 = vadd.f32 %v1070_v35, %v9016_v21 }
 0x19a   :  { %v1074_v24 = vpop.f32.mrf.mxu1  ;;  %1934 = vmatmul.mubr.bf16.gmra.mxu1 %v1425_v34  ;;  %v9810_v25 = vpop.f32.mrf.mxu0  ;;  %v707_v34 = vadd.f32 %v9701_v5, %v9016_v21 }
 0x19b   :  { %v9808_v48 = vpack.c.bf16 %v1363_v26, %v1361_v4  ;;  %v1364_v33 = vmax.f32 %v1071_v51, 0.0  ;;  %1943 = vmatprep.mubr.bf16.mxu1 %v1428_v13  ;;  %v1075_v2 = vadd.f32 %v1074_v24, %v9009_v17  ;;  %v695_v4 = vadd.f32 %v9667_v3, %v9009_v17 }
 0x19c   :  { %v1076_v40 = vpop.f32.mrf.mxu1  ;;  %v9817_v35 = vpop.f32.mrf.mxu0  ;;  %v699_v26 = vadd.f32 %v9680_v53, %v9009_v17  ;;  %v1220_v3 = vmax.f32 %v711_v29, 0.0 }
 0x19d   :  { %13397 = vst [vmem:[#allocation37_spill] sm:$0xff] %v9808_v48  ;;  %v9813_v32 = vpack.c.bf16 %v1364_v33, %v1362_v8  ;;  %v1077_v22 = vadd.f32 %v1076_v40, %v9016_v21  ;;  %v1365_v5 = vmax.f32 %v1075_v2, 0.0  ;;  %v1218_v40 = vmax.f32 %v707_v34, 0.0 }
 0x19e   :  { %v1078_v10 = vpop.f32.mrf.mxu1  ;;  %v9827_v24 = vpop.f32.mrf.mxu0  ;;  %v1213_v54 = vmax.f32 %v695_v4, 0.0  ;;  %v1215_v53 = vmax.f32 %v699_v26, 0.0  ;;  %v721_v4 = vadd.f32 %v9732_v59, %v9016_v21 }
 0x19f   :  { %13398 = vst [vmem:[#allocation38_spill] sm:$0xff] %v9813_v32  ;;  %v1079_v13 = vadd.f32 %v1078_v10, %v9009_v17  ;;  %v1366_v18 = vmax.f32 %v1077_v22, 0.0  ;;  %v1432_v29 = vpack.c.bf16 %v1220_v3, %v1218_v40 }
 0x1a0   :  { %v1080_v51 = vpop.f32.mrf.mxu1  ;;  %v9830_v0 = vpop.f32.mrf.mxu0  ;;  %v1429_v26 = vpack.c.bf16 %v1215_v53, %v1213_v54 }
 0x1a1   :  { %v1367_v8 = vmax.f32 %v1079_v13, 0.0  ;;  %v1081_v33 = vadd.f32 %v1080_v51, %v9016_v21 }
 0x1a2   :  { %v1084_v10 = vpop.f32.mrf.mxu1  ;;  %1944 = vmatmul.mubr.bf16.gmra.mxu1 %v1427_v42  ;;  %v9834_v32 = vpop.f32.mrf.mxu0  ;;  %v717_v42 = vadd.f32 %v9725_v58, %v9016_v21 }
 0x1a3   :  { %v9832_v9 = vpack.c.bf16 %v1367_v8, %v1365_v5  ;;  %v1368_v23 = vmax.f32 %v1081_v33, 0.0  ;;  %1953 = vmatprep.mubr.bf16.mxu1 %v1430_v16  ;;  %v1085_v2 = vadd.f32 %v1084_v10, %v9009_v17  ;;  %v705_v5 = vadd.f32 %v9691_v62, %v9009_v17 }
 0x1a4   :  { %v1086_v48 = vpop.f32.mrf.mxu1  ;;  %v9841_v51 = vpop.f32.mrf.mxu0  ;;  %v709_v8 = vadd.f32 %v9704_v12, %v9009_v17  ;;  %v1224_v62 = vmax.f32 %v721_v4, 0.0 }
 0x1a5   :  { %13399 = vst [vmem:[#allocation39_spill] sm:$0xff] %v9832_v9  ;;  %v9837_v13 = vpack.c.bf16 %v1368_v23, %v1366_v18  ;;  %v1087_v22 = vadd.f32 %v1086_v48, %v9016_v21  ;;  %v1369_v58 = vmax.f32 %v1085_v2, 0.0  ;;  %v1222_v23 = vmax.f32 %v717_v42, 0.0  ;;  %v7839_v42 = vld [vmem:[%s13290_s7 + $0xe0] ss:$8 sps:$4 sm:$0xff]  }
 0x1a6   :  { %v1088_v34 = vpop.f32.mrf.mxu1  ;;  %v9851_v10 = vpop.f32.mrf.mxu0  ;;  %v1217_v53 = vmax.f32 %v705_v5, 0.0  ;;  %v1219_v12 = vmax.f32 %v709_v8, 0.0 }
 0x1a7   :  { %13400 = vst [vmem:[#allocation40_spill] sm:$0xff] %v9837_v13  ;;  %v1089_v16 = vadd.f32 %v1088_v34, %v9009_v17  ;;  %v1370_v59 = vmax.f32 %v1087_v22, 0.0  ;;  %v7841_v22 = vld [vmem:[%s13290_s7 + $0xe4] ss:$8 sps:$4 sm:$0xff]   ;;  %v1434_v8 = vpack.c.bf16 %v1224_v62, %v1222_v23 }
 0x1a8   :  { %v1090_v33 = vpop.f32.mrf.mxu1  ;;  %v9854_v40 = vpop.f32.mrf.mxu0  ;;  %4261 = vmatprep.subr.bf16.mxu1 %v7841_v22 }
 0x1a9   :  { %v1371_v18 = vmax.f32 %v1089_v16, 0.0  ;;  %v1091_v48 = vadd.f32 %v1090_v33, %v9016_v21  ;;  %v731_v33 = vadd.f32 %v9756_v19, %v9016_v21  ;;  %4262 = vmatpush2.bf16.msra.mxu1 %v7839_v42 }
 0x1aa   :  { %v1094_v34 = vpop.f32.mrf.mxu1  ;;  %1954 = vmatmul.mubr.bf16.gmra.mxu1 %v1429_v26  ;;  %v9858_v13 = vpop.f32.mrf.mxu0 }
 0x1ab   :  { %v9856_v3 = vpack.c.bf16 %v1371_v18, %v1369_v58  ;;  %v1372_v54 = vmax.f32 %v1091_v48, 0.0  ;;  %1963 = vmatprep.mubr.bf16.mxu1 %v1432_v29  ;;  %v1095_v2 = vadd.f32 %v1094_v34, %v9009_v17  ;;  %v727_v29 = vadd.f32 %v9749_v56, %v9016_v21 }
 0x1ac   :  { %v1096_v9 = vpop.f32.mrf.mxu1  ;;  %v1431_v58 = vpack.c.bf16 %v1219_v12, %v1217_v53  ;;  %v715_v18 = vadd.f32 %v9715_v49, %v9009_v17  ;;  %v719_v48 = vadd.f32 %v9728_v30, %v9009_v17  ;;  %v1228_v49 = vmax.f32 %v731_v33, 0.0 }
 0x1ad   :  { %13401 = vst [vmem:[#allocation41_spill] sm:$0xff] %v9856_v3  ;;  %v9867_v16 = vpack.c.bf16 %v1372_v54, %v1370_v59  ;;  %v1097_v4 = vadd.f32 %v1096_v9, %v9016_v21  ;;  %v9879_v59 = vpop.f32.mrf.mxu0  ;;  %v1373_v56 = vmax.f32 %v1095_v2, 0.0  ;;  %v1226_v23 = vmax.f32 %v727_v29, 0.0 }
 0x1ae   :  { %v1098_v26 = vpop.f32.mrf.mxu1  ;;  %v1221_v12 = vmax.f32 %v715_v18, 0.0  ;;  %v737_v29 = vadd.f32 %v9779_v44, %v9016_v21  ;;  %v725_v18 = vadd.f32 %v9739_v31, %v9009_v17 }
 0x1af   :  { %v1099_v5 = vadd.f32 %v1098_v26, %v9009_v17  ;;  %v1374_v19 = vmax.f32 %v1097_v4, 0.0  ;;  %v1223_v26 = vmax.f32 %v719_v48, 0.0  ;;  %v9884_v3 = vpop.f32.mrf.mxu0  ;;  %v729_v48 = vadd.f32 %v9752_v57, %v9009_v17 }
 0x1b0   :  { %v1100_v34 = vpop.f32.mrf.mxu1  ;;  %v1225_v31 = vmax.f32 %v725_v18, 0.0  ;;  %v735_v18 = vadd.f32 %v9769_v52, %v9009_v17 }
 0x1b1   :  { %v1375_v9 = vmax.f32 %v1099_v5, 0.0  ;;  %v1101_v54 = vadd.f32 %v1100_v34, %v9016_v21  ;;  %v1436_v34 = vpack.c.bf16 %v1228_v49, %v1226_v23  ;;  %v1433_v33 = vpack.c.bf16 %v1223_v26, %v1221_v12 }
 0x1b2   :  { %v1104_v62 = vpop.f32.mrf.mxu1  ;;  %1964 = vmatmul.mubr.bf16.gmra.mxu1 %v1431_v58  ;;  %v1227_v26 = vmax.f32 %v729_v48, 0.0  ;;  %v739_v48 = vadd.f32 %v9782_v63, %v9009_v17  ;;  %v1229_v52 = vmax.f32 %v735_v18, 0.0  ;;  %v745_v18 = vadd.f32 %v9793_v37, %v9009_v17 }
 0x1b3   :  { %v9882_v22 = vpack.c.bf16 %v1375_v9, %v1373_v56  ;;  %v1376_v53 = vmax.f32 %v1101_v54, 0.0  ;;  %1973 = vmatprep.mubr.bf16.mxu1 %v1434_v8  ;;  %v1105_v42 = vadd.f32 %v1104_v62, %v9009_v17  ;;  %v741_v8 = vadd.f32 %v9786_v27, %v9016_v21  ;;  %v9899_v9 = vpop.f32.mrf.mxu0 }
 0x1b4   :  { %v1106_v30 = vpop.f32.mrf.mxu1 }
 0x1b5   :  { %v9887_v2 = vpack.c.bf16 %v1376_v53, %v1374_v19  ;;  %v1107_v4 = vadd.f32 %v1106_v30, %v9016_v21  ;;  %v1377_v54 = vmax.f32 %v1105_v42, 0.0  ;;  %v1230_v19 = vmax.f32 %v737_v29, 0.0  ;;  %v9904_v57 = vpop.f32.mrf.mxu0 }
 0x1b6   :  { %v1108_v5 = vpop.f32.mrf.mxu1  ;;  %v1232_v12 = vmax.f32 %v741_v8, 0.0  ;;  %v747_v29 = vadd.f32 %v9803_v28, %v9016_v21  ;;  %v1435_v8 = vpack.c.bf16 %v1227_v26, %v1225_v31  ;;  %v1231_v26 = vmax.f32 %v739_v48, 0.0 }
 0x1b7   :  { %v1109_v58 = vadd.f32 %v1108_v5, %v9009_v17  ;;  %v1378_v23 = vmax.f32 %v1107_v4, 0.0  ;;  %v749_v48 = vadd.f32 %v9806_v41, %v9009_v17 }
 0x1b8   :  { %v1110_v56 = vpop.f32.mrf.mxu1 }
 0x1b9   :  { %v1379_v44 = vmax.f32 %v1109_v58, 0.0  ;;  %v1111_v62 = vadd.f32 %v1110_v56, %v9016_v21  ;;  %v1438_v56 = vpack.c.bf16 %v1232_v12, %v1230_v19 }
 0x1ba   :  { %v1114_v53 = vpop.f32.mrf.mxu1  ;;  %1974 = vmatmul.mubr.bf16.gmra.mxu1 %v1433_v33 }
 0x1bb   :  { %v9902_v49 = vpack.c.bf16 %v1379_v44, %v1377_v54  ;;  %v1380_v27 = vmax.f32 %v1111_v62, 0.0  ;;  %1983 = vmatprep.mubr.bf16.mxu1 %v1436_v34  ;;  %v1115_v5 = vadd.f32 %v1114_v53, %v9009_v17  ;;  %v751_v34 = vadd.f32 %v9810_v25, %v9016_v21  ;;  %v9919_v44 = vpop.f32.mrf.mxu0 }
 0x1bc   :  { %v1116_v30 = vpop.f32.mrf.mxu1 }
 0x1bd   :  { %v9907_v42 = vpack.c.bf16 %v1380_v27, %v1378_v23  ;;  %v1117_v4 = vadd.f32 %v1116_v30, %v9016_v21  ;;  %v1381_v62 = vmax.f32 %v1115_v5, 0.0  ;;  %v1234_v23 = vmax.f32 %v747_v29, 0.0  ;;  %v9924_v63 = vpop.f32.mrf.mxu0 }
 0x1be   :  { %v1118_v58 = vpop.f32.mrf.mxu1  ;;  %v1236_v31 = vmax.f32 %v751_v34, 0.0  ;;  %v757_v29 = vadd.f32 %v9827_v24, %v9016_v21  ;;  %v1437_v34 = vpack.c.bf16 %v1231_v26, %v1229_v52  ;;  %v1233_v26 = vmax.f32 %v745_v18, 0.0 }
 0x1bf   :  { %v1119_v33 = vadd.f32 %v1118_v58, %v9009_v17  ;;  %v1382_v19 = vmax.f32 %v1117_v4, 0.0 }
 0x1c0   :  { %v1120_v54 = vpop.f32.mrf.mxu1 }
 0x1c1   :  { %v1383_v28 = vmax.f32 %v1119_v33, 0.0  ;;  %v1121_v53 = vadd.f32 %v1120_v54, %v9016_v21  ;;  %v1440_v54 = vpack.c.bf16 %v1236_v31, %v1234_v23  ;;  %v1549_v23 = vld [vmem:[%s13293_s4] sm:$0x3] }
 0x1c2   :  { %v1124_v27 = vpop.f32.mrf.mxu1  ;;  %1984 = vmatmul.mubr.bf16.gmra.mxu1 %v1435_v8 }
 0x1c3   :  { %v9922_v12 = vpack.c.bf16 %v1383_v28, %v1381_v62  ;;  %v1384_v25 = vmax.f32 %v1121_v53, 0.0  ;;  %1993 = vmatprep.mubr.bf16.mxu1 %v1438_v56  ;;  %v1125_v58 = vadd.f32 %v1124_v27, %v9009_v17  ;;  %v761_v56 = vadd.f32 %v9834_v32, %v9016_v21  ;;  %v9939_v28 = vpop.f32.mrf.mxu0 }
 0x1c4   :  { %v1126_v30 = vpop.f32.mrf.mxu1 }
 0x1c5   :  { %v9927_v5 = vpack.c.bf16 %v1384_v25, %v1382_v19  ;;  %v1127_v4 = vadd.f32 %v1126_v30, %v9016_v21  ;;  %v1385_v53 = vmax.f32 %v1125_v58, 0.0  ;;  %v1238_v19 = vmax.f32 %v757_v29, 0.0  ;;  %v7843_v29 = vld [vmem:[%s13290_s7 + $0xd0] ss:$8 sps:$4 sm:$0xff]  }
 0x1c6   :  { %v1128_v33 = vpop.f32.mrf.mxu1  ;;  %v9946_v25 = vrot.slane %v1549_v23, %v8999_v14  ;;  %v1240_v52 = vmax.f32 %v761_v56, 0.0  ;;  %v1235_v30 = vmax.f32 %v749_v48, 0.0  ;;  %v9951_v58 = vrot.slane %v1549_v23, %v8993_v11 }
 0x1c7   :  { %v1129_v8 = vadd.f32 %v1128_v33, %v9009_v17  ;;  %v1386_v37 = vmax.f32 %v1127_v4, 0.0  ;;  %v7845_v4 = vld [vmem:[%s13290_s7 + $0xd4] ss:$8 sps:$4 sm:$0xff]   ;;  %v767_v56 = vadd.f32 %v9851_v10, %v9016_v21 }
 0x1c8   :  { %v1130_v62 = vpop.f32.mrf.mxu1  ;;  %4263 = vmatprep.subr.bf16.mxu1 %v7845_v4 }
 0x1c9   :  { %v1387_v24 = vmax.f32 %v1129_v8, 0.0  ;;  %v1131_v27 = vadd.f32 %v1130_v62, %v9016_v21  ;;  %v9953_v8 = vpop.f32.mrf.mxu0  ;;  %v1442_v62 = vpack.c.bf16 %v1240_v52, %v1238_v19  ;;  %4264 = vmatpush2.bf16.msra.mxu1 %v7843_v29  ;;  %v7830_v29 = vld [vmem:[%s13292_s9 + $0x38] sm:$0xff]  }
 0x1ca   :  { %v1755_v32 = vpop.f32.mrf.mxu1  ;;  %1994 = vmatmul.mubr.bf16.gmra.mxu1 %v1437_v34 }
 0x1cb   :  { %v9948_v31 = vpack.c.bf16 %v1387_v24, %v1385_v53  ;;  %v1388_v41 = vmax.f32 %v1131_v27, 0.0  ;;  %2003 = vmatprep.mubr.bf16.mxu1 %v1440_v54  ;;  %v771_v53 = vadd.f32 %v9858_v13, %v9016_v21  ;;  %v1439_v24 = vpack.c.bf16 %v1235_v30, %v1233_v26  ;;  %v9974_v10 = vpop.f32.mrf.mxu0 }
 0x1cc   :  { %v1757_v33 = vpop.f32.mrf.mxu1  ;;  %v755_v27 = vadd.f32 %v9817_v35, %v9009_v17  ;;  %v1756_v23 = vadd.f32 %v1755_v32, %v9951_v58  ;;  %v1242_v26 = vmax.f32 %v767_v56, 0.0 }
 0x1cd   :  { %13402 = vst [vmem:[#allocation42_spill] sm:$0xff] %v9948_v31  ;;  %v9961_v34 = vpack.c.bf16 %v1388_v41, %v1386_v37  ;;  %v1758_v18 = vadd.f32 %v1757_v33, %v9946_v25  ;;  %v759_v37 = vadd.f32 %v9830_v0, %v9009_v17  ;;  %v1244_v30 = vmax.f32 %v771_v53, 0.0 }
 0x1ce   :  { %v1759_v54 = vpop.f32.mrf.mxu1  ;;  %v1237_v35 = vmax.f32 %v755_v27, 0.0 }
 0x1cf   :  { %13403 = vst [vmem:[#allocation43_spill] sm:$0xff] %v9961_v34  ;;  %v1760_v48 = vadd.f32 %v1759_v54, %v9951_v58  ;;  %v2395_v13 = vmax.f32 %v1758_v18, 0.0  ;;  %v2394_v54 = vmax.f32 %v1756_v23, 0.0  ;;  %v1239_v32 = vmax.f32 %v759_v37, 0.0  ;;  %v9977_v34 = vpop.f32.mrf.mxu0 }
 0x1d0   :  { %v1761_v41 = vpop.f32.mrf.mxu1  ;;  %v777_v18 = vadd.f32 %v9884_v3, %v9016_v21  ;;  %v1444_v53 = vpack.c.bf16 %v1244_v30, %v1242_v26  ;;  %v765_v23 = vadd.f32 %v9841_v51, %v9009_v17 }
 0x1d1   :  { %v1762_v33 = vadd.f32 %v1761_v41, %v9946_v25  ;;  %v2396_v19 = vmax.f32 %v1760_v48, 0.0  ;;  %v1441_v27 = vpack.c.bf16 %v1239_v32, %v1237_v35  ;;  %v9993_v3 = vpop.f32.mrf.mxu0 }
 0x1d2   :  { %v1765_v52 = vpop.f32.mrf.mxu1  ;;  %2004 = vmatmul.mubr.bf16.gmra.mxu1 %v1439_v24  ;;  %v781_v24 = vadd.f32 %v9904_v57, %v9016_v21  ;;  %v7834_v57 = vld [vmem:[%s13292_s9 + $0x30] sm:$0xff]   ;;  %v1246_v26 = vmax.f32 %v777_v18, 0.0  ;;  %v1241_v30 = vmax.f32 %v765_v23, 0.0 }
 0x1d3   :  { %v2397_v4 = vmax.f32 %v1762_v33, 0.0  ;;  %2013 = vmatprep.mubr.bf16.mxu1 %v1442_v62  ;;  %v2650_v41 = vpack.c.bf16 %v2396_v19, %v2394_v54  ;;  %v1766_v37 = vadd.f32 %v1765_v52, %v9951_v58  ;;  %v769_v33 = vadd.f32 %v9854_v40, %v9009_v17 }
 0x1d4   :  { %v1767_v31 = vpop.f32.mrf.mxu1  ;;  %v1248_v40 = vmax.f32 %v781_v24, 0.0 }
 0x1d5   :  { %v2651_v0 = vpack.c.bf16 %v2397_v4, %v2395_v13  ;;  %v1768_v56 = vadd.f32 %v1767_v31, %v9946_v25  ;;  %v2398_v35 = vmax.f32 %v1766_v37, 0.0  ;;  %v1243_v54 = vmax.f32 %v769_v33, 0.0 }
 0x1d6   :  { %v1769_v48 = vpop.f32.mrf.mxu1  ;;  %v1446_v24 = vpack.c.bf16 %v1248_v40, %v1246_v26  ;;  %v775_v37 = vadd.f32 %v9879_v59, %v9009_v17 }
 0x1d7   :  { %v1770_v62 = vadd.f32 %v1769_v48, %v9951_v58  ;;  %3014 = vmatprep.mubr.bf16.mxu0 %v2651_v0  ;;  %v2399_v51 = vmax.f32 %v1768_v56, 0.0  ;;  %v800_v0 = vpop.f32.mrf.mxu0  ;;  %v787_v56 = vadd.f32 %v9924_v63, %v9016_v21  ;;  %v1443_v23 = vpack.c.bf16 %v1243_v54, %v1241_v30 }
 0x1d8   :  { %v1771_v19 = vpop.f32.mrf.mxu1  ;;  %3015 = vmatmul.mubr.bf16.vlgmr.msra.gmra.mxu0 %v2650_v41  ;;  %v7838_v41 = vld [vmem:[%s13292_s9 + $0x28] sm:$0xff]   ;;  %v779_v63 = vadd.f32 %v9899_v9, %v9009_v17  ;;  %v1245_v26 = vmax.f32 %v775_v37, 0.0 }
 0x1d9   :  { %v1772_v31 = vadd.f32 %v1771_v19, %v9946_v25  ;;  %5436 = vmatpush1.bf16.msra.mxu0 %v7830_v29  ;;  %v2400_v13 = vmax.f32 %v1770_v62, 0.0 }
 0x1da   :  { %v1775_v4 = vpop.f32.mrf.mxu1  ;;  %2014 = vmatmul.mubr.bf16.gmra.mxu1 %v1441_v27  ;;  %5437 = vmatprep.subr.bf16.mxu0 %v13379_v1  ;;  %v791_v27 = vadd.f32 %v9953_v8, %v9016_v21  ;;  %v7842_v8 = vld [vmem:[%s13292_s9 + $0x20] sm:$0xff]   ;;  %v1247_v30 = vmax.f32 %v779_v63, 0.0 }
 0x1db   :  { %v2401_v52 = vmax.f32 %v1772_v31, 0.0  ;;  %2023 = vmatprep.mubr.bf16.mxu1 %v1444_v53  ;;  %v2652_v48 = vpack.c.bf16 %v2400_v13, %v2398_v35  ;;  %v1776_v33 = vadd.f32 %v1775_v4, %v9951_v58  ;;  %v10015_v31 = vpop.f32.mrf.mxu0 }
 0x1dc   :  { %v1777_v32 = vpop.f32.mrf.mxu1  ;;  %v1252_v9 = vmax.f32 %v791_v27, 0.0  ;;  %v1445_v27 = vpack.c.bf16 %v1247_v30, %v1245_v26  ;;  %v7849_v30 = vld [vmem:[%s13290_s7 + $0xc4] ss:$8 sps:$4 sm:$0xff]  }
 0x1dd   :  { %v2653_v29 = vpack.c.bf16 %v2401_v52, %v2399_v51  ;;  %5438 = vmatpush1.bf16.msra.mxu0 %v7834_v57  ;;  %v1778_v18 = vadd.f32 %v1777_v32, %v9946_v25  ;;  %v1250_v52 = vmax.f32 %v787_v56, 0.0  ;;  %v2402_v40 = vmax.f32 %v1776_v33, 0.0  ;;  %v806_v54 = vpop.f32.mrf.mxu0  ;;  %4265 = vmatprep.subr.bf16.mxu1 %v7849_v30 }
 0x1de   :  { %v1779_v62 = vpop.f32.mrf.mxu1  ;;  %5439 = vmatprep.subr.bf16.mxu0 %v13379_v1  ;;  %v801_v56 = vadd.f32 %v800_v0, %v9016_v21  ;;  %v789_v33 = vadd.f32 %v9939_v28, %v9009_v17 }
 0x1df   :  { %v1780_v53 = vadd.f32 %v1779_v62, %v9951_v58  ;;  %3024 = vmatprep.mubr.bf16.mxu0 %v2653_v29  ;;  %v2403_v59 = vmax.f32 %v1778_v18, 0.0  ;;  %v7846_v29 = vld [vmem:[%s13292_s9 + $0x18] sm:$0xff]   ;;  %v797_v62 = vadd.f32 %v9977_v34, %v9016_v21  ;;  %v808_v0 = vpop.f32.mrf.mxu0 }
 0x1e0   :  { %v1781_v19 = vpop.f32.mrf.mxu1  ;;  %3025 = vmatmul.mubr.bf16.gmra.mxu0 %v2652_v48 }
 0x1e1   :  { %v1782_v57 = vadd.f32 %v1781_v19, %v9946_v25  ;;  %5440 = vmatpush1.bf16.msra.mxu0 %v7838_v41  ;;  %v2404_v13 = vmax.f32 %v1780_v53, 0.0 }
 0x1e2   :  { %v1785_v51 = vpop.f32.mrf.mxu1  ;;  %2024 = vmatmul.mubr.bf16.gmra.mxu1 %v1443_v23  ;;  %5441 = vmatprep.subr.bf16.mxu0 %v13379_v1  ;;  %v785_v23 = vadd.f32 %v9919_v44, %v9009_v17 }
 0x1e3   :  { %v2405_v4 = vmax.f32 %v1782_v57, 0.0  ;;  %2033 = vmatprep.mubr.bf16.mxu1 %v1446_v24  ;;  %v2654_v41 = vpack.c.bf16 %v2404_v13, %v2402_v40  ;;  %v1448_v24 = vpack.c.bf16 %v1252_v9, %v1250_v52  ;;  %v1786_v37 = vadd.f32 %v1785_v51, %v9951_v58  ;;  %v810_v9 = vpop.f32.mrf.mxu0  ;;  %v7847_v40 = vld [vmem:[%s13290_s7 + $0xc0] ss:$8 sps:$4 sm:$0xff]  }
 0x1e4   :  { %v1787_v35 = vpop.f32.mrf.mxu1  ;;  %v1254_v57 = vmax.f32 %v797_v62, 0.0  ;;  %v1256_v13 = vmax.f32 %v801_v56, 0.0  ;;  %v1249_v51 = vmax.f32 %v785_v23, 0.0  ;;  %v1251_v52 = vmax.f32 %v789_v33, 0.0  ;;  %4266 = vmatpush2.bf16.msra.mxu1 %v7847_v40 }
 0x1e5   :  { %v2655_v32 = vpack.c.bf16 %v2405_v4, %v2403_v59  ;;  %5442 = vmatpush1.bf16.msra.mxu0 %v7842_v8  ;;  %v1788_v18 = vadd.f32 %v1787_v35, %v9946_v25  ;;  %v2406_v4 = vmax.f32 %v1786_v37, 0.0  ;;  %v809_v40 = vadd.f32 %v808_v0, %v9009_v17 }
 0x1e6   :  { %v1789_v48 = vpop.f32.mrf.mxu1  ;;  %5443 = vmatprep.subr.bf16.mxu0 %v13379_v1 }
 0x1e7   :  { %v1790_v53 = vadd.f32 %v1789_v48, %v9951_v58  ;;  %3034 = vmatprep.mubr.bf16.mxu0 %v2655_v32  ;;  %v2407_v59 = vmax.f32 %v1788_v18, 0.0  ;;  %v795_v32 = vadd.f32 %v9974_v10, %v9009_v17  ;;  %v1450_v48 = vpack.c.bf16 %v1256_v13, %v1254_v57 }
 0x1e8   :  { %v1791_v34 = vpop.f32.mrf.mxu1  ;;  %3035 = vmatmul.mubr.bf16.gmra.mxu0 %v2654_v41  ;;  %v807_v41 = vadd.f32 %v806_v54, %v9016_v21  ;;  %v811_v18 = vadd.f32 %v810_v9, %v9016_v21  ;;  %v805_v9 = vadd.f32 %v10015_v31, %v9009_v17 }
 0x1e9   :  { %v1792_v63 = vadd.f32 %v1791_v34, %v9946_v25  ;;  %5444 = vmatpush1.bf16.msra.mxu0 %v7846_v29  ;;  %v2408_v19 = vmax.f32 %v1790_v53, 0.0  ;;  %v1447_v53 = vpack.c.bf16 %v1251_v52, %v1249_v51 }
 0x1ea   :  { %v1795_v8 = vpop.f32.mrf.mxu1  ;;  %2034 = vmatmul.mubr.bf16.gmra.mxu1 %v1445_v27  ;;  %5445 = vmatprep.subr.bf16.mxu0 %v13379_v1  ;;  %v799_v27 = vadd.f32 %v9993_v3, %v9009_v17  ;;  %v1260_v21 = vmax.f32 %v811_v18, 0.0  ;;  %v1259_v18 = vmax.f32 %v809_v40, 0.0 }
 0x1eb   :  { %v2409_v44 = vmax.f32 %v1792_v63, 0.0  ;;  %2043 = vmatprep.mubr.bf16.mxu1 %v1448_v24  ;;  %v2656_v35 = vpack.c.bf16 %v2408_v19, %v2406_v4  ;;  %v1796_v24 = vadd.f32 %v1795_v8, %v9951_v58  ;;  %v1258_v63 = vmax.f32 %v807_v41, 0.0 }
 0x1ec   :  { %v1797_v28 = vpop.f32.mrf.mxu1  ;;  %v1253_v19 = vmax.f32 %v795_v32, 0.0  ;;  %v1255_v13 = vmax.f32 %v799_v27, 0.0 }
 0x1ed   :  { %v2657_v26 = vpack.c.bf16 %v2409_v44, %v2407_v59  ;;  %v1798_v62 = vadd.f32 %v1797_v28, %v9946_v25  ;;  %v2410_v57 = vmax.f32 %v1796_v24, 0.0  ;;  %v1452_v52 = vpack.c.bf16 %v1260_v21, %v1258_v63 }
 0x1ee   :  { %v1799_v29 = vpop.f32.mrf.mxu1  ;;  %v1449_v28 = vpack.c.bf16 %v1255_v13, %v1253_v19 }
 0x1ef   :  { %v1800_v56 = vadd.f32 %v1799_v29, %v9951_v58  ;;  %3044 = vmatprep.mubr.bf16.mxu0 %v2657_v26  ;;  %v2411_v33 = vmax.f32 %v1798_v62, 0.0  ;;  %v7850_v62 = vld [vmem:[%s13292_s9 + $0x10] sm:$0xff]  }
 0x1f0   :  { %v1801_v23 = vpop.f32.mrf.mxu1  ;;  %3045 = vmatmul.mubr.bf16.gmra.mxu0 %v2656_v35 }
 0x1f1   :  { %v1802_v10 = vadd.f32 %v1801_v23, %v9946_v25  ;;  %v2412_v54 = vmax.f32 %v1800_v56, 0.0  ;;  %v1257_v56 = vmax.f32 %v805_v9, 0.0  ;;  %5446 = vmatpush1.bf16.msra.mxu0 %v7850_v62 }
 0x1f2   :  { %v1805_v37 = vpop.f32.mrf.mxu1  ;;  %2044 = vmatmul.mubr.bf16.gmra.mxu1 %v1447_v53  ;;  %5447 = vmatprep.subr.bf16.mxu0 %v13379_v1 }
 0x1f3   :  { %v2413_v34 = vmax.f32 %v1802_v10, 0.0  ;;  %2053 = vmatprep.mubr.bf16.mxu1 %v1450_v48  ;;  %v2658_v44 = vpack.c.bf16 %v2412_v54, %v2410_v57  ;;  %v1806_v26 = vadd.f32 %v1805_v37, %v9951_v58  ;;  %v1451_v10 = vpack.c.bf16 %v1259_v18, %v1257_v56 }
 0x1f4   :  { %v1807_v8 = vpop.f32.mrf.mxu1 }
 0x1f5   :  { %v2659_v59 = vpack.c.bf16 %v2413_v34, %v2411_v33  ;;  %v1808_v51 = vadd.f32 %v1807_v8, %v9946_v25  ;;  %v2414_v31 = vmax.f32 %v1806_v26, 0.0 }
 0x1f6   :  { %v1809_v3 = vpop.f32.mrf.mxu1 }
 0x1f7   :  { %v1810_v4 = vadd.f32 %v1809_v3, %v9951_v58  ;;  %3054 = vmatprep.mubr.bf16.mxu0 %v2659_v59  ;;  %v2415_v41 = vmax.f32 %v1808_v51, 0.0 }
 0x1f8   :  { %v1811_v30 = vpop.f32.mrf.mxu1  ;;  %3055 = vmatmul.mubr.bf16.gmra.mxu0 %v2658_v44 }
 0x1f9   :  { %v1812_v35 = vadd.f32 %v1811_v30, %v9946_v25  ;;  %v2416_v32 = vmax.f32 %v1810_v4, 0.0 }
 0x1fa   :  { %v1815_v29 = vpop.f32.mrf.mxu1  ;;  %2054 = vmatmul.mubr.bf16.gmra.mxu1 %v1449_v28 }
 0x1fb   :  { %v2417_v48 = vmax.f32 %v1812_v35, 0.0  ;;  %2063 = vmatprep.mubr.bf16.mxu1 %v1452_v52  ;;  %v2660_v17 = vpack.c.bf16 %v2416_v32, %v2414_v31  ;;  %v1816_v54 = vadd.f32 %v1815_v29, %v9951_v58  ;;  %v7851_v29 = vld [vmem:[%s13290_s7 + $0xb0] ss:$8 sps:$4 sm:$0xff]  }
 0x1fc   :  { %v1817_v53 = vpop.f32.mrf.mxu1 }
 0x1fd   :  { %v2661_v24 = vpack.c.bf16 %v2417_v48, %v2415_v41  ;;  %v1818_v27 = vadd.f32 %v1817_v53, %v9946_v25  ;;  %v2418_v57 = vmax.f32 %v1816_v54, 0.0  ;;  %v7853_v41 = vld [vmem:[%s13290_s7 + $0xb4] ss:$8 sps:$4 sm:$0xff]  }
 0x1fe   :  { %v1819_v0 = vpop.f32.mrf.mxu1  ;;  %4267 = vmatprep.subr.bf16.mxu1 %v7853_v41 }
 0x1ff   :  { %v1820_v23 = vadd.f32 %v1819_v0, %v9951_v58  ;;  %3064 = vmatprep.mubr.bf16.mxu0 %v2661_v24  ;;  %v2419_v21 = vmax.f32 %v1818_v27, 0.0  ;;  %4268 = vmatpush2.bf16.msra.mxu1 %v7851_v29 }
 0x200   :  { %v1821_v37 = vpop.f32.mrf.mxu1  ;;  %3065 = vmatmul.mubr.bf16.gmra.mxu0 %v2660_v17 }
 0x201   :  { %v1822_v33 = vadd.f32 %v1821_v37, %v9946_v25  ;;  %v2420_v34 = vmax.f32 %v1820_v23, 0.0 }
 0x202   :  { %v1825_v63 = vpop.f32.mrf.mxu1  ;;  %2064 = vmatmul.mubr.bf16.gmra.mxu1 %v1451_v10 }
 0x203   :  { %v2421_v19 = vmax.f32 %v1822_v33, 0.0  ;;  %2073 = vmatprep.mubr.bf16.mxu1 %v9059_v50  ;;  %v2662_v59 = vpack.c.bf16 %v2420_v34, %v2418_v57  ;;  %v1826_v4 = vadd.f32 %v1825_v63, %v9951_v58 }
 0x204   :  { %v1827_v13 = vpop.f32.mrf.mxu1 }
 0x205   :  { %v2663_v8 = vpack.c.bf16 %v2421_v19, %v2419_v21  ;;  %v1828_v3 = vadd.f32 %v1827_v13, %v9946_v25  ;;  %v2422_v30 = vmax.f32 %v1826_v4, 0.0 }
 0x206   :  { %v1829_v44 = vpop.f32.mrf.mxu1 }
 0x207   :  { %v1830_v51 = vadd.f32 %v1829_v44, %v9951_v58  ;;  %3074 = vmatprep.mubr.bf16.mxu0 %v2663_v8  ;;  %v2423_v50 = vmax.f32 %v1828_v3, 0.0  ;;  %v7854_v8 = vld [vmem:[%s13292_s9 + $0x8] sm:$0xff]  }
 0x208   :  { %v1831_v52 = vpop.f32.mrf.mxu1  ;;  %3075 = vmatmul.mubr.bf16.gmra.mxu0 %v2662_v59 }
 0x209   :  { %v1832_v28 = vadd.f32 %v1831_v52, %v9946_v25  ;;  %v2424_v9 = vmax.f32 %v1830_v51, 0.0  ;;  %5448 = vmatpush1.bf16.msra.mxu0 %v7854_v8 }
 0x20a   :  { %v1835_v26 = vpop.f32.mrf.mxu1  ;;  %2074 = vmatmul.mubr.bf16.gmra.mxu1 %v9047_v43  ;;  %5449 = vmatprep.subr.bf16.mxu0 %v13379_v1 }
 0x20b   :  { %v2425_v40 = vmax.f32 %v1832_v28, 0.0  ;;  %2083 = vmatprep.mubr.bf16.mxu1 %v9097_v15  ;;  %v2664_v48 = vpack.c.bf16 %v2424_v9, %v2422_v30  ;;  %v1836_v15 = vadd.f32 %v1835_v26, %v9951_v58 }
 0x20c   :  { %v1837_v35 = vpop.f32.mrf.mxu1 }
 0x20d   :  { %v2665_v32 = vpack.c.bf16 %v2425_v40, %v2423_v50  ;;  %v1838_v56 = vadd.f32 %v1837_v35, %v9946_v25  ;;  %v2426_v27 = vmax.f32 %v1836_v15, 0.0 }
 0x20e   :  { %v1839_v62 = vpop.f32.mrf.mxu1 }
 0x20f   :  { %v1840_v43 = vadd.f32 %v1839_v62, %v9951_v58  ;;  %3084 = vmatprep.mubr.bf16.mxu0 %v2665_v32  ;;  %v2427_v17 = vmax.f32 %v1838_v56, 0.0 }
 0x210   :  { %v1841_v31 = vpop.f32.mrf.mxu1  ;;  %3085 = vmatmul.mubr.bf16.gmra.mxu0 %v2664_v48 }
 0x211   :  { %v1842_v18 = vadd.f32 %v1841_v31, %v9946_v25  ;;  %v2428_v53 = vmax.f32 %v1840_v43, 0.0 }
 0x212   :  { %v1845_v24 = vpop.f32.mrf.mxu1  ;;  %2084 = vmatmul.mubr.bf16.gmra.mxu1 %v9085_v6 }
 0x213   :  { %v2429_v0 = vmax.f32 %v1842_v18, 0.0  ;;  %2093 = vmatprep.mubr.bf16.mxu1 %v9129_v45  ;;  %v2666_v54 = vpack.c.bf16 %v2428_v53, %v2426_v27  ;;  %v1846_v63 = vadd.f32 %v1845_v24, %v9951_v58  ;;  %v7855_v27 = vld [vmem:[%s13290_s7 + $0xa0] ss:$8 sps:$4 sm:$0xff]  }
 0x214   :  { %v1847_v23 = vpop.f32.mrf.mxu1 }
 0x215   :  { %v2667_v10 = vpack.c.bf16 %v2429_v0, %v2427_v17  ;;  %v1848_v33 = vadd.f32 %v1847_v23, %v9946_v25  ;;  %v2430_v59 = vmax.f32 %v1846_v63, 0.0  ;;  %v7857_v23 = vld [vmem:[%s13290_s7 + $0xa4] ss:$8 sps:$4 sm:$0xff]  }
 0x216   :  { %v1849_v37 = vpop.f32.mrf.mxu1  ;;  %4269 = vmatprep.subr.bf16.mxu1 %v7857_v23 }
 0x217   :  { %v1850_v34 = vadd.f32 %v1849_v37, %v9951_v58  ;;  %3094 = vmatprep.mubr.bf16.mxu0 %v2667_v10  ;;  %v2431_v45 = vmax.f32 %v1848_v33, 0.0  ;;  %4270 = vmatpush2.bf16.msra.mxu1 %v7855_v27 }
 0x218   :  { %v1851_v21 = vpop.f32.mrf.mxu1  ;;  %3095 = vmatmul.mubr.bf16.gmra.mxu0 %v2666_v54 }
 0x219   :  { %v1852_v6 = vadd.f32 %v1851_v21, %v9946_v25  ;;  %v2432_v19 = vmax.f32 %v1850_v34, 0.0 }
 0x21a   :  { %v1855_v57 = vpop.f32.mrf.mxu1  ;;  %2094 = vmatmul.mubr.bf16.gmra.mxu1 %v9117_v36 }
 0x21b   :  { %v2433_v13 = vmax.f32 %v1852_v6, 0.0  ;;  %2103 = vmatprep.mubr.bf16.mxu1 %v9167_v20  ;;  %v2668_v51 = vpack.c.bf16 %v2432_v19, %v2430_v59  ;;  %v1856_v28 = vadd.f32 %v1855_v57, %v9951_v58 }
 0x21c   :  { %v1857_v44 = vpop.f32.mrf.mxu1 }
 0x21d   :  { %v2669_v3 = vpack.c.bf16 %v2433_v13, %v2431_v45  ;;  %v1858_v52 = vadd.f32 %v1857_v44, %v9946_v25  ;;  %v2434_v35 = vmax.f32 %v1856_v28, 0.0 }
 0x21e   :  { %v1859_v4 = vpop.f32.mrf.mxu1 }
 0x21f   :  { %v1860_v36 = vadd.f32 %v1859_v4, %v9951_v58  ;;  %3104 = vmatprep.mubr.bf16.mxu0 %v2669_v3  ;;  %v2435_v40 = vmax.f32 %v1858_v52, 0.0 }
 0x220   :  { %v1861_v20 = vpop.f32.mrf.mxu1  ;;  %3105 = vmatmul.mubr.bf16.gmra.mxu0 %v2668_v51 }
 0x221   :  { %v1862_v9 = vadd.f32 %v1861_v20, %v9946_v25  ;;  %v2436_v26 = vmax.f32 %v1860_v36, 0.0  ;;  %v13404_v20 = vld [vmem:[#allocation3_spill] sm:$0xff] }
 0x222   :  { %v1865_v50 = vpop.f32.mrf.mxu1  ;;  %2104 = vmatmul.mubr.bf16.gmra.mxu1 %v9155_v7 }
 0x223   :  { %v2437_v30 = vmax.f32 %v1862_v9, 0.0  ;;  %2113 = vmatprep.mubr.bf16.mxu1 %v9199_v60  ;;  %v2670_v41 = vpack.c.bf16 %v2436_v26, %v2434_v35  ;;  %v1866_v43 = vadd.f32 %v1865_v50, %v9951_v58  ;;  %v7858_v50 = vld [vmem:[%s13292_s9] sm:$0xff]  }
 0x224   :  { %v1867_v32 = vpop.f32.mrf.mxu1  ;;  %5450 = vmatpush1.bf16.msra.mxu0 %v7858_v50 }
 0x225   :  { %v2671_v29 = vpack.c.bf16 %v2437_v30, %v2435_v40  ;;  %v1868_v62 = vadd.f32 %v1867_v32, %v9946_v25  ;;  %v2438_v24 = vmax.f32 %v1866_v43, 0.0  ;;  %5451 = vmatprep.subr.bf16.mxu0 %v13379_v1  ;;  %v13405_v43 = vld [vmem:[#allocation2_spill] sm:$0xff] }
 0x226   :  { %v1869_v48 = vpop.f32.mrf.mxu1 }
 0x227   :  { %v1870_v56 = vadd.f32 %v1869_v48, %v9951_v58  ;;  %3114 = vmatprep.mubr.bf16.mxu0 %v2671_v29  ;;  %v2439_v60 = vmax.f32 %v1868_v62, 0.0 }
 0x228   :  { %v1871_v15 = vpop.f32.mrf.mxu1  ;;  %3115 = vmatmul.mubr.bf16.gmra.mxu0 %v2670_v41 }
 0x229   :  { %v1872_v7 = vadd.f32 %v1871_v15, %v9946_v25  ;;  %v2440_v31 = vmax.f32 %v1870_v56, 0.0 }
 0x22a   :  { %v1875_v18 = vpop.f32.mrf.mxu1  ;;  %2114 = vmatmul.mubr.bf16.gmra.mxu1 %v9187_v47 }
 0x22b   :  { %v2441_v53 = vmax.f32 %v1872_v7, 0.0  ;;  %2123 = vmatprep.mubr.bf16.mxu1 %v9241_v55  ;;  %v2672_v10 = vpack.c.bf16 %v2440_v31, %v2438_v24  ;;  %v1876_v55 = vadd.f32 %v1875_v18, %v9951_v58  ;;  %v13406_v31 = vld [vmem:[#allocation5_spill] sm:$0xff] }
 0x22c   :  { %v1877_v17 = vpop.f32.mrf.mxu1 }
 0x22d   :  { %v2673_v0 = vpack.c.bf16 %v2441_v53, %v2439_v60  ;;  %v1878_v37 = vadd.f32 %v1877_v17, %v9946_v25  ;;  %v2442_v57 = vmax.f32 %v1876_v55, 0.0  ;;  %v13407_v55 = vld [vmem:[#allocation4_spill] sm:$0xff] }
 0x22e   :  { %v1879_v54 = vpop.f32.mrf.mxu1 }
 0x22f   :  { %v1880_v47 = vadd.f32 %v1879_v54, %v9951_v58  ;;  %3124 = vmatprep.mubr.bf16.mxu0 %v2673_v0  ;;  %v2443_v6 = vmax.f32 %v1878_v37, 0.0 }
 0x230   :  { %v1881_v33 = vpop.f32.mrf.mxu1  ;;  %3125 = vmatmul.mubr.bf16.gmra.mxu0 %v2672_v10 }
 0x231   :  { %v1882_v34 = vadd.f32 %v1881_v33, %v9946_v25  ;;  %v2444_v63 = vmax.f32 %v1880_v47, 0.0 }
 0x232   :  { %v1885_v21 = vpop.f32.mrf.mxu1  ;;  %2124 = vmatmul.mubr.bf16.gmra.mxu1 %v9229_v38 }
 0x233   :  { %v2445_v19 = vmax.f32 %v1882_v34, 0.0  ;;  %2133 = vmatprep.mubr.bf16.mxu1 %v9274_v61  ;;  %v2674_v8 = vpack.c.bf16 %v2444_v63, %v2442_v57  ;;  %v1886_v51 = vadd.f32 %v1885_v21, %v9951_v58  ;;  %v13408_v63 = vld [vmem:[#allocation7_spill] sm:$0xff]  ;;  %v7859_v57 = vld [vmem:[%s13290_s7 + $0x90] ss:$8 sps:$4 sm:$0xff]  }
 0x234   :  { %v1887_v45 = vpop.f32.mrf.mxu1 }
 0x235   :  { %v2675_v13 = vpack.c.bf16 %v2445_v19, %v2443_v6  ;;  %v1888_v44 = vadd.f32 %v1887_v45, %v9946_v25  ;;  %v2446_v9 = vmax.f32 %v1886_v51, 0.0  ;;  %v7861_v45 = vld [vmem:[%s13290_s7 + $0x94] ss:$8 sps:$4 sm:$0xff]  }
 0x236   :  { %v1889_v59 = vpop.f32.mrf.mxu1  ;;  %4271 = vmatprep.subr.bf16.mxu1 %v7861_v45 }
 0x237   :  { %v1890_v3 = vadd.f32 %v1889_v59, %v9951_v58  ;;  %3134 = vmatprep.mubr.bf16.mxu0 %v2675_v13  ;;  %v2447_v61 = vmax.f32 %v1888_v44, 0.0  ;;  %4272 = vmatpush2.bf16.msra.mxu1 %v7859_v57 }
 0x238   :  { %v1891_v4 = vpop.f32.mrf.mxu1  ;;  %3135 = vmatmul.mubr.bf16.gmra.mxu0 %v2674_v8 }
 0x239   :  { %v1892_v38 = vadd.f32 %v1891_v4, %v9946_v25  ;;  %v2448_v52 = vmax.f32 %v1890_v3, 0.0 }
 0x23a   :  { %v1895_v36 = vpop.f32.mrf.mxu1  ;;  %2134 = vmatmul.mubr.bf16.gmra.mxu1 %v9269_v39 }
 0x23b   :  { %v2449_v28 = vmax.f32 %v1892_v38, 0.0  ;;  %2143 = vmatprep.mubr.bf16.mxu1 %v13404_v20  ;;  %v2676_v30 = vpack.c.bf16 %v2448_v52, %v2446_v9  ;;  %v1896_v39 = vadd.f32 %v1895_v36, %v9951_v58  ;;  %v13409_v36 = vld [vmem:[#allocation6_spill] sm:$0xff]  ;;  %v13410_v20 = vld [vmem:[#allocation9_spill] sm:$0xff] }
 0x23c   :  { %v1897_v26 = vpop.f32.mrf.mxu1 }
 0x23d   :  { %v2677_v40 = vpack.c.bf16 %v2449_v28, %v2447_v61  ;;  %v1898_v32 = vadd.f32 %v1897_v26, %v9946_v25  ;;  %v2450_v18 = vmax.f32 %v1896_v39, 0.0 }
 0x23e   :  { %v1899_v35 = vpop.f32.mrf.mxu1 }
 0x23f   :  { %v1900_v29 = vadd.f32 %v1899_v35, %v9951_v58  ;;  %3144 = vmatprep.mubr.bf16.mxu0 %v2677_v40  ;;  %v2451_v15 = vmax.f32 %v1898_v32, 0.0 }
 0x240   :  { %v1901_v41 = vpop.f32.mrf.mxu1  ;;  %3145 = vmatmul.mubr.bf16.gmra.mxu0 %v2676_v30 }
 0x241   :  { %v1902_v48 = vadd.f32 %v1901_v41, %v9946_v25  ;;  %v2452_v62 = vmax.f32 %v1900_v29, 0.0 }
 0x242   :  { %v1905_v56 = vpop.f32.mrf.mxu1  ;;  %2144 = vmatmul.mubr.bf16.gmra.mxu1 %v13405_v43 }
 0x243   :  { %v2453_v7 = vmax.f32 %v1902_v48, 0.0  ;;  %2153 = vmatprep.mubr.bf16.mxu1 %v13406_v31  ;;  %v2678_v24 = vpack.c.bf16 %v2452_v62, %v2450_v18  ;;  %v1906_v23 = vadd.f32 %v1905_v56, %v9951_v58  ;;  %v13411_v56 = vld [vmem:[#allocation8_spill] sm:$0xff] }
 0x244   :  { %v1907_v60 = vpop.f32.mrf.mxu1 }
 0x245   :  { %v2679_v53 = vpack.c.bf16 %v2453_v7, %v2451_v15  ;;  %v1908_v0 = vadd.f32 %v1907_v60, %v9946_v25  ;;  %v2454_v21 = vmax.f32 %v1906_v23, 0.0  ;;  %v13412_v7 = vld [vmem:[#allocation11_spill] sm:$0xff]  ;;  %v7862_v60 = vld [vmem:[%s13292_s9 + $0x78] sm:$0xff]  }
 0x246   :  { %v1909_v17 = vpop.f32.mrf.mxu1  ;;  %5452 = vmatpush2.bf16.msra.mxu0 %v7862_v60 }
 0x247   :  { %v1910_v27 = vadd.f32 %v1909_v17, %v9951_v58  ;;  %3154 = vmatprep.mubr.bf16.mxu0 %v2679_v53  ;;  %v2455_v33 = vmax.f32 %v1908_v0, 0.0  ;;  %5453 = vmatprep.subr.bf16.mxu0 %v13379_v1 }
 0x248   :  { %v1911_v10 = vpop.f32.mrf.mxu1  ;;  %3155 = vmatmul.mubr.bf16.gmra.mxu0 %v2678_v24 }
 0x249   :  { %v1912_v54 = vadd.f32 %v1911_v10, %v9946_v25  ;;  %v2456_v37 = vmax.f32 %v1910_v27, 0.0 }
 0x24a   :  { %v1915_v47 = vpop.f32.mrf.mxu1  ;;  %2154 = vmatmul.mubr.bf16.gmra.mxu1 %v13407_v55  ;;  %v13413_v55 = vld [vmem:[#allocation10_spill] sm:$0xff] }
 0x24b   :  { %v2457_v34 = vmax.f32 %v1912_v54, 0.0  ;;  %2163 = vmatprep.mubr.bf16.mxu1 %v13408_v63  ;;  %v2680_v13 = vpack.c.bf16 %v2456_v37, %v2454_v21  ;;  %v1916_v3 = vadd.f32 %v1915_v47, %v9951_v58  ;;  %v13414_v63 = vld [vmem:[#allocation13_spill] sm:$0xff] }
 0x24c   :  { %v1917_v6 = vpop.f32.mrf.mxu1 }
 0x24d   :  { %v2681_v19 = vpack.c.bf16 %v2457_v34, %v2455_v33  ;;  %v1918_v59 = vadd.f32 %v1917_v6, %v9946_v25  ;;  %v2458_v9 = vmax.f32 %v1916_v3, 0.0 }
 0x24e   :  { %v1919_v8 = vpop.f32.mrf.mxu1 }
 0x24f   :  { %v1920_v44 = vadd.f32 %v1919_v8, %v9951_v58  ;;  %3164 = vmatprep.mubr.bf16.mxu0 %v2681_v19  ;;  %v2459_v61 = vmax.f32 %v1918_v59, 0.0 }
 0x250   :  { %v1921_v51 = vpop.f32.mrf.mxu1  ;;  %3165 = vmatmul.mubr.bf16.gmra.mxu0 %v2680_v13 }
 0x251   :  { %v1922_v4 = vadd.f32 %v1921_v51, %v9946_v25  ;;  %v2460_v38 = vmax.f32 %v1920_v44, 0.0 }
 0x252   :  { %v1925_v52 = vpop.f32.mrf.mxu1  ;;  %2164 = vmatmul.mubr.bf16.gmra.mxu1 %v13409_v36 }
 0x253   :  { %v2461_v28 = vmax.f32 %v1922_v4, 0.0  ;;  %2173 = vmatprep.mubr.bf16.mxu1 %v13410_v20  ;;  %v2682_v40 = vpack.c.bf16 %v2460_v38, %v2458_v9  ;;  %v1926_v29 = vadd.f32 %v1925_v52, %v9951_v58  ;;  %v13415_v38 = vld [vmem:[#allocation12_spill] sm:$0xff] }
 0x254   :  { %v1927_v26 = vpop.f32.mrf.mxu1 }
 0x255   :  { %v2683_v50 = vpack.c.bf16 %v2461_v28, %v2459_v61  ;;  %v1928_v35 = vadd.f32 %v1927_v26, %v9946_v25  ;;  %v2462_v31 = vmax.f32 %v1926_v29, 0.0  ;;  %v13416_v61 = vld [vmem:[#allocation15_spill] sm:$0xff] }
 0x256   :  { %v1929_v30 = vpop.f32.mrf.mxu1  ;;  %v7863_v26 = vld [vmem:[%s13290_s7 + $0x80] ss:$8 sps:$4 sm:$0xff]  }
 0x257   :  { %v1930_v32 = vadd.f32 %v1929_v30, %v9951_v58  ;;  %3174 = vmatprep.mubr.bf16.mxu0 %v2683_v50  ;;  %v2463_v43 = vmax.f32 %v1928_v35, 0.0  ;;  %v7865_v50 = vld [vmem:[%s13290_s7 + $0x84] ss:$8 sps:$4 sm:$0xff]  }
 0x258   :  { %v1931_v39 = vpop.f32.mrf.mxu1  ;;  %3175 = vmatmul.mubr.bf16.gmra.mxu0 %v2682_v40  ;;  %4273 = vmatprep.subr.bf16.mxu1 %v7865_v50 }
 0x259   :  { %v1932_v41 = vadd.f32 %v1931_v39, %v9946_v25  ;;  %v2464_v48 = vmax.f32 %v1930_v32, 0.0  ;;  %4274 = vmatpush2.bf16.msra.mxu1 %v7863_v26 }
 0x25a   :  { %v1935_v62 = vpop.f32.mrf.mxu1  ;;  %2174 = vmatmul.mubr.bf16.gmra.mxu1 %v13411_v56  ;;  %v13417_v56 = vld [vmem:[#allocation14_spill] sm:$0xff] }
 0x25b   :  { %v2465_v15 = vmax.f32 %v1932_v41, 0.0  ;;  %2183 = vmatprep.mubr.bf16.mxu1 %v13412_v7  ;;  %v2684_v24 = vpack.c.bf16 %v2464_v48, %v2462_v31  ;;  %v1936_v23 = vadd.f32 %v1935_v62, %v9951_v58  ;;  %v13418_v7 = vld [vmem:[#allocation17_spill] sm:$0xff] }
 0x25c   :  { %v1937_v18 = vpop.f32.mrf.mxu1 }
 0x25d   :  { %v2685_v53 = vpack.c.bf16 %v2465_v15, %v2463_v43  ;;  %v1938_v0 = vadd.f32 %v1937_v18, %v9946_v25  ;;  %v2466_v21 = vmax.f32 %v1936_v23, 0.0 }
 0x25e   :  { %v1939_v17 = vpop.f32.mrf.mxu1 }
 0x25f   :  { %v1940_v27 = vadd.f32 %v1939_v17, %v9951_v58  ;;  %3184 = vmatprep.mubr.bf16.mxu0 %v2685_v53  ;;  %v2467_v33 = vmax.f32 %v1938_v0, 0.0 }
 0x260   :  { %v1941_v10 = vpop.f32.mrf.mxu1  ;;  %3185 = vmatmul.mubr.bf16.gmra.mxu0 %v2684_v24 }
 0x261   :  { %v1942_v54 = vadd.f32 %v1941_v10, %v9946_v25  ;;  %v2468_v37 = vmax.f32 %v1940_v27, 0.0 }
 0x262   :  { %v1945_v47 = vpop.f32.mrf.mxu1  ;;  %2184 = vmatmul.mubr.bf16.gmra.mxu1 %v13413_v55 }
 0x263   :  { %v2469_v34 = vmax.f32 %v1942_v54, 0.0  ;;  %2193 = vmatprep.mubr.bf16.mxu1 %v13414_v63  ;;  %v2686_v57 = vpack.c.bf16 %v2468_v37, %v2466_v21  ;;  %v1946_v59 = vadd.f32 %v1945_v47, %v9951_v58  ;;  %v13419_v47 = vld [vmem:[#allocation16_spill] sm:$0xff] }
 0x264   :  { %v1947_v6 = vpop.f32.mrf.mxu1 }
 0x265   :  { %v2687_v19 = vpack.c.bf16 %v2469_v34, %v2467_v33  ;;  %v1948_v13 = vadd.f32 %v1947_v6, %v9946_v25  ;;  %v2470_v28 = vmax.f32 %v1946_v59, 0.0  ;;  %v13420_v34 = vld [vmem:[#allocation19_spill] sm:$0xff]  ;;  %v7866_v6 = vld [vmem:[%s13292_s9 + $0x70] sm:$0xff]  }
 0x266   :  { %v1949_v45 = vpop.f32.mrf.mxu1  ;;  %5454 = vmatpush2.bf16.msra.mxu0 %v7866_v6 }
 0x267   :  { %v1950_v8 = vadd.f32 %v1949_v45, %v9951_v58  ;;  %3194 = vmatprep.mubr.bf16.mxu0 %v2687_v19  ;;  %v2471_v52 = vmax.f32 %v1948_v13, 0.0  ;;  %5455 = vmatprep.subr.bf16.mxu0 %v13379_v1 }
 0x268   :  { %v1951_v44 = vpop.f32.mrf.mxu1  ;;  %3195 = vmatmul.mubr.bf16.gmra.mxu0 %v2686_v57 }
 0x269   :  { %v1952_v3 = vadd.f32 %v1951_v44, %v9946_v25  ;;  %v2472_v51 = vmax.f32 %v1950_v8, 0.0 }
 0x26a   :  { %v1955_v4 = vpop.f32.mrf.mxu1  ;;  %2194 = vmatmul.mubr.bf16.gmra.mxu1 %v13415_v38  ;;  %v13421_v38 = vld [vmem:[#allocation18_spill] sm:$0xff] }
 0x26b   :  { %v2473_v36 = vmax.f32 %v1952_v3, 0.0  ;;  %2203 = vmatprep.mubr.bf16.mxu1 %v13416_v61  ;;  %v2688_v40 = vpack.c.bf16 %v2472_v51, %v2470_v28  ;;  %v1956_v29 = vadd.f32 %v1955_v4, %v9951_v58  ;;  %v13422_v61 = vld [vmem:[#allocation21_spill] sm:$0xff] }
 0x26c   :  { %v1957_v20 = vpop.f32.mrf.mxu1 }
 0x26d   :  { %v2689_v9 = vpack.c.bf16 %v2473_v36, %v2471_v52  ;;  %v1958_v35 = vadd.f32 %v1957_v20, %v9946_v25  ;;  %v2474_v31 = vmax.f32 %v1956_v29, 0.0 }
 0x26e   :  { %v1959_v30 = vpop.f32.mrf.mxu1 }
 0x26f   :  { %v1960_v32 = vadd.f32 %v1959_v30, %v9951_v58  ;;  %3204 = vmatprep.mubr.bf16.mxu0 %v2689_v9  ;;  %v2475_v43 = vmax.f32 %v1958_v35, 0.0 }
 0x270   :  { %v1961_v39 = vpop.f32.mrf.mxu1  ;;  %3205 = vmatmul.mubr.bf16.gmra.mxu0 %v2688_v40 }
 0x271   :  { %v1962_v41 = vadd.f32 %v1961_v39, %v9946_v25  ;;  %v2476_v48 = vmax.f32 %v1960_v32, 0.0 }
 0x272   :  { %v1965_v62 = vpop.f32.mrf.mxu1  ;;  %2204 = vmatmul.mubr.bf16.gmra.mxu1 %v13417_v56 }
 0x273   :  { %v2477_v15 = vmax.f32 %v1962_v41, 0.0  ;;  %2213 = vmatprep.mubr.bf16.mxu1 %v13418_v7  ;;  %v2690_v53 = vpack.c.bf16 %v2476_v48, %v2474_v31  ;;  %v1966_v27 = vadd.f32 %v1965_v62, %v9951_v58  ;;  %v13423_v48 = vld [vmem:[#allocation20_spill] sm:$0xff] }
 0x274   :  { %v1967_v18 = vpop.f32.mrf.mxu1 }
 0x275   :  { %v2691_v60 = vpack.c.bf16 %v2477_v15, %v2475_v43  ;;  %v1968_v17 = vadd.f32 %v1967_v18, %v9946_v25  ;;  %v2478_v63 = vmax.f32 %v1966_v27, 0.0  ;;  %v13424_v43 = vld [vmem:[#allocation23_spill] sm:$0xff] }
 0x276   :  { %v1969_v24 = vpop.f32.mrf.mxu1 }
 0x277   :  { %v1970_v0 = vadd.f32 %v1969_v24, %v9951_v58  ;;  %3214 = vmatprep.mubr.bf16.mxu0 %v2691_v60  ;;  %v2479_v55 = vmax.f32 %v1968_v17, 0.0 }
 0x278   :  { %v1971_v23 = vpop.f32.mrf.mxu1  ;;  %3215 = vmatmul.mubr.bf16.gmra.mxu0 %v2690_v53 }
 0x279   :  { %v1972_v10 = vadd.f32 %v1971_v23, %v9946_v25  ;;  %v2480_v54 = vmax.f32 %v1970_v0, 0.0 }
 0x27a   :  { %v1975_v37 = vpop.f32.mrf.mxu1  ;;  %2214 = vmatmul.mubr.bf16.gmra.mxu1 %v13419_v47 }
 0x27b   :  { %v2481_v33 = vmax.f32 %v1972_v10, 0.0  ;;  %2223 = vmatprep.mubr.bf16.mxu1 %v13420_v34  ;;  %v2692_v57 = vpack.c.bf16 %v2480_v54, %v2478_v63  ;;  %v1976_v59 = vadd.f32 %v1975_v37, %v9951_v58  ;;  %v13425_v54 = vld [vmem:[#allocation22_spill] sm:$0xff] }
 0x27c   :  { %v1977_v21 = vpop.f32.mrf.mxu1  ;;  %v2810_v63 = vld [vmem:[%s13294_s6] sm:$0x3] }
 0x27d   :  { %v2693_v19 = vpack.c.bf16 %v2481_v33, %v2479_v55  ;;  %v1978_v13 = vadd.f32 %v1977_v21, %v9946_v25  ;;  %v2482_v28 = vmax.f32 %v1976_v59, 0.0  ;;  %v13426_v55 = vld [vmem:[#allocation25_spill] sm:$0xff] }
 0x27e   :  { %v1979_v45 = vpop.f32.mrf.mxu1 }
 0x27f   :  { %v1980_v8 = vadd.f32 %v1979_v45, %v9951_v58  ;;  %3224 = vmatprep.mubr.bf16.mxu0 %v2693_v19  ;;  %v2483_v52 = vmax.f32 %v1978_v13, 0.0  ;;  %v10224_v13 = vrot.slane %v2810_v63, %v8993_v11 }
 0x280   :  { %v1981_v44 = vpop.f32.mrf.mxu1  ;;  %3225 = vmatmul.mubr.bf16.gmra.mxu0 %v2692_v57 }
 0x281   :  { %v1982_v3 = vadd.f32 %v1981_v44, %v9946_v25  ;;  %v2484_v51 = vmax.f32 %v1980_v8, 0.0 }
 0x282   :  { %v1985_v4 = vpop.f32.mrf.mxu1  ;;  %2224 = vmatmul.mubr.bf16.gmra.mxu1 %v13421_v38  ;;  %v13427_v38 = vld [vmem:[#allocation24_spill] sm:$0xff] }
 0x283   :  { %v2485_v36 = vmax.f32 %v1982_v3, 0.0  ;;  %2233 = vmatprep.mubr.bf16.mxu1 %v13422_v61  ;;  %v2694_v26 = vpack.c.bf16 %v2484_v51, %v2482_v28  ;;  %v1986_v35 = vadd.f32 %v1985_v4, %v9951_v58 }
 0x284   :  { %v1987_v20 = vpop.f32.mrf.mxu1 }
 0x285   :  { %v2695_v9 = vpack.c.bf16 %v2485_v36, %v2483_v52  ;;  %v1988_v40 = vadd.f32 %v1987_v20, %v9946_v25  ;;  %v2486_v15 = vmax.f32 %v1986_v35, 0.0  ;;  %v10230_v52 = vrot.slane %v2810_v63, %v8999_v14 }
 0x286   :  { %v1989_v50 = vpop.f32.mrf.mxu1 }
 0x287   :  { %v1990_v30 = vadd.f32 %v1989_v50, %v9951_v58  ;;  %3234 = vmatprep.mubr.bf16.mxu0 %v2695_v9  ;;  %v2487_v62 = vmax.f32 %v1988_v40, 0.0  ;;  %v13428_v9 = vld [vmem:[#allocation27_spill] sm:$0xff] }
 0x288   :  { %v1991_v32 = vpop.f32.mrf.mxu1  ;;  %3235 = vmatmul.mubr.bf16.gmra.mxu0 %v2694_v26 }
 0x289   :  { %v1992_v29 = vadd.f32 %v1991_v32, %v9946_v25  ;;  %v2488_v39 = vmax.f32 %v1990_v30, 0.0  ;;  %v7867_v30 = vld [vmem:[%s13292_s9 + $0x68] sm:$0xff]  }
 0x28a   :  { %v1995_v41 = vpop.f32.mrf.mxu1  ;;  %2234 = vmatmul.mubr.bf16.gmra.mxu1 %v13423_v48  ;;  %5456 = vmatpush2.bf16.msra.mxu0 %v7867_v30 }
 0x28b   :  { %v2489_v56 = vmax.f32 %v1992_v29, 0.0  ;;  %2243 = vmatprep.mubr.bf16.mxu1 %v13424_v43  ;;  %v2696_v18 = vpack.c.bf16 %v2488_v39, %v2486_v15  ;;  %v1996_v17 = vadd.f32 %v1995_v41, %v9951_v58  ;;  %5457 = vmatprep.subr.bf16.mxu0 %v13379_v1 }
 0x28c   :  { %v1997_v7 = vpop.f32.mrf.mxu1 }
 0x28d   :  { %v2697_v31 = vpack.c.bf16 %v2489_v56, %v2487_v62  ;;  %v1998_v53 = vadd.f32 %v1997_v7, %v9946_v25  ;;  %v2490_v33 = vmax.f32 %v1996_v17, 0.0 }
 0x28e   :  { %v1999_v60 = vpop.f32.mrf.mxu1 }
 0x28f   :  { %v2000_v24 = vadd.f32 %v1999_v60, %v9951_v58  ;;  %3244 = vmatprep.mubr.bf16.mxu0 %v2697_v31  ;;  %v2491_v37 = vmax.f32 %v1998_v53, 0.0 }
 0x290   :  { %v2001_v0 = vpop.f32.mrf.mxu1  ;;  %3245 = vmatmul.mubr.bf16.gmra.mxu0 %v2696_v18 }
 0x291   :  { %v2002_v27 = vadd.f32 %v2001_v0, %v9946_v25  ;;  %v2492_v23 = vmax.f32 %v2000_v24, 0.0 }
 0x292   :  { %v2005_v10 = vpop.f32.mrf.mxu1  ;;  %2244 = vmatmul.mubr.bf16.gmra.mxu1 %v13425_v54 }
 0x293   :  { %v2493_v47 = vmax.f32 %v2002_v27, 0.0  ;;  %2253 = vmatprep.mubr.bf16.mxu1 %v13426_v55  ;;  %v2698_v6 = vpack.c.bf16 %v2492_v23, %v2490_v33  ;;  %v2006_v8 = vadd.f32 %v2005_v10, %v9951_v58  ;;  %v13429_v10 = vld [vmem:[#allocation26_spill] sm:$0xff]  ;;  %v13430_v55 = vld [vmem:[#allocation29_spill] sm:$0xff] }
 0x294   :  { %v2007_v34 = vpop.f32.mrf.mxu1 }
 0x295   :  { %v2699_v21 = vpack.c.bf16 %v2493_v47, %v2491_v37  ;;  %v2008_v57 = vadd.f32 %v2007_v34, %v9946_v25  ;;  %v2494_v26 = vmax.f32 %v2006_v8, 0.0 }
 0x296   :  { %v2009_v19 = vpop.f32.mrf.mxu1 }
 0x297   :  { %v2010_v45 = vadd.f32 %v2009_v19, %v9951_v58  ;;  %3254 = vmatprep.mubr.bf16.mxu0 %v2699_v21  ;;  %v2495_v61 = vmax.f32 %v2008_v57, 0.0 }
 0x298   :  { %v2011_v59 = vpop.f32.mrf.mxu1  ;;  %v3016_v44 = vpop.f32.mrf.mxu0  ;;  %3255 = vmatmul.mubr.bf16.gmra.mxu0 %v2698_v6 }
 0x299   :  { %v2012_v3 = vadd.f32 %v2011_v59, %v9946_v25  ;;  %v2496_v51 = vmax.f32 %v2010_v45, 0.0  ;;  %v3017_v20 = vadd.f32 %v3016_v44, %v10224_v13 }
 0x29a   :  { %v2015_v4 = vpop.f32.mrf.mxu1  ;;  %2254 = vmatmul.mubr.bf16.gmra.mxu1 %v13427_v38  ;;  %v3018_v36 = vpop.f32.mrf.mxu0 }
 0x29b   :  { %v2497_v28 = vmax.f32 %v2012_v3, 0.0  ;;  %2263 = vmatprep.mubr.bf16.mxu1 %v13428_v9  ;;  %v2700_v29 = vpack.c.bf16 %v2496_v51, %v2494_v26  ;;  %v3019_v39 = vadd.f32 %v3018_v36, %v10230_v52  ;;  %v3655_v62 = vmax.f32 %v3017_v20, 0.0 }
 0x29c   :  { %v2017_v50 = vpop.f32.mrf.mxu1  ;;  %v3020_v40 = vpop.f32.mrf.mxu0  ;;  %v2016_v7 = vadd.f32 %v2015_v4, %v9951_v58 }
 0x29d   :  { %v3021_v35 = vadd.f32 %v3020_v40, %v10224_v13  ;;  %v2701_v32 = vpack.c.bf16 %v2497_v28, %v2495_v61  ;;  %v2018_v31 = vadd.f32 %v2017_v50, %v9946_v25  ;;  %v3656_v0 = vmax.f32 %v3019_v39, 0.0 }
 0x29e   :  { %v2019_v41 = vpop.f32.mrf.mxu1  ;;  %v3022_v48 = vpop.f32.mrf.mxu0  ;;  %v2498_v33 = vmax.f32 %v2016_v7, 0.0 }
 0x29f   :  { %v3657_v56 = vmax.f32 %v3021_v35, 0.0  ;;  %v2020_v43 = vadd.f32 %v2019_v41, %v9951_v58  ;;  %v3023_v15 = vadd.f32 %v3022_v48, %v10230_v52  ;;  %3264 = vmatprep.mubr.bf16.mxu0 %v2701_v32  ;;  %v2499_v34 = vmax.f32 %v2018_v31, 0.0  ;;  %v13431_v32 = vld [vmem:[#allocation28_spill] sm:$0xff]  ;;  %v13432_v48 = vld [vmem:[#allocation31_spill] sm:$0xff] }
 0x2a0   :  { %v2021_v18 = vpop.f32.mrf.mxu1  ;;  %v3026_v60 = vpop.f32.mrf.mxu0  ;;  %3265 = vmatmul.mubr.bf16.gmra.mxu0 %v2700_v29 }
 0x2a1   :  { %v10244_v53 = vpack.c.bf16 %v3657_v56, %v3655_v62  ;;  %v3658_v24 = vmax.f32 %v3023_v15, 0.0  ;;  %v2022_v17 = vadd.f32 %v2021_v18, %v9946_v25  ;;  %v2500_v27 = vmax.f32 %v2020_v43, 0.0 }
 0x2a2   :  { %v2025_v23 = vpop.f32.mrf.mxu1  ;;  %2264 = vmatmul.mubr.bf16.gmra.mxu1 %v13429_v10  ;;  %v3028_v54 = vpop.f32.mrf.mxu0  ;;  %v3027_v47 = vadd.f32 %v3026_v60, %v10224_v13 }
 0x2a3   :  { %v2501_v37 = vmax.f32 %v2022_v17, 0.0  ;;  %2273 = vmatprep.mubr.bf16.mxu1 %v13430_v55  ;;  %v10250_v6 = vpack.c.bf16 %v3658_v24, %v3656_v0  ;;  %v2702_v57 = vpack.c.bf16 %v2500_v27, %v2498_v33  ;;  %v3029_v45 = vadd.f32 %v3028_v54, %v10230_v52 }
 0x2a4   :  { %v2027_v63 = vpop.f32.mrf.mxu1  ;;  %v3030_v21 = vpop.f32.mrf.mxu0  ;;  %v3659_v3 = vmax.f32 %v3027_v47, 0.0  ;;  %v2026_v36 = vadd.f32 %v2025_v23, %v9951_v58 }
 0x2a5   :  { %v3031_v19 = vadd.f32 %v3030_v21, %v10224_v13  ;;  %v2703_v44 = vpack.c.bf16 %v2501_v37, %v2499_v34  ;;  %v2028_v61 = vadd.f32 %v2027_v63, %v9946_v25  ;;  %v3660_v40 = vmax.f32 %v3029_v45, 0.0 }
 0x2a6   :  { %v2029_v8 = vpop.f32.mrf.mxu1  ;;  %v3032_v59 = vpop.f32.mrf.mxu0  ;;  %v2502_v62 = vmax.f32 %v2026_v36, 0.0 }
 0x2a7   :  { %v3661_v51 = vmax.f32 %v3031_v19, 0.0  ;;  %v2030_v4 = vadd.f32 %v2029_v8, %v9951_v58  ;;  %v3033_v38 = vadd.f32 %v3032_v59, %v10230_v52  ;;  %3274 = vmatprep.mubr.bf16.mxu0 %v2703_v44  ;;  %v2503_v56 = vmax.f32 %v2028_v61, 0.0  ;;  %v13433_v8 = vld [vmem:[#allocation30_spill] sm:$0xff] }
 0x2a8   :  { %v2031_v28 = vpop.f32.mrf.mxu1  ;;  %v3036_v20 = vpop.f32.mrf.mxu0  ;;  %3275 = vmatmul.mubr.bf16.gmra.mxu0 %v2702_v57 }
 0x2a9   :  { %v10258_v9 = vpack.c.bf16 %v3661_v51, %v3659_v3  ;;  %v3662_v26 = vmax.f32 %v3033_v38, 0.0  ;;  %v2032_v50 = vadd.f32 %v2031_v28, %v9946_v25  ;;  %v2504_v30 = vmax.f32 %v2030_v4, 0.0  ;;  %v13434_v51 = vld [vmem:[#allocation33_spill] sm:$0xff] }
 0x2aa   :  { %v2035_v35 = vpop.f32.mrf.mxu1  ;;  %2274 = vmatmul.mubr.bf16.gmra.mxu1 %v13431_v32  ;;  %v3038_v29 = vpop.f32.mrf.mxu0  ;;  %v3037_v41 = vadd.f32 %v3036_v20, %v10224_v13 }
 0x2ab   :  { %v2505_v39 = vmax.f32 %v2032_v50, 0.0  ;;  %2283 = vmatprep.mubr.bf16.mxu1 %v13432_v48  ;;  %v10264_v7 = vpack.c.bf16 %v3662_v26, %v3660_v40  ;;  %v2704_v18 = vpack.c.bf16 %v2504_v30, %v2502_v62  ;;  %v3039_v60 = vadd.f32 %v3038_v29, %v10230_v52 }
 0x2ac   :  { %v2037_v43 = vpop.f32.mrf.mxu1  ;;  %v3040_v15 = vpop.f32.mrf.mxu0  ;;  %v3663_v27 = vmax.f32 %v3037_v41, 0.0  ;;  %v2036_v37 = vadd.f32 %v2035_v35, %v9951_v58 }
 0x2ad   :  { %v3041_v31 = vadd.f32 %v3040_v15, %v10224_v13  ;;  %v2705_v0 = vpack.c.bf16 %v2505_v39, %v2503_v56  ;;  %v2038_v47 = vadd.f32 %v2037_v43, %v9946_v25  ;;  %v3664_v19 = vmax.f32 %v3039_v60, 0.0 }
 0x2ae   :  { %v2039_v24 = vpop.f32.mrf.mxu1  ;;  %v3042_v17 = vpop.f32.mrf.mxu0  ;;  %v2506_v4 = vmax.f32 %v2036_v37, 0.0 }
 0x2af   :  { %v3665_v23 = vmax.f32 %v3041_v31, 0.0  ;;  %v2040_v10 = vadd.f32 %v2039_v24, %v9951_v58  ;;  %v3043_v54 = vadd.f32 %v3042_v17, %v10230_v52  ;;  %3284 = vmatprep.mubr.bf16.mxu0 %v2705_v0  ;;  %v2507_v38 = vmax.f32 %v2038_v47, 0.0  ;;  %v13435_v0 = vld [vmem:[#allocation32_spill] sm:$0xff] }
 0x2b0   :  { %v2041_v55 = vpop.f32.mrf.mxu1  ;;  %v3046_v33 = vpop.f32.mrf.mxu0  ;;  %3285 = vmatmul.mubr.bf16.gmra.mxu0 %v2704_v18 }
 0x2b1   :  { %v10272_v34 = vpack.c.bf16 %v3665_v23, %v3663_v27  ;;  %v3666_v63 = vmax.f32 %v3043_v54, 0.0  ;;  %v2042_v21 = vadd.f32 %v2041_v55, %v9946_v25  ;;  %v2508_v57 = vmax.f32 %v2040_v10, 0.0  ;;  %v13436_v54 = vld [vmem:[#allocation35_spill] sm:$0xff] }
 0x2b2   :  { %v2045_v45 = vpop.f32.mrf.mxu1  ;;  %2284 = vmatmul.mubr.bf16.gmra.mxu1 %v13433_v8  ;;  %v3048_v59 = vpop.f32.mrf.mxu0  ;;  %v3047_v3 = vadd.f32 %v3046_v33, %v10224_v13 }
 0x2b3   :  { %v2509_v44 = vmax.f32 %v2042_v21, 0.0  ;;  %2293 = vmatprep.mubr.bf16.mxu1 %v13434_v51  ;;  %v10278_v28 = vpack.c.bf16 %v3666_v63, %v3664_v19  ;;  %v2706_v26 = vpack.c.bf16 %v2508_v57, %v2506_v4  ;;  %v3049_v50 = vadd.f32 %v3048_v59, %v10230_v52  ;;  %v7868_v21 = vld [vmem:[%s13292_s9 + $0x60] sm:$0xff]  }
 0x2b4   :  { %v2047_v36 = vpop.f32.mrf.mxu1  ;;  %v3050_v61 = vpop.f32.mrf.mxu0  ;;  %v3667_v32 = vmax.f32 %v3047_v3, 0.0  ;;  %v2046_v48 = vadd.f32 %v2045_v45, %v9951_v58  ;;  %5458 = vmatpush2.bf16.msra.mxu0 %v7868_v21 }
 0x2b5   :  { %v3051_v20 = vadd.f32 %v3050_v61, %v10224_v13  ;;  %v2707_v35 = vpack.c.bf16 %v2509_v44, %v2507_v38  ;;  %v2048_v62 = vadd.f32 %v2047_v36, %v9946_v25  ;;  %v3668_v60 = vmax.f32 %v3049_v50, 0.0  ;;  %5459 = vmatprep.subr.bf16.mxu0 %v13379_v1 }
 0x2b6   :  { %v2049_v40 = vpop.f32.mrf.mxu1  ;;  %v3052_v30 = vpop.f32.mrf.mxu0  ;;  %v2510_v37 = vmax.f32 %v2046_v48, 0.0 }
 0x2b7   :  { %v3669_v29 = vmax.f32 %v3051_v20, 0.0  ;;  %v2050_v39 = vadd.f32 %v2049_v40, %v9951_v58  ;;  %v3053_v41 = vadd.f32 %v3052_v30, %v10230_v52  ;;  %3294 = vmatprep.mubr.bf16.mxu0 %v2707_v35  ;;  %v2511_v47 = vmax.f32 %v2048_v62, 0.0 }
 0x2b8   :  { %v2051_v56 = vpop.f32.mrf.mxu1  ;;  %v3056_v43 = vpop.f32.mrf.mxu0  ;;  %3295 = vmatmul.mubr.bf16.gmra.mxu0 %v2706_v26 }
 0x2b9   :  { %v10286_v15 = vpack.c.bf16 %v3669_v29, %v3667_v32  ;;  %v3670_v31 = vmax.f32 %v3053_v41, 0.0  ;;  %v2052_v18 = vadd.f32 %v2051_v56, %v9946_v25  ;;  %v2512_v24 = vmax.f32 %v2050_v39, 0.0  ;;  %v13437_v39 = vld [vmem:[#allocation34_spill] sm:$0xff] }
 0x2ba   :  { %v2055_v17 = vpop.f32.mrf.mxu1  ;;  %2294 = vmatmul.mubr.bf16.gmra.mxu1 %v13435_v0  ;;  %v3058_v27 = vpop.f32.mrf.mxu0  ;;  %v3057_v10 = vadd.f32 %v3056_v43, %v10224_v13 }
 0x2bb   :  { %v2513_v23 = vmax.f32 %v2052_v18, 0.0  ;;  %2303 = vmatprep.mubr.bf16.mxu1 %v13436_v54  ;;  %v10292_v63 = vpack.c.bf16 %v3670_v31, %v3668_v60  ;;  %v2708_v57 = vpack.c.bf16 %v2512_v24, %v2510_v37  ;;  %v3059_v45 = vadd.f32 %v3058_v27, %v10230_v52 }
 0x2bc   :  { %v2057_v55 = vpop.f32.mrf.mxu1  ;;  %v3060_v33 = vpop.f32.mrf.mxu0  ;;  %v3671_v3 = vmax.f32 %v3057_v10, 0.0  ;;  %v2056_v36 = vadd.f32 %v2055_v17, %v9951_v58 }
 0x2bd   :  { %v3061_v19 = vadd.f32 %v3060_v33, %v10224_v13  ;;  %v2709_v44 = vpack.c.bf16 %v2513_v23, %v2511_v47  ;;  %v2058_v61 = vadd.f32 %v2057_v55, %v9946_v25  ;;  %v3672_v35 = vmax.f32 %v3059_v45, 0.0 }
 0x2be   :  { %v2059_v8 = vpop.f32.mrf.mxu1  ;;  %v3062_v59 = vpop.f32.mrf.mxu0  ;;  %v2514_v56 = vmax.f32 %v2056_v36, 0.0 }
 0x2bf   :  { %v3673_v51 = vmax.f32 %v3061_v19, 0.0  ;;  %v2060_v4 = vadd.f32 %v2059_v8, %v9951_v58  ;;  %v3063_v38 = vadd.f32 %v3062_v59, %v10230_v52  ;;  %3304 = vmatprep.mubr.bf16.mxu0 %v2709_v44  ;;  %v2515_v43 = vmax.f32 %v2058_v61, 0.0  ;;  %v13439_v61 = vld [vmem:[#allocation38_spill] sm:$0xff] }
 0x2c0   :  { %v2061_v20 = vpop.f32.mrf.mxu1  ;;  %v3066_v26 = vpop.f32.mrf.mxu0  ;;  %3305 = vmatmul.mubr.bf16.gmra.mxu0 %v2708_v57 }
 0x2c1   :  { %v10304_v50 = vpack.c.bf16 %v3673_v51, %v3671_v3  ;;  %v3674_v40 = vmax.f32 %v3063_v38, 0.0  ;;  %v2062_v30 = vadd.f32 %v2061_v20, %v9946_v25  ;;  %v2516_v32 = vmax.f32 %v2060_v4, 0.0  ;;  %v13438_v51 = vld [vmem:[#allocation36_spill] sm:$0xff] }
 0x2c2   :  { %v2065_v29 = vpop.f32.mrf.mxu1  ;;  %2304 = vmatmul.mubr.bf16.gmra.mxu1 %v13437_v39  ;;  %v3068_v41 = vpop.f32.mrf.mxu0  ;;  %v3067_v62 = vadd.f32 %v3066_v26, %v10224_v13 }
 0x2c3   :  { %v2517_v48 = vmax.f32 %v2062_v30, 0.0  ;;  %2313 = vmatprep.mubr.bf16.mxu1 %v9789_v46  ;;  %v10310_v60 = vpack.c.bf16 %v3674_v40, %v3672_v35  ;;  %v2710_v17 = vpack.c.bf16 %v2516_v32, %v2514_v56  ;;  %v3069_v0 = vadd.f32 %v3068_v41, %v10230_v52 }
 0x2c4   :  { %v2067_v31 = vpop.f32.mrf.mxu1  ;;  %v3070_v18 = vpop.f32.mrf.mxu0  ;;  %v3675_v54 = vmax.f32 %v3067_v62, 0.0  ;;  %v2066_v55 = vadd.f32 %v2065_v29, %v9951_v58 }
 0x2c5   :  { %v3071_v24 = vadd.f32 %v3070_v18, %v10224_v13  ;;  %v2711_v10 = vpack.c.bf16 %v2517_v48, %v2515_v43  ;;  %v2068_v33 = vadd.f32 %v2067_v31, %v9946_v25  ;;  %v3676_v59 = vmax.f32 %v3069_v0, 0.0 }
 0x2c6   :  { %v2069_v27 = vpop.f32.mrf.mxu1  ;;  %v3072_v23 = vpop.f32.mrf.mxu0  ;;  %v2518_v20 = vmax.f32 %v2066_v55, 0.0  ;;  %v13440_v55 = vld [vmem:[#allocation37_spill] sm:$0xff] }
 0x2c7   :  { %v3677_v37 = vmax.f32 %v3071_v24, 0.0  ;;  %v2070_v47 = vadd.f32 %v2069_v27, %v9951_v58  ;;  %v3073_v46 = vadd.f32 %v3072_v23, %v10230_v52  ;;  %3314 = vmatprep.mubr.bf16.mxu0 %v2711_v10  ;;  %v2519_v26 = vmax.f32 %v2068_v33, 0.0 }
 0x2c8   :  { %v2071_v21 = vpop.f32.mrf.mxu1  ;;  %v3076_v19 = vpop.f32.mrf.mxu0  ;;  %3315 = vmatmul.mubr.bf16.gmra.mxu0 %v2710_v17 }
 0x2c9   :  { %v10318_v57 = vpack.c.bf16 %v3677_v37, %v3675_v54  ;;  %v3678_v45 = vmax.f32 %v3073_v46, 0.0  ;;  %v2072_v8 = vadd.f32 %v2071_v21, %v9946_v25  ;;  %v2520_v44 = vmax.f32 %v2070_v47, 0.0 }
 0x2ca   :  { %v2075_v3 = vpop.f32.mrf.mxu1  ;;  %2314 = vmatmul.mubr.bf16.gmra.mxu1 %v13438_v51  ;;  %v3078_v4 = vpop.f32.mrf.mxu0  ;;  %v3077_v36 = vadd.f32 %v3076_v19, %v10224_v13 }
 0x2cb   :  { %v2521_v38 = vmax.f32 %v2072_v8, 0.0  ;;  %2323 = vmatprep.mubr.bf16.mxu1 %v13439_v61  ;;  %v10324_v35 = vpack.c.bf16 %v3678_v45, %v3676_v59  ;;  %v2712_v29 = vpack.c.bf16 %v2520_v44, %v2518_v20  ;;  %v3079_v39 = vadd.f32 %v3078_v4, %v10230_v52  ;;  %v13441_v45 = vld [vmem:[#allocation40_spill] sm:$0xff] }
 0x2cc   :  { %v2077_v40 = vpop.f32.mrf.mxu1  ;;  %v3080_v30 = vpop.f32.mrf.mxu0  ;;  %v3679_v56 = vmax.f32 %v3077_v36, 0.0  ;;  %v2076_v24 = vadd.f32 %v2075_v3, %v9951_v58 }
 0x2cd   :  { %v3081_v32 = vadd.f32 %v3080_v30, %v10224_v13  ;;  %v2713_v62 = vpack.c.bf16 %v2521_v38, %v2519_v26  ;;  %v2078_v17 = vadd.f32 %v2077_v40, %v9946_v25  ;;  %v3680_v37 = vmax.f32 %v3079_v39, 0.0 }
 0x2ce   :  { %v2079_v41 = vpop.f32.mrf.mxu1  ;;  %v3082_v48 = vpop.f32.mrf.mxu0  ;;  %v2522_v8 = vmax.f32 %v2076_v24, 0.0 }
 0x2cf   :  { %v3681_v43 = vmax.f32 %v3081_v32, 0.0  ;;  %v2080_v31 = vadd.f32 %v2079_v41, %v9951_v58  ;;  %v3083_v18 = vadd.f32 %v3082_v48, %v10230_v52  ;;  %3324 = vmatprep.mubr.bf16.mxu0 %v2713_v62  ;;  %v2523_v59 = vmax.f32 %v2078_v17, 0.0 }
 0x2d0   :  { %v2081_v0 = vpop.f32.mrf.mxu1  ;;  %v3086_v27 = vpop.f32.mrf.mxu0  ;;  %3325 = vmatmul.mubr.bf16.gmra.mxu0 %v2712_v29 }
 0x2d1   :  { %v10332_v23 = vpack.c.bf16 %v3681_v43, %v3679_v56  ;;  %v3682_v10 = vmax.f32 %v3083_v18, 0.0  ;;  %v2082_v54 = vadd.f32 %v2081_v0, %v9946_v25  ;;  %v2524_v47 = vmax.f32 %v2080_v31, 0.0  ;;  %v13442_v0 = vld [vmem:[#allocation39_spill] sm:$0xff] }
 0x2d2   :  { %v2085_v46 = vpop.f32.mrf.mxu1  ;;  %2324 = vmatmul.mubr.bf16.gmra.mxu1 %v13440_v55  ;;  %v3088_v33 = vpop.f32.mrf.mxu0  ;;  %v3087_v19 = vadd.f32 %v3086_v27, %v10224_v13 }
 0x2d3   :  { %v2525_v21 = vmax.f32 %v2082_v54, 0.0  ;;  %2333 = vmatprep.mubr.bf16.mxu1 %v13441_v45  ;;  %v10338_v51 = vpack.c.bf16 %v3682_v10, %v3680_v37  ;;  %v2714_v38 = vpack.c.bf16 %v2524_v47, %v2522_v8  ;;  %v3089_v36 = vadd.f32 %v3088_v33, %v10230_v52 }
 0x2d4   :  { %v2087_v44 = vpop.f32.mrf.mxu1  ;;  %v3090_v3 = vpop.f32.mrf.mxu0  ;;  %v3683_v40 = vmax.f32 %v3087_v19, 0.0  ;;  %v2086_v39 = vadd.f32 %v2085_v46, %v9951_v58 }
 0x2d5   :  { %v3091_v4 = vadd.f32 %v3090_v3, %v10224_v13  ;;  %v2715_v26 = vpack.c.bf16 %v2525_v21, %v2523_v59  ;;  %v2088_v41 = vadd.f32 %v2087_v44, %v9946_v25  ;;  %v3684_v18 = vmax.f32 %v3089_v36, 0.0  ;;  %v7869_v21 = vld [vmem:[%s13292_s9 + $0x58] sm:$0xff]  }
 0x2d6   :  { %v2089_v61 = vpop.f32.mrf.mxu1  ;;  %v3092_v20 = vpop.f32.mrf.mxu0  ;;  %v2526_v37 = vmax.f32 %v2086_v39, 0.0  ;;  %5460 = vmatpush2.bf16.msra.mxu0 %v7869_v21 }
 0x2d7   :  { %v3685_v30 = vmax.f32 %v3091_v4, 0.0  ;;  %v2090_v32 = vadd.f32 %v2089_v61, %v9951_v58  ;;  %v3093_v29 = vadd.f32 %v3092_v20, %v10230_v52  ;;  %3334 = vmatprep.mubr.bf16.mxu0 %v2715_v26  ;;  %v2527_v47 = vmax.f32 %v2088_v41, 0.0  ;;  %5461 = vmatprep.subr.bf16.mxu0 %v13379_v1 }
 0x2d8   :  { %v2091_v48 = vpop.f32.mrf.mxu1  ;;  %v3096_v62 = vpop.f32.mrf.mxu0  ;;  %3335 = vmatmul.mubr.bf16.gmra.mxu0 %v2714_v38 }
 0x2d9   :  { %v10346_v56 = vpack.c.bf16 %v3685_v30, %v3683_v40  ;;  %v3686_v43 = vmax.f32 %v3093_v29, 0.0  ;;  %v2092_v31 = vadd.f32 %v2091_v48, %v9946_v25  ;;  %v2528_v24 = vmax.f32 %v2090_v32, 0.0 }
 0x2da   :  { %v2095_v17 = vpop.f32.mrf.mxu1  ;;  %2334 = vmatmul.mubr.bf16.gmra.mxu1 %v13442_v0  ;;  %v3098_v27 = vpop.f32.mrf.mxu0  ;;  %v3097_v54 = vadd.f32 %v3096_v62, %v10224_v13  ;;  %v13443_v62 = vld [vmem:[#allocation41_spill] sm:$0xff] }
 0x2db   :  { %v2529_v10 = vmax.f32 %v2092_v31, 0.0  ;;  %2343 = vmatprep.mubr.bf16.mxu1 %v9867_v16  ;;  %v10352_v33 = vpack.c.bf16 %v3686_v43, %v3684_v18  ;;  %v2716_v45 = vpack.c.bf16 %v2528_v24, %v2526_v37  ;;  %v3099_v8 = vadd.f32 %v3098_v27, %v10230_v52 }
 0x2dc   :  { %v2097_v46 = vpop.f32.mrf.mxu1  ;;  %v3100_v55 = vpop.f32.mrf.mxu0  ;;  %v3687_v16 = vmax.f32 %v3097_v54, 0.0  ;;  %v2096_v61 = vadd.f32 %v2095_v17, %v9951_v58 }
 0x2dd   :  { %v3101_v19 = vadd.f32 %v3100_v55, %v10224_v13  ;;  %v2717_v3 = vpack.c.bf16 %v2529_v10, %v2527_v47  ;;  %v2098_v20 = vadd.f32 %v2097_v46, %v9946_v25  ;;  %v3688_v39 = vmax.f32 %v3099_v8, 0.0 }
 0x2de   :  { %v2099_v59 = vpop.f32.mrf.mxu1  ;;  %v3102_v44 = vpop.f32.mrf.mxu0  ;;  %v2530_v24 = vmax.f32 %v2096_v61, 0.0 }
 0x2df   :  { %v3689_v4 = vmax.f32 %v3101_v19, 0.0  ;;  %v2100_v38 = vadd.f32 %v2099_v59, %v9951_v58  ;;  %v3103_v36 = vadd.f32 %v3102_v44, %v10230_v52  ;;  %3344 = vmatprep.mubr.bf16.mxu0 %v2717_v3  ;;  %v2531_v17 = vmax.f32 %v2098_v20, 0.0 }
 0x2e0   :  { %v2101_v26 = vpop.f32.mrf.mxu1  ;;  %v3106_v40 = vpop.f32.mrf.mxu0  ;;  %3345 = vmatmul.mubr.bf16.gmra.mxu0 %v2716_v45 }
 0x2e1   :  { %v10364_v30 = vpack.c.bf16 %v3689_v4, %v3687_v16  ;;  %v3690_v32 = vmax.f32 %v3103_v36, 0.0  ;;  %v2102_v29 = vadd.f32 %v2101_v26, %v9946_v25  ;;  %v2532_v41 = vmax.f32 %v2100_v38, 0.0 }
 0x2e2   :  { %v2105_v48 = vpop.f32.mrf.mxu1  ;;  %2344 = vmatmul.mubr.bf16.gmra.mxu1 %v13443_v62  ;;  %v3108_v43 = vpop.f32.mrf.mxu0  ;;  %v3107_v18 = vadd.f32 %v3106_v40, %v10224_v13 }
 0x2e3   :  { %v2533_v31 = vmax.f32 %v2102_v29, 0.0  ;;  %2353 = vmatprep.mubr.bf16.mxu1 %v9887_v2  ;;  %v10370_v10 = vpack.c.bf16 %v3690_v32, %v3688_v39  ;;  %v2718_v37 = vpack.c.bf16 %v2532_v41, %v2530_v24  ;;  %v3109_v47 = vadd.f32 %v3108_v43, %v10230_v52 }
 0x2e4   :  { %v2107_v0 = vpop.f32.mrf.mxu1  ;;  %v3110_v27 = vpop.f32.mrf.mxu0  ;;  %v3691_v19 = vmax.f32 %v3107_v18, 0.0  ;;  %v2106_v59 = vadd.f32 %v2105_v48, %v9951_v58 }
 0x2e5   :  { %v3111_v54 = vadd.f32 %v3110_v27, %v10224_v13  ;;  %v2719_v21 = vpack.c.bf16 %v2533_v31, %v2531_v17  ;;  %v2108_v44 = vadd.f32 %v2107_v0, %v9946_v25  ;;  %v3692_v61 = vmax.f32 %v3109_v47, 0.0 }
 0x2e6   :  { %v2109_v46 = vpop.f32.mrf.mxu1  ;;  %v3112_v55 = vpop.f32.mrf.mxu0  ;;  %v2534_v39 = vmax.f32 %v2106_v59, 0.0 }
 0x2e7   :  { %v3693_v45 = vmax.f32 %v3111_v54, 0.0  ;;  %v2110_v8 = vadd.f32 %v2109_v46, %v9951_v58  ;;  %v3113_v2 = vadd.f32 %v3112_v55, %v10230_v52  ;;  %3354 = vmatprep.mubr.bf16.mxu0 %v2719_v21  ;;  %v2535_v41 = vmax.f32 %v2108_v44, 0.0 }
 0x2e8   :  { %v2111_v3 = vpop.f32.mrf.mxu1  ;;  %v3116_v16 = vpop.f32.mrf.mxu0  ;;  %3355 = vmatmul.mubr.bf16.gmra.mxu0 %v2718_v37 }
 0x2e9   :  { %v10378_v4 = vpack.c.bf16 %v3693_v45, %v3691_v19  ;;  %v3694_v38 = vmax.f32 %v3113_v2, 0.0  ;;  %v2112_v36 = vadd.f32 %v2111_v3, %v9946_v25  ;;  %v2536_v20 = vmax.f32 %v2110_v8, 0.0 }
 0x2ea   :  { %v2115_v26 = vpop.f32.mrf.mxu1  ;;  %2354 = vmatmul.mubr.bf16.gmra.mxu1 %v9882_v22  ;;  %v3118_v40 = vpop.f32.mrf.mxu0  ;;  %v3117_v29 = vadd.f32 %v3116_v16, %v10224_v13 }
 0x2eb   :  { %v2537_v32 = vmax.f32 %v2112_v36, 0.0  ;;  %2363 = vmatprep.mubr.bf16.mxu1 %v9907_v42  ;;  %v10384_v43 = vpack.c.bf16 %v3694_v38, %v3692_v61  ;;  %v2720_v18 = vpack.c.bf16 %v2536_v20, %v2534_v39  ;;  %v3119_v24 = vadd.f32 %v3118_v40, %v10230_v52 }
 0x2ec   :  { %v2117_v48 = vpop.f32.mrf.mxu1  ;;  %v3120_v62 = vpop.f32.mrf.mxu0  ;;  %v3695_v27 = vmax.f32 %v3117_v29, 0.0  ;;  %v2116_v47 = vadd.f32 %v2115_v26, %v9951_v58 }
 0x2ed   :  { %v3121_v31 = vadd.f32 %v3120_v62, %v10224_v13  ;;  %v2721_v22 = vpack.c.bf16 %v2537_v32, %v2535_v41  ;;  %v2118_v46 = vadd.f32 %v2117_v48, %v9946_v25  ;;  %v3696_v2 = vmax.f32 %v3119_v24, 0.0 }
 0x2ee   :  { %v2119_v17 = vpop.f32.mrf.mxu1  ;;  %v3122_v0 = vpop.f32.mrf.mxu0  ;;  %v2538_v36 = vmax.f32 %v2116_v47, 0.0 }
 0x2ef   :  { %v3697_v54 = vmax.f32 %v3121_v31, 0.0  ;;  %v2120_v37 = vadd.f32 %v2119_v17, %v9951_v58  ;;  %v3123_v42 = vadd.f32 %v3122_v0, %v10230_v52  ;;  %3364 = vmatprep.mubr.bf16.mxu0 %v2721_v22  ;;  %v2539_v61 = vmax.f32 %v2118_v46, 0.0 }
 0x2f0   :  { %v2121_v55 = vpop.f32.mrf.mxu1  ;;  %v3126_v21 = vpop.f32.mrf.mxu0  ;;  %3365 = vmatmul.mubr.bf16.gmra.mxu0 %v2720_v18 }
 0x2f1   :  { %v10392_v19 = vpack.c.bf16 %v3697_v54, %v3695_v27  ;;  %v3698_v45 = vmax.f32 %v3123_v42, 0.0  ;;  %v2122_v8 = vadd.f32 %v2121_v55, %v9946_v25  ;;  %v2540_v59 = vmax.f32 %v2120_v37, 0.0 }
 0x2f2   :  { %v2125_v44 = vpop.f32.mrf.mxu1  ;;  %2364 = vmatmul.mubr.bf16.gmra.mxu1 %v9902_v49  ;;  %v3128_v3 = vpop.f32.mrf.mxu0  ;;  %v3127_v38 = vadd.f32 %v3126_v21, %v10224_v13 }
 0x2f3   :  { %v2541_v16 = vmax.f32 %v2122_v8, 0.0  ;;  %2373 = vmatprep.mubr.bf16.mxu1 %v9927_v5  ;;  %v10398_v40 = vpack.c.bf16 %v3698_v45, %v3696_v2  ;;  %v2722_v29 = vpack.c.bf16 %v2540_v59, %v2538_v36  ;;  %v3129_v39 = vadd.f32 %v3128_v3, %v10230_v52  ;;  %v13444_v8 = vld [vmem:[#allocation43_spill] sm:$0xff] }
 0x2f4   :  { %v2127_v20 = vpop.f32.mrf.mxu1  ;;  %v3130_v26 = vpop.f32.mrf.mxu0  ;;  %v3699_v62 = vmax.f32 %v3127_v38, 0.0  ;;  %v2126_v24 = vadd.f32 %v2125_v44, %v9951_v58  ;;  %v7870_v38 = vld [vmem:[%s13292_s9 + $0x50] sm:$0xff]  }
 0x2f5   :  { %v3131_v32 = vadd.f32 %v3130_v26, %v10224_v13  ;;  %v2723_v49 = vpack.c.bf16 %v2541_v16, %v2539_v61  ;;  %v2128_v17 = vadd.f32 %v2127_v20, %v9946_v25  ;;  %v3700_v42 = vmax.f32 %v3129_v39, 0.0  ;;  %5462 = vmatpush2.bf16.msra.mxu0 %v7870_v38 }
 0x2f6   :  { %v2129_v41 = vpop.f32.mrf.mxu1  ;;  %v3132_v48 = vpop.f32.mrf.mxu0  ;;  %v2542_v2 = vmax.f32 %v2126_v24, 0.0  ;;  %5463 = vmatprep.subr.bf16.mxu0 %v13379_v1 }
 0x2f7   :  { %v3701_v31 = vmax.f32 %v3131_v32, 0.0  ;;  %v2130_v18 = vadd.f32 %v2129_v41, %v9951_v58  ;;  %v3133_v5 = vadd.f32 %v3132_v48, %v10230_v52  ;;  %3374 = vmatprep.mubr.bf16.mxu0 %v2723_v49  ;;  %v2543_v59 = vmax.f32 %v2128_v17, 0.0 }
 0x2f8   :  { %v2131_v0 = vpop.f32.mrf.mxu1  ;;  %v3136_v22 = vpop.f32.mrf.mxu0  ;;  %3375 = vmatmul.mubr.bf16.gmra.mxu0 %v2722_v29 }
 0x2f9   :  { %v10406_v27 = vpack.c.bf16 %v3701_v31, %v3699_v62  ;;  %v3702_v54 = vmax.f32 %v3133_v5, 0.0  ;;  %v2132_v37 = vadd.f32 %v2131_v0, %v9946_v25  ;;  %v2544_v47 = vmax.f32 %v2130_v18, 0.0 }
 0x2fa   :  { %v2135_v46 = vpop.f32.mrf.mxu1  ;;  %2374 = vmatmul.mubr.bf16.gmra.mxu1 %v9922_v12  ;;  %v3138_v55 = vpop.f32.mrf.mxu0  ;;  %v3137_v45 = vadd.f32 %v3136_v22, %v10224_v13 }
 0x2fb   :  { %v2545_v21 = vmax.f32 %v2132_v37, 0.0  ;;  %2383 = vmatprep.mubr.bf16.mxu1 %v13444_v8  ;;  %v10412_v16 = vpack.c.bf16 %v3702_v54, %v3700_v42  ;;  %v2724_v61 = vpack.c.bf16 %v2544_v47, %v2542_v2  ;;  %v3139_v12 = vadd.f32 %v3138_v55, %v10230_v52  ;;  %v13445_v37 = vld [vmem:[#allocation42_spill] sm:$0xff] }
 0x2fc   :  { %v2137_v44 = vpop.f32.mrf.mxu1  ;;  %v3140_v3 = vpop.f32.mrf.mxu0  ;;  %v3703_v29 = vmax.f32 %v3137_v45, 0.0  ;;  %v2136_v49 = vadd.f32 %v2135_v46, %v9951_v58 }
 0x2fd   :  { %v3141_v36 = vadd.f32 %v3140_v3, %v10224_v13  ;;  %v2725_v32 = vpack.c.bf16 %v2545_v21, %v2543_v59  ;;  %v2138_v62 = vadd.f32 %v2137_v44, %v9946_v25  ;;  %v3704_v0 = vmax.f32 %v3139_v12, 0.0 }
 0x2fe   :  { %v2139_v20 = vpop.f32.mrf.mxu1  ;;  %v3142_v26 = vpop.f32.mrf.mxu0  ;;  %v2546_v55 = vmax.f32 %v2136_v49, 0.0 }
 0x2ff   :  { %v3705_v39 = vmax.f32 %v3141_v36, 0.0  ;;  %v2140_v41 = vadd.f32 %v2139_v20, %v9951_v58  ;;  %v3143_v48 = vadd.f32 %v3142_v26, %v10230_v52  ;;  %3384 = vmatprep.mubr.bf16.mxu0 %v2725_v32  ;;  %v2547_v21 = vmax.f32 %v2138_v62, 0.0 }
 0x300   :  { %v2141_v31 = vpop.f32.mrf.mxu1  ;;  %v3146_v18 = vpop.f32.mrf.mxu0  ;;  %3385 = vmatmul.mubr.bf16.gmra.mxu0 %v2724_v61 }
 0x301   :  { %v10424_v5 = vpack.c.bf16 %v3705_v39, %v3703_v29  ;;  %v3706_v24 = vmax.f32 %v3143_v48, 0.0  ;;  %v2142_v17 = vadd.f32 %v2141_v31, %v9946_v25  ;;  %v2548_v22 = vmax.f32 %v2140_v41, 0.0 }
 0x302   :  { %v2145_v54 = vpop.f32.mrf.mxu1  ;;  %2384 = vmatmul.mubr.bf16.gmra.mxu1 %v13445_v37  ;;  %v3148_v42 = vpop.f32.mrf.mxu0  ;;  %v3147_v46 = vadd.f32 %v3146_v18, %v10224_v13 }
 0x303   :  { %v2549_v47 = vmax.f32 %v2142_v17, 0.0  ;;  %4275 = vmatprep.mubr.bf16.mxu1 %v10250_v6  ;;  %v10430_v2 = vpack.c.bf16 %v3706_v24, %v3704_v0  ;;  %v2726_v44 = vpack.c.bf16 %v2548_v22, %v2546_v55  ;;  %v3149_v3 = vadd.f32 %v3148_v42, %v10230_v52 }
 0x304   :  { %v2147_v45 = vpop.f32.mrf.mxu1  ;;  %v3150_v8 = vpop.f32.mrf.mxu0  ;;  %v3707_v12 = vmax.f32 %v3147_v46, 0.0  ;;  %v2146_v32 = vadd.f32 %v2145_v54, %v9951_v58 }
 0x305   :  { %v3151_v59 = vadd.f32 %v3150_v8, %v10224_v13  ;;  %v2727_v61 = vpack.c.bf16 %v2549_v47, %v2547_v21  ;;  %v2148_v29 = vadd.f32 %v2147_v45, %v9946_v25  ;;  %v3708_v31 = vmax.f32 %v3149_v3, 0.0 }
 0x306   :  { %v2149_v38 = vpop.f32.mrf.mxu1  ;;  %v3152_v36 = vpop.f32.mrf.mxu0  ;;  %v2550_v54 = vmax.f32 %v2146_v32, 0.0 }
 0x307   :  { %v3709_v20 = vmax.f32 %v3151_v59, 0.0  ;;  %v2150_v26 = vadd.f32 %v2149_v38, %v9951_v58  ;;  %v3153_v6 = vadd.f32 %v3152_v36, %v10230_v52  ;;  %3394 = vmatprep.mubr.bf16.mxu0 %v2727_v61  ;;  %v2551_v37 = vmax.f32 %v2148_v29, 0.0 }
 0x308   :  { %v2151_v39 = vpop.f32.mrf.mxu1  ;;  %v3156_v41 = vpop.f32.mrf.mxu0  ;;  %3395 = vmatmul.mubr.bf16.gmra.mxu0 %v2726_v44 }
 0x309   :  { %v10438_v48 = vpack.c.bf16 %v3709_v20, %v3707_v12  ;;  %v3710_v49 = vmax.f32 %v3153_v6, 0.0  ;;  %v2152_v62 = vadd.f32 %v2151_v39, %v9946_v25  ;;  %v2552_v18 = vmax.f32 %v2150_v26, 0.0 }
 0x30a   :  { %v2155_v24 = vpop.f32.mrf.mxu1  ;;  %v3158_v17 = vpop.f32.mrf.mxu0  ;;  %4276 = vmatmul.mubr.bf16.vlgmr.msra.gmra.mxu1 %v10244_v53  ;;  %v3157_v22 = vadd.f32 %v3156_v41, %v10224_v13 }
 0x30b   :  { %v2553_v0 = vmax.f32 %v2152_v62, 0.0  ;;  %4285 = vmatprep.mubr.bf16.mxu1 %v10264_v7  ;;  %v10444_v46 = vpack.c.bf16 %v3710_v49, %v3708_v31  ;;  %v2728_v21 = vpack.c.bf16 %v2552_v18, %v2550_v54  ;;  %v3159_v45 = vadd.f32 %v3158_v17, %v10230_v52 }
 0x30c   :  { %v2157_v42 = vpop.f32.mrf.mxu1  ;;  %v3160_v47 = vpop.f32.mrf.mxu0  ;;  %v3711_v53 = vmax.f32 %v3157_v22, 0.0  ;;  %v2156_v36 = vadd.f32 %v2155_v24, %v9951_v58 }
 0x30d   :  { %v3161_v55 = vadd.f32 %v3160_v47, %v10224_v13  ;;  %v2729_v44 = vpack.c.bf16 %v2553_v0, %v2551_v37  ;;  %v2158_v61 = vadd.f32 %v2157_v42, %v9946_v25  ;;  %v3712_v29 = vmax.f32 %v3159_v45, 0.0 }
 0x30e   :  { %v2159_v8 = vpop.f32.mrf.mxu1  ;;  %v3162_v59 = vpop.f32.mrf.mxu0  ;;  %v2554_v18 = vmax.f32 %v2156_v36, 0.0 }
 0x30f   :  { %v3713_v3 = vmax.f32 %v3161_v55, 0.0  ;;  %v2160_v38 = vadd.f32 %v2159_v8, %v9951_v58  ;;  %v3163_v7 = vadd.f32 %v3162_v59, %v10230_v52  ;;  %3404 = vmatprep.mubr.bf16.mxu0 %v2729_v44  ;;  %v2555_v24 = vmax.f32 %v2158_v61, 0.0 }
 0x310   :  { %v2161_v12 = vpop.f32.mrf.mxu1  ;;  %v3166_v20 = vpop.f32.mrf.mxu0  ;;  %3405 = vmatmul.mubr.bf16.gmra.mxu0 %v2728_v21 }
 0x311   :  { %v10452_v26 = vpack.c.bf16 %v3713_v3, %v3711_v53  ;;  %v3714_v6 = vmax.f32 %v3163_v7, 0.0  ;;  %v2162_v32 = vadd.f32 %v2161_v12, %v9946_v25  ;;  %v2556_v39 = vmax.f32 %v2160_v38, 0.0 }
 0x312   :  { %v2165_v41 = vpop.f32.mrf.mxu1  ;;  %v3168_v49 = vpop.f32.mrf.mxu0  ;;  %4286 = vmatmul.mubr.bf16.gmra.mxu1 %v10258_v9  ;;  %v3167_v31 = vadd.f32 %v3166_v20, %v10224_v13 }
 0x313   :  { %v2557_v62 = vmax.f32 %v2162_v32, 0.0  ;;  %4295 = vmatprep.mubr.bf16.mxu1 %v10278_v28  ;;  %v10458_v22 = vpack.c.bf16 %v3714_v6, %v3712_v29  ;;  %v2730_v37 = vpack.c.bf16 %v2556_v39, %v2554_v18  ;;  %v3169_v42 = vadd.f32 %v3168_v49, %v10230_v52  ;;  %v7871_v18 = vld [vmem:[%s13292_s9 + $0x48] sm:$0xff]  }
 0x314   :  { %v2167_v17 = vpop.f32.mrf.mxu1  ;;  %v3170_v0 = vpop.f32.mrf.mxu0  ;;  %v3715_v9 = vmax.f32 %v3167_v31, 0.0  ;;  %v2166_v59 = vadd.f32 %v2165_v41, %v9951_v58  ;;  %5464 = vmatpush2.bf16.msra.mxu0 %v7871_v18 }
 0x315   :  { %v3171_v54 = vadd.f32 %v3170_v0, %v10224_v13  ;;  %v2731_v21 = vpack.c.bf16 %v2557_v62, %v2555_v24  ;;  %v2168_v44 = vadd.f32 %v2167_v17, %v9946_v25  ;;  %v3716_v61 = vmax.f32 %v3169_v42, 0.0  ;;  %5465 = vmatprep.subr.bf16.mxu0 %v13379_v1 }
 0x316   :  { %v2169_v47 = vpop.f32.mrf.mxu1  ;;  %v3172_v55 = vpop.f32.mrf.mxu0  ;;  %v2558_v39 = vmax.f32 %v2166_v59, 0.0 }
 0x317   :  { %v3717_v45 = vmax.f32 %v3171_v54, 0.0  ;;  %v2170_v8 = vadd.f32 %v2169_v47, %v9951_v58  ;;  %v3173_v28 = vadd.f32 %v3172_v55, %v10230_v52  ;;  %3414 = vmatprep.mubr.bf16.mxu0 %v2731_v21  ;;  %v2559_v41 = vmax.f32 %v2168_v44, 0.0 }
 0x318   :  { %v2171_v53 = vpop.f32.mrf.mxu1  ;;  %v3176_v3 = vpop.f32.mrf.mxu0  ;;  %3415 = vmatmul.mubr.bf16.gmra.mxu0 %v2730_v37 }
 0x319   :  { %v10466_v38 = vpack.c.bf16 %v3717_v45, %v3715_v9  ;;  %v3718_v7 = vmax.f32 %v3173_v28, 0.0  ;;  %v2172_v36 = vadd.f32 %v2171_v53, %v9946_v25  ;;  %v2560_v12 = vmax.f32 %v2170_v8, 0.0 }
 0x31a   :  { %v2175_v20 = vpop.f32.mrf.mxu1  ;;  %v3178_v6 = vpop.f32.mrf.mxu0  ;;  %4296 = vmatmul.mubr.bf16.gmra.mxu1 %v10272_v34  ;;  %v3177_v29 = vadd.f32 %v3176_v3, %v10224_v13 }
 0x31b   :  { %v2561_v32 = vmax.f32 %v2172_v36, 0.0  ;;  %4305 = vmatprep.mubr.bf16.mxu1 %v10292_v63  ;;  %v10472_v31 = vpack.c.bf16 %v3718_v7, %v3716_v61  ;;  %v2732_v17 = vpack.c.bf16 %v2560_v12, %v2558_v39  ;;  %v3179_v34 = vadd.f32 %v3178_v6, %v10230_v52 }
 0x31c   :  { %v2177_v49 = vpop.f32.mrf.mxu1  ;;  %v3180_v62 = vpop.f32.mrf.mxu0  ;;  %v3719_v63 = vmax.f32 %v3177_v29, 0.0  ;;  %v2176_v21 = vadd.f32 %v2175_v20, %v9951_v58 }
 0x31d   :  { %v3181_v24 = vadd.f32 %v3180_v62, %v10224_v13  ;;  %v2733_v37 = vpack.c.bf16 %v2561_v32, %v2559_v41  ;;  %v2178_v9 = vadd.f32 %v2177_v49, %v9946_v25  ;;  %v3720_v53 = vmax.f32 %v3179_v34, 0.0 }
 0x31e   :  { %v2179_v0 = vpop.f32.mrf.mxu1  ;;  %v3182_v54 = vpop.f32.mrf.mxu0  ;;  %v2562_v12 = vmax.f32 %v2176_v21, 0.0 }
 0x31f   :  { %v3721_v42 = vmax.f32 %v3181_v24, 0.0  ;;  %v2180_v47 = vadd.f32 %v2179_v0, %v9951_v58  ;;  %v3183_v55 = vadd.f32 %v3182_v54, %v10230_v52  ;;  %3424 = vmatprep.mubr.bf16.mxu0 %v2733_v37  ;;  %v2563_v20 = vmax.f32 %v2178_v9, 0.0 }
 0x320   :  { %v2181_v45 = vpop.f32.mrf.mxu1  ;;  %v3186_v8 = vpop.f32.mrf.mxu0  ;;  %3425 = vmatmul.mubr.bf16.gmra.mxu0 %v2732_v17 }
 0x321   :  { %v10484_v28 = vpack.c.bf16 %v3721_v42, %v3719_v63  ;;  %v3722_v59 = vmax.f32 %v3183_v55, 0.0  ;;  %v2182_v44 = vadd.f32 %v2181_v45, %v9946_v25  ;;  %v2564_v3 = vmax.f32 %v2180_v47, 0.0 }
 0x322   :  { %v2185_v7 = vpop.f32.mrf.mxu1  ;;  %v3188_v36 = vpop.f32.mrf.mxu0  ;;  %4306 = vmatmul.mubr.bf16.gmra.mxu1 %v10286_v15  ;;  %v3187_v61 = vadd.f32 %v3186_v8, %v10224_v13 }
 0x323   :  { %v2565_v1 = vmax.f32 %v2182_v44, 0.0  ;;  %4315 = vmatprep.mubr.bf16.mxu1 %v10310_v60  ;;  %v10490_v29 = vpack.c.bf16 %v3722_v59, %v3720_v53  ;;  %v2734_v41 = vpack.c.bf16 %v2564_v3, %v2562_v12  ;;  %v3189_v49 = vadd.f32 %v3188_v36, %v10230_v52 }
 0x324   :  { %v2187_v6 = vpop.f32.mrf.mxu1  ;;  %v3190_v32 = vpop.f32.mrf.mxu0  ;;  %v3723_v15 = vmax.f32 %v3187_v61, 0.0  ;;  %v2186_v0 = vadd.f32 %v2185_v7, %v9951_v58 }
 0x325   :  { %v3191_v39 = vadd.f32 %v3190_v32, %v10224_v13  ;;  %v2735_v24 = vpack.c.bf16 %v2565_v1, %v2563_v20  ;;  %v2188_v54 = vadd.f32 %v2187_v6, %v9946_v25  ;;  %v3724_v21 = vmax.f32 %v3189_v49, 0.0 }
 0x326   :  { %v2189_v62 = vpop.f32.mrf.mxu1  ;;  %v3192_v18 = vpop.f32.mrf.mxu0  ;;  %v2566_v53 = vmax.f32 %v2186_v0, 0.0 }
 0x327   :  { %v3725_v17 = vmax.f32 %v3191_v39, 0.0  ;;  %v2190_v34 = vadd.f32 %v2189_v62, %v9951_v58  ;;  %v3193_v60 = vadd.f32 %v3192_v18, %v10230_v52  ;;  %3434 = vmatprep.mubr.bf16.mxu0 %v2735_v24  ;;  %v2567_v3 = vmax.f32 %v2188_v54, 0.0 }
 0x328   :  { %v2191_v37 = vpop.f32.mrf.mxu1  ;;  %v3196_v63 = vpop.f32.mrf.mxu0  ;;  %3435 = vmatmul.mubr.bf16.gmra.mxu0 %v2734_v41 }
 0x329   :  { %v10498_v42 = vpack.c.bf16 %v3725_v17, %v3723_v15  ;;  %v3726_v47 = vmax.f32 %v3193_v60, 0.0  ;;  %v2192_v55 = vadd.f32 %v2191_v37, %v9946_v25  ;;  %v2568_v9 = vmax.f32 %v2190_v34, 0.0 }
 0x32a   :  { %v2195_v45 = vpop.f32.mrf.mxu1  ;;  %v3198_v8 = vpop.f32.mrf.mxu0  ;;  %4316 = vmatmul.mubr.bf16.gmra.mxu1 %v10304_v50  ;;  %v3197_v44 = vadd.f32 %v3196_v63, %v10224_v13 }
 0x32b   :  { %v2569_v59 = vmax.f32 %v2192_v55, 0.0  ;;  %4325 = vmatprep.mubr.bf16.mxu1 %v10324_v35  ;;  %v10504_v1 = vpack.c.bf16 %v3726_v47, %v3724_v21  ;;  %v2736_v12 = vpack.c.bf16 %v2568_v9, %v2566_v53  ;;  %v3199_v20 = vadd.f32 %v3198_v8, %v10230_v52 }
 0x32c   :  { %v2197_v7 = vpop.f32.mrf.mxu1  ;;  %v3200_v36 = vpop.f32.mrf.mxu0  ;;  %v3727_v50 = vmax.f32 %v3197_v44, 0.0  ;;  %v2196_v62 = vadd.f32 %v2195_v45, %v9951_v58 }
 0x32d   :  { %v3201_v61 = vadd.f32 %v3200_v36, %v10224_v13  ;;  %v2737_v39 = vpack.c.bf16 %v2569_v59, %v2567_v3  ;;  %v2198_v18 = vadd.f32 %v2197_v7, %v9946_v25  ;;  %v3728_v0 = vmax.f32 %v3199_v20, 0.0 }
 0x32e   :  { %v2199_v6 = vpop.f32.mrf.mxu1  ;;  %v3202_v32 = vpop.f32.mrf.mxu0  ;;  %v2570_v21 = vmax.f32 %v2196_v62, 0.0 }
 0x32f   :  { %v3729_v41 = vmax.f32 %v3201_v61, 0.0  ;;  %v2200_v49 = vadd.f32 %v2199_v6, %v9951_v58  ;;  %v3203_v35 = vadd.f32 %v3202_v32, %v10230_v52  ;;  %3444 = vmatprep.mubr.bf16.mxu0 %v2737_v39  ;;  %v2571_v9 = vmax.f32 %v2198_v18, 0.0 }
 0x330   :  { %v2201_v24 = vpop.f32.mrf.mxu1  ;;  %v3206_v15 = vpop.f32.mrf.mxu0  ;;  %3445 = vmatmul.mubr.bf16.gmra.mxu0 %v2736_v12 }
 0x331   :  { %v10512_v17 = vpack.c.bf16 %v3729_v41, %v3727_v50  ;;  %v3730_v34 = vmax.f32 %v3203_v35, 0.0  ;;  %v2202_v60 = vadd.f32 %v2201_v24, %v9946_v25  ;;  %v2572_v54 = vmax.f32 %v2200_v49, 0.0 }
 0x332   :  { %v2205_v37 = vpop.f32.mrf.mxu1  ;;  %v3208_v63 = vpop.f32.mrf.mxu0  ;;  %4326 = vmatmul.mubr.bf16.gmra.mxu1 %v10318_v57  ;;  %v3207_v55 = vadd.f32 %v3206_v15, %v10224_v13 }
 0x333   :  { %v2573_v47 = vmax.f32 %v2202_v60, 0.0  ;;  %4335 = vmatprep.mubr.bf16.mxu1 %v10338_v51  ;;  %v10518_v59 = vpack.c.bf16 %v3730_v34, %v3728_v0  ;;  %v2738_v53 = vpack.c.bf16 %v2572_v54, %v2570_v21  ;;  %v3209_v3 = vadd.f32 %v3208_v63, %v10230_v52 }
 0x334   :  { %v2207_v45 = vpop.f32.mrf.mxu1  ;;  %v3210_v8 = vpop.f32.mrf.mxu0  ;;  %v3731_v57 = vmax.f32 %v3207_v55, 0.0  ;;  %v2206_v6 = vadd.f32 %v2205_v37, %v9951_v58  ;;  %v7872_v55 = vld [vmem:[%s13292_s9 + $0x40] sm:$0xff]  }
 0x335   :  { %v3211_v44 = vadd.f32 %v3210_v8, %v10224_v13  ;;  %v2739_v61 = vpack.c.bf16 %v2573_v47, %v2571_v9  ;;  %v2208_v32 = vadd.f32 %v2207_v45, %v9946_v25  ;;  %v3732_v62 = vmax.f32 %v3209_v3, 0.0  ;;  %5466 = vmatpush2.bf16.msra.mxu0 %v7872_v55 }
 0x336   :  { %v2209_v7 = vpop.f32.mrf.mxu1  ;;  %v3212_v36 = vpop.f32.mrf.mxu0  ;;  %v2574_v0 = vmax.f32 %v2206_v6, 0.0 }
 0x337   :  { %v3733_v12 = vmax.f32 %v3211_v44, 0.0  ;;  %v2210_v20 = vadd.f32 %v2209_v7, %v9951_v58  ;;  %v3213_v51 = vadd.f32 %v3212_v36, %v10230_v52  ;;  %3454 = vmatprep.mubr.bf16.mxu0 %v2739_v61  ;;  %v2575_v54 = vmax.f32 %v2208_v32, 0.0 }
 0x338   :  { %v2211_v39 = vpop.f32.mrf.mxu1  ;;  %v3216_v50 = vpop.f32.mrf.mxu0  ;;  %3455 = vmatmul.mubr.bf16.gmra.mxu0 %v2738_v53 }
 0x339   :  { %v10526_v41 = vpack.c.bf16 %v3733_v12, %v3731_v57  ;;  %v3734_v49 = vmax.f32 %v3213_v51, 0.0  ;;  %v2212_v35 = vadd.f32 %v2211_v39, %v9946_v25  ;;  %v2576_v18 = vmax.f32 %v2210_v20, 0.0 }
 0x33a   :  { %v2215_v24 = vpop.f32.mrf.mxu1  ;;  %v3218_v15 = vpop.f32.mrf.mxu0  ;;  %4336 = vmatmul.mubr.bf16.gmra.mxu1 %v10332_v23  ;;  %v3217_v60 = vadd.f32 %v3216_v50, %v10224_v13 }
 0x33b   :  { %v2577_v34 = vmax.f32 %v2212_v35, 0.0  ;;  %4345 = vmatprep.mubr.bf16.mxu1 %v10352_v33  ;;  %v10532_v47 = vpack.c.bf16 %v3734_v49, %v3732_v62  ;;  %v2740_v9 = vpack.c.bf16 %v2576_v18, %v2574_v0  ;;  %v3219_v23 = vadd.f32 %v3218_v15, %v10230_v52 }
 0x33c   :  { %v2217_v37 = vpop.f32.mrf.mxu1  ;;  %v3220_v63 = vpop.f32.mrf.mxu0  ;;  %v3735_v33 = vmax.f32 %v3217_v60, 0.0  ;;  %v2216_v36 = vadd.f32 %v2215_v24, %v9951_v58 }
 0x33d   :  { %v3221_v21 = vadd.f32 %v3220_v63, %v10224_v13  ;;  %v2741_v44 = vpack.c.bf16 %v2577_v34, %v2575_v54  ;;  %v2218_v61 = vadd.f32 %v2217_v37, %v9946_v25  ;;  %v3736_v32 = vmax.f32 %v3219_v23, 0.0 }
 0x33e   :  { %v2219_v45 = vpop.f32.mrf.mxu1  ;;  %v3222_v8 = vpop.f32.mrf.mxu0  ;;  %v2578_v18 = vmax.f32 %v2216_v36, 0.0 }
 0x33f   :  { %v3737_v53 = vmax.f32 %v3221_v21, 0.0  ;;  %v2220_v3 = vadd.f32 %v2219_v45, %v9951_v58  ;;  %v3223_v7 = vadd.f32 %v3222_v8, %v10230_v52  ;;  %3464 = vmatprep.mubr.bf16.mxu0 %v2741_v44  ;;  %v2579_v24 = vmax.f32 %v2218_v61, 0.0 }
 0x340   :  { %v2221_v57 = vpop.f32.mrf.mxu1  ;;  %v3226_v12 = vpop.f32.mrf.mxu0  ;;  %3465 = vmatmul.mubr.bf16.gmra.mxu0 %v2740_v9 }
 0x341   :  { %v10543_v20 = vpack.c.bf16 %v3737_v53, %v3735_v33  ;;  %v3738_v51 = vmax.f32 %v3223_v7, 0.0  ;;  %v2222_v6 = vadd.f32 %v2221_v57, %v9946_v25  ;;  %v2580_v39 = vmax.f32 %v2220_v3, 0.0 }
 0x342   :  { %v2225_v50 = vpop.f32.mrf.mxu1  ;;  %v3228_v49 = vpop.f32.mrf.mxu0  ;;  %4346 = vmatmul.mubr.bf16.gmra.mxu1 %v10346_v56  ;;  %v3227_v62 = vadd.f32 %v3226_v12, %v10224_v13 }
 0x343   :  { %v2581_v35 = vmax.f32 %v2222_v6, 0.0  ;;  %4355 = vmatprep.mubr.bf16.mxu1 %v10370_v10  ;;  %v10549_v60 = vpack.c.bf16 %v3738_v51, %v3736_v32  ;;  %v2742_v54 = vpack.c.bf16 %v2580_v39, %v2578_v18  ;;  %v3229_v37 = vadd.f32 %v3228_v49, %v10230_v52 }
 0x344   :  { %v2227_v15 = vpop.f32.mrf.mxu1  ;;  %v3230_v34 = vpop.f32.mrf.mxu0  ;;  %v3739_v56 = vmax.f32 %v3227_v62, 0.0  ;;  %v2226_v45 = vadd.f32 %v2225_v50, %v9951_v58 }
 0x345   :  { %v3231_v0 = vadd.f32 %v3230_v34, %v10224_v13  ;;  %v2743_v21 = vpack.c.bf16 %v2581_v35, %v2579_v24  ;;  %v2228_v8 = vadd.f32 %v2227_v15, %v9946_v25  ;;  %v3740_v36 = vmax.f32 %v3229_v37, 0.0 }
 0x346   :  { %v2229_v63 = vpop.f32.mrf.mxu1  ;;  %v3232_v55 = vpop.f32.mrf.mxu0  ;;  %v2582_v32 = vmax.f32 %v2226_v45, 0.0 }
 0x347   :  { %v3741_v9 = vmax.f32 %v3231_v0, 0.0  ;;  %v2230_v23 = vadd.f32 %v2229_v63, %v9951_v58  ;;  %v3233_v10 = vadd.f32 %v3232_v55, %v10230_v52  ;;  %3474 = vmatprep.mubr.bf16.mxu0 %v2743_v21  ;;  %v2583_v39 = vmax.f32 %v2228_v8, 0.0 }
 0x348   :  { %v2231_v44 = vpop.f32.mrf.mxu1  ;;  %v3236_v33 = vpop.f32.mrf.mxu0  ;;  %3475 = vmatmul.mubr.bf16.gmra.mxu0 %v2742_v54 }
 0x349   :  { %v10557_v53 = vpack.c.bf16 %v3741_v9, %v3739_v56  ;;  %v3742_v3 = vmax.f32 %v3233_v10, 0.0  ;;  %v2232_v7 = vadd.f32 %v2231_v44, %v9946_v25  ;;  %v2584_v61 = vmax.f32 %v2230_v23, 0.0 }
 0x34a   :  { %v2235_v57 = vpop.f32.mrf.mxu1  ;;  %v3238_v12 = vpop.f32.mrf.mxu0  ;;  %4356 = vmatmul.mubr.bf16.gmra.mxu1 %v10364_v30  ;;  %v3237_v6 = vadd.f32 %v3236_v33, %v10224_v13 }
 0x34b   :  { %v2585_v51 = vmax.f32 %v2232_v7, 0.0  ;;  %4365 = vmatprep.mubr.bf16.mxu1 %v10384_v43  ;;  %v10563_v35 = vpack.c.bf16 %v3742_v3, %v3740_v36  ;;  %v2744_v18 = vpack.c.bf16 %v2584_v61, %v2582_v32  ;;  %v3239_v24 = vadd.f32 %v3238_v12, %v10230_v52 }
 0x34c   :  { %v2237_v50 = vpop.f32.mrf.mxu1  ;;  %v3240_v49 = vpop.f32.mrf.mxu0  ;;  %v3743_v30 = vmax.f32 %v3237_v6, 0.0  ;;  %v2236_v63 = vadd.f32 %v2235_v57, %v9951_v58 }
 0x34d   :  { %v3241_v62 = vadd.f32 %v3240_v49, %v10224_v13  ;;  %v2745_v0 = vpack.c.bf16 %v2585_v51, %v2583_v39  ;;  %v2238_v55 = vadd.f32 %v2237_v50, %v9946_v25  ;;  %v3744_v45 = vmax.f32 %v3239_v24, 0.0 }
 0x34e   :  { %v2239_v15 = vpop.f32.mrf.mxu1  ;;  %v3242_v34 = vpop.f32.mrf.mxu0  ;;  %v2586_v36 = vmax.f32 %v2236_v63, 0.0 }
 0x34f   :  { %v3745_v54 = vmax.f32 %v3241_v62, 0.0  ;;  %v2240_v37 = vadd.f32 %v2239_v15, %v9951_v58  ;;  %v3243_v43 = vadd.f32 %v3242_v34, %v10230_v52  ;;  %3484 = vmatprep.mubr.bf16.mxu0 %v2745_v0  ;;  %v2587_v61 = vmax.f32 %v2238_v55, 0.0 }
 0x350   :  { %v2241_v21 = vpop.f32.mrf.mxu1  ;;  %v3246_v56 = vpop.f32.mrf.mxu0  ;;  %3485 = vmatmul.mubr.bf16.gmra.mxu0 %v2744_v18 }
 0x351   :  { %v10571_v9 = vpack.c.bf16 %v3745_v54, %v3743_v30  ;;  %v3746_v23 = vmax.f32 %v3243_v43, 0.0  ;;  %v2242_v10 = vadd.f32 %v2241_v21, %v9946_v25  ;;  %v2588_v8 = vmax.f32 %v2240_v37, 0.0 }
 0x352   :  { %v2245_v44 = vpop.f32.mrf.mxu1  ;;  %v3248_v33 = vpop.f32.mrf.mxu0  ;;  %4366 = vmatmul.mubr.bf16.gmra.mxu1 %v10378_v4  ;;  %v3247_v7 = vadd.f32 %v3246_v56, %v10224_v13 }
 0x353   :  { %v2589_v3 = vmax.f32 %v2242_v10, 0.0  ;;  %4375 = vmatprep.mubr.bf16.mxu1 %v10398_v40  ;;  %v10577_v51 = vpack.c.bf16 %v3746_v23, %v3744_v45  ;;  %v2746_v32 = vpack.c.bf16 %v2588_v8, %v2586_v36  ;;  %v3249_v39 = vadd.f32 %v3248_v33, %v10230_v52 }
 0x354   :  { %v2247_v57 = vpop.f32.mrf.mxu1  ;;  %v3250_v12 = vpop.f32.mrf.mxu0  ;;  %v3747_v4 = vmax.f32 %v3247_v7, 0.0  ;;  %v2246_v15 = vadd.f32 %v2245_v44, %v9951_v58 }
 0x355   :  { %v3251_v6 = vadd.f32 %v3250_v12, %v10224_v13  ;;  %v2747_v62 = vpack.c.bf16 %v2589_v3, %v2587_v61  ;;  %v2248_v34 = vadd.f32 %v2247_v57, %v9946_v25  ;;  %v3748_v63 = vmax.f32 %v3249_v39, 0.0 }
 0x356   :  { %v2249_v50 = vpop.f32.mrf.mxu1  ;;  %v3252_v49 = vpop.f32.mrf.mxu0  ;;  %v2590_v45 = vmax.f32 %v2246_v15, 0.0 }
 0x357   :  { %v3749_v18 = vmax.f32 %v3251_v6, 0.0  ;;  %v2250_v24 = vadd.f32 %v2249_v50, %v9951_v58  ;;  %v3253_v40 = vadd.f32 %v3252_v49, %v10230_v52  ;;  %3494 = vmatprep.mubr.bf16.mxu0 %v2747_v62  ;;  %v2591_v8 = vmax.f32 %v2248_v34, 0.0 }
 0x358   :  { %v2251_v0 = vpop.f32.mrf.mxu1  ;;  %v3256_v30 = vpop.f32.mrf.mxu0  ;;  %3495 = vmatmul.mubr.bf16.gmra.mxu0 %v2746_v32 }
 0x359   :  { %v10585_v54 = vpack.c.bf16 %v3749_v18, %v3747_v4  ;;  %v3750_v37 = vmax.f32 %v3253_v40, 0.0  ;;  %v2252_v43 = vadd.f32 %v2251_v0, %v9946_v25  ;;  %v2592_v55 = vmax.f32 %v2250_v24, 0.0 }
 0x35a   :  { %v2255_v21 = vpop.f32.mrf.mxu1  ;;  %v3258_v56 = vpop.f32.mrf.mxu0  ;;  %4376 = vmatmul.mubr.bf16.gmra.mxu1 %v10392_v19  ;;  %v3257_v10 = vadd.f32 %v3256_v30, %v10224_v13 }
 0x35b   :  { %v2593_v23 = vmax.f32 %v2252_v43, 0.0  ;;  %4385 = vmatprep.mubr.bf16.mxu1 %v10412_v16  ;;  %v10591_v3 = vpack.c.bf16 %v3750_v37, %v3748_v63  ;;  %v2748_v36 = vpack.c.bf16 %v2592_v55, %v2590_v45  ;;  %v3259_v61 = vadd.f32 %v3258_v56, %v10230_v52 }
 0x35c   :  { %v2257_v44 = vpop.f32.mrf.mxu1  ;;  %v3260_v33 = vpop.f32.mrf.mxu0  ;;  %v3751_v19 = vmax.f32 %v3257_v10, 0.0  ;;  %v2256_v50 = vadd.f32 %v2255_v21, %v9951_v58 }
 0x35d   :  { %v3261_v7 = vadd.f32 %v3260_v33, %v10224_v13  ;;  %v2749_v6 = vpack.c.bf16 %v2593_v23, %v2591_v8  ;;  %v2258_v49 = vadd.f32 %v2257_v44, %v9946_v25  ;;  %v3752_v15 = vmax.f32 %v3259_v61, 0.0 }
 0x35e   :  { %v2259_v57 = vpop.f32.mrf.mxu1  ;;  %v3262_v12 = vpop.f32.mrf.mxu0  ;;  %v2594_v63 = vmax.f32 %v2256_v50, 0.0 }
 0x35f   :  { %v3753_v32 = vmax.f32 %v3261_v7, 0.0  ;;  %v2260_v39 = vadd.f32 %v2259_v57, %v9951_v58  ;;  %v3263_v16 = vadd.f32 %v3262_v12, %v10230_v52  ;;  %3504 = vmatprep.mubr.bf16.mxu0 %v2749_v6  ;;  %v2595_v55 = vmax.f32 %v2258_v49, 0.0 }
 0x360   :  { %v2261_v62 = vpop.f32.mrf.mxu1  ;;  %v3266_v4 = vpop.f32.mrf.mxu0  ;;  %3505 = vmatmul.mubr.bf16.gmra.mxu0 %v2748_v36 }
 0x361   :  { %v10599_v18 = vpack.c.bf16 %v3753_v32, %v3751_v19  ;;  %v3754_v24 = vmax.f32 %v3263_v16, 0.0  ;;  %v2262_v40 = vadd.f32 %v2261_v62, %v9946_v25  ;;  %v2596_v34 = vmax.f32 %v2260_v39, 0.0 }
 0x362   :  { %v3267_v0 = vadd.f32 %v3266_v4, %v10224_v13  ;;  %v2265_v30 = vpop.f32.mrf.mxu1  ;;  %v3268_v37 = vpop.f32.mrf.mxu0  ;;  %4386 = vmatmul.mubr.bf16.gmra.mxu1 %v10406_v27 }
 0x363   :  { %v2597_v43 = vmax.f32 %v2262_v40, 0.0  ;;  %4395 = vmatprep.mubr.bf16.mxu1 %v10430_v2  ;;  %v10605_v23 = vpack.c.bf16 %v3754_v24, %v3752_v15  ;;  %v3269_v10 = vadd.f32 %v3268_v37, %v10230_v52  ;;  %v2750_v8 = vpack.c.bf16 %v2596_v34, %v2594_v63 }
 0x364   :  { %v2267_v21 = vpop.f32.mrf.mxu1  ;;  %v3270_v56 = vpop.f32.mrf.mxu0  ;;  %v3755_v44 = vmax.f32 %v3267_v0, 0.0  ;;  %v2266_v12 = vadd.f32 %v2265_v30, %v9951_v58 }
 0x365   :  { %v3271_v45 = vadd.f32 %v3270_v56, %v10224_v13  ;;  %v2751_v36 = vpack.c.bf16 %v2597_v43, %v2595_v55  ;;  %v2268_v27 = vadd.f32 %v2267_v21, %v9946_v25  ;;  %v3756_v19 = vmax.f32 %v3269_v10, 0.0 }
 0x366   :  { %v2269_v33 = vpop.f32.mrf.mxu1  ;;  %v3272_v7 = vpop.f32.mrf.mxu0  ;;  %v2598_v30 = vmax.f32 %v2266_v12, 0.0 }
 0x367   :  { %v3757_v61 = vmax.f32 %v3271_v45, 0.0  ;;  %v2270_v2 = vadd.f32 %v2269_v33, %v9951_v58  ;;  %v3273_v57 = vadd.f32 %v3272_v7, %v10230_v52  ;;  %3514 = vmatprep.mubr.bf16.mxu0 %v2751_v36  ;;  %v2599_v62 = vmax.f32 %v2268_v27, 0.0 }
 0x368   :  { %v2271_v6 = vpop.f32.mrf.mxu1  ;;  %v3276_v50 = vpop.f32.mrf.mxu0  ;;  %3515 = vmatmul.mubr.bf16.gmra.mxu0 %v2750_v8 }
 0x369   :  { %v10613_v32 = vpack.c.bf16 %v3757_v61, %v3755_v44  ;;  %v3758_v39 = vmax.f32 %v3273_v57, 0.0  ;;  %v2272_v16 = vadd.f32 %v2271_v6, %v9946_v25  ;;  %v2600_v4 = vmax.f32 %v2270_v2, 0.0 }
 0x36a   :  { %v2275_v49 = vpop.f32.mrf.mxu1  ;;  %4396 = vmatmul.mubr.bf16.gmra.mxu1 %v10424_v5  ;;  %v3278_v40 = vpop.f32.mrf.mxu0  ;;  %v3277_v34 = vadd.f32 %v3276_v50, %v10224_v13 }
 0x36b   :  { %v2601_v24 = vmax.f32 %v2272_v16, 0.0  ;;  %4405 = vmatprep.mubr.bf16.mxu1 %v10444_v46  ;;  %v10618_v15 = vpack.c.bf16 %v3758_v39, %v3756_v19  ;;  %v3279_v63 = vadd.f32 %v3278_v40, %v10230_v52  ;;  %v2752_v5 = vpack.c.bf16 %v2600_v4, %v2598_v30 }
 0x36c   :  { %v2277_v0 = vpop.f32.mrf.mxu1  ;;  %v3280_v37 = vpop.f32.mrf.mxu0  ;;  %v3759_v46 = vmax.f32 %v3277_v34, 0.0  ;;  %v2276_v7 = vadd.f32 %v2275_v49, %v9951_v58 }
 0x36d   :  { %v2753_v43 = vpack.c.bf16 %v2601_v24, %v2599_v62  ;;  %v3281_v55 = vadd.f32 %v3280_v37, %v10224_v13  ;;  %v2278_v56 = vadd.f32 %v2277_v0, %v9946_v25  ;;  %v3760_v61 = vmax.f32 %v3279_v63, 0.0 }
 0x36e   :  { %v2279_v21 = vpop.f32.mrf.mxu1  ;;  %v3282_v45 = vpop.f32.mrf.mxu0  ;;  %v2602_v4 = vmax.f32 %v2276_v7, 0.0 }
 0x36f   :  { %v2280_v10 = vadd.f32 %v2279_v21, %v9951_v58  ;;  %3524 = vmatprep.mubr.bf16.mxu0 %v2753_v43  ;;  %v3761_v8 = vmax.f32 %v3281_v55, 0.0  ;;  %v3283_v44 = vadd.f32 %v3282_v45, %v10230_v52  ;;  %v2603_v6 = vmax.f32 %v2278_v56, 0.0 }
 0x370   :  { %v2281_v33 = vpop.f32.mrf.mxu1  ;;  %v3286_v27 = vpop.f32.mrf.mxu0  ;;  %3525 = vmatmul.mubr.bf16.gmra.mxu0 %v2752_v5 }
 0x371   :  { %v2282_v36 = vadd.f32 %v2281_v33, %v9946_v25  ;;  %v10628_v2 = vpack.c.bf16 %v3761_v8, %v3759_v46  ;;  %v3762_v57 = vmax.f32 %v3283_v44, 0.0  ;;  %v2604_v19 = vmax.f32 %v2280_v10, 0.0 }
 0x372   :  { %v2285_v12 = vpop.f32.mrf.mxu1  ;;  %4406 = vmatmul.mubr.bf16.gmra.mxu1 %v10438_v48  ;;  %v3288_v16 = vpop.f32.mrf.mxu0  ;;  %v3287_v50 = vadd.f32 %v3286_v27, %v10224_v13 }
 0x373   :  { %v2605_v39 = vmax.f32 %v2282_v36, 0.0  ;;  %4415 = vmatprep.mubr.bf16.mxu1 %v10458_v22  ;;  %v10633_v62 = vpack.c.bf16 %v3762_v57, %v3760_v61  ;;  %v3289_v34 = vadd.f32 %v3288_v16, %v10230_v52  ;;  %v2754_v48 = vpack.c.bf16 %v2604_v19, %v2602_v4 }
 0x374   :  { %v2287_v49 = vpop.f32.mrf.mxu1  ;;  %v3290_v24 = vpop.f32.mrf.mxu0  ;;  %v3763_v22 = vmax.f32 %v3287_v50, 0.0  ;;  %v2286_v56 = vadd.f32 %v2285_v12, %v9951_v58 }
 0x375   :  { %v2755_v40 = vpack.c.bf16 %v2605_v39, %v2603_v6  ;;  %v3291_v0 = vadd.f32 %v3290_v24, %v10224_v13  ;;  %v2288_v37 = vadd.f32 %v2287_v49, %v9946_v25  ;;  %v3764_v46 = vmax.f32 %v3289_v34, 0.0 }
 0x376   :  { %v2289_v30 = vpop.f32.mrf.mxu1  ;;  %v3292_v63 = vpop.f32.mrf.mxu0  ;;  %v2606_v19 = vmax.f32 %v2286_v56, 0.0 }
 0x377   :  { %v2290_v43 = vadd.f32 %v2289_v30, %v9951_v58  ;;  %3534 = vmatprep.mubr.bf16.mxu0 %v2755_v40  ;;  %v3765_v55 = vmax.f32 %v3291_v0, 0.0  ;;  %v3293_v21 = vadd.f32 %v3292_v63, %v10230_v52  ;;  %v2607_v7 = vmax.f32 %v2288_v37, 0.0 }
 0x378   :  { %v2291_v5 = vpop.f32.mrf.mxu1  ;;  %v3296_v45 = vpop.f32.mrf.mxu0  ;;  %3535 = vmatmul.mubr.bf16.gmra.mxu0 %v2754_v48 }
 0x379   :  { %v2292_v10 = vadd.f32 %v2291_v5, %v9946_v25  ;;  %v10642_v8 = vpack.c.bf16 %v3765_v55, %v3763_v22  ;;  %v3766_v44 = vmax.f32 %v3293_v21, 0.0  ;;  %v2608_v36 = vmax.f32 %v2290_v43, 0.0 }
 0x37a   :  { %v2295_v33 = vpop.f32.mrf.mxu1  ;;  %4416 = vmatmul.mubr.bf16.gmra.mxu1 %v10452_v26  ;;  %v3298_v61 = vpop.f32.mrf.mxu0  ;;  %v3297_v57 = vadd.f32 %v3296_v45, %v10224_v13 }
 0x37b   :  { %v2609_v27 = vmax.f32 %v2292_v10, 0.0  ;;  %4425 = vmatprep.mubr.bf16.mxu1 %v10472_v31  ;;  %v10647_v6 = vpack.c.bf16 %v3766_v44, %v3764_v46  ;;  %v3299_v50 = vadd.f32 %v3298_v61, %v10230_v52  ;;  %v2756_v26 = vpack.c.bf16 %v2608_v36, %v2606_v19 }
 0x37c   :  { %v2297_v12 = vpop.f32.mrf.mxu1  ;;  %v3300_v39 = vpop.f32.mrf.mxu0  ;;  %v3767_v31 = vmax.f32 %v3297_v57, 0.0  ;;  %v2296_v37 = vadd.f32 %v2295_v33, %v9951_v58 }
 0x37d   :  { %v2757_v16 = vpack.c.bf16 %v2609_v27, %v2607_v7  ;;  %v3301_v49 = vadd.f32 %v3300_v39, %v10224_v13  ;;  %v2298_v24 = vadd.f32 %v2297_v12, %v9946_v25  ;;  %v3768_v22 = vmax.f32 %v3299_v50, 0.0 }
 0x37e   :  { %v2299_v4 = vpop.f32.mrf.mxu1  ;;  %v3302_v34 = vpop.f32.mrf.mxu0  ;;  %v2610_v36 = vmax.f32 %v2296_v37, 0.0 }
 0x37f   :  { %v2300_v40 = vadd.f32 %v2299_v4, %v9951_v58  ;;  %3544 = vmatprep.mubr.bf16.mxu0 %v2757_v16  ;;  %v3769_v0 = vmax.f32 %v3301_v49, 0.0  ;;  %v3303_v30 = vadd.f32 %v3302_v34, %v10230_v52  ;;  %v2611_v56 = vmax.f32 %v2298_v24, 0.0 }
 0x380   :  { %v2301_v48 = vpop.f32.mrf.mxu1  ;;  %v3306_v63 = vpop.f32.mrf.mxu0  ;;  %3545 = vmatmul.mubr.bf16.gmra.mxu0 %v2756_v26 }
 0x381   :  { %v2302_v43 = vadd.f32 %v2301_v48, %v9946_v25  ;;  %v10656_v55 = vpack.c.bf16 %v3769_v0, %v3767_v31  ;;  %v3770_v21 = vmax.f32 %v3303_v30, 0.0  ;;  %v2612_v10 = vmax.f32 %v2300_v40, 0.0 }
 0x382   :  { %v2305_v5 = vpop.f32.mrf.mxu1  ;;  %4426 = vmatmul.mubr.bf16.gmra.mxu1 %v10466_v38  ;;  %v3308_v46 = vpop.f32.mrf.mxu0  ;;  %v3307_v44 = vadd.f32 %v3306_v63, %v10224_v13 }
 0x383   :  { %v2613_v45 = vmax.f32 %v2302_v43, 0.0  ;;  %4435 = vmatprep.mubr.bf16.mxu1 %v10490_v29  ;;  %v10661_v7 = vpack.c.bf16 %v3770_v21, %v3768_v22  ;;  %v3309_v57 = vadd.f32 %v3308_v46, %v10230_v52  ;;  %v2758_v38 = vpack.c.bf16 %v2612_v10, %v2610_v36 }
 0x384   :  { %v2307_v33 = vpop.f32.mrf.mxu1  ;;  %v3310_v27 = vpop.f32.mrf.mxu0  ;;  %v3771_v29 = vmax.f32 %v3307_v44, 0.0  ;;  %v2306_v24 = vadd.f32 %v2305_v5, %v9951_v58 }
 0x385   :  { %v2759_v61 = vpack.c.bf16 %v2613_v45, %v2611_v56  ;;  %v3311_v12 = vadd.f32 %v3310_v27, %v10224_v13  ;;  %v2308_v39 = vadd.f32 %v2307_v33, %v9946_v25  ;;  %v3772_v31 = vmax.f32 %v3309_v57, 0.0 }
 0x386   :  { %v2309_v19 = vpop.f32.mrf.mxu1  ;;  %v3312_v50 = vpop.f32.mrf.mxu0  ;;  %v2614_v10 = vmax.f32 %v2306_v24, 0.0 }
 0x387   :  { %v2310_v16 = vadd.f32 %v2309_v19, %v9951_v58  ;;  %3554 = vmatprep.mubr.bf16.mxu0 %v2759_v61  ;;  %v3773_v49 = vmax.f32 %v3311_v12, 0.0  ;;  %v3313_v4 = vadd.f32 %v3312_v50, %v10230_v52  ;;  %v2615_v37 = vmax.f32 %v2308_v39, 0.0 }
 0x388   :  { %v2311_v26 = vpop.f32.mrf.mxu1  ;;  %v3316_v34 = vpop.f32.mrf.mxu0  ;;  %3555 = vmatmul.mubr.bf16.gmra.mxu0 %v2758_v38 }
 0x389   :  { %v2312_v40 = vadd.f32 %v2311_v26, %v9946_v25  ;;  %v10670_v0 = vpack.c.bf16 %v3773_v49, %v3771_v29  ;;  %v3774_v30 = vmax.f32 %v3313_v4, 0.0  ;;  %v2616_v43 = vmax.f32 %v2310_v16, 0.0 }
 0x38a   :  { %v2315_v48 = vpop.f32.mrf.mxu1  ;;  %4436 = vmatmul.mubr.bf16.gmra.mxu1 %v10484_v28  ;;  %v3318_v22 = vpop.f32.mrf.mxu0  ;;  %v3317_v21 = vadd.f32 %v3316_v34, %v10224_v13 }
 0x38b   :  { %v2617_v63 = vmax.f32 %v2312_v40, 0.0  ;;  %4445 = vmatprep.mubr.bf16.mxu1 %v10504_v1  ;;  %v10675_v56 = vpack.c.bf16 %v3774_v30, %v3772_v31  ;;  %v3319_v44 = vadd.f32 %v3318_v22, %v10230_v52  ;;  %v2760_v28 = vpack.c.bf16 %v2616_v43, %v2614_v10 }
 0x38c   :  { %v2317_v5 = vpop.f32.mrf.mxu1  ;;  %v3320_v45 = vpop.f32.mrf.mxu0  ;;  %v3775_v1 = vmax.f32 %v3317_v21, 0.0  ;;  %v2316_v39 = vadd.f32 %v2315_v48, %v9951_v58 }
 0x38d   :  { %v2761_v46 = vpack.c.bf16 %v2617_v63, %v2615_v37  ;;  %v3321_v33 = vadd.f32 %v3320_v45, %v10224_v13  ;;  %v2318_v27 = vadd.f32 %v2317_v5, %v9946_v25  ;;  %v3776_v29 = vmax.f32 %v3319_v44, 0.0 }
 0x38e   :  { %v2319_v36 = vpop.f32.mrf.mxu1  ;;  %v3322_v57 = vpop.f32.mrf.mxu0  ;;  %v2618_v43 = vmax.f32 %v2316_v39, 0.0 }
 0x38f   :  { %v2320_v61 = vadd.f32 %v2319_v36, %v9951_v58  ;;  %3564 = vmatprep.mubr.bf16.mxu0 %v2761_v46  ;;  %v3777_v12 = vmax.f32 %v3321_v33, 0.0  ;;  %v3323_v19 = vadd.f32 %v3322_v57, %v10230_v52  ;;  %v2619_v24 = vmax.f32 %v2318_v27, 0.0 }
 0x390   :  { %v2321_v38 = vpop.f32.mrf.mxu1  ;;  %v3326_v50 = vpop.f32.mrf.mxu0  ;;  %3565 = vmatmul.mubr.bf16.gmra.mxu0 %v2760_v28 }
 0x391   :  { %v2322_v16 = vadd.f32 %v2321_v38, %v9946_v25  ;;  %v10684_v49 = vpack.c.bf16 %v3777_v12, %v3775_v1  ;;  %v3778_v4 = vmax.f32 %v3323_v19, 0.0  ;;  %v2620_v40 = vmax.f32 %v2320_v61, 0.0 }
 0x392   :  { %v2325_v26 = vpop.f32.mrf.mxu1  ;;  %4446 = vmatmul.mubr.bf16.gmra.mxu1 %v10498_v42  ;;  %v3328_v31 = vpop.f32.mrf.mxu0  ;;  %v3327_v30 = vadd.f32 %v3326_v50, %v10224_v13 }
 0x393   :  { %v2621_v34 = vmax.f32 %v2322_v16, 0.0  ;;  %4455 = vmatprep.mubr.bf16.mxu1 %v10518_v59  ;;  %v10689_v37 = vpack.c.bf16 %v3778_v4, %v3776_v29  ;;  %v3329_v21 = vadd.f32 %v3328_v31, %v10230_v52  ;;  %v2762_v42 = vpack.c.bf16 %v2620_v40, %v2618_v43 }
 0x394   :  { %v2327_v48 = vpop.f32.mrf.mxu1  ;;  %v3330_v63 = vpop.f32.mrf.mxu0  ;;  %v3779_v59 = vmax.f32 %v3327_v30, 0.0  ;;  %v2326_v27 = vadd.f32 %v2325_v26, %v9951_v58 }
 0x395   :  { %v2763_v22 = vpack.c.bf16 %v2621_v34, %v2619_v24  ;;  %v3331_v5 = vadd.f32 %v3330_v63, %v10224_v13  ;;  %v2328_v45 = vadd.f32 %v2327_v48, %v9946_v25  ;;  %v3780_v1 = vmax.f32 %v3329_v21, 0.0 }
 0x396   :  { %v2329_v10 = vpop.f32.mrf.mxu1  ;;  %v3332_v44 = vpop.f32.mrf.mxu0  ;;  %v2622_v40 = vmax.f32 %v2326_v27, 0.0 }
 0x397   :  { %v2330_v46 = vadd.f32 %v2329_v10, %v9951_v58  ;;  %3574 = vmatprep.mubr.bf16.mxu0 %v2763_v22  ;;  %v3781_v33 = vmax.f32 %v3331_v5, 0.0  ;;  %v3333_v36 = vadd.f32 %v3332_v44, %v10230_v52  ;;  %v2623_v39 = vmax.f32 %v2328_v45, 0.0 }
 0x398   :  { %v2331_v28 = vpop.f32.mrf.mxu1  ;;  %v3336_v57 = vpop.f32.mrf.mxu0  ;;  %3575 = vmatmul.mubr.bf16.gmra.mxu0 %v2762_v42 }
 0x399   :  { %v2332_v61 = vadd.f32 %v2331_v28, %v9946_v25  ;;  %v10698_v12 = vpack.c.bf16 %v3781_v33, %v3779_v59  ;;  %v3782_v19 = vmax.f32 %v3333_v36, 0.0  ;;  %v2624_v16 = vmax.f32 %v2330_v46, 0.0 }
 0x39a   :  { %v2335_v38 = vpop.f32.mrf.mxu1  ;;  %4456 = vmatmul.mubr.bf16.gmra.mxu1 %v10512_v17  ;;  %v3338_v29 = vpop.f32.mrf.mxu0  ;;  %v3337_v4 = vadd.f32 %v3336_v57, %v10224_v13 }
 0x39b   :  { %v2625_v50 = vmax.f32 %v2332_v61, 0.0  ;;  %4465 = vmatprep.mubr.bf16.mxu1 %v10532_v47  ;;  %v10703_v24 = vpack.c.bf16 %v3782_v19, %v3780_v1  ;;  %v3339_v30 = vadd.f32 %v3338_v29, %v10230_v52  ;;  %v2764_v17 = vpack.c.bf16 %v2624_v16, %v2622_v40 }
 0x39c   :  { %v2337_v26 = vpop.f32.mrf.mxu1  ;;  %v3340_v34 = vpop.f32.mrf.mxu0  ;;  %v3783_v47 = vmax.f32 %v3337_v4, 0.0  ;;  %v2336_v45 = vadd.f32 %v2335_v38, %v9951_v58 }
 0x39d   :  { %v2765_v31 = vpack.c.bf16 %v2625_v50, %v2623_v39  ;;  %v3341_v48 = vadd.f32 %v3340_v34, %v10224_v13  ;;  %v2338_v63 = vadd.f32 %v2337_v26, %v9946_v25  ;;  %v3784_v59 = vmax.f32 %v3339_v30, 0.0 }
 0x39e   :  { %v2339_v43 = vpop.f32.mrf.mxu1  ;;  %v3342_v21 = vpop.f32.mrf.mxu0  ;;  %v2626_v16 = vmax.f32 %v2336_v45, 0.0 }
 0x39f   :  { %v2340_v22 = vadd.f32 %v2339_v43, %v9951_v58  ;;  %3584 = vmatprep.mubr.bf16.mxu0 %v2765_v31  ;;  %v3785_v5 = vmax.f32 %v3341_v48, 0.0  ;;  %v3343_v10 = vadd.f32 %v3342_v21, %v10230_v52  ;;  %v2627_v27 = vmax.f32 %v2338_v63, 0.0 }
 0x3a0   :  { %v2341_v42 = vpop.f32.mrf.mxu1  ;;  %v3346_v44 = vpop.f32.mrf.mxu0  ;;  %3585 = vmatmul.mubr.bf16.gmra.mxu0 %v2764_v17 }
 0x3a1   :  { %v2342_v46 = vadd.f32 %v2341_v42, %v9946_v25  ;;  %v10712_v33 = vpack.c.bf16 %v3785_v5, %v3783_v47  ;;  %v3786_v36 = vmax.f32 %v3343_v10, 0.0  ;;  %v2628_v61 = vmax.f32 %v2340_v22, 0.0 }
 0x3a2   :  { %v2345_v28 = vpop.f32.mrf.mxu1  ;;  %4466 = vmatmul.mubr.bf16.gmra.mxu1 %v10526_v41  ;;  %v3348_v1 = vpop.f32.mrf.mxu0  ;;  %v3347_v19 = vadd.f32 %v3346_v44, %v10224_v13 }
 0x3a3   :  { %v2629_v57 = vmax.f32 %v2342_v46, 0.0  ;;  %4475 = vmatprep.mubr.bf16.mxu1 %v10549_v60  ;;  %v10717_v39 = vpack.c.bf16 %v3786_v36, %v3784_v59  ;;  %v3349_v4 = vadd.f32 %v3348_v1, %v10230_v52  ;;  %v2766_v41 = vpack.c.bf16 %v2628_v61, %v2626_v16 }
 0x3a4   :  { %v2347_v38 = vpop.f32.mrf.mxu1  ;;  %v3350_v50 = vpop.f32.mrf.mxu0  ;;  %v3787_v60 = vmax.f32 %v3347_v19, 0.0  ;;  %v2346_v63 = vadd.f32 %v2345_v28, %v9951_v58 }
 0x3a5   :  { %v2767_v29 = vpack.c.bf16 %v2629_v57, %v2627_v27  ;;  %v3351_v26 = vadd.f32 %v3350_v50, %v10224_v13  ;;  %v2348_v34 = vadd.f32 %v2347_v38, %v9946_v25  ;;  %v3788_v47 = vmax.f32 %v3349_v4, 0.0 }
 0x3a6   :  { %v2349_v40 = vpop.f32.mrf.mxu1  ;;  %v3352_v30 = vpop.f32.mrf.mxu0  ;;  %v2630_v61 = vmax.f32 %v2346_v63, 0.0 }
 0x3a7   :  { %v2350_v31 = vadd.f32 %v2349_v40, %v9951_v58  ;;  %3594 = vmatprep.mubr.bf16.mxu0 %v2767_v29  ;;  %v3789_v48 = vmax.f32 %v3351_v26, 0.0  ;;  %v3353_v43 = vadd.f32 %v3352_v30, %v10230_v52  ;;  %v2631_v45 = vmax.f32 %v2348_v34, 0.0 }
 0x3a8   :  { %v2351_v17 = vpop.f32.mrf.mxu1  ;;  %v3356_v21 = vpop.f32.mrf.mxu0  ;;  %3595 = vmatmul.mubr.bf16.gmra.mxu0 %v2766_v41 }
 0x3a9   :  { %v2352_v22 = vadd.f32 %v2351_v17, %v9946_v25  ;;  %v10726_v5 = vpack.c.bf16 %v3789_v48, %v3787_v60  ;;  %v3790_v10 = vmax.f32 %v3353_v43, 0.0  ;;  %v2632_v46 = vmax.f32 %v2350_v31, 0.0 }
 0x3aa   :  { %v2355_v42 = vpop.f32.mrf.mxu1  ;;  %4476 = vmatmul.mubr.bf16.gmra.mxu1 %v10543_v20  ;;  %v3358_v59 = vpop.f32.mrf.mxu0  ;;  %v3357_v36 = vadd.f32 %v3356_v21, %v10224_v13 }
 0x3ab   :  { %v2633_v44 = vmax.f32 %v2352_v22, 0.0  ;;  %4485 = vmatprep.mubr.bf16.mxu1 %v10563_v35  ;;  %v10731_v27 = vpack.c.bf16 %v3790_v10, %v3788_v47  ;;  %v3359_v19 = vadd.f32 %v3358_v59, %v10230_v52  ;;  %v2768_v20 = vpack.c.bf16 %v2632_v46, %v2630_v61 }
 0x3ac   :  { %v2357_v28 = vpop.f32.mrf.mxu1  ;;  %v3360_v57 = vpop.f32.mrf.mxu0  ;;  %v3791_v35 = vmax.f32 %v3357_v36, 0.0  ;;  %v2356_v34 = vadd.f32 %v2355_v42, %v9951_v58 }
 0x3ad   :  { %v2769_v1 = vpack.c.bf16 %v2633_v44, %v2631_v45  ;;  %v3361_v38 = vadd.f32 %v3360_v57, %v10224_v13  ;;  %v2358_v50 = vadd.f32 %v2357_v28, %v9946_v25  ;;  %v3792_v60 = vmax.f32 %v3359_v19, 0.0 }
 0x3ae   :  { %v2359_v16 = vpop.f32.mrf.mxu1  ;;  %v3362_v4 = vpop.f32.mrf.mxu0  ;;  %v2634_v46 = vmax.f32 %v2356_v34, 0.0 }
 0x3af   :  { %v2360_v29 = vadd.f32 %v2359_v16, %v9951_v58  ;;  %3604 = vmatprep.mubr.bf16.mxu0 %v2769_v1  ;;  %v3793_v26 = vmax.f32 %v3361_v38, 0.0  ;;  %v3363_v40 = vadd.f32 %v3362_v4, %v10230_v52  ;;  %v2635_v63 = vmax.f32 %v2358_v50, 0.0 }
 0x3b0   :  { %v2361_v41 = vpop.f32.mrf.mxu1  ;;  %v3366_v30 = vpop.f32.mrf.mxu0  ;;  %3605 = vmatmul.mubr.bf16.gmra.mxu0 %v2768_v20 }
 0x3b1   :  { %v2362_v31 = vadd.f32 %v2361_v41, %v9946_v25  ;;  %v10740_v48 = vpack.c.bf16 %v3793_v26, %v3791_v35  ;;  %v3794_v43 = vmax.f32 %v3363_v40, 0.0  ;;  %v2636_v22 = vmax.f32 %v2360_v29, 0.0 }
 0x3b2   :  { %v2365_v17 = vpop.f32.mrf.mxu1  ;;  %4486 = vmatmul.mubr.bf16.gmra.mxu1 %v10557_v53  ;;  %v3368_v47 = vpop.f32.mrf.mxu0  ;;  %v3367_v10 = vadd.f32 %v3366_v30, %v10224_v13 }
 0x3b3   :  { %v2637_v21 = vmax.f32 %v2362_v31, 0.0  ;;  %4495 = vmatprep.mubr.bf16.mxu1 %v10577_v51  ;;  %v10745_v45 = vpack.c.bf16 %v3794_v43, %v3792_v60  ;;  %v3369_v36 = vadd.f32 %v3368_v47, %v10230_v52  ;;  %v2770_v53 = vpack.c.bf16 %v2636_v22, %v2634_v46 }
 0x3b4   :  { %v2367_v42 = vpop.f32.mrf.mxu1  ;;  %v3370_v44 = vpop.f32.mrf.mxu0  ;;  %v3795_v51 = vmax.f32 %v3367_v10, 0.0  ;;  %v2366_v50 = vadd.f32 %v2365_v17, %v9951_v58 }
 0x3b5   :  { %v2771_v59 = vpack.c.bf16 %v2637_v21, %v2635_v63  ;;  %v3371_v28 = vadd.f32 %v3370_v44, %v10224_v13  ;;  %v2368_v57 = vadd.f32 %v2367_v42, %v9946_v25  ;;  %v3796_v35 = vmax.f32 %v3369_v36, 0.0 }
 0x3b6   :  { %v2369_v61 = vpop.f32.mrf.mxu1  ;;  %v3372_v19 = vpop.f32.mrf.mxu0  ;;  %v2638_v22 = vmax.f32 %v2366_v50, 0.0 }
 0x3b7   :  { %v2370_v1 = vadd.f32 %v2369_v61, %v9951_v58  ;;  %3614 = vmatprep.mubr.bf16.mxu0 %v2771_v59  ;;  %v3797_v38 = vmax.f32 %v3371_v28, 0.0  ;;  %v3373_v16 = vadd.f32 %v3372_v19, %v10230_v52  ;;  %v2639_v34 = vmax.f32 %v2368_v57, 0.0 }
 0x3b8   :  { %v2371_v20 = vpop.f32.mrf.mxu1  ;;  %v3376_v4 = vpop.f32.mrf.mxu0  ;;  %3615 = vmatmul.mubr.bf16.gmra.mxu0 %v2770_v53 }
 0x3b9   :  { %v2372_v29 = vadd.f32 %v2371_v20, %v9946_v25  ;;  %v10754_v26 = vpack.c.bf16 %v3797_v38, %v3795_v51  ;;  %v3798_v40 = vmax.f32 %v3373_v16, 0.0  ;;  %v2640_v31 = vmax.f32 %v2370_v1, 0.0 }
 0x3ba   :  { %v2375_v41 = vpop.f32.mrf.mxu1  ;;  %4496 = vmatmul.mubr.bf16.gmra.mxu1 %v10571_v9  ;;  %v3378_v60 = vpop.f32.mrf.mxu0  ;;  %v3377_v43 = vadd.f32 %v3376_v4, %v10224_v13 }
 0x3bb   :  { %v2641_v30 = vmax.f32 %v2372_v29, 0.0  ;;  %4505 = vmatprep.mubr.bf16.mxu1 %v10591_v3  ;;  %v10759_v63 = vpack.c.bf16 %v3798_v40, %v3796_v35  ;;  %v3379_v10 = vadd.f32 %v3378_v60, %v10230_v52  ;;  %v2772_v9 = vpack.c.bf16 %v2640_v31, %v2638_v22 }
 0x3bc   :  { %v2377_v17 = vpop.f32.mrf.mxu1  ;;  %v3380_v21 = vpop.f32.mrf.mxu0  ;;  %v3799_v3 = vmax.f32 %v3377_v43, 0.0  ;;  %v2376_v57 = vadd.f32 %v2375_v41, %v9951_v58 }
 0x3bd   :  { %v2773_v47 = vpack.c.bf16 %v2641_v30, %v2639_v34  ;;  %v3381_v42 = vadd.f32 %v3380_v21, %v10224_v13  ;;  %v2378_v44 = vadd.f32 %v2377_v17, %v9946_v25  ;;  %v3800_v51 = vmax.f32 %v3379_v10, 0.0 }
 0x3be   :  { %v2379_v46 = vpop.f32.mrf.mxu1  ;;  %v3382_v36 = vpop.f32.mrf.mxu0  ;;  %v2642_v31 = vmax.f32 %v2376_v57, 0.0 }
 0x3bf   :  { %v2380_v59 = vadd.f32 %v2379_v46, %v9951_v58  ;;  %3624 = vmatprep.mubr.bf16.mxu0 %v2773_v47  ;;  %v3801_v28 = vmax.f32 %v3381_v42, 0.0  ;;  %v3383_v61 = vadd.f32 %v3382_v36, %v10230_v52  ;;  %v2643_v50 = vmax.f32 %v2378_v44, 0.0 }
 0x3c0   :  { %v2381_v53 = vpop.f32.mrf.mxu1  ;;  %v3386_v19 = vpop.f32.mrf.mxu0  ;;  %3625 = vmatmul.mubr.bf16.gmra.mxu0 %v2772_v9 }
 0x3c1   :  { %v2382_v1 = vadd.f32 %v2381_v53, %v9946_v25  ;;  %v10768_v38 = vpack.c.bf16 %v3801_v28, %v3799_v3  ;;  %v3802_v16 = vmax.f32 %v3383_v61, 0.0  ;;  %v2644_v29 = vmax.f32 %v2380_v59, 0.0  ;;  %v4071_v53 = vld [vmem:[%s13295_s8] sm:$0x3] }
 0x3c2   :  { %v2385_v20 = vpop.f32.mrf.mxu1  ;;  %4506 = vmatmul.mubr.bf16.gmra.mxu1 %v10585_v54  ;;  %v3388_v35 = vpop.f32.mrf.mxu0  ;;  %v3387_v40 = vadd.f32 %v3386_v19, %v10224_v13 }
 0x3c3   :  { %v2645_v4 = vmax.f32 %v2382_v1, 0.0  ;;  %4515 = vmatprep.mubr.bf16.mxu1 %v10605_v23  ;;  %v10773_v34 = vpack.c.bf16 %v3802_v16, %v3800_v51  ;;  %v3389_v43 = vadd.f32 %v3388_v35, %v10230_v52  ;;  %v2774_v54 = vpack.c.bf16 %v2644_v29, %v2642_v31 }
 0x3c4   :  { %v2387_v41 = vpop.f32.mrf.mxu1  ;;  %v3390_v30 = vpop.f32.mrf.mxu0  ;;  %v3803_v23 = vmax.f32 %v3387_v40, 0.0  ;;  %v2386_v44 = vadd.f32 %v2385_v20, %v9951_v58 }
 0x3c5   :  { %v2775_v60 = vpack.c.bf16 %v2645_v4, %v2643_v50  ;;  %v3391_v17 = vadd.f32 %v3390_v30, %v10224_v13  ;;  %v2388_v21 = vadd.f32 %v2387_v41, %v9946_v25  ;;  %v3804_v3 = vmax.f32 %v3389_v43, 0.0 }
 0x3c6   :  { %v2389_v22 = vpop.f32.mrf.mxu1  ;;  %v3392_v10 = vpop.f32.mrf.mxu0  ;;  %v2646_v29 = vmax.f32 %v2386_v44, 0.0  ;;  %v10796_v4 = vrot.slane %v4071_v53, %v8993_v11 }
 0x3c7   :  { %v2390_v47 = vadd.f32 %v2389_v22, %v9951_v58  ;;  %3634 = vmatprep.mubr.bf16.mxu0 %v2775_v60  ;;  %v3805_v42 = vmax.f32 %v3391_v17, 0.0  ;;  %v3393_v46 = vadd.f32 %v3392_v10, %v10230_v52  ;;  %v2647_v1 = vmax.f32 %v2388_v21, 0.0 }
 0x3c8   :  { %v2391_v9 = vpop.f32.mrf.mxu1  ;;  %v3396_v36 = vpop.f32.mrf.mxu0  ;;  %3635 = vmatmul.mubr.bf16.gmra.mxu0 %v2774_v54 }
 0x3c9   :  { %v2392_v59 = vadd.f32 %v2391_v9, %v9946_v25  ;;  %v10782_v28 = vpack.c.bf16 %v3805_v42, %v3803_v23  ;;  %v3806_v61 = vmax.f32 %v3393_v46, 0.0  ;;  %v2648_v19 = vmax.f32 %v2390_v47, 0.0 }
 0x3ca   :  { %v4277_v57 = vpop.f32.mrf.mxu1  ;;  %4516 = vmatmul.mubr.bf16.gmra.mxu1 %v10599_v18  ;;  %v3398_v16 = vpop.f32.mrf.mxu0  ;;  %v10790_v25 = vrot.slane %v4071_v53, %v8999_v14  ;;  %v3397_v58 = vadd.f32 %v3396_v36, %v10224_v13 }
 0x3cb   :  { %v2649_v51 = vmax.f32 %v2392_v59, 0.0  ;;  %4525 = vmatprep.mubr.bf16.mxu1 %v10618_v15  ;;  %v10793_v50 = vpack.c.bf16 %v3806_v61, %v3804_v3  ;;  %v3399_v40 = vadd.f32 %v3398_v16, %v10230_v52  ;;  %v2776_v15 = vpack.c.bf16 %v2648_v19, %v2646_v29 }
 0x3cc   :  { %v4279_v20 = vpop.f32.mrf.mxu1  ;;  %v3400_v35 = vpop.f32.mrf.mxu0  ;;  %v3807_v43 = vmax.f32 %v3397_v58, 0.0  ;;  %v4278_v54 = vadd.f32 %v4277_v57, %v10796_v4 }
 0x3cd   :  { %v2777_v18 = vpack.c.bf16 %v2649_v51, %v2647_v1  ;;  %v3401_v41 = vadd.f32 %v3400_v35, %v10224_v13  ;;  %v4280_v14 = vadd.f32 %v4279_v20, %v10790_v25  ;;  %v3808_v10 = vmax.f32 %v3399_v40, 0.0 }
 0x3ce   :  { %v4281_v31 = vpop.f32.mrf.mxu1  ;;  %v3402_v30 = vpop.f32.mrf.mxu0  ;;  %v4916_v57 = vmax.f32 %v4278_v54, 0.0 }
 0x3cf   :  { %v4282_v60 = vadd.f32 %v4281_v31, %v10796_v4  ;;  %3644 = vmatprep.mubr.bf16.mxu0 %v2777_v18  ;;  %v3809_v17 = vmax.f32 %v3401_v41, 0.0  ;;  %v3403_v22 = vadd.f32 %v3402_v30, %v10230_v52  ;;  %v4917_v9 = vmax.f32 %v4280_v14, 0.0 }
 0x3d0   :  { %v4283_v11 = vpop.f32.mrf.mxu1  ;;  %v3406_v21 = vpop.f32.mrf.mxu0  ;;  %3645 = vmatmul.mubr.bf16.gmra.mxu0 %v2776_v15 }
 0x3d1   :  { %v4284_v47 = vadd.f32 %v4283_v11, %v10790_v25  ;;  %v10805_v23 = vpack.c.bf16 %v3809_v17, %v3807_v43  ;;  %v3810_v42 = vmax.f32 %v3403_v22, 0.0  ;;  %v4918_v44 = vmax.f32 %v4282_v60, 0.0 }
 0x3d2   :  { %v4287_v46 = vpop.f32.mrf.mxu1  ;;  %4526 = vmatmul.mubr.bf16.gmra.mxu1 %v10613_v32  ;;  %v3408_v36 = vpop.f32.mrf.mxu0  ;;  %v3407_v3 = vadd.f32 %v3406_v21, %v10224_v13 }
 0x3d3   :  { %v4919_v59 = vmax.f32 %v4284_v47, 0.0  ;;  %4535 = vmatprep.mubr.bf16.mxu1 %v10633_v62  ;;  %v10810_v53 = vpack.c.bf16 %v3810_v42, %v3808_v10  ;;  %v3409_v51 = vadd.f32 %v3408_v36, %v10230_v52  ;;  %v5172_v32 = vpack.c.bf16 %v4918_v44, %v4916_v57 }
 0x3d4   :  { %v4289_v61 = vpop.f32.mrf.mxu1  ;;  %v3410_v1 = vpop.f32.mrf.mxu0  ;;  %v3811_v62 = vmax.f32 %v3407_v3, 0.0  ;;  %v4288_v31 = vadd.f32 %v4287_v46, %v10796_v4 }
 0x3d5   :  { %v5173_v19 = vpack.c.bf16 %v4919_v59, %v4917_v9  ;;  %v3411_v16 = vadd.f32 %v3410_v1, %v10224_v13  ;;  %v4290_v20 = vadd.f32 %v4289_v61, %v10790_v25  ;;  %v3812_v30 = vmax.f32 %v3409_v51, 0.0 }
 0x3d6   :  { %v4291_v58 = vpop.f32.mrf.mxu1  ;;  %v3412_v29 = vpop.f32.mrf.mxu0  ;;  %v4920_v46 = vmax.f32 %v4288_v31, 0.0 }
 0x3d7   :  { %v4292_v35 = vadd.f32 %v4291_v58, %v10796_v4  ;;  %5467 = vmatprep.mubr.bf16.mxu0 %v5173_v19  ;;  %v3813_v18 = vmax.f32 %v3411_v16, 0.0  ;;  %v3413_v40 = vadd.f32 %v3412_v29, %v10230_v52  ;;  %v4921_v22 = vmax.f32 %v4290_v20, 0.0 }
 0x3d8   :  { %v4293_v41 = vpop.f32.mrf.mxu1  ;;  %v3416_v15 = vpop.f32.mrf.mxu0  ;;  %5468 = vmatmul.mubr.bf16.vlgmr.msra.gmra.mxu0 %v5172_v32 }
 0x3d9   :  { %v4294_v14 = vadd.f32 %v4293_v41, %v10790_v25  ;;  %v10819_v60 = vpack.c.bf16 %v3813_v18, %v3811_v62  ;;  %v3814_v43 = vmax.f32 %v3413_v40, 0.0  ;;  %v4922_v11 = vmax.f32 %v4292_v35, 0.0 }
 0x3da   :  { %v4297_v17 = vpop.f32.mrf.mxu1  ;;  %4536 = vmatmul.mubr.bf16.gmra.mxu1 %v10628_v2  ;;  %v3418_v21 = vpop.f32.mrf.mxu0  ;;  %v3417_v47 = vadd.f32 %v3416_v15, %v10224_v13 }
 0x3db   :  { %v4923_v54 = vmax.f32 %v4294_v14, 0.0  ;;  %4545 = vmatprep.mubr.bf16.mxu1 %v10647_v6  ;;  %v10824_v42 = vpack.c.bf16 %v3814_v43, %v3812_v30  ;;  %v3419_v59 = vadd.f32 %v3418_v21, %v10230_v52  ;;  %v5174_v2 = vpack.c.bf16 %v4922_v11, %v4920_v46 }
 0x3dc   :  { %v4299_v10 = vpop.f32.mrf.mxu1  ;;  %v3420_v9 = vpop.f32.mrf.mxu0  ;;  %v3815_v6 = vmax.f32 %v3417_v47, 0.0  ;;  %v4298_v58 = vadd.f32 %v4297_v17, %v10796_v4 }
 0x3dd   :  { %v5175_v44 = vpack.c.bf16 %v4923_v54, %v4921_v22  ;;  %v3421_v36 = vadd.f32 %v3420_v9, %v10224_v13  ;;  %v4300_v61 = vadd.f32 %v4299_v10, %v10790_v25  ;;  %v3816_v29 = vmax.f32 %v3419_v59, 0.0 }
 0x3de   :  { %v4301_v3 = vpop.f32.mrf.mxu1  ;;  %v3422_v57 = vpop.f32.mrf.mxu0  ;;  %v4924_v17 = vmax.f32 %v4298_v58, 0.0 }
 0x3df   :  { %v4302_v1 = vadd.f32 %v4301_v3, %v10796_v4  ;;  %5475 = vmatprep.mubr.bf16.mxu0 %v5175_v44  ;;  %v3817_v19 = vmax.f32 %v3421_v36, 0.0  ;;  %v3423_v51 = vadd.f32 %v3422_v57, %v10230_v52  ;;  %v4925_v40 = vmax.f32 %v4300_v61, 0.0 }
 0x3e0   :  { %v4303_v16 = vpop.f32.mrf.mxu1  ;;  %v3426_v32 = vpop.f32.mrf.mxu0  ;;  %5476 = vmatmul.mubr.bf16.gmra.mxu0 %v5174_v2 }
 0x3e1   :  { %v4304_v20 = vadd.f32 %v4303_v16, %v10790_v25  ;;  %v10833_v35 = vpack.c.bf16 %v3817_v19, %v3815_v6  ;;  %v3818_v62 = vmax.f32 %v3423_v51, 0.0  ;;  %v4926_v41 = vmax.f32 %v4302_v1, 0.0 }
 0x3e2   :  { %v4307_v18 = vpop.f32.mrf.mxu1  ;;  %4546 = vmatmul.mubr.bf16.gmra.mxu1 %v10642_v8  ;;  %v3428_v15 = vpop.f32.mrf.mxu0  ;;  %v3427_v14 = vadd.f32 %v3426_v32, %v10224_v13 }
 0x3e3   :  { %v4927_v31 = vmax.f32 %v4304_v20, 0.0  ;;  %4555 = vmatprep.mubr.bf16.mxu1 %v10661_v7  ;;  %v10838_v43 = vpack.c.bf16 %v3818_v62, %v3816_v29  ;;  %v3429_v54 = vadd.f32 %v3428_v15, %v10230_v52  ;;  %v5176_v8 = vpack.c.bf16 %v4926_v41, %v4924_v17 }
 0x3e4   :  { %v4309_v30 = vpop.f32.mrf.mxu1  ;;  %v3430_v22 = vpop.f32.mrf.mxu0  ;;  %v3819_v7 = vmax.f32 %v3427_v14, 0.0  ;;  %v4308_v3 = vadd.f32 %v4307_v18, %v10796_v4 }
 0x3e5   :  { %v5177_v11 = vpack.c.bf16 %v4927_v31, %v4925_v40  ;;  %v3431_v21 = vadd.f32 %v3430_v22, %v10224_v13  ;;  %v4310_v10 = vadd.f32 %v4309_v30, %v10790_v25  ;;  %v3820_v57 = vmax.f32 %v3429_v54, 0.0 }
 0x3e6   :  { %v4311_v47 = vpop.f32.mrf.mxu1  ;;  %v3432_v46 = vpop.f32.mrf.mxu0  ;;  %v4928_v18 = vmax.f32 %v4308_v3, 0.0 }
 0x3e7   :  { %v4312_v9 = vadd.f32 %v4311_v47, %v10796_v4  ;;  %5483 = vmatprep.mubr.bf16.mxu0 %v5177_v11  ;;  %v3821_v44 = vmax.f32 %v3431_v21, 0.0  ;;  %v3433_v59 = vadd.f32 %v3432_v46, %v10230_v52  ;;  %v4929_v51 = vmax.f32 %v4310_v10, 0.0 }
 0x3e8   :  { %v4313_v36 = vpop.f32.mrf.mxu1  ;;  %v3436_v2 = vpop.f32.mrf.mxu0  ;;  %5484 = vmatmul.mubr.bf16.gmra.mxu0 %v5176_v8 }
 0x3e9   :  { %v4314_v61 = vadd.f32 %v4313_v36, %v10790_v25  ;;  %v10847_v1 = vpack.c.bf16 %v3821_v44, %v3819_v7  ;;  %v3822_v6 = vmax.f32 %v3433_v59, 0.0  ;;  %v4930_v16 = vmax.f32 %v4312_v9, 0.0 }
 0x3ea   :  { %v4317_v19 = vpop.f32.mrf.mxu1  ;;  %4556 = vmatmul.mubr.bf16.gmra.mxu1 %v10656_v55  ;;  %v3438_v32 = vpop.f32.mrf.mxu0  ;;  %v3437_v20 = vadd.f32 %v3436_v2, %v10224_v13 }
 0x3eb   :  { %v4931_v58 = vmax.f32 %v4314_v61, 0.0  ;;  %4565 = vmatprep.mubr.bf16.mxu1 %v10675_v56  ;;  %v10852_v62 = vpack.c.bf16 %v3822_v6, %v3820_v57  ;;  %v3439_v31 = vadd.f32 %v3438_v32, %v10230_v52  ;;  %v5178_v55 = vpack.c.bf16 %v4930_v16, %v4928_v18 }
 0x3ec   :  { %v4319_v29 = vpop.f32.mrf.mxu1  ;;  %v3440_v40 = vpop.f32.mrf.mxu0  ;;  %v3823_v56 = vmax.f32 %v3437_v20, 0.0  ;;  %v4318_v47 = vadd.f32 %v4317_v19, %v10796_v4 }
 0x3ed   :  { %v5179_v41 = vpack.c.bf16 %v4931_v58, %v4929_v51  ;;  %v3441_v15 = vadd.f32 %v3440_v40, %v10224_v13  ;;  %v4320_v30 = vadd.f32 %v4319_v29, %v10790_v25  ;;  %v3824_v46 = vmax.f32 %v3439_v31, 0.0 }
 0x3ee   :  { %v4321_v14 = vpop.f32.mrf.mxu1  ;;  %v3442_v17 = vpop.f32.mrf.mxu0  ;;  %v4932_v19 = vmax.f32 %v4318_v47, 0.0 }
 0x3ef   :  { %v4322_v22 = vadd.f32 %v4321_v14, %v10796_v4  ;;  %5491 = vmatprep.mubr.bf16.mxu0 %v5179_v41  ;;  %v3825_v11 = vmax.f32 %v3441_v15, 0.0  ;;  %v3443_v54 = vadd.f32 %v3442_v17, %v10230_v52  ;;  %v4933_v59 = vmax.f32 %v4320_v30, 0.0 }
 0x3f0   :  { %v4323_v21 = vpop.f32.mrf.mxu1  ;;  %v3446_v8 = vpop.f32.mrf.mxu0  ;;  %5492 = vmatmul.mubr.bf16.gmra.mxu0 %v5178_v55 }
 0x3f1   :  { %v4324_v10 = vadd.f32 %v4323_v21, %v10790_v25  ;;  %v10861_v9 = vpack.c.bf16 %v3825_v11, %v3823_v56  ;;  %v3826_v7 = vmax.f32 %v3443_v54, 0.0  ;;  %v4934_v36 = vmax.f32 %v4322_v22, 0.0 }
 0x3f2   :  { %v4327_v44 = vpop.f32.mrf.mxu1  ;;  %4566 = vmatmul.mubr.bf16.gmra.mxu1 %v10670_v0  ;;  %v3448_v2 = vpop.f32.mrf.mxu0  ;;  %v3447_v61 = vadd.f32 %v3446_v8, %v10224_v13 }
 0x3f3   :  { %v4935_v3 = vmax.f32 %v4324_v10, 0.0  ;;  %4575 = vmatprep.mubr.bf16.mxu1 %v10689_v37  ;;  %v10866_v6 = vpack.c.bf16 %v3826_v7, %v3824_v46  ;;  %v3449_v58 = vadd.f32 %v3448_v2, %v10230_v52  ;;  %v5180_v0 = vpack.c.bf16 %v4934_v36, %v4932_v19 }
 0x3f4   :  { %v4329_v57 = vpop.f32.mrf.mxu1  ;;  %v3450_v51 = vpop.f32.mrf.mxu0  ;;  %v3827_v37 = vmax.f32 %v3447_v61, 0.0  ;;  %v4328_v14 = vadd.f32 %v4327_v44, %v10796_v4 }
 0x3f5   :  { %v5181_v16 = vpack.c.bf16 %v4935_v3, %v4933_v59  ;;  %v3451_v32 = vadd.f32 %v3450_v51, %v10224_v13  ;;  %v4330_v29 = vadd.f32 %v4329_v57, %v10790_v25  ;;  %v3828_v17 = vmax.f32 %v3449_v58, 0.0 }
 0x3f6   :  { %v4331_v20 = vpop.f32.mrf.mxu1  ;;  %v3452_v18 = vpop.f32.mrf.mxu0  ;;  %v4936_v44 = vmax.f32 %v4328_v14, 0.0 }
 0x3f7   :  { %v4332_v40 = vadd.f32 %v4331_v20, %v10796_v4  ;;  %5499 = vmatprep.mubr.bf16.mxu0 %v5181_v16  ;;  %v3829_v41 = vmax.f32 %v3451_v32, 0.0  ;;  %v3453_v31 = vadd.f32 %v3452_v18, %v10230_v52  ;;  %v4937_v54 = vmax.f32 %v4330_v29, 0.0 }
 0x3f8   :  { %v4333_v15 = vpop.f32.mrf.mxu1  ;;  %v3456_v55 = vpop.f32.mrf.mxu0  ;;  %5500 = vmatmul.mubr.bf16.gmra.mxu0 %v5180_v0 }
 0x3f9   :  { %v4334_v30 = vadd.f32 %v4333_v15, %v10790_v25  ;;  %v10875_v22 = vpack.c.bf16 %v3829_v41, %v3827_v37  ;;  %v3830_v56 = vmax.f32 %v3453_v31, 0.0  ;;  %v4938_v21 = vmax.f32 %v4332_v40, 0.0 }
 0x3fa   :  { %v4337_v11 = vpop.f32.mrf.mxu1  ;;  %4576 = vmatmul.mubr.bf16.gmra.mxu1 %v10684_v49  ;;  %v3458_v8 = vpop.f32.mrf.mxu0  ;;  %v3457_v10 = vadd.f32 %v3456_v55, %v10224_v13 }
 0x3fb   :  { %v4939_v47 = vmax.f32 %v4334_v30, 0.0  ;;  %4585 = vmatprep.mubr.bf16.mxu1 %v10703_v24  ;;  %v10880_v7 = vpack.c.bf16 %v3830_v56, %v3828_v17  ;;  %v3459_v3 = vadd.f32 %v3458_v8, %v10230_v52  ;;  %v5182_v49 = vpack.c.bf16 %v4938_v21, %v4936_v44 }
 0x3fc   :  { %v4339_v46 = vpop.f32.mrf.mxu1  ;;  %v3460_v59 = vpop.f32.mrf.mxu0  ;;  %v3831_v24 = vmax.f32 %v3457_v10, 0.0  ;;  %v4338_v20 = vadd.f32 %v4337_v11, %v10796_v4 }
 0x3fd   :  { %v5183_v36 = vpack.c.bf16 %v4939_v47, %v4937_v54  ;;  %v3461_v2 = vadd.f32 %v3460_v59, %v10224_v13  ;;  %v4340_v57 = vadd.f32 %v4339_v46, %v10790_v25  ;;  %v3832_v18 = vmax.f32 %v3459_v3, 0.0 }
 0x3fe   :  { %v4341_v61 = vpop.f32.mrf.mxu1  ;;  %v3462_v19 = vpop.f32.mrf.mxu0  ;;  %v4940_v11 = vmax.f32 %v4338_v20, 0.0 }
 0x3ff   :  { %v4342_v51 = vadd.f32 %v4341_v61, %v10796_v4  ;;  %5507 = vmatprep.mubr.bf16.mxu0 %v5183_v36  ;;  %v3833_v16 = vmax.f32 %v3461_v2, 0.0  ;;  %v3463_v58 = vadd.f32 %v3462_v19, %v10230_v52  ;;  %v4941_v31 = vmax.f32 %v4340_v57, 0.0 }
 0x400   :  { %v4343_v32 = vpop.f32.mrf.mxu1  ;;  %v3466_v0 = vpop.f32.mrf.mxu0  ;;  %5508 = vmatmul.mubr.bf16.gmra.mxu0 %v5182_v49 }
 0x401   :  { %v4344_v29 = vadd.f32 %v4343_v32, %v10790_v25  ;;  %v10889_v40 = vpack.c.bf16 %v3833_v16, %v3831_v24  ;;  %v3834_v37 = vmax.f32 %v3463_v58, 0.0  ;;  %v4942_v15 = vmax.f32 %v4342_v51, 0.0 }
 0x402   :  { %v4347_v41 = vpop.f32.mrf.mxu1  ;;  %4586 = vmatmul.mubr.bf16.gmra.mxu1 %v10698_v12  ;;  %v3468_v55 = vpop.f32.mrf.mxu0  ;;  %v3467_v30 = vadd.f32 %v3466_v0, %v10224_v13 }
 0x403   :  { %v4943_v14 = vmax.f32 %v4344_v29, 0.0  ;;  %4595 = vmatprep.mubr.bf16.mxu1 %v10717_v39  ;;  %v10894_v56 = vpack.c.bf16 %v3834_v37, %v3832_v18  ;;  %v3469_v47 = vadd.f32 %v3468_v55, %v10230_v52  ;;  %v5184_v12 = vpack.c.bf16 %v4942_v15, %v4940_v11 }
 0x404   :  { %v4349_v17 = vpop.f32.mrf.mxu1  ;;  %v3470_v54 = vpop.f32.mrf.mxu0  ;;  %v3835_v39 = vmax.f32 %v3467_v30, 0.0  ;;  %v4348_v61 = vadd.f32 %v4347_v41, %v10796_v4 }
 0x405   :  { %v5185_v21 = vpack.c.bf16 %v4943_v14, %v4941_v31  ;;  %v3471_v8 = vadd.f32 %v3470_v54, %v10224_v13  ;;  %v4350_v46 = vadd.f32 %v4349_v17, %v10790_v25  ;;  %v3836_v19 = vmax.f32 %v3469_v47, 0.0 }
 0x406   :  { %v4351_v10 = vpop.f32.mrf.mxu1  ;;  %v3472_v44 = vpop.f32.mrf.mxu0  ;;  %v4944_v41 = vmax.f32 %v4348_v61, 0.0 }
 0x407   :  { %v4352_v59 = vadd.f32 %v4351_v10, %v10796_v4  ;;  %5515 = vmatprep.mubr.bf16.mxu0 %v5185_v21  ;;  %v3837_v36 = vmax.f32 %v3471_v8, 0.0  ;;  %v3473_v3 = vadd.f32 %v3472_v44, %v10230_v52  ;;  %v4945_v58 = vmax.f32 %v4350_v46, 0.0 }
 0x408   :  { %v4353_v2 = vpop.f32.mrf.mxu1  ;;  %v3476_v49 = vpop.f32.mrf.mxu0  ;;  %5516 = vmatmul.mubr.bf16.gmra.mxu0 %v5184_v12 }
 0x409   :  { %v4354_v57 = vadd.f32 %v4353_v2, %v10790_v25  ;;  %v10903_v51 = vpack.c.bf16 %v3837_v36, %v3835_v39  ;;  %v3838_v24 = vmax.f32 %v3473_v3, 0.0  ;;  %v4946_v32 = vmax.f32 %v4352_v59, 0.0 }
 0x40a   :  { %v4357_v16 = vpop.f32.mrf.mxu1  ;;  %4596 = vmatmul.mubr.bf16.gmra.mxu1 %v10712_v33  ;;  %v3478_v0 = vpop.f32.mrf.mxu0  ;;  %v3477_v29 = vadd.f32 %v3476_v49, %v10224_v13 }
 0x40b   :  { %v4947_v20 = vmax.f32 %v4354_v57, 0.0  ;;  %4605 = vmatprep.mubr.bf16.mxu1 %v10731_v27  ;;  %v10908_v37 = vpack.c.bf16 %v3838_v24, %v3836_v19  ;;  %v3479_v14 = vadd.f32 %v3478_v0, %v10230_v52  ;;  %v5186_v33 = vpack.c.bf16 %v4946_v32, %v4944_v41 }
 0x40c   :  { %v4359_v18 = vpop.f32.mrf.mxu1  ;;  %v3480_v31 = vpop.f32.mrf.mxu0  ;;  %v3839_v27 = vmax.f32 %v3477_v29, 0.0  ;;  %v4358_v10 = vadd.f32 %v4357_v16, %v10796_v4 }
 0x40d   :  { %v5187_v15 = vpack.c.bf16 %v4947_v20, %v4945_v58  ;;  %v3481_v55 = vadd.f32 %v3480_v31, %v10224_v13  ;;  %v4360_v17 = vadd.f32 %v4359_v18, %v10790_v25  ;;  %v3840_v44 = vmax.f32 %v3479_v14, 0.0 }
 0x40e   :  { %v4361_v30 = vpop.f32.mrf.mxu1  ;;  %v3482_v11 = vpop.f32.mrf.mxu0  ;;  %v4948_v16 = vmax.f32 %v4358_v10, 0.0 }
 0x40f   :  { %v4362_v54 = vadd.f32 %v4361_v30, %v10796_v4  ;;  %5523 = vmatprep.mubr.bf16.mxu0 %v5187_v15  ;;  %v3841_v21 = vmax.f32 %v3481_v55, 0.0  ;;  %v3483_v47 = vadd.f32 %v3482_v11, %v10230_v52  ;;  %v4949_v3 = vmax.f32 %v4360_v17, 0.0 }
 0x410   :  { %v4363_v8 = vpop.f32.mrf.mxu1  ;;  %v3486_v12 = vpop.f32.mrf.mxu0  ;;  %5524 = vmatmul.mubr.bf16.gmra.mxu0 %v5186_v33 }
 0x411   :  { %v4364_v46 = vadd.f32 %v4363_v8, %v10790_v25  ;;  %v10917_v59 = vpack.c.bf16 %v3841_v21, %v3839_v27  ;;  %v3842_v39 = vmax.f32 %v3483_v47, 0.0  ;;  %v4950_v2 = vmax.f32 %v4362_v54, 0.0 }
 0x412   :  { %v4367_v36 = vpop.f32.mrf.mxu1  ;;  %4606 = vmatmul.mubr.bf16.gmra.mxu1 %v10726_v5  ;;  %v3488_v49 = vpop.f32.mrf.mxu0  ;;  %v3487_v57 = vadd.f32 %v3486_v12, %v10224_v13 }
 0x413   :  { %v4951_v61 = vmax.f32 %v4364_v46, 0.0  ;;  %4615 = vmatprep.mubr.bf16.mxu1 %v10745_v45  ;;  %v10922_v24 = vpack.c.bf16 %v3842_v39, %v3840_v44  ;;  %v3489_v20 = vadd.f32 %v3488_v49, %v10230_v52  ;;  %v5188_v5 = vpack.c.bf16 %v4950_v2, %v4948_v16 }
 0x414   :  { %v4369_v19 = vpop.f32.mrf.mxu1  ;;  %v3490_v58 = vpop.f32.mrf.mxu0  ;;  %v3843_v45 = vmax.f32 %v3487_v57, 0.0  ;;  %v4368_v30 = vadd.f32 %v4367_v36, %v10796_v4 }
 0x415   :  { %v5189_v32 = vpack.c.bf16 %v4951_v61, %v4949_v3  ;;  %v3491_v0 = vadd.f32 %v3490_v58, %v10224_v13  ;;  %v4370_v18 = vadd.f32 %v4369_v19, %v10790_v25  ;;  %v3844_v11 = vmax.f32 %v3489_v20, 0.0 }
 0x416   :  { %v4371_v29 = vpop.f32.mrf.mxu1  ;;  %v3492_v41 = vpop.f32.mrf.mxu0  ;;  %v4952_v36 = vmax.f32 %v4368_v30, 0.0 }
 0x417   :  { %v4372_v31 = vadd.f32 %v4371_v29, %v10796_v4  ;;  %5531 = vmatprep.mubr.bf16.mxu0 %v5189_v32  ;;  %v3845_v15 = vmax.f32 %v3491_v0, 0.0  ;;  %v3493_v14 = vadd.f32 %v3492_v41, %v10230_v52  ;;  %v4953_v47 = vmax.f32 %v4370_v18, 0.0 }
 0x418   :  { %v4373_v55 = vpop.f32.mrf.mxu1  ;;  %v3496_v33 = vpop.f32.mrf.mxu0  ;;  %5532 = vmatmul.mubr.bf16.gmra.mxu0 %v5188_v5 }
 0x419   :  { %v4374_v17 = vadd.f32 %v4373_v55, %v10790_v25  ;;  %v10931_v54 = vpack.c.bf16 %v3845_v15, %v3843_v45  ;;  %v3846_v27 = vmax.f32 %v3493_v14, 0.0  ;;  %v4954_v8 = vmax.f32 %v4372_v31, 0.0 }
 0x41a   :  { %v4377_v21 = vpop.f32.mrf.mxu1  ;;  %4616 = vmatmul.mubr.bf16.gmra.mxu1 %v10740_v48  ;;  %v3498_v12 = vpop.f32.mrf.mxu0  ;;  %v3497_v46 = vadd.f32 %v3496_v33, %v10224_v13 }
 0x41b   :  { %v4955_v10 = vmax.f32 %v4374_v17, 0.0  ;;  %4625 = vmatprep.mubr.bf16.mxu1 %v10759_v63  ;;  %v10936_v39 = vpack.c.bf16 %v3846_v27, %v3844_v11  ;;  %v3499_v61 = vadd.f32 %v3498_v12, %v10230_v52  ;;  %v5190_v48 = vpack.c.bf16 %v4954_v8, %v4952_v36 }
 0x41c   :  { %v4379_v44 = vpop.f32.mrf.mxu1  ;;  %v3500_v3 = vpop.f32.mrf.mxu0  ;;  %v3847_v63 = vmax.f32 %v3497_v46, 0.0  ;;  %v4378_v29 = vadd.f32 %v4377_v21, %v10796_v4 }
 0x41d   :  { %v5191_v2 = vpack.c.bf16 %v4955_v10, %v4953_v47  ;;  %v3501_v49 = vadd.f32 %v3500_v3, %v10224_v13  ;;  %v4380_v19 = vadd.f32 %v4379_v44, %v10790_v25  ;;  %v3848_v41 = vmax.f32 %v3499_v61, 0.0 }
 0x41e   :  { %v4381_v57 = vpop.f32.mrf.mxu1  ;;  %v3502_v16 = vpop.f32.mrf.mxu0  ;;  %v4956_v21 = vmax.f32 %v4378_v29, 0.0 }
 0x41f   :  { %v4382_v58 = vadd.f32 %v4381_v57, %v10796_v4  ;;  %5539 = vmatprep.mubr.bf16.mxu0 %v5191_v2  ;;  %v3849_v32 = vmax.f32 %v3501_v49, 0.0  ;;  %v3503_v20 = vadd.f32 %v3502_v16, %v10230_v52  ;;  %v4957_v14 = vmax.f32 %v4380_v19, 0.0 }
 0x420   :  { %v4383_v0 = vpop.f32.mrf.mxu1  ;;  %v3506_v5 = vpop.f32.mrf.mxu0  ;;  %5540 = vmatmul.mubr.bf16.gmra.mxu0 %v5190_v48 }
 0x421   :  { %v4384_v18 = vadd.f32 %v4383_v0, %v10790_v25  ;;  %v10945_v31 = vpack.c.bf16 %v3849_v32, %v3847_v63  ;;  %v3850_v45 = vmax.f32 %v3503_v20, 0.0  ;;  %v4958_v55 = vmax.f32 %v4382_v58, 0.0 }
 0x422   :  { %v4387_v15 = vpop.f32.mrf.mxu1  ;;  %4626 = vmatmul.mubr.bf16.gmra.mxu1 %v10754_v26  ;;  %v3508_v33 = vpop.f32.mrf.mxu0  ;;  %v3507_v17 = vadd.f32 %v3506_v5, %v10224_v13 }
 0x423   :  { %v4959_v30 = vmax.f32 %v4384_v18, 0.0  ;;  %4635 = vmatprep.mubr.bf16.mxu1 %v10773_v34  ;;  %v10950_v27 = vpack.c.bf16 %v3850_v45, %v3848_v41  ;;  %v3509_v10 = vadd.f32 %v3508_v33, %v10230_v52  ;;  %v5192_v26 = vpack.c.bf16 %v4958_v55, %v4956_v21 }
 0x424   :  { %v4389_v11 = vpop.f32.mrf.mxu1  ;;  %v3510_v47 = vpop.f32.mrf.mxu0  ;;  %v3851_v34 = vmax.f32 %v3507_v17, 0.0  ;;  %v4388_v57 = vadd.f32 %v4387_v15, %v10796_v4 }
 0x425   :  { %v5193_v8 = vpack.c.bf16 %v4959_v30, %v4957_v14  ;;  %v3511_v12 = vadd.f32 %v3510_v47, %v10224_v13  ;;  %v4390_v44 = vadd.f32 %v4389_v11, %v10790_v25  ;;  %v3852_v16 = vmax.f32 %v3509_v10, 0.0 }
 0x426   :  { %v4391_v46 = vpop.f32.mrf.mxu1  ;;  %v3512_v36 = vpop.f32.mrf.mxu0  ;;  %v4960_v15 = vmax.f32 %v4388_v57, 0.0 }
 0x427   :  { %v4392_v3 = vadd.f32 %v4391_v46, %v10796_v4  ;;  %5547 = vmatprep.mubr.bf16.mxu0 %v5193_v8  ;;  %v3853_v2 = vmax.f32 %v3511_v12, 0.0  ;;  %v3513_v61 = vadd.f32 %v3512_v36, %v10230_v52  ;;  %v4961_v20 = vmax.f32 %v4390_v44, 0.0 }
 0x428   :  { %v4393_v49 = vpop.f32.mrf.mxu1  ;;  %v3516_v48 = vpop.f32.mrf.mxu0  ;;  %5548 = vmatmul.mubr.bf16.gmra.mxu0 %v5192_v26 }
 0x429   :  { %v4394_v19 = vadd.f32 %v4393_v49, %v10790_v25  ;;  %v10959_v58 = vpack.c.bf16 %v3853_v2, %v3851_v34  ;;  %v3854_v63 = vmax.f32 %v3513_v61, 0.0  ;;  %v4962_v0 = vmax.f32 %v4392_v3, 0.0 }
 0x42a   :  { %v4397_v32 = vpop.f32.mrf.mxu1  ;;  %4636 = vmatmul.mubr.bf16.gmra.mxu1 %v10768_v38  ;;  %v3518_v5 = vpop.f32.mrf.mxu0  ;;  %v3517_v18 = vadd.f32 %v3516_v48, %v10224_v13 }
 0x42b   :  { %v4963_v29 = vmax.f32 %v4394_v19, 0.0  ;;  %4645 = vmatprep.mubr.bf16.mxu1 %v10793_v50  ;;  %v10964_v45 = vpack.c.bf16 %v3854_v63, %v3852_v16  ;;  %v3519_v30 = vadd.f32 %v3518_v5, %v10230_v52  ;;  %v5194_v38 = vpack.c.bf16 %v4962_v0, %v4960_v15 }
 0x42c   :  { %v4399_v41 = vpop.f32.mrf.mxu1  ;;  %v3520_v14 = vpop.f32.mrf.mxu0  ;;  %v3855_v50 = vmax.f32 %v3517_v18, 0.0  ;;  %v4398_v46 = vadd.f32 %v4397_v32, %v10796_v4 }
 0x42d   :  { %v5195_v55 = vpack.c.bf16 %v4963_v29, %v4961_v20  ;;  %v3521_v33 = vadd.f32 %v3520_v14, %v10224_v13  ;;  %v4400_v11 = vadd.f32 %v4399_v41, %v10790_v25  ;;  %v3856_v36 = vmax.f32 %v3519_v30, 0.0 }
 0x42e   :  { %v4401_v17 = vpop.f32.mrf.mxu1  ;;  %v3522_v21 = vpop.f32.mrf.mxu0  ;;  %v4964_v32 = vmax.f32 %v4398_v46, 0.0 }
 0x42f   :  { %v4402_v47 = vadd.f32 %v4401_v17, %v10796_v4  ;;  %5555 = vmatprep.mubr.bf16.mxu0 %v5195_v55  ;;  %v3857_v8 = vmax.f32 %v3521_v33, 0.0  ;;  %v3523_v10 = vadd.f32 %v3522_v21, %v10230_v52  ;;  %v4965_v61 = vmax.f32 %v4400_v11, 0.0 }
 0x430   :  { %v4403_v12 = vpop.f32.mrf.mxu1  ;;  %v3526_v26 = vpop.f32.mrf.mxu0  ;;  %5556 = vmatmul.mubr.bf16.gmra.mxu0 %v5194_v38 }
 0x431   :  { %v4404_v44 = vadd.f32 %v4403_v12, %v10790_v25  ;;  %v10973_v3 = vpack.c.bf16 %v3857_v8, %v3855_v50  ;;  %v3858_v34 = vmax.f32 %v3523_v10, 0.0  ;;  %v4966_v49 = vmax.f32 %v4402_v47, 0.0 }
 0x432   :  { %v4407_v2 = vpop.f32.mrf.mxu1  ;;  %4646 = vmatmul.mubr.bf16.gmra.mxu1 %v10782_v28  ;;  %v3528_v48 = vpop.f32.mrf.mxu0  ;;  %v3527_v19 = vadd.f32 %v3526_v26, %v10224_v13 }
 0x433   :  { %v4967_v57 = vmax.f32 %v4404_v44, 0.0  ;;  %4655 = vmatprep.mubr.bf16.mxu1 %v10810_v53  ;;  %v10978_v63 = vpack.c.bf16 %v3858_v34, %v3856_v36  ;;  %v3529_v29 = vadd.f32 %v3528_v48, %v10230_v52  ;;  %v5196_v28 = vpack.c.bf16 %v4966_v49, %v4964_v32 }
 0x434   :  { %v4409_v16 = vpop.f32.mrf.mxu1  ;;  %v3530_v20 = vpop.f32.mrf.mxu0  ;;  %v3859_v53 = vmax.f32 %v3527_v19, 0.0  ;;  %v4408_v17 = vadd.f32 %v4407_v2, %v10796_v4 }
 0x435   :  { %v5197_v0 = vpack.c.bf16 %v4967_v57, %v4965_v61  ;;  %v3531_v5 = vadd.f32 %v3530_v20, %v10224_v13  ;;  %v4410_v41 = vadd.f32 %v4409_v16, %v10790_v25  ;;  %v3860_v21 = vmax.f32 %v3529_v29, 0.0 }
 0x436   :  { %v4411_v18 = vpop.f32.mrf.mxu1  ;;  %v3532_v15 = vpop.f32.mrf.mxu0  ;;  %v4968_v2 = vmax.f32 %v4408_v17, 0.0 }
 0x437   :  { %v4412_v14 = vadd.f32 %v4411_v18, %v10796_v4  ;;  %5563 = vmatprep.mubr.bf16.mxu0 %v5197_v0  ;;  %v3861_v55 = vmax.f32 %v3531_v5, 0.0  ;;  %v3533_v30 = vadd.f32 %v3532_v15, %v10230_v52  ;;  %v4969_v10 = vmax.f32 %v4410_v41, 0.0 }
 0x438   :  { %v4413_v33 = vpop.f32.mrf.mxu1  ;;  %v3536_v38 = vpop.f32.mrf.mxu0  ;;  %5564 = vmatmul.mubr.bf16.gmra.mxu0 %v5196_v28 }
 0x439   :  { %v4414_v11 = vadd.f32 %v4413_v33, %v10790_v25  ;;  %v10987_v47 = vpack.c.bf16 %v3861_v55, %v3859_v53  ;;  %v3862_v50 = vmax.f32 %v3533_v30, 0.0  ;;  %v4970_v12 = vmax.f32 %v4412_v14, 0.0 }
 0x43a   :  { %v4417_v8 = vpop.f32.mrf.mxu1  ;;  %4656 = vmatmul.mubr.bf16.gmra.mxu1 %v10805_v23  ;;  %v3538_v26 = vpop.f32.mrf.mxu0  ;;  %v3537_v44 = vadd.f32 %v3536_v38, %v10224_v13 }
 0x43b   :  { %v4971_v46 = vmax.f32 %v4414_v11, 0.0  ;;  %4665 = vmatprep.mubr.bf16.mxu1 %v10824_v42  ;;  %v10992_v34 = vpack.c.bf16 %v3862_v50, %v3860_v21  ;;  %v3539_v57 = vadd.f32 %v3538_v26, %v10230_v52  ;;  %v5198_v23 = vpack.c.bf16 %v4970_v12, %v4968_v2 }
 0x43c   :  { %v4419_v36 = vpop.f32.mrf.mxu1  ;;  %v3540_v61 = vpop.f32.mrf.mxu0  ;;  %v3863_v42 = vmax.f32 %v3537_v44, 0.0  ;;  %v4418_v18 = vadd.f32 %v4417_v8, %v10796_v4 }
 0x43d   :  { %v5199_v49 = vpack.c.bf16 %v4971_v46, %v4969_v10  ;;  %v3541_v48 = vadd.f32 %v3540_v61, %v10224_v13  ;;  %v4420_v16 = vadd.f32 %v4419_v36, %v10790_v25  ;;  %v3864_v15 = vmax.f32 %v3539_v57, 0.0 }
 0x43e   :  { %v4421_v19 = vpop.f32.mrf.mxu1  ;;  %v3542_v32 = vpop.f32.mrf.mxu0  ;;  %v4972_v8 = vmax.f32 %v4418_v18, 0.0 }
 0x43f   :  { %v4422_v20 = vadd.f32 %v4421_v19, %v10796_v4  ;;  %5571 = vmatprep.mubr.bf16.mxu0 %v5199_v49  ;;  %v3865_v0 = vmax.f32 %v3541_v48, 0.0  ;;  %v3543_v29 = vadd.f32 %v3542_v32, %v10230_v52  ;;  %v4973_v30 = vmax.f32 %v4420_v16, 0.0 }
 0x440   :  { %v4423_v5 = vpop.f32.mrf.mxu1  ;;  %v3546_v28 = vpop.f32.mrf.mxu0  ;;  %5572 = vmatmul.mubr.bf16.gmra.mxu0 %v5198_v23 }
 0x441   :  { %v4424_v41 = vadd.f32 %v4423_v5, %v10790_v25  ;;  %v11001_v14 = vpack.c.bf16 %v3865_v0, %v3863_v42  ;;  %v3866_v53 = vmax.f32 %v3543_v29, 0.0  ;;  %v4974_v33 = vmax.f32 %v4422_v20, 0.0 }
 0x442   :  { %v4427_v55 = vpop.f32.mrf.mxu1  ;;  %4666 = vmatmul.mubr.bf16.gmra.mxu1 %v10819_v60  ;;  %v3548_v38 = vpop.f32.mrf.mxu0  ;;  %v3547_v11 = vadd.f32 %v3546_v28, %v10224_v13 }
 0x443   :  { %v4975_v17 = vmax.f32 %v4424_v41, 0.0  ;;  %4675 = vmatprep.mubr.bf16.mxu1 %v10838_v43  ;;  %v11006_v50 = vpack.c.bf16 %v3866_v53, %v3864_v15  ;;  %v3549_v46 = vadd.f32 %v3548_v38, %v10230_v52  ;;  %v5200_v60 = vpack.c.bf16 %v4974_v33, %v4972_v8 }
 0x444   :  { %v4429_v21 = vpop.f32.mrf.mxu1  ;;  %v3550_v10 = vpop.f32.mrf.mxu0  ;;  %v3867_v43 = vmax.f32 %v3547_v11, 0.0  ;;  %v4428_v19 = vadd.f32 %v4427_v55, %v10796_v4 }
 0x445   :  { %v5201_v12 = vpack.c.bf16 %v4975_v17, %v4973_v30  ;;  %v3551_v26 = vadd.f32 %v3550_v10, %v10224_v13  ;;  %v4430_v36 = vadd.f32 %v4429_v21, %v10790_v25  ;;  %v3868_v32 = vmax.f32 %v3549_v46, 0.0 }
 0x446   :  { %v4431_v44 = vpop.f32.mrf.mxu1  ;;  %v3552_v2 = vpop.f32.mrf.mxu0  ;;  %v4976_v55 = vmax.f32 %v4428_v19, 0.0 }
 0x447   :  { %v4432_v61 = vadd.f32 %v4431_v44, %v10796_v4  ;;  %5579 = vmatprep.mubr.bf16.mxu0 %v5201_v12  ;;  %v3869_v49 = vmax.f32 %v3551_v26, 0.0  ;;  %v3553_v57 = vadd.f32 %v3552_v2, %v10230_v52  ;;  %v4977_v29 = vmax.f32 %v4430_v36, 0.0 }
 0x448   :  { %v4433_v48 = vpop.f32.mrf.mxu1  ;;  %v3556_v23 = vpop.f32.mrf.mxu0  ;;  %5580 = vmatmul.mubr.bf16.gmra.mxu0 %v5200_v60 }
 0x449   :  { %v4434_v16 = vadd.f32 %v4433_v48, %v10790_v25  ;;  %v11015_v20 = vpack.c.bf16 %v3869_v49, %v3867_v43  ;;  %v3870_v42 = vmax.f32 %v3553_v57, 0.0  ;;  %v4978_v5 = vmax.f32 %v4432_v61, 0.0 }
 0x44a   :  { %v4437_v0 = vpop.f32.mrf.mxu1  ;;  %4676 = vmatmul.mubr.bf16.gmra.mxu1 %v10833_v35  ;;  %v3558_v28 = vpop.f32.mrf.mxu0  ;;  %v3557_v41 = vadd.f32 %v3556_v23, %v10224_v13 }
 0x44b   :  { %v4979_v18 = vmax.f32 %v4434_v16, 0.0  ;;  %4685 = vmatprep.mubr.bf16.mxu1 %v10852_v62  ;;  %v11020_v53 = vpack.c.bf16 %v3870_v42, %v3868_v32  ;;  %v3559_v17 = vadd.f32 %v3558_v28, %v10230_v52  ;;  %v5202_v35 = vpack.c.bf16 %v4978_v5, %v4976_v55 }
 0x44c   :  { %v4439_v15 = vpop.f32.mrf.mxu1  ;;  %v3560_v30 = vpop.f32.mrf.mxu0  ;;  %v3871_v62 = vmax.f32 %v3557_v41, 0.0  ;;  %v4438_v44 = vadd.f32 %v4437_v0, %v10796_v4 }
 0x44d   :  { %v5203_v33 = vpack.c.bf16 %v4979_v18, %v4977_v29  ;;  %v3561_v38 = vadd.f32 %v3560_v30, %v10224_v13  ;;  %v4440_v21 = vadd.f32 %v4439_v15, %v10790_v25  ;;  %v3872_v2 = vmax.f32 %v3559_v17, 0.0 }
 0x44e   :  { %v4441_v11 = vpop.f32.mrf.mxu1  ;;  %v3562_v8 = vpop.f32.mrf.mxu0  ;;  %v4980_v0 = vmax.f32 %v4438_v44, 0.0 }
 0x44f   :  { %v4442_v10 = vadd.f32 %v4441_v11, %v10796_v4  ;;  %5587 = vmatprep.mubr.bf16.mxu0 %v5203_v33  ;;  %v3873_v12 = vmax.f32 %v3561_v38, 0.0  ;;  %v3563_v46 = vadd.f32 %v3562_v8, %v10230_v52  ;;  %v4981_v57 = vmax.f32 %v4440_v21, 0.0 }
 0x450   :  { %v4443_v26 = vpop.f32.mrf.mxu1  ;;  %v3566_v60 = vpop.f32.mrf.mxu0  ;;  %5588 = vmatmul.mubr.bf16.gmra.mxu0 %v5202_v35 }
 0x451   :  { %v4444_v36 = vadd.f32 %v4443_v26, %v10790_v25  ;;  %v11029_v61 = vpack.c.bf16 %v3873_v12, %v3871_v62  ;;  %v3874_v43 = vmax.f32 %v3563_v46, 0.0  ;;  %v4982_v48 = vmax.f32 %v4442_v10, 0.0 }
 0x452   :  { %v4447_v49 = vpop.f32.mrf.mxu1  ;;  %4686 = vmatmul.mubr.bf16.gmra.mxu1 %v10847_v1  ;;  %v3568_v23 = vpop.f32.mrf.mxu0  ;;  %v3567_v16 = vadd.f32 %v3566_v60, %v10224_v13 }
 0x453   :  { %v4983_v19 = vmax.f32 %v4444_v36, 0.0  ;;  %4695 = vmatprep.mubr.bf16.mxu1 %v10866_v6  ;;  %v11034_v42 = vpack.c.bf16 %v3874_v43, %v3872_v2  ;;  %v3569_v18 = vadd.f32 %v3568_v23, %v10230_v52  ;;  %v5204_v1 = vpack.c.bf16 %v4982_v48, %v4980_v0 }
 0x454   :  { %v4449_v32 = vpop.f32.mrf.mxu1  ;;  %v3570_v29 = vpop.f32.mrf.mxu0  ;;  %v3875_v6 = vmax.f32 %v3567_v16, 0.0  ;;  %v4448_v11 = vadd.f32 %v4447_v49, %v10796_v4 }
 0x455   :  { %v5205_v5 = vpack.c.bf16 %v4983_v19, %v4981_v57  ;;  %v3571_v28 = vadd.f32 %v3570_v29, %v10224_v13  ;;  %v4450_v15 = vadd.f32 %v4449_v32, %v10790_v25  ;;  %v3876_v8 = vmax.f32 %v3569_v18, 0.0 }
 0x456   :  { %v4451_v41 = vpop.f32.mrf.mxu1  ;;  %v3572_v55 = vpop.f32.mrf.mxu0  ;;  %v4984_v49 = vmax.f32 %v4448_v11, 0.0 }
 0x457   :  { %v4452_v30 = vadd.f32 %v4451_v41, %v10796_v4  ;;  %5595 = vmatprep.mubr.bf16.mxu0 %v5205_v5  ;;  %v3877_v33 = vmax.f32 %v3571_v28, 0.0  ;;  %v3573_v17 = vadd.f32 %v3572_v55, %v10230_v52  ;;  %v4985_v46 = vmax.f32 %v4450_v15, 0.0 }
 0x458   :  { %v4453_v38 = vpop.f32.mrf.mxu1  ;;  %v3576_v35 = vpop.f32.mrf.mxu0  ;;  %5596 = vmatmul.mubr.bf16.gmra.mxu0 %v5204_v1 }
 0x459   :  { %v4454_v21 = vadd.f32 %v4453_v38, %v10790_v25  ;;  %v11043_v10 = vpack.c.bf16 %v3877_v33, %v3875_v6  ;;  %v3878_v62 = vmax.f32 %v3573_v17, 0.0  ;;  %v4986_v26 = vmax.f32 %v4452_v30, 0.0 }
 0x45a   :  { %v4457_v12 = vpop.f32.mrf.mxu1  ;;  %4696 = vmatmul.mubr.bf16.gmra.mxu1 %v10861_v9  ;;  %v3578_v60 = vpop.f32.mrf.mxu0  ;;  %v3577_v36 = vadd.f32 %v3576_v35, %v10224_v13 }
 0x45b   :  { %v4987_v44 = vmax.f32 %v4454_v21, 0.0  ;;  %4705 = vmatprep.mubr.bf16.mxu1 %v10880_v7  ;;  %v11048_v43 = vpack.c.bf16 %v3878_v62, %v3876_v8  ;;  %v3579_v19 = vadd.f32 %v3578_v60, %v10230_v52  ;;  %v5206_v9 = vpack.c.bf16 %v4986_v26, %v4984_v49 }
 0x45c   :  { %v4459_v2 = vpop.f32.mrf.mxu1  ;;  %v3580_v57 = vpop.f32.mrf.mxu0  ;;  %v3879_v7 = vmax.f32 %v3577_v36, 0.0  ;;  %v4458_v41 = vadd.f32 %v4457_v12, %v10796_v4 }
 0x45d   :  { %v5207_v48 = vpack.c.bf16 %v4987_v44, %v4985_v46  ;;  %v3581_v23 = vadd.f32 %v3580_v57, %v10224_v13  ;;  %v4460_v32 = vadd.f32 %v4459_v2, %v10790_v25  ;;  %v3880_v55 = vmax.f32 %v3579_v19, 0.0 }
 0x45e   :  { %v4461_v16 = vpop.f32.mrf.mxu1  ;;  %v3582_v0 = vpop.f32.mrf.mxu0  ;;  %v4988_v12 = vmax.f32 %v4458_v41, 0.0 }
 0x45f   :  { %v4462_v29 = vadd.f32 %v4461_v16, %v10796_v4  ;;  %5603 = vmatprep.mubr.bf16.mxu0 %v5207_v48  ;;  %v3881_v5 = vmax.f32 %v3581_v23, 0.0  ;;  %v3583_v18 = vadd.f32 %v3582_v0, %v10230_v52  ;;  %v4989_v17 = vmax.f32 %v4460_v32, 0.0 }
 0x460   :  { %v4463_v28 = vpop.f32.mrf.mxu1  ;;  %v3586_v1 = vpop.f32.mrf.mxu0  ;;  %5604 = vmatmul.mubr.bf16.gmra.mxu0 %v5206_v9 }
 0x461   :  { %v4464_v15 = vadd.f32 %v4463_v28, %v10790_v25  ;;  %v11057_v30 = vpack.c.bf16 %v3881_v5, %v3879_v7  ;;  %v3882_v6 = vmax.f32 %v3583_v18, 0.0  ;;  %v4990_v38 = vmax.f32 %v4462_v29, 0.0 }
 0x462   :  { %v4467_v33 = vpop.f32.mrf.mxu1  ;;  %4706 = vmatmul.mubr.bf16.gmra.mxu1 %v10875_v22  ;;  %v3588_v35 = vpop.f32.mrf.mxu0  ;;  %v3587_v21 = vadd.f32 %v3586_v1, %v10224_v13 }
 0x463   :  { %v4991_v11 = vmax.f32 %v4464_v15, 0.0  ;;  %4715 = vmatprep.mubr.bf16.mxu1 %v10894_v56  ;;  %v11062_v62 = vpack.c.bf16 %v3882_v6, %v3880_v55  ;;  %v3589_v44 = vadd.f32 %v3588_v35, %v10230_v52  ;;  %v5208_v22 = vpack.c.bf16 %v4990_v38, %v4988_v12 }
 0x464   :  { %v4469_v8 = vpop.f32.mrf.mxu1  ;;  %v3590_v46 = vpop.f32.mrf.mxu0  ;;  %v3883_v56 = vmax.f32 %v3587_v21, 0.0  ;;  %v4468_v16 = vadd.f32 %v4467_v33, %v10796_v4 }
 0x465   :  { %v5209_v26 = vpack.c.bf16 %v4991_v11, %v4989_v17  ;;  %v3591_v60 = vadd.f32 %v3590_v46, %v10224_v13  ;;  %v4470_v2 = vadd.f32 %v4469_v8, %v10790_v25  ;;  %v3884_v0 = vmax.f32 %v3589_v44, 0.0 }
 0x466   :  { %v4471_v36 = vpop.f32.mrf.mxu1  ;;  %v3592_v49 = vpop.f32.mrf.mxu0  ;;  %v4992_v33 = vmax.f32 %v4468_v16, 0.0 }
 0x467   :  { %v4472_v57 = vadd.f32 %v4471_v36, %v10796_v4  ;;  %5611 = vmatprep.mubr.bf16.mxu0 %v5209_v26  ;;  %v3885_v48 = vmax.f32 %v3591_v60, 0.0  ;;  %v3593_v19 = vadd.f32 %v3592_v49, %v10230_v52  ;;  %v4993_v18 = vmax.f32 %v4470_v2, 0.0 }
 0x468   :  { %v4473_v23 = vpop.f32.mrf.mxu1  ;;  %v3596_v9 = vpop.f32.mrf.mxu0  ;;  %5612 = vmatmul.mubr.bf16.gmra.mxu0 %v5208_v22 }
 0x469   :  { %v4474_v32 = vadd.f32 %v4473_v23, %v10790_v25  ;;  %v11071_v29 = vpack.c.bf16 %v3885_v48, %v3883_v56  ;;  %v3886_v7 = vmax.f32 %v3593_v19, 0.0  ;;  %v4994_v28 = vmax.f32 %v4472_v57, 0.0 }
 0x46a   :  { %v4477_v5 = vpop.f32.mrf.mxu1  ;;  %4716 = vmatmul.mubr.bf16.gmra.mxu1 %v10889_v40  ;;  %v3598_v1 = vpop.f32.mrf.mxu0  ;;  %v3597_v15 = vadd.f32 %v3596_v9, %v10224_v13 }
 0x46b   :  { %v4995_v41 = vmax.f32 %v4474_v32, 0.0  ;;  %4725 = vmatprep.mubr.bf16.mxu1 %v10908_v37  ;;  %v11076_v6 = vpack.c.bf16 %v3886_v7, %v3884_v0  ;;  %v3599_v11 = vadd.f32 %v3598_v1, %v10230_v52  ;;  %v5210_v40 = vpack.c.bf16 %v4994_v28, %v4992_v33 }
 0x46c   :  { %v4479_v55 = vpop.f32.mrf.mxu1  ;;  %v3600_v17 = vpop.f32.mrf.mxu0  ;;  %v3887_v37 = vmax.f32 %v3597_v15, 0.0  ;;  %v4478_v36 = vadd.f32 %v4477_v5, %v10796_v4 }
 0x46d   :  { %v5211_v38 = vpack.c.bf16 %v4995_v41, %v4993_v18  ;;  %v3601_v35 = vadd.f32 %v3600_v17, %v10224_v13  ;;  %v4480_v8 = vadd.f32 %v4479_v55, %v10790_v25  ;;  %v3888_v49 = vmax.f32 %v3599_v11, 0.0 }
 0x46e   :  { %v4481_v21 = vpop.f32.mrf.mxu1  ;;  %v3602_v12 = vpop.f32.mrf.mxu0  ;;  %v4996_v5 = vmax.f32 %v4478_v36, 0.0 }
 0x46f   :  { %v4482_v46 = vadd.f32 %v4481_v21, %v10796_v4  ;;  %5619 = vmatprep.mubr.bf16.mxu0 %v5211_v38  ;;  %v3889_v26 = vmax.f32 %v3601_v35, 0.0  ;;  %v3603_v44 = vadd.f32 %v3602_v12, %v10230_v52  ;;  %v4997_v19 = vmax.f32 %v4480_v8, 0.0 }
 0x470   :  { %v4483_v60 = vpop.f32.mrf.mxu1  ;;  %v3606_v22 = vpop.f32.mrf.mxu0  ;;  %5620 = vmatmul.mubr.bf16.gmra.mxu0 %v5210_v40 }
 0x471   :  { %v4484_v2 = vadd.f32 %v4483_v60, %v10790_v25  ;;  %v11085_v57 = vpack.c.bf16 %v3889_v26, %v3887_v37  ;;  %v3890_v56 = vmax.f32 %v3603_v44, 0.0  ;;  %v4998_v23 = vmax.f32 %v4482_v46, 0.0 }
 0x472   :  { %v4487_v48 = vpop.f32.mrf.mxu1  ;;  %4726 = vmatmul.mubr.bf16.gmra.mxu1 %v10903_v51  ;;  %v3608_v9 = vpop.f32.mrf.mxu0  ;;  %v3607_v32 = vadd.f32 %v3606_v22, %v10224_v13 }
 0x473   :  { %v4999_v16 = vmax.f32 %v4484_v2, 0.0  ;;  %4735 = vmatprep.mubr.bf16.mxu1 %v10922_v24  ;;  %v11090_v7 = vpack.c.bf16 %v3890_v56, %v3888_v49  ;;  %v3609_v41 = vadd.f32 %v3608_v9, %v10230_v52  ;;  %v5212_v51 = vpack.c.bf16 %v4998_v23, %v4996_v5 }
 0x474   :  { %v4489_v0 = vpop.f32.mrf.mxu1  ;;  %v3610_v18 = vpop.f32.mrf.mxu0  ;;  %v3891_v24 = vmax.f32 %v3607_v32, 0.0  ;;  %v4488_v21 = vadd.f32 %v4487_v48, %v10796_v4 }
 0x475   :  { %v5213_v28 = vpack.c.bf16 %v4999_v16, %v4997_v19  ;;  %v3611_v1 = vadd.f32 %v3610_v18, %v10224_v13  ;;  %v4490_v55 = vadd.f32 %v4489_v0, %v10790_v25  ;;  %v3892_v12 = vmax.f32 %v3609_v41, 0.0 }
 0x476   :  { %v4491_v15 = vpop.f32.mrf.mxu1  ;;  %v3612_v33 = vpop.f32.mrf.mxu0  ;;  %v5000_v48 = vmax.f32 %v4488_v21, 0.0 }
 0x477   :  { %v4492_v17 = vadd.f32 %v4491_v15, %v10796_v4  ;;  %5627 = vmatprep.mubr.bf16.mxu0 %v5213_v28  ;;  %v3893_v38 = vmax.f32 %v3611_v1, 0.0  ;;  %v3613_v11 = vadd.f32 %v3612_v33, %v10230_v52  ;;  %v5001_v44 = vmax.f32 %v4490_v55, 0.0 }
 0x478   :  { %v4493_v35 = vpop.f32.mrf.mxu1  ;;  %v3616_v40 = vpop.f32.mrf.mxu0  ;;  %5628 = vmatmul.mubr.bf16.gmra.mxu0 %v5212_v51 }
 0x479   :  { %v4494_v8 = vadd.f32 %v4493_v35, %v10790_v25  ;;  %v11099_v46 = vpack.c.bf16 %v3893_v38, %v3891_v24  ;;  %v3894_v37 = vmax.f32 %v3613_v11, 0.0  ;;  %v5002_v60 = vmax.f32 %v4492_v17, 0.0 }
 0x47a   :  { %v4497_v26 = vpop.f32.mrf.mxu1  ;;  %4736 = vmatmul.mubr.bf16.gmra.mxu1 %v10917_v59  ;;  %v3618_v22 = vpop.f32.mrf.mxu0  ;;  %v3617_v2 = vadd.f32 %v3616_v40, %v10224_v13 }
 0x47b   :  { %v5003_v36 = vmax.f32 %v4494_v8, 0.0  ;;  %4745 = vmatprep.mubr.bf16.mxu1 %v10936_v39  ;;  %v11104_v56 = vpack.c.bf16 %v3894_v37, %v3892_v12  ;;  %v3619_v16 = vadd.f32 %v3618_v22, %v10230_v52  ;;  %v5214_v59 = vpack.c.bf16 %v5002_v60, %v5000_v48 }
 0x47c   :  { %v4499_v49 = vpop.f32.mrf.mxu1  ;;  %v3620_v19 = vpop.f32.mrf.mxu0  ;;  %v3895_v39 = vmax.f32 %v3617_v2, 0.0  ;;  %v4498_v15 = vadd.f32 %v4497_v26, %v10796_v4 }
 0x47d   :  { %v5215_v23 = vpack.c.bf16 %v5003_v36, %v5001_v44  ;;  %v3621_v9 = vadd.f32 %v3620_v19, %v10224_v13  ;;  %v4500_v0 = vadd.f32 %v4499_v49, %v10790_v25  ;;  %v3896_v33 = vmax.f32 %v3619_v16, 0.0 }
 0x47e   :  { %v4501_v32 = vpop.f32.mrf.mxu1  ;;  %v3622_v5 = vpop.f32.mrf.mxu0  ;;  %v5004_v26 = vmax.f32 %v4498_v15, 0.0 }
 0x47f   :  { %v4502_v18 = vadd.f32 %v4501_v32, %v10796_v4  ;;  %5635 = vmatprep.mubr.bf16.mxu0 %v5215_v23  ;;  %v3897_v28 = vmax.f32 %v3621_v9, 0.0  ;;  %v3623_v41 = vadd.f32 %v3622_v5, %v10230_v52  ;;  %v5005_v11 = vmax.f32 %v4500_v0, 0.0 }
 0x480   :  { %v4503_v1 = vpop.f32.mrf.mxu1  ;;  %v3626_v51 = vpop.f32.mrf.mxu0  ;;  %5636 = vmatmul.mubr.bf16.gmra.mxu0 %v5214_v59 }
 0x481   :  { %v4504_v55 = vadd.f32 %v4503_v1, %v10790_v25  ;;  %v11113_v17 = vpack.c.bf16 %v3897_v28, %v3895_v39  ;;  %v3898_v24 = vmax.f32 %v3623_v41, 0.0  ;;  %v5006_v35 = vmax.f32 %v4502_v18, 0.0 }
 0x482   :  { %v4507_v38 = vpop.f32.mrf.mxu1  ;;  %4746 = vmatmul.mubr.bf16.gmra.mxu1 %v10931_v54  ;;  %v3628_v40 = vpop.f32.mrf.mxu0  ;;  %v3627_v8 = vadd.f32 %v3626_v51, %v10224_v13 }
 0x483   :  { %v5007_v21 = vmax.f32 %v4504_v55, 0.0  ;;  %4755 = vmatprep.mubr.bf16.mxu1 %v10950_v27  ;;  %v11118_v37 = vpack.c.bf16 %v3898_v24, %v3896_v33  ;;  %v3629_v36 = vadd.f32 %v3628_v40, %v10230_v52  ;;  %v5216_v54 = vpack.c.bf16 %v5006_v35, %v5004_v26 }
 0x484   :  { %v4509_v12 = vpop.f32.mrf.mxu1  ;;  %v3630_v44 = vpop.f32.mrf.mxu0  ;;  %v3899_v27 = vmax.f32 %v3627_v8, 0.0  ;;  %v4508_v32 = vadd.f32 %v4507_v38, %v10796_v4 }
 0x485   :  { %v5217_v60 = vpack.c.bf16 %v5007_v21, %v5005_v11  ;;  %v3631_v22 = vadd.f32 %v3630_v44, %v10224_v13  ;;  %v4510_v49 = vadd.f32 %v4509_v12, %v10790_v25  ;;  %v3900_v5 = vmax.f32 %v3629_v36, 0.0 }
 0x486   :  { %v4511_v2 = vpop.f32.mrf.mxu1  ;;  %v3632_v48 = vpop.f32.mrf.mxu0  ;;  %v5008_v38 = vmax.f32 %v4508_v32, 0.0 }
 0x487   :  { %v4512_v19 = vadd.f32 %v4511_v2, %v10796_v4  ;;  %5643 = vmatprep.mubr.bf16.mxu0 %v5217_v60  ;;  %v3901_v23 = vmax.f32 %v3631_v22, 0.0  ;;  %v3633_v16 = vadd.f32 %v3632_v48, %v10230_v52  ;;  %v5009_v41 = vmax.f32 %v4510_v49, 0.0 }
 0x488   :  { %v4513_v9 = vpop.f32.mrf.mxu1  ;;  %v3636_v59 = vpop.f32.mrf.mxu0  ;;  %5644 = vmatmul.mubr.bf16.gmra.mxu0 %v5216_v54 }
 0x489   :  { %v4514_v0 = vadd.f32 %v4513_v9, %v10790_v25  ;;  %v11127_v18 = vpack.c.bf16 %v3901_v23, %v3899_v27  ;;  %v3902_v39 = vmax.f32 %v3633_v16, 0.0  ;;  %v5010_v1 = vmax.f32 %v4512_v19, 0.0 }
 0x48a   :  { %v4517_v28 = vpop.f32.mrf.mxu1  ;;  %4756 = vmatmul.mubr.bf16.gmra.mxu1 %v10945_v31  ;;  %v3638_v51 = vpop.f32.mrf.mxu0  ;;  %v3637_v55 = vadd.f32 %v3636_v59, %v10224_v13 }
 0x48b   :  { %v5011_v15 = vmax.f32 %v4514_v0, 0.0  ;;  %4765 = vmatprep.mubr.bf16.mxu1 %v10964_v45  ;;  %v11132_v24 = vpack.c.bf16 %v3902_v39, %v3900_v5  ;;  %v3639_v21 = vadd.f32 %v3638_v51, %v10230_v52  ;;  %v5218_v31 = vpack.c.bf16 %v5010_v1, %v5008_v38 }
 0x48c   :  { %v4519_v33 = vpop.f32.mrf.mxu1  ;;  %v3640_v11 = vpop.f32.mrf.mxu0  ;;  %v3903_v45 = vmax.f32 %v3637_v55, 0.0  ;;  %v4518_v2 = vadd.f32 %v4517_v28, %v10796_v4 }
 0x48d   :  { %v5219_v35 = vpack.c.bf16 %v5011_v15, %v5009_v41  ;;  %v3641_v40 = vadd.f32 %v3640_v11, %v10224_v13  ;;  %v4520_v12 = vadd.f32 %v4519_v33, %v10790_v25  ;;  %v3904_v48 = vmax.f32 %v3639_v21, 0.0 }
 0x48e   :  { %v4521_v8 = vpop.f32.mrf.mxu1  ;;  %v3642_v26 = vpop.f32.mrf.mxu0  ;;  %v5012_v28 = vmax.f32 %v4518_v2, 0.0 }
 0x48f   :  { %v4522_v44 = vadd.f32 %v4521_v8, %v10796_v4  ;;  %5651 = vmatprep.mubr.bf16.mxu0 %v5219_v35  ;;  %v3905_v60 = vmax.f32 %v3641_v40, 0.0  ;;  %v3643_v36 = vadd.f32 %v3642_v26, %v10230_v52  ;;  %v5013_v16 = vmax.f32 %v4520_v12, 0.0 }
 0x490   :  { %v4523_v22 = vpop.f32.mrf.mxu1  ;;  %v3646_v54 = vpop.f32.mrf.mxu0  ;;  %5652 = vmatmul.mubr.bf16.gmra.mxu0 %v5218_v31 }
 0x491   :  { %v4524_v49 = vadd.f32 %v4523_v22, %v10790_v25  ;;  %v11141_v19 = vpack.c.bf16 %v3905_v60, %v3903_v45  ;;  %v3906_v27 = vmax.f32 %v3643_v36, 0.0  ;;  %v5014_v9 = vmax.f32 %v4522_v44, 0.0 }
 0x492   :  { %v4527_v23 = vpop.f32.mrf.mxu1  ;;  %4766 = vmatmul.mubr.bf16.gmra.mxu1 %v10959_v58  ;;  %v3648_v59 = vpop.f32.mrf.mxu0  ;;  %v3647_v0 = vadd.f32 %v3646_v54, %v10224_v13 }
 0x493   :  { %v5015_v32 = vmax.f32 %v4524_v49, 0.0  ;;  %4775 = vmatprep.mubr.bf16.mxu1 %v10978_v63  ;;  %v11146_v39 = vpack.c.bf16 %v3906_v27, %v3904_v48  ;;  %v3649_v15 = vadd.f32 %v3648_v59, %v10230_v52  ;;  %v5220_v58 = vpack.c.bf16 %v5014_v9, %v5012_v28  ;;  %v11155_v63 = vld [vmem:[%s13296_s10] ss:$0 sm:$0xff] }
 0x494   :  { %v4529_v5 = vpop.f32.mrf.mxu1  ;;  %v3650_v41 = vpop.f32.mrf.mxu0  ;;  %v3907_v35 = vmax.f32 %v3647_v0, 0.0 }
 0x495   :  { %v5221_v1 = vpack.c.bf16 %v5015_v32, %v5013_v16  ;;  %v3651_v51 = vadd.f32 %v3650_v41, %v10224_v13  ;;  %v4530_v33 = vadd.f32 %v4529_v5, %v10790_v25  ;;  %v4528_v13 = vadd.f32 %v4527_v23, %v10796_v4 }
 0x496   :  { %v4531_v55 = vpop.f32.mrf.mxu1  ;;  %v3652_v38 = vpop.f32.mrf.mxu0  ;;  %v3908_v26 = vmax.f32 %v3649_v15, 0.0 }
 0x497   :  { %v4532_v11 = vadd.f32 %v4531_v55, %v10796_v4  ;;  %5659 = vmatprep.mubr.bf16.mxu0 %v5221_v1  ;;  %v3909_v21 = vmax.f32 %v3651_v51, 0.0  ;;  %v3653_v40 = vadd.f32 %v3652_v38, %v10230_v52  ;;  %v5017_v22 = vmax.f32 %v4530_v33, 0.0 }
 0x498   :  { %v4533_v8 = vpop.f32.mrf.mxu1  ;;  %v5469_v12 = vpop.f32.mrf.mxu0  ;;  %5660 = vmatmul.mubr.bf16.gmra.mxu0 %v5220_v58  ;;  %v5016_v23 = vmax.f32 %v4528_v13, 0.0 }
 0x499   :  { %v4534_v31 = vadd.f32 %v4533_v8, %v10790_v25  ;;  %v11160_v44 = vpack.c.bf16 %v3909_v21, %v3907_v35  ;;  %v3910_v45 = vmax.f32 %v3653_v40, 0.0  ;;  %v11163_v60 = vadd.f32 %v11155_v63, %v5469_v12 }
 0x49a   :  { %v4537_v36 = vpop.f32.mrf.mxu1  ;;  %4776 = vmatmul.mubr.bf16.gmra.mxu1 %v10973_v3  ;;  %v5018_v52 = vmax.f32 %v4532_v11, 0.0  ;;  %v5471_v54 = vpop.f32.mrf.mxu0 }
 0x49b   :  { %v5019_v2 = vmax.f32 %v4534_v31, 0.0  ;;  %4785 = vmatprep.mubr.bf16.mxu1 %v10992_v34  ;;  %v5981_v48 = vsel %vm5980_vm1, %v11163_v60, -inf  ;;  %v11169_v27 = vpack.c.bf16 %v3910_v45, %v3908_v26  ;;  %v4538_v1 = vadd.f32 %v4537_v36, %v10796_v4 }
 0x49c   :  { %v4539_v49 = vpop.f32.mrf.mxu1  ;;  %v5472_v16 = vpop.f32.mrf.mxu0  ;;  %5982 = vmax.xlane.f32.xlu0 %v5981_v48  ;;  %v5222_v59 = vpack.c.bf16 %v5018_v52, %v5016_v23 }
 0x49d   :  { %v5223_v9 = vpack.c.bf16 %v5019_v2, %v5017_v22  ;;  %v11172_v32 = vadd.f32 %v11155_v63, %v5472_v16  ;;  %v4540_v0 = vadd.f32 %v4539_v49, %v10790_v25  ;;  %v5020_v8 = vmax.f32 %v4538_v1, 0.0 }
 0x49e   :  { %v4541_v3 = vpop.f32.mrf.mxu1  ;;  %v5474_v34 = vpop.f32.mrf.mxu0 }
 0x49f   :  { %v4542_v5 = vadd.f32 %v4541_v3, %v10796_v4  ;;  %5667 = vmatprep.mubr.bf16.mxu0 %v5223_v9  ;;  %v5984_v41 = vsel %vm5980_vm1, %v11172_v32, -inf  ;;  %v5021_v33 = vmax.f32 %v4540_v0, 0.0 }
 0x4a0   :  { %v4543_v28 = vpop.f32.mrf.mxu1  ;;  %v5477_v51 = vpop.f32.mrf.mxu0  ;;  %5668 = vmatmul.mubr.bf16.gmra.mxu0 %v5222_v59  ;;  %5985 = vmax.xlane.f32.xlu0 %v5984_v41 }
 0x4a1   :  { %v4544_v15 = vadd.f32 %v4543_v28, %v10790_v25  ;;  %v11181_v55 = vadd.f32 %v11155_v63, %v5477_v51  ;;  %v5022_v38 = vmax.f32 %v4542_v5, 0.0 }
 0x4a2   :  { %v4547_v58 = vpop.f32.mrf.mxu1  ;;  %4786 = vmatmul.mubr.bf16.gmra.mxu1 %v10987_v47  ;;  %v5479_v35 = vpop.f32.mrf.mxu0 }
 0x4a3   :  { %v5023_v11 = vmax.f32 %v4544_v15, 0.0  ;;  %4795 = vmatprep.mubr.bf16.mxu1 %v11006_v50  ;;  %v5987_v40 = vsel %vm5980_vm1, %v11181_v55, -inf  ;;  %v5224_v45 = vpack.c.bf16 %v5022_v38, %v5020_v8  ;;  %v4548_v2 = vadd.f32 %v4547_v58, %v10796_v4 }
 0x4a4   :  { %v4549_v21 = vpop.f32.mrf.mxu1  ;;  %v5480_v13 = vpop.f32.mrf.mxu0  ;;  %5988 = vmax.xlane.f32.xlu1 %v5987_v40 }
 0x4a5   :  { %v5225_v31 = vpack.c.bf16 %v5023_v11, %v5021_v33  ;;  %v11188_v12 = vadd.f32 %v11155_v63, %v5480_v13  ;;  %v4550_v47 = vadd.f32 %v4549_v21, %v10790_v25  ;;  %v5024_v34 = vmax.f32 %v4548_v2, 0.0 }
 0x4a6   :  { %v4551_v26 = vpop.f32.mrf.mxu1  ;;  %v5482_v22 = vpop.f32.mrf.mxu0 }
 0x4a7   :  { %v4552_v36 = vadd.f32 %v4551_v26, %v10796_v4  ;;  %5675 = vmatprep.mubr.bf16.mxu0 %v5225_v31  ;;  %v5990_v52 = vsel %vm5980_vm1, %v11188_v12, -inf  ;;  %v5025_v16 = vmax.f32 %v4550_v47, 0.0 }
 0x4a8   :  { %v4553_v50 = vpop.f32.mrf.mxu1  ;;  %v5485_v49 = vpop.f32.mrf.mxu0  ;;  %5676 = vmatmul.mubr.bf16.gmra.mxu0 %v5224_v45  ;;  %5991 = vmax.xlane.f32.xlu1 %v5990_v52 }
 0x4a9   :  { %v4554_v54 = vadd.f32 %v4553_v50, %v10790_v25  ;;  %v11197_v48 = vadd.f32 %v11155_v63, %v5485_v49  ;;  %v5026_v9 = vmax.f32 %v4552_v36, 0.0 }
 0x4aa   :  { %v4557_v23 = vpop.f32.mrf.mxu1  ;;  %4796 = vmatmul.mubr.bf16.gmra.mxu1 %v11001_v14  ;;  %v5487_v59 = vpop.f32.mrf.mxu0 }
 0x4ab   :  { %v5027_v3 = vmax.f32 %v4554_v54, 0.0  ;;  %4805 = vmatprep.mubr.bf16.mxu1 %v11020_v53  ;;  %v5993_v5 = vsel %vm5980_vm1, %v11197_v48, -inf  ;;  %v5226_v51 = vpack.c.bf16 %v5026_v9, %v5024_v34  ;;  %v4558_v11 = vadd.f32 %v4557_v23, %v10796_v4 }
 0x4ac   :  { %v4559_v0 = vpop.f32.mrf.mxu1  ;;  %v5488_v28 = vpop.f32.mrf.mxu0  ;;  %5994 = vmax.xlane.f32.xlu0 %v5993_v5 }
 0x4ad   :  { %v5227_v41 = vpack.c.bf16 %v5027_v3, %v5025_v16  ;;  %v11204_v1 = vadd.f32 %v11155_v63, %v5488_v28  ;;  %v4560_v14 = vadd.f32 %v4559_v0, %v10790_v25  ;;  %v5028_v22 = vmax.f32 %v4558_v11, 0.0 }
 0x4ae   :  { %v4561_v15 = vpop.f32.mrf.mxu1  ;;  %v5490_v33 = vpop.f32.mrf.mxu0 }
 0x4af   :  { %v4562_v58 = vadd.f32 %v4561_v15, %v10796_v4  ;;  %5683 = vmatprep.mubr.bf16.mxu0 %v5227_v41  ;;  %v5996_v38 = vsel %vm5980_vm1, %v11204_v1, -inf  ;;  %v5029_v13 = vmax.f32 %v4560_v14, 0.0 }
 0x4b0   :  { %v4563_v53 = vpop.f32.mrf.mxu1  ;;  %v5493_v21 = vpop.f32.mrf.mxu0  ;;  %5684 = vmatmul.mubr.bf16.gmra.mxu0 %v5226_v51  ;;  %5997 = vmax.xlane.f32.xlu1 %v5996_v38 }
 0x4b1   :  { %v4564_v35 = vadd.f32 %v4563_v53, %v10790_v25  ;;  %v11213_v40 = vadd.f32 %v11155_v63, %v5493_v21  ;;  %v5030_v31 = vmax.f32 %v4562_v58, 0.0 }
 0x4b2   :  { %v4567_v8 = vpop.f32.mrf.mxu1  ;;  %4806 = vmatmul.mubr.bf16.gmra.mxu1 %v11015_v20  ;;  %v5495_v45 = vpop.f32.mrf.mxu0 }
 0x4b3   :  { %v5031_v26 = vmax.f32 %v4564_v35, 0.0  ;;  %4815 = vmatprep.mubr.bf16.mxu1 %v11034_v42  ;;  %v5999_v36 = vsel %vm5980_vm1, %v11213_v40, -inf  ;;  %v5228_v49 = vpack.c.bf16 %v5030_v31, %v5028_v22  ;;  %v4568_v3 = vadd.f32 %v4567_v8, %v10796_v4 }
 0x4b4   :  { %v4569_v47 = vpop.f32.mrf.mxu1  ;;  %v5496_v50 = vpop.f32.mrf.mxu0  ;;  %6000 = vmax.xlane.f32.xlu0 %v5999_v36 }
 0x4b5   :  { %v5229_v52 = vpack.c.bf16 %v5031_v26, %v5029_v13  ;;  %v11220_v2 = vadd.f32 %v11155_v63, %v5496_v50  ;;  %v4570_v20 = vadd.f32 %v4569_v47, %v10790_v25  ;;  %v5032_v33 = vmax.f32 %v4568_v3, 0.0 }
 0x4b6   :  { %v4571_v54 = vpop.f32.mrf.mxu1  ;;  %v5498_v16 = vpop.f32.mrf.mxu0 }
 0x4b7   :  { %v4572_v23 = vadd.f32 %v4571_v54, %v10796_v4  ;;  %5691 = vmatprep.mubr.bf16.mxu0 %v5229_v52  ;;  %v6002_v9 = vsel %vm5980_vm1, %v11220_v2, -inf  ;;  %v5033_v28 = vmax.f32 %v4570_v20, 0.0 }
 0x4b8   :  { %v4573_v42 = vpop.f32.mrf.mxu1  ;;  %v5501_v0 = vpop.f32.mrf.mxu0  ;;  %5692 = vmatmul.mubr.bf16.gmra.mxu0 %v5228_v49  ;;  %6003 = vmax.xlane.f32.xlu1 %v6002_v9 }
 0x4b9   :  { %v4574_v59 = vadd.f32 %v4573_v42, %v10790_v25  ;;  %v11229_v5 = vadd.f32 %v11155_v63, %v5501_v0  ;;  %v5034_v41 = vmax.f32 %v4572_v23, 0.0 }
 0x4ba   :  { %v4577_v34 = vpop.f32.mrf.mxu1  ;;  %4816 = vmatmul.mubr.bf16.gmra.mxu1 %v11029_v61  ;;  %v5503_v51 = vpop.f32.mrf.mxu0 }
 0x4bb   :  { %v5035_v15 = vmax.f32 %v4574_v59, 0.0  ;;  %4825 = vmatprep.mubr.bf16.mxu1 %v11048_v43  ;;  %v6005_v58 = vsel %vm5980_vm1, %v11229_v5, -inf  ;;  %v5230_v21 = vpack.c.bf16 %v5034_v41, %v5032_v33  ;;  %v4578_v26 = vadd.f32 %v4577_v34, %v10796_v4 }
 0x4bc   :  { %v4579_v14 = vpop.f32.mrf.mxu1  ;;  %v5504_v53 = vpop.f32.mrf.mxu0  ;;  %6006 = vmax.xlane.f32.xlu0 %v6005_v58 }
 0x4bd   :  { %v5231_v38 = vpack.c.bf16 %v5035_v15, %v5033_v28  ;;  %v11236_v11 = vadd.f32 %v11155_v63, %v5504_v53  ;;  %v4580_v61 = vadd.f32 %v4579_v14, %v10790_v25  ;;  %v5036_v16 = vmax.f32 %v4578_v26, 0.0 }
 0x4be   :  { %v4581_v35 = vpop.f32.mrf.mxu1  ;;  %v5506_v13 = vpop.f32.mrf.mxu0 }
 0x4bf   :  { %v4582_v8 = vadd.f32 %v4581_v35, %v10796_v4  ;;  %5699 = vmatprep.mubr.bf16.mxu0 %v5231_v38  ;;  %v6008_v31 = vsel %vm5980_vm1, %v11236_v11, -inf  ;;  %v5037_v50 = vmax.f32 %v4580_v61, 0.0 }
 0x4c0   :  { %v4583_v43 = vpop.f32.mrf.mxu1  ;;  %v5509_v47 = vpop.f32.mrf.mxu0  ;;  %5700 = vmatmul.mubr.bf16.gmra.mxu0 %v5230_v21  ;;  %6009 = vmax.xlane.f32.xlu1 %v6008_v31 }
 0x4c1   :  { %v4584_v45 = vadd.f32 %v4583_v43, %v10790_v25  ;;  %v11245_v36 = vadd.f32 %v11155_v63, %v5509_v47  ;;  %v5038_v52 = vmax.f32 %v4582_v8, 0.0 }
 0x4c2   :  { %v4587_v22 = vpop.f32.mrf.mxu1  ;;  %4826 = vmatmul.mubr.bf16.gmra.mxu1 %v11043_v10  ;;  %v5511_v49 = vpop.f32.mrf.mxu0 }
 0x4c3   :  { %v5039_v54 = vmax.f32 %v4584_v45, 0.0  ;;  %4835 = vmatprep.mubr.bf16.mxu1 %v11062_v62  ;;  %v6011_v23 = vsel %vm5980_vm1, %v11245_v36, -inf  ;;  %v5232_v0 = vpack.c.bf16 %v5038_v52, %v5036_v16  ;;  %v4588_v15 = vadd.f32 %v4587_v22, %v10796_v4 }
 0x4c4   :  { %v4589_v20 = vpop.f32.mrf.mxu1  ;;  %v5512_v42 = vpop.f32.mrf.mxu0  ;;  %6012 = vmax.xlane.f32.xlu0 %v6011_v23 }
 0x4c5   :  { %v5233_v9 = vpack.c.bf16 %v5039_v54, %v5037_v50  ;;  %v11252_v3 = vadd.f32 %v11155_v63, %v5512_v42  ;;  %v4590_v10 = vadd.f32 %v4589_v20, %v10790_v25  ;;  %v5040_v13 = vmax.f32 %v4588_v15, 0.0 }
 0x4c6   :  { %v4591_v59 = vpop.f32.mrf.mxu1  ;;  %v5514_v28 = vpop.f32.mrf.mxu0 }
 0x4c7   :  { %v4592_v34 = vadd.f32 %v4591_v59, %v10796_v4  ;;  %5707 = vmatprep.mubr.bf16.mxu0 %v5233_v9  ;;  %v6014_v41 = vsel %vm5980_vm1, %v11252_v3, -inf  ;;  %v5041_v53 = vmax.f32 %v4590_v10, 0.0 }
 0x4c8   :  { %v4593_v62 = vpop.f32.mrf.mxu1  ;;  %v5517_v14 = vpop.f32.mrf.mxu0  ;;  %5708 = vmatmul.mubr.bf16.gmra.mxu0 %v5232_v0  ;;  %6015 = vmax.xlane.f32.xlu1 %v6014_v41 }
 0x4c9   :  { %v4594_v51 = vadd.f32 %v4593_v62, %v10790_v25  ;;  %v11261_v58 = vadd.f32 %v11155_v63, %v5517_v14  ;;  %v5042_v38 = vmax.f32 %v4592_v34, 0.0 }
 0x4ca   :  { %v4597_v33 = vpop.f32.mrf.mxu1  ;;  %4836 = vmatmul.mubr.bf16.gmra.mxu1 %v11057_v30  ;;  %v5519_v21 = vpop.f32.mrf.mxu0 }
 0x4cb   :  { %v5043_v35 = vmax.f32 %v4594_v51, 0.0  ;;  %4845 = vmatprep.mubr.bf16.mxu1 %v11076_v6  ;;  %v6017_v8 = vsel %vm5980_vm1, %v11261_v58, -inf  ;;  %v5234_v47 = vpack.c.bf16 %v5042_v38, %v5040_v13  ;;  %v4598_v54 = vadd.f32 %v4597_v33, %v10796_v4 }
 0x4cc   :  { %v4599_v61 = vpop.f32.mrf.mxu1  ;;  %v5520_v43 = vpop.f32.mrf.mxu0  ;;  %6018 = vmax.xlane.f32.xlu0 %v6017_v8 }
 0x4cd   :  { %v5235_v31 = vpack.c.bf16 %v5043_v35, %v5041_v53  ;;  %v11268_v26 = vadd.f32 %v11155_v63, %v5520_v43  ;;  %v4600_v30 = vadd.f32 %v4599_v61, %v10790_v25  ;;  %v5044_v28 = vmax.f32 %v4598_v54, 0.0 }
 0x4ce   :  { %v4601_v45 = vpop.f32.mrf.mxu1  ;;  %v5522_v50 = vpop.f32.mrf.mxu0 }
 0x4cf   :  { %v4602_v22 = vadd.f32 %v4601_v45, %v10796_v4  ;;  %5715 = vmatprep.mubr.bf16.mxu0 %v5235_v31  ;;  %v6020_v52 = vsel %vm5980_vm1, %v11268_v26, -inf  ;;  %v5045_v42 = vmax.f32 %v4600_v30, 0.0 }
 0x4d0   :  { %v4603_v6 = vpop.f32.mrf.mxu1  ;;  %v5525_v20 = vpop.f32.mrf.mxu0  ;;  %5716 = vmatmul.mubr.bf16.gmra.mxu0 %v5234_v47  ;;  %6021 = vmax.xlane.f32.xlu1 %v6020_v52 }
 0x4d1   :  { %v4604_v49 = vadd.f32 %v4603_v6, %v10790_v25  ;;  %v11277_v23 = vadd.f32 %v11155_v63, %v5525_v20  ;;  %v5046_v9 = vmax.f32 %v4602_v22, 0.0 }
 0x4d2   :  { %v4607_v16 = vpop.f32.mrf.mxu1  ;;  %4846 = vmatmul.mubr.bf16.gmra.mxu1 %v11071_v29  ;;  %v5527_v0 = vpop.f32.mrf.mxu0 }
 0x4d3   :  { %v5047_v59 = vmax.f32 %v4604_v49, 0.0  ;;  %4855 = vmatprep.mubr.bf16.mxu1 %v11090_v7  ;;  %v6023_v34 = vsel %vm5980_vm1, %v11277_v23, -inf  ;;  %v5236_v14 = vpack.c.bf16 %v5046_v9, %v5044_v28  ;;  %v4608_v35 = vadd.f32 %v4607_v16, %v10796_v4 }
 0x4d4   :  { %v4609_v10 = vpop.f32.mrf.mxu1  ;;  %v5528_v62 = vpop.f32.mrf.mxu0  ;;  %6024 = vmax.xlane.f32.xlu0 %v6023_v34 }
 0x4d5   :  { %v5237_v41 = vpack.c.bf16 %v5047_v59, %v5045_v42  ;;  %v11284_v15 = vadd.f32 %v11155_v63, %v5528_v62  ;;  %v4610_v29 = vadd.f32 %v4609_v10, %v10790_v25  ;;  %v5048_v50 = vmax.f32 %v4608_v35, 0.0 }
 0x4d6   :  { %v4611_v51 = vpop.f32.mrf.mxu1  ;;  %v5530_v53 = vpop.f32.mrf.mxu0 }
 0x4d7   :  { %v4612_v33 = vadd.f32 %v4611_v51, %v10796_v4  ;;  %5723 = vmatprep.mubr.bf16.mxu0 %v5237_v41  ;;  %v6026_v38 = vsel %vm5980_vm1, %v11284_v15, -inf  ;;  %v5049_v43 = vmax.f32 %v4610_v29, 0.0 }
 0x4d8   :  { %v4613_v7 = vpop.f32.mrf.mxu1  ;;  %v5533_v61 = vpop.f32.mrf.mxu0  ;;  %5724 = vmatmul.mubr.bf16.gmra.mxu0 %v5236_v14  ;;  %6027 = vmax.xlane.f32.xlu1 %v6026_v38 }
 0x4d9   :  { %v4614_v21 = vadd.f32 %v4613_v7, %v10790_v25  ;;  %v11293_v8 = vadd.f32 %v11155_v63, %v5533_v61  ;;  %v5050_v31 = vmax.f32 %v4612_v33, 0.0 }
 0x4da   :  { %v4617_v13 = vpop.f32.mrf.mxu1  ;;  %4856 = vmatmul.mubr.bf16.gmra.mxu1 %v11085_v57  ;;  %v5535_v47 = vpop.f32.mrf.mxu0 }
 0x4db   :  { %v5051_v45 = vmax.f32 %v4614_v21, 0.0  ;;  %4865 = vmatprep.mubr.bf16.mxu1 %v11104_v56  ;;  %v6029_v22 = vsel %vm5980_vm1, %v11293_v8, -inf  ;;  %v5238_v20 = vpack.c.bf16 %v5050_v31, %v5048_v50  ;;  %v4618_v59 = vadd.f32 %v4617_v13, %v10796_v4 }
 0x4dc   :  { %v4619_v30 = vpop.f32.mrf.mxu1  ;;  %v5536_v6 = vpop.f32.mrf.mxu0  ;;  %6030 = vmax.xlane.f32.xlu0 %v6029_v22 }
 0x4dd   :  { %v5239_v52 = vpack.c.bf16 %v5051_v45, %v5049_v43  ;;  %v11300_v54 = vadd.f32 %v11155_v63, %v5536_v6  ;;  %v4620_v57 = vadd.f32 %v4619_v30, %v10790_v25  ;;  %v5052_v53 = vmax.f32 %v4618_v59, 0.0 }
 0x4de   :  { %v4621_v49 = vpop.f32.mrf.mxu1  ;;  %v5538_v42 = vpop.f32.mrf.mxu0 }
 0x4df   :  { %v4622_v16 = vadd.f32 %v4621_v49, %v10796_v4  ;;  %5731 = vmatprep.mubr.bf16.mxu0 %v5239_v52  ;;  %v6032_v9 = vsel %vm5980_vm1, %v11300_v54, -inf  ;;  %v5053_v62 = vmax.f32 %v4620_v57, 0.0 }
 0x4e0   :  { %v4623_v56 = vpop.f32.mrf.mxu1  ;;  %v5541_v10 = vpop.f32.mrf.mxu0  ;;  %5732 = vmatmul.mubr.bf16.gmra.mxu0 %v5238_v20  ;;  %6033 = vmax.xlane.f32.xlu1 %v6032_v9 }
 0x4e1   :  { %v4624_v0 = vadd.f32 %v4623_v56, %v10790_v25  ;;  %v11309_v34 = vadd.f32 %v11155_v63, %v5541_v10  ;;  %v5054_v41 = vmax.f32 %v4622_v16, 0.0 }
 0x4e2   :  { %v4627_v28 = vpop.f32.mrf.mxu1  ;;  %4866 = vmatmul.mubr.bf16.gmra.mxu1 %v11099_v46  ;;  %v5543_v14 = vpop.f32.mrf.mxu0 }
 0x4e3   :  { %v5055_v51 = vmax.f32 %v4624_v0, 0.0  ;;  %4875 = vmatprep.mubr.bf16.mxu1 %v11118_v37  ;;  %v6035_v33 = vsel %vm5980_vm1, %v11309_v34, -inf  ;;  %v5240_v61 = vpack.c.bf16 %v5054_v41, %v5052_v53  ;;  %v4628_v45 = vadd.f32 %v4627_v28, %v10796_v4 }
 0x4e4   :  { %v4629_v29 = vpop.f32.mrf.mxu1  ;;  %v5544_v7 = vpop.f32.mrf.mxu0  ;;  %6036 = vmax.xlane.f32.xlu0 %v6035_v33 }
 0x4e5   :  { %v5241_v38 = vpack.c.bf16 %v5055_v51, %v5053_v62  ;;  %v11316_v35 = vadd.f32 %v11155_v63, %v5544_v7  ;;  %v4630_v46 = vadd.f32 %v4629_v29, %v10790_v25  ;;  %v5056_v42 = vmax.f32 %v4628_v45, 0.0 }
 0x4e6   :  { %v4631_v21 = vpop.f32.mrf.mxu1  ;;  %v5546_v43 = vpop.f32.mrf.mxu0 }
 0x4e7   :  { %v4632_v13 = vadd.f32 %v4631_v21, %v10796_v4  ;;  %5739 = vmatprep.mubr.bf16.mxu0 %v5241_v38  ;;  %v6038_v31 = vsel %vm5980_vm1, %v11316_v35, -inf  ;;  %v5057_v6 = vmax.f32 %v4630_v46, 0.0 }
 0x4e8   :  { %v4633_v37 = vpop.f32.mrf.mxu1  ;;  %v5549_v30 = vpop.f32.mrf.mxu0  ;;  %5740 = vmatmul.mubr.bf16.gmra.mxu0 %v5240_v61  ;;  %6039 = vmax.xlane.f32.xlu1 %v6038_v31 }
 0x4e9   :  { %v4634_v47 = vadd.f32 %v4633_v37, %v10790_v25  ;;  %v11325_v22 = vadd.f32 %v11155_v63, %v5549_v30  ;;  %v5058_v52 = vmax.f32 %v4632_v13, 0.0 }
 0x4ea   :  { %v4637_v50 = vpop.f32.mrf.mxu1  ;;  %4876 = vmatmul.mubr.bf16.gmra.mxu1 %v11113_v17  ;;  %v5551_v20 = vpop.f32.mrf.mxu0 }
 0x4eb   :  { %v5059_v49 = vmax.f32 %v4634_v47, 0.0  ;;  %4885 = vmatprep.mubr.bf16.mxu1 %v11132_v24  ;;  %v6041_v16 = vsel %vm5980_vm1, %v11325_v22, -inf  ;;  %v5242_v10 = vpack.c.bf16 %v5058_v52, %v5056_v42  ;;  %v4638_v51 = vadd.f32 %v4637_v50, %v10796_v4 }
 0x4ec   :  { %v4639_v57 = vpop.f32.mrf.mxu1  ;;  %v5552_v56 = vpop.f32.mrf.mxu0  ;;  %6042 = vmax.xlane.f32.xlu0 %v6041_v16 }
 0x4ed   :  { %v5243_v9 = vpack.c.bf16 %v5059_v49, %v5057_v6  ;;  %v11332_v59 = vadd.f32 %v11155_v63, %v5552_v56  ;;  %v4640_v17 = vadd.f32 %v4639_v57, %v10790_v25  ;;  %v5060_v43 = vmax.f32 %v4638_v51, 0.0 }
 0x4ee   :  { %v4641_v0 = vpop.f32.mrf.mxu1  ;;  %v5554_v62 = vpop.f32.mrf.mxu0 }
 0x4ef   :  { %v4642_v28 = vadd.f32 %v4641_v0, %v10796_v4  ;;  %5747 = vmatprep.mubr.bf16.mxu0 %v5243_v9  ;;  %v6044_v41 = vsel %vm5980_vm1, %v11332_v59, -inf  ;;  %v5061_v7 = vmax.f32 %v4640_v17, 0.0 }
 0x4f0   :  { %v4643_v24 = vpop.f32.mrf.mxu1  ;;  %v5557_v29 = vpop.f32.mrf.mxu0  ;;  %5748 = vmatmul.mubr.bf16.gmra.mxu0 %v5242_v10  ;;  %6045 = vmax.xlane.f32.xlu1 %v6044_v41 }
 0x4f1   :  { %v4644_v14 = vadd.f32 %v4643_v24, %v10790_v25  ;;  %v11341_v33 = vadd.f32 %v11155_v63, %v5557_v29  ;;  %v5062_v38 = vmax.f32 %v4642_v28, 0.0 }
 0x4f2   :  { %v4647_v53 = vpop.f32.mrf.mxu1  ;;  %4886 = vmatmul.mubr.bf16.gmra.mxu1 %v11127_v18  ;;  %v5559_v61 = vpop.f32.mrf.mxu0 }
 0x4f3   :  { %v5063_v21 = vmax.f32 %v4644_v14, 0.0  ;;  %4895 = vmatprep.mubr.bf16.mxu1 %v11146_v39  ;;  %v6047_v13 = vsel %vm5980_vm1, %v11341_v33, -inf  ;;  %v5244_v30 = vpack.c.bf16 %v5062_v38, %v5060_v43  ;;  %v4648_v49 = vadd.f32 %v4647_v53, %v10796_v4 }
 0x4f4   :  { %v4649_v46 = vpop.f32.mrf.mxu1  ;;  %v5560_v31 = vpop.f32.mrf.mxu0  ;;  %6048 = vmax.xlane.f32.xlu0 %v6047_v13 }
 0x4f5   :  { %v5245_v37 = vpack.c.bf16 %v5063_v21, %v5061_v7  ;;  %v11348_v45 = vadd.f32 %v11155_v63, %v5560_v31  ;;  %v4650_v18 = vadd.f32 %v4649_v46, %v10790_v25  ;;  %v5064_v62 = vmax.f32 %v4648_v49, 0.0 }
 0x4f6   :  { %v4651_v47 = vpop.f32.mrf.mxu1  ;;  %v5562_v6 = vpop.f32.mrf.mxu0 }
 0x4f7   :  { %v4652_v50 = vadd.f32 %v4651_v47, %v10796_v4  ;;  %5755 = vmatprep.mubr.bf16.mxu0 %v5245_v37  ;;  %v6050_v52 = vsel %vm5980_vm1, %v11348_v45, -inf  ;;  %v5065_v56 = vmax.f32 %v4650_v18, 0.0 }
 0x4f8   :  { %v4653_v39 = vpop.f32.mrf.mxu1  ;;  %v5565_v57 = vpop.f32.mrf.mxu0  ;;  %5756 = vmatmul.mubr.bf16.gmra.mxu0 %v5244_v30  ;;  %6051 = vmax.xlane.f32.xlu1 %v6050_v52 }
 0x4f9   :  { %v4654_v20 = vadd.f32 %v4653_v39, %v10790_v25  ;;  %v11357_v16 = vadd.f32 %v11155_v63, %v5565_v57  ;;  %v5066_v9 = vmax.f32 %v4652_v50, 0.0 }
 0x4fa   :  { %v4657_v42 = vpop.f32.mrf.mxu1  ;;  %4896 = vmatmul.mubr.bf16.gmra.mxu1 %v11141_v19  ;;  %v5567_v10 = vpop.f32.mrf.mxu0 }
 0x4fb   :  { %v5067_v0 = vmax.f32 %v4654_v20, 0.0  ;;  %4905 = vmatprep.mubr.bf16.mxu1 %v11169_v27  ;;  %v6053_v28 = vsel %vm5980_vm1, %v11357_v16, -inf  ;;  %v5246_v29 = vpack.c.bf16 %v5066_v9, %v5064_v62  ;;  %v4658_v21 = vadd.f32 %v4657_v42, %v10796_v4 }
 0x4fc   :  { %v4659_v17 = vpop.f32.mrf.mxu1  ;;  %v5568_v41 = vpop.f32.mrf.mxu0  ;;  %6054 = vmax.xlane.f32.xlu0 %v6053_v28 }
 0x4fd   :  { %v5247_v24 = vpack.c.bf16 %v5067_v0, %v5065_v56  ;;  %v11364_v51 = vadd.f32 %v11155_v63, %v5568_v41  ;;  %v4660_v19 = vadd.f32 %v4659_v17, %v10790_v25  ;;  %v5068_v6 = vmax.f32 %v4658_v21, 0.0 }
 0x4fe   :  { %v4661_v14 = vpop.f32.mrf.mxu1  ;;  %v5570_v7 = vpop.f32.mrf.mxu0 }
 0x4ff   :  { %v4662_v53 = vadd.f32 %v4661_v14, %v10796_v4  ;;  %5763 = vmatprep.mubr.bf16.mxu0 %v5247_v24  ;;  %v6056_v38 = vsel %vm5980_vm1, %v11364_v51, -inf  ;;  %v5069_v37 = vmax.f32 %v4660_v19, 0.0 }
 0x500   :  { %v4663_v27 = vpop.f32.mrf.mxu1  ;;  %v5573_v46 = vpop.f32.mrf.mxu0  ;;  %5764 = vmatmul.mubr.bf16.gmra.mxu0 %v5246_v29  ;;  %6057 = vmax.xlane.f32.xlu1 %v6056_v38 }
 0x501   :  { %v4664_v61 = vadd.f32 %v4663_v27, %v10790_v25  ;;  %v11373_v13 = vadd.f32 %v11155_v63, %v5573_v46  ;;  %v5070_v31 = vmax.f32 %v4662_v53, 0.0 }
 0x502   :  { %v4667_v43 = vpop.f32.mrf.mxu1  ;;  %4906 = vmatmul.mubr.bf16.gmra.mxu1 %v11160_v44  ;;  %v5575_v30 = vpop.f32.mrf.mxu0 }
 0x503   :  { %v5071_v47 = vmax.f32 %v4664_v61, 0.0  ;;  %v6059_v50 = vsel %vm5980_vm1, %v11373_v13, -inf  ;;  %v5248_v57 = vpack.c.bf16 %v5070_v31, %v5068_v6  ;;  %v4668_v10 = vadd.f32 %v4667_v43, %v10796_v4 }
 0x504   :  { %v4669_v18 = vpop.f32.mrf.mxu1  ;;  %v5576_v52 = vpop.f32.mrf.mxu0  ;;  %6060 = vmax.xlane.f32.xlu0 %v6059_v50 }
 0x505   :  { %v5249_v39 = vpack.c.bf16 %v5071_v47, %v5069_v37  ;;  %v11379_v49 = vadd.f32 %v11155_v63, %v5576_v52  ;;  %v4670_v42 = vadd.f32 %v4669_v18, %v10790_v25  ;;  %v5072_v27 = vmax.f32 %v4668_v10, 0.0 }
 0x506   :  { %v4671_v20 = vpop.f32.mrf.mxu1  ;;  %v5578_v56 = vpop.f32.mrf.mxu0 }
 0x507   :  { %v4672_v44 = vadd.f32 %v4671_v20, %v10796_v4  ;;  %5771 = vmatprep.mubr.bf16.mxu0 %v5249_v39  ;;  %v6062_v0 = vsel %vm5980_vm1, %v11379_v49, -inf  ;;  %v5073_v41 = vmax.f32 %v4670_v42, 0.0 }
 0x508   :  { %v4673_v9 = vpop.f32.mrf.mxu1  ;;  %v5581_v28 = vpop.f32.mrf.mxu0  ;;  %5772 = vmatmul.mubr.bf16.gmra.mxu0 %v5248_v57  ;;  %6063 = vmax.xlane.f32.xlu1 %v6062_v0 }
 0x509   :  { %v4674_v17 = vadd.f32 %v4673_v9, %v10790_v25  ;;  %v11388_v62 = vadd.f32 %v11155_v63, %v5581_v28  ;;  %v5074_v14 = vmax.f32 %v4672_v44, 0.0 }
 0x50a   :  { %v4677_v24 = vpop.f32.mrf.mxu1  ;;  %v5583_v19 = vpop.f32.mrf.mxu0 }
 0x50b   :  { %v5075_v29 = vmax.f32 %v4674_v17, 0.0  ;;  %v6065_v7 = vsel %vm5980_vm1, %v11388_v62, -inf  ;;  %v5250_v43 = vpack.c.bf16 %v5074_v14, %v5072_v27  ;;  %v4678_v50 = vadd.f32 %v4677_v24, %v10796_v4 }
 0x50c   :  { %v4679_v53 = vpop.f32.mrf.mxu1  ;;  %v5584_v21 = vpop.f32.mrf.mxu0  ;;  %6066 = vmax.xlane.f32.xlu0 %v6065_v7 }
 0x50d   :  { %v5251_v38 = vpack.c.bf16 %v5075_v29, %v5073_v41  ;;  %v11393_v61 = vadd.f32 %v11155_v63, %v5584_v21  ;;  %v4680_v37 = vadd.f32 %v4679_v53, %v10790_v25  ;;  %v5076_v10 = vmax.f32 %v4678_v50, 0.0 }
 0x50e   :  { %v4681_v46 = vpop.f32.mrf.mxu1  ;;  %v5586_v47 = vpop.f32.mrf.mxu0 }
 0x50f   :  { %v4682_v31 = vadd.f32 %v4681_v46, %v10796_v4  ;;  %5779 = vmatprep.mubr.bf16.mxu0 %v5251_v38  ;;  %v6068_v18 = vsel %vm5980_vm1, %v11393_v61, -inf  ;;  %v5077_v57 = vmax.f32 %v4680_v37, 0.0 }
 0x510   :  { %v4683_v30 = vpop.f32.mrf.mxu1  ;;  %v5589_v39 = vpop.f32.mrf.mxu0  ;;  %5780 = vmatmul.mubr.bf16.gmra.mxu0 %v5250_v43  ;;  %6069 = vmax.xlane.f32.xlu1 %v6068_v18 }
 0x511   :  { %v4684_v6 = vadd.f32 %v4683_v30, %v10790_v25  ;;  %v11402_v52 = vadd.f32 %v11155_v63, %v5589_v39  ;;  %v5078_v42 = vmax.f32 %v4682_v31, 0.0 }
 0x512   :  { %v4687_v20 = vpop.f32.mrf.mxu1  ;;  %v5591_v56 = vpop.f32.mrf.mxu0 }
 0x513   :  { %v5079_v44 = vmax.f32 %v4684_v6, 0.0  ;;  %v6071_v0 = vsel %vm5980_vm1, %v11402_v52, -inf  ;;  %v5252_v14 = vpack.c.bf16 %v5078_v42, %v5076_v10  ;;  %v4688_v38 = vadd.f32 %v4687_v20, %v10796_v4 }
 0x514   :  { %v4689_v9 = vpop.f32.mrf.mxu1  ;;  %v5592_v28 = vpop.f32.mrf.mxu0  ;;  %6072 = vmax.xlane.f32.xlu0 %v6071_v0 }
 0x515   :  { %v5253_v17 = vpack.c.bf16 %v5079_v44, %v5077_v57  ;;  %v11407_v24 = vadd.f32 %v11155_v63, %v5592_v28  ;;  %v4690_v29 = vadd.f32 %v4689_v9, %v10790_v25  ;;  %v5080_v39 = vmax.f32 %v4688_v38, 0.0 }
 0x516   :  { %v4691_v41 = vpop.f32.mrf.mxu1  ;;  %v5594_v53 = vpop.f32.mrf.mxu0 }
 0x517   :  { %v4692_v19 = vadd.f32 %v4691_v41, %v10796_v4  ;;  %5787 = vmatprep.mubr.bf16.mxu0 %v5253_v17  ;;  %v6074_v27 = vsel %vm5980_vm1, %v11407_v24, -inf  ;;  %v5081_v31 = vmax.f32 %v4690_v29, 0.0 }
 0x518   :  { %v4693_v7 = vpop.f32.mrf.mxu1  ;;  %v5597_v46 = vpop.f32.mrf.mxu0  ;;  %5788 = vmatmul.mubr.bf16.gmra.mxu0 %v5252_v14  ;;  %6075 = vmax.xlane.f32.xlu1 %v6074_v27 }
 0x519   :  { %v4694_v21 = vadd.f32 %v4693_v7, %v10790_v25  ;;  %v11416_v43 = vadd.f32 %v11155_v63, %v5597_v46  ;;  %v5082_v47 = vmax.f32 %v4692_v19, 0.0 }
 0x51a   :  { %v4697_v37 = vpop.f32.mrf.mxu1  ;;  %v5599_v18 = vpop.f32.mrf.mxu0 }
 0x51b   :  { %v5083_v30 = vmax.f32 %v4694_v21, 0.0  ;;  %v6077_v6 = vsel %vm5980_vm1, %v11416_v43, -inf  ;;  %v5254_v56 = vpack.c.bf16 %v5082_v47, %v5080_v39  ;;  %v4698_v41 = vadd.f32 %v4697_v37, %v10796_v4 }
 0x51c   :  { %v4699_v50 = vpop.f32.mrf.mxu1  ;;  %v5600_v20 = vpop.f32.mrf.mxu0  ;;  %6078 = vmax.xlane.f32.xlu0 %v6077_v6 }
 0x51d   :  { %v5255_v57 = vpack.c.bf16 %v5083_v30, %v5081_v31  ;;  %v11421_v42 = vadd.f32 %v11155_v63, %v5600_v20  ;;  %v4700_v9 = vadd.f32 %v4699_v50, %v10790_v25  ;;  %v5084_v47 = vmax.f32 %v4698_v41, 0.0 }
 0x51e   :  { %v4701_v44 = vpop.f32.mrf.mxu1  ;;  %v5602_v10 = vpop.f32.mrf.mxu0 }
 0x51f   :  { %v4702_v0 = vadd.f32 %v4701_v44, %v10796_v4  ;;  %5795 = vmatprep.mubr.bf16.mxu0 %v5255_v57  ;;  %v6080_v28 = vsel %vm5980_vm1, %v11421_v42, -inf  ;;  %v5085_v7 = vmax.f32 %v4700_v9, 0.0 }
 0x520   :  { %v4703_v17 = vpop.f32.mrf.mxu1  ;;  %v5605_v29 = vpop.f32.mrf.mxu0  ;;  %5796 = vmatmul.mubr.bf16.gmra.mxu0 %v5254_v56  ;;  %6081 = vmax.xlane.f32.xlu1 %v6080_v28 }
 0x521   :  { %v4704_v14 = vadd.f32 %v4703_v17, %v10790_v25  ;;  %v11430_v19 = vadd.f32 %v11155_v63, %v5605_v29  ;;  %v5086_v27 = vmax.f32 %v4702_v0, 0.0 }
 0x522   :  { %v4707_v53 = vpop.f32.mrf.mxu1  ;;  %v5607_v21 = vpop.f32.mrf.mxu0 }
 0x523   :  { %v5087_v38 = vmax.f32 %v4704_v14, 0.0  ;;  %v6083_v31 = vsel %vm5980_vm1, %v11430_v19, -inf  ;;  %v5256_v57 = vpack.c.bf16 %v5086_v27, %v5084_v47  ;;  %v4708_v10 = vadd.f32 %v4707_v53, %v10796_v4 }
 0x524   :  { %v4709_v46 = vpop.f32.mrf.mxu1  ;;  %v5608_v37 = vpop.f32.mrf.mxu0  ;;  %6084 = vmax.xlane.f32.xlu0 %v6083_v31 }
 0x525   :  { %v5257_v30 = vpack.c.bf16 %v5087_v38, %v5085_v7  ;;  %v4710_v18 = vadd.f32 %v4709_v46, %v10790_v25  ;;  %v11436_v50 = vadd.f32 %v11155_v63, %v5608_v37  ;;  %v5983_v6 = vpop.xlane.xlu0 %5982  ;;  %v5088_v47 = vmax.f32 %v4708_v10, 0.0 }
 0x526   :  { %v4711_v39 = vpop.f32.mrf.mxu1  ;;  %v6365_v20 = vsub.f32 %v11163_v60, %v5983_v6  ;;  %v5610_v56 = vpop.f32.mrf.mxu0  ;;  %v11447_v60 = vld [vmem:[%s13296_s10] ss:$0 sm:$0xff] }
 0x527   :  { %v4712_v44 = vadd.f32 %v4711_v39, %v10796_v4  ;;  %5803 = vmatprep.mubr.bf16.mxu0 %v5257_v30  ;;  %v6086_v0 = vsel %vm5980_vm1, %v11436_v50, -inf  ;;  %v5089_v41 = vmax.f32 %v4710_v18, 0.0 }
 0x528   :  { %v4713_v9 = vpop.f32.mrf.mxu1  ;;  %v6493_v17 = vmul.f32 1.442695, %v6365_v20  ;;  %v5613_v63 = vpop.f32.mrf.mxu0  ;;  %5804 = vmatmul.mubr.bf16.gmra.mxu0 %v5256_v57  ;;  %6087 = vmax.xlane.f32.xlu1 %v6086_v0 }
 0x529   :  { %v4714_v28 = vadd.f32 %v4713_v9, %v10790_v25  ;;  %v11450_v14 = vadd.f32 %v11447_v60, %v5613_v63  ;;  %v5986_v29 = vpop.xlane.xlu0 %5985  ;;  %v5090_v27 = vmax.f32 %v4712_v44, 0.0 }
 0x52a   :  { %v4717_v7 = vpop.f32.mrf.mxu1  ;;  %7873 = vpow2.f32 %v6493_v17  ;;  %v6366_v38 = vsub.f32 %v11172_v32, %v5986_v29  ;;  %v5615_v21 = vpop.f32.mrf.mxu0 }
 0x52b   :  { %v5091_v53 = vmax.f32 %v4714_v28, 0.0  ;;  %v6089_v31 = vsel %vm5980_vm1, %v11450_v14, -inf  ;;  %v5258_v44 = vpack.c.bf16 %v5090_v27, %v5088_v47  ;;  %v4718_v17 = vadd.f32 %v4717_v7, %v10796_v4 }
 0x52c   :  { %v4719_v46 = vpop.f32.mrf.mxu1  ;;  %v6495_v37 = vmul.f32 1.442695, %v6366_v38  ;;  %v5616_v18 = vpop.f32.mrf.mxu0  ;;  %6090 = vmax.xlane.f32.xlu0 %v6089_v31 }
 0x52d   :  { %v5259_v30 = vpack.c.bf16 %v5091_v53, %v5089_v41  ;;  %v4720_v6 = vadd.f32 %v4719_v46, %v10790_v25  ;;  %v11457_v39 = vadd.f32 %v11447_v60, %v5616_v18  ;;  %v5989_v57 = vpop.xlane.xlu1 %5988 }
 0x52e   :  { %v4721_v20 = vpop.f32.mrf.mxu1  ;;  %7875 = vpow2.f32 %v6495_v37  ;;  %v6367_v32 = vsub.f32 %v11181_v55, %v5989_v57  ;;  %v5618_v9 = vpop.f32.mrf.mxu0 }
 0x52f   :  { %v4722_v56 = vadd.f32 %v4721_v20, %v10796_v4  ;;  %5811 = vmatprep.mubr.bf16.mxu0 %v5259_v30  ;;  %v6092_v10 = vsel %vm5980_vm1, %v11457_v39, -inf  ;;  %v5093_v29 = vmax.f32 %v4720_v6, 0.0  ;;  %v5092_v30 = vmax.f32 %v4718_v17, 0.0 }
 0x530   :  { %v4723_v0 = vpop.f32.mrf.mxu1  ;;  %v6497_v28 = vmul.f32 1.442695, %v6367_v32  ;;  %v5621_v41 = vpop.f32.mrf.mxu0  ;;  %5812 = vmatmul.mubr.bf16.gmra.mxu0 %v5258_v44  ;;  %6093 = vmax.xlane.f32.xlu1 %v6092_v10 }
 0x531   :  { %v4724_v63 = vadd.f32 %v4723_v0, %v10790_v25  ;;  %v11466_v27 = vadd.f32 %v11447_v60, %v5621_v41  ;;  %v5992_v55 = vpop.xlane.xlu1 %5991  ;;  %v5094_v38 = vmax.f32 %v4722_v56, 0.0 }
 0x532   :  { %v4727_v53 = vpop.f32.mrf.mxu1  ;;  %7877 = vpow2.f32 %v6497_v28  ;;  %v6368_v46 = vsub.f32 %v11188_v12, %v5992_v55  ;;  %v5623_v31 = vpop.f32.mrf.mxu0 }
 0x533   :  { %v5095_v21 = vmax.f32 %v4724_v63, 0.0  ;;  %v6095_v7 = vsel %vm5980_vm1, %v11466_v27, -inf  ;;  %v5260_v56 = vpack.c.bf16 %v5094_v38, %v5092_v30  ;;  %v4728_v63 = vadd.f32 %v4727_v53, %v10796_v4 }
 0x534   :  { %v4729_v47 = vpop.f32.mrf.mxu1  ;;  %v6499_v18 = vmul.f32 1.442695, %v6368_v46  ;;  %v5624_v57 = vpop.f32.mrf.mxu0  ;;  %6096 = vmax.xlane.f32.xlu0 %v6095_v7 }
 0x535   :  { %v5261_v37 = vpack.c.bf16 %v5095_v21, %v5093_v29  ;;  %v4730_v6 = vadd.f32 %v4729_v47, %v10790_v25  ;;  %v11473_v20 = vadd.f32 %v11447_v60, %v5624_v57  ;;  %v5995_v44 = vpop.xlane.xlu0 %5994 }
 0x536   :  { %v4731_v32 = vpop.f32.mrf.mxu1  ;;  %7879 = vpow2.f32 %v6499_v18  ;;  %v6369_v12 = vsub.f32 %v11197_v48, %v5995_v44  ;;  %v5626_v0 = vpop.f32.mrf.mxu0  ;;  %v5096_v44 = vmax.f32 %v4728_v63, 0.0 }
 0x537   :  { %v4732_v9 = vadd.f32 %v4731_v32, %v10796_v4  ;;  %5819 = vmatprep.mubr.bf16.mxu0 %v5261_v37  ;;  %v11477_v10 = vpop.eup %7873  ;;  %v6098_v28 = vsel %vm5980_vm1, %v11473_v20, -inf  ;;  %v5097_v38 = vmax.f32 %v4730_v6, 0.0 }
 0x538   :  { %v4733_v17 = vpop.f32.mrf.mxu1  ;;  %v6501_v41 = vmul.f32 1.442695, %v6369_v12  ;;  %v5629_v55 = vpop.f32.mrf.mxu0  ;;  %5820 = vmatmul.mubr.bf16.gmra.mxu0 %v5260_v56  ;;  %6099 = vmax.xlane.f32.xlu1 %v6098_v28  ;;  %v6749_v48 = vsel %vm5980_vm1, %v11477_v10, 0.0 }
 0x539   :  { %v4734_v29 = vadd.f32 %v4733_v17, %v10790_v25  ;;  %v11486_v21 = vadd.f32 %v11447_v60, %v5629_v55  ;;  %v5998_v46 = vpop.xlane.xlu1 %5997  ;;  %6750 = vadd.xlane.f32.xlu0 %v6749_v48  ;;  %v5098_v47 = vmax.f32 %v4732_v9, 0.0 }
 0x53a   :  { %v4737_v31 = vpop.f32.mrf.mxu1  ;;  %7881 = vpow2.f32 %v6501_v41  ;;  %v6370_v53 = vsub.f32 %v11204_v1, %v5998_v46  ;;  %v5631_v30 = vpop.f32.mrf.mxu0 }
 0x53b   :  { %v5099_v7 = vmax.f32 %v4734_v29, 0.0  ;;  %v11489_v37 = vpop.eup %7875  ;;  %v6101_v57 = vsel %vm5980_vm1, %v11486_v21, -inf  ;;  %v5262_v28 = vpack.c.bf16 %v5098_v47, %v5096_v44  ;;  %v4738_v46 = vadd.f32 %v4737_v31, %v10796_v4 }
 0x53c   :  { %v4739_v18 = vpop.f32.mrf.mxu1  ;;  %v6503_v32 = vmul.f32 1.442695, %v6370_v53  ;;  %v5632_v56 = vpop.f32.mrf.mxu0  ;;  %v6752_v12 = vsel %vm5980_vm1, %v11489_v37, 0.0 }
 0x53d   :  { %v5263_v6 = vpack.c.bf16 %v5099_v7, %v5097_v38  ;;  %v4740_v0 = vadd.f32 %v4739_v18, %v10790_v25  ;;  %v11497_v9 = vadd.f32 %v11447_v60, %v5632_v56  ;;  %6102 = vmax.xlane.f32.xlu0 %v6101_v57  ;;  %6753 = vadd.xlane.f32.xlu1 %v6752_v12  ;;  %v6001_v1 = vpop.xlane.xlu0 %6000 }
 0x53e   :  { %v4741_v17 = vpop.f32.mrf.mxu1  ;;  %7883 = vpow2.f32 %v6503_v32  ;;  %v6371_v41 = vsub.f32 %v11213_v40, %v6001_v1  ;;  %v5634_v29 = vpop.f32.mrf.mxu0 }
 0x53f   :  { %v4742_v63 = vadd.f32 %v4741_v17, %v10796_v4  ;;  %5827 = vmatprep.mubr.bf16.mxu0 %v5263_v6  ;;  %v11501_v55 = vpop.eup %7877  ;;  %v6104_v38 = vsel %vm5980_vm1, %v11497_v9, -inf  ;;  %v5101_v47 = vmax.f32 %v4740_v0, 0.0  ;;  %v5100_v0 = vmax.f32 %v4738_v46, 0.0 }
 0x540   :  { %v4743_v48 = vpop.f32.mrf.mxu1  ;;  %v6505_v7 = vmul.f32 1.442695, %v6371_v41  ;;  %v5637_v30 = vpop.f32.mrf.mxu0  ;;  %5828 = vmatmul.mubr.bf16.gmra.mxu0 %v5262_v28  ;;  %v6755_v40 = vsel %vm5980_vm1, %v11501_v55, 0.0 }
 0x541   :  { %v4744_v53 = vadd.f32 %v4743_v48, %v10790_v25  ;;  %v11510_v18 = vadd.f32 %v11447_v60, %v5637_v30  ;;  %v6004_v57 = vpop.xlane.xlu1 %6003  ;;  %6756 = vadd.xlane.f32.xlu0 %v6755_v40  ;;  %6105 = vmax.xlane.f32.xlu1 %v6104_v38  ;;  %v5102_v6 = vmax.f32 %v4742_v63, 0.0 }
 0x542   :  { %v4747_v44 = vpop.f32.mrf.mxu1  ;;  %7885 = vpow2.f32 %v6505_v7  ;;  %v6372_v31 = vsub.f32 %v11220_v2, %v6004_v57  ;;  %v5639_v56 = vpop.f32.mrf.mxu0 }
 0x543   :  { %v5103_v32 = vmax.f32 %v4744_v53, 0.0  ;;  %v11513_v12 = vpop.eup %7879  ;;  %v6107_v17 = vsel %vm5980_vm1, %v11510_v18, -inf  ;;  %v5264_v53 = vpack.c.bf16 %v5102_v6, %v5100_v0 }
 0x544   :  { %v4749_v1 = vpop.f32.mrf.mxu1  ;;  %v6507_v41 = vmul.f32 1.442695, %v6372_v31  ;;  %v5640_v29 = vpop.f32.mrf.mxu0  ;;  %v6758_v48 = vsel %vm5980_vm1, %v11513_v12, 0.0  ;;  %v4748_v31 = vadd.f32 %v4747_v44, %v10796_v4 }
 0x545   :  { %v5265_v28 = vpack.c.bf16 %v5103_v32, %v5101_v47  ;;  %v4750_v38 = vadd.f32 %v4749_v1, %v10790_v25  ;;  %v11521_v63 = vadd.f32 %v11447_v60, %v5640_v29  ;;  %6108 = vmax.xlane.f32.xlu0 %v6107_v17  ;;  %6759 = vadd.xlane.f32.xlu1 %v6758_v48  ;;  %v6007_v2 = vpop.xlane.xlu0 %6006 }
 0x546   :  { %v4751_v7 = vpop.f32.mrf.mxu1  ;;  %7887 = vpow2.f32 %v6507_v41  ;;  %v6373_v30 = vsub.f32 %v11229_v5, %v6007_v2  ;;  %v5642_v40 = vpop.f32.mrf.mxu0 }
 0x547   :  { %v4752_v46 = vadd.f32 %v4751_v7, %v10796_v4  ;;  %5835 = vmatprep.mubr.bf16.mxu0 %v5265_v28  ;;  %v11525_v47 = vpop.eup %7881  ;;  %v6110_v32 = vsel %vm5980_vm1, %v11521_v63, -inf  ;;  %v5105_v6 = vmax.f32 %v4750_v38, 0.0  ;;  %v5104_v38 = vmax.f32 %v4748_v31, 0.0 }
 0x548   :  { %v4753_v57 = vpop.f32.mrf.mxu1  ;;  %v6509_v56 = vmul.f32 1.442695, %v6373_v30  ;;  %v5645_v17 = vpop.f32.mrf.mxu0  ;;  %5836 = vmatmul.mubr.bf16.gmra.mxu0 %v5264_v53  ;;  %v6761_v5 = vsel %vm5980_vm1, %v11525_v47, 0.0 }
 0x549   :  { %v4754_v1 = vadd.f32 %v4753_v57, %v10790_v25  ;;  %v11534_v0 = vadd.f32 %v11447_v60, %v5645_v17  ;;  %v6010_v28 = vpop.xlane.xlu1 %6009  ;;  %6111 = vmax.xlane.f32.xlu1 %v6110_v32  ;;  %6762 = vadd.xlane.f32.xlu0 %v6761_v5  ;;  %v5106_v29 = vmax.f32 %v4752_v46, 0.0 }
 0x54a   :  { %v4757_v41 = vpop.f32.mrf.mxu1  ;;  %7889 = vpow2.f32 %v6509_v56  ;;  %v6374_v44 = vsub.f32 %v11236_v11, %v6010_v28  ;;  %v5647_v2 = vpop.f32.mrf.mxu0 }
 0x54b   :  { %v5107_v48 = vmax.f32 %v4754_v1, 0.0  ;;  %v11537_v7 = vpop.eup %7883  ;;  %v6113_v30 = vsel %vm5980_vm1, %v11534_v0, -inf  ;;  %v5266_v5 = vpack.c.bf16 %v5106_v29, %v5104_v38 }
 0x54c   :  { %13446 = vst [vmem:[#allocation3_spill] sm:$0xff] %v11537_v7  ;;  %v4759_v53 = vpop.f32.mrf.mxu1  ;;  %v6511_v57 = vmul.f32 1.442695, %v6374_v44  ;;  %v5648_v17 = vpop.f32.mrf.mxu0  ;;  %v6764_v32 = vsel %vm5980_vm1, %v11537_v7, 0.0 }
 0x54d   :  { %v5267_v40 = vpack.c.bf16 %v5107_v48, %v5105_v6  ;;  %v4760_v56 = vadd.f32 %v4759_v53, %v10790_v25  ;;  %v11545_v46 = vadd.f32 %v11447_v60, %v5648_v17  ;;  %6765 = vadd.xlane.f32.xlu1 %v6764_v32  ;;  %6114 = vmax.xlane.f32.xlu0 %v6113_v30  ;;  %v6013_v11 = vpop.xlane.xlu0 %6012 }
 0x54e   :  { %v4761_v1 = vpop.f32.mrf.mxu1  ;;  %7891 = vpow2.f32 %v6511_v57  ;;  %v6375_v28 = vsub.f32 %v11245_v36, %v6013_v11  ;;  %v5650_v6 = vpop.f32.mrf.mxu0  ;;  %v4758_v53 = vadd.f32 %v4757_v41, %v10796_v4 }
 0x54f   :  { %v4762_v31 = vadd.f32 %v4761_v1, %v10796_v4  ;;  %5843 = vmatprep.mubr.bf16.mxu0 %v5267_v40  ;;  %v11549_v48 = vpop.eup %7885  ;;  %v6116_v2 = vsel %vm5980_vm1, %v11545_v46, -inf  ;;  %v5109_v29 = vmax.f32 %v4760_v56, 0.0 }
 0x550   :  { %13447 = vst [vmem:[#allocation2_spill] sm:$0xff] %v11549_v48  ;;  %v4763_v44 = vpop.f32.mrf.mxu1  ;;  %v6513_v17 = vmul.f32 1.442695, %v6375_v28  ;;  %v5653_v32 = vpop.f32.mrf.mxu0  ;;  %5844 = vmatmul.mubr.bf16.gmra.mxu0 %v5266_v5  ;;  %v6767_v36 = vsel %vm5980_vm1, %v11549_v48, 0.0  ;;  %v5108_v56 = vmax.f32 %v4758_v53, 0.0 }
 0x551   :  { %v4764_v30 = vadd.f32 %v4763_v44, %v10790_v25  ;;  %v11558_v38 = vadd.f32 %v11447_v60, %v5653_v32  ;;  %v6016_v40 = vpop.xlane.xlu1 %6015  ;;  %6117 = vmax.xlane.f32.xlu1 %v6116_v2  ;;  %6768 = vadd.xlane.f32.xlu0 %v6767_v36  ;;  %v5110_v11 = vmax.f32 %v4762_v31, 0.0 }
 0x552   :  { %v4767_v57 = vpop.f32.mrf.mxu1  ;;  %7893 = vpow2.f32 %v6513_v17  ;;  %v6376_v41 = vsub.f32 %v11252_v3, %v6016_v40  ;;  %v5655_v28 = vpop.f32.mrf.mxu0 }
 0x553   :  { %v5111_v1 = vmax.f32 %v4764_v30, 0.0  ;;  %v11561_v6 = vpop.eup %7887  ;;  %v6119_v44 = vsel %vm5980_vm1, %v11558_v38, -inf  ;;  %v5268_v36 = vpack.c.bf16 %v5110_v11, %v5108_v56 }
 0x554   :  { %13448 = vst [vmem:[#allocation5_spill] sm:$0xff] %v11561_v6  ;;  %v4769_v5 = vpop.f32.mrf.mxu1  ;;  %v6515_v32 = vmul.f32 1.442695, %v6376_v41  ;;  %v5656_v7 = vpop.f32.mrf.mxu0  ;;  %v6770_v2 = vsel %vm5980_vm1, %v11561_v6, 0.0 }
 0x555   :  { %v5269_v48 = vpack.c.bf16 %v5111_v1, %v5109_v29  ;;  %v4770_v17 = vadd.f32 %v4769_v5, %v10790_v25  ;;  %v11569_v31 = vadd.f32 %v11447_v60, %v5656_v7  ;;  %6771 = vadd.xlane.f32.xlu1 %v6770_v2  ;;  %6120 = vmax.xlane.f32.xlu0 %v6119_v44  ;;  %v6019_v3 = vpop.xlane.xlu0 %6018 }
 0x556   :  { %v4771_v30 = vpop.f32.mrf.mxu1  ;;  %7895 = vpow2.f32 %v6515_v32  ;;  %v6377_v40 = vsub.f32 %v11261_v58, %v6019_v3  ;;  %v5658_v29 = vpop.f32.mrf.mxu0  ;;  %v4768_v7 = vadd.f32 %v4767_v57, %v10796_v4 }
 0x557   :  { %v4772_v53 = vadd.f32 %v4771_v30, %v10796_v4  ;;  %5851 = vmatprep.mubr.bf16.mxu0 %v5269_v48  ;;  %v11573_v1 = vpop.eup %7889  ;;  %v6122_v28 = vsel %vm5980_vm1, %v11569_v31, -inf  ;;  %v5113_v11 = vmax.f32 %v4770_v17, 0.0 }
 0x558   :  { %13449 = vst [vmem:[#allocation4_spill] sm:$0xff] %v11573_v1  ;;  %v4773_v41 = vpop.f32.mrf.mxu1  ;;  %v6517_v5 = vmul.f32 1.442695, %v6377_v40  ;;  %v5661_v2 = vpop.f32.mrf.mxu0  ;;  %5852 = vmatmul.mubr.bf16.gmra.mxu0 %v5268_v36  ;;  %v6773_v58 = vsel %vm5980_vm1, %v11573_v1, 0.0  ;;  %v5112_v17 = vmax.f32 %v4768_v7, 0.0 }
 0x559   :  { %v4774_v44 = vadd.f32 %v4773_v41, %v10790_v25  ;;  %v11582_v56 = vadd.f32 %v11447_v60, %v5661_v2  ;;  %v6022_v48 = vpop.xlane.xlu1 %6021  ;;  %6123 = vmax.xlane.f32.xlu1 %v6122_v28  ;;  %6774 = vadd.xlane.f32.xlu0 %v6773_v58  ;;  %v5114_v3 = vmax.f32 %v4772_v53, 0.0 }
 0x55a   :  { %v4777_v32 = vpop.f32.mrf.mxu1  ;;  %7897 = vpow2.f32 %v6517_v5  ;;  %v6378_v57 = vsub.f32 %v11268_v26, %v6022_v48  ;;  %v5663_v40 = vpop.f32.mrf.mxu0 }
 0x55b   :  { %v5115_v30 = vmax.f32 %v4774_v44, 0.0  ;;  %v11585_v29 = vpop.eup %7891  ;;  %v6125_v41 = vsel %vm5980_vm1, %v11582_v56, -inf  ;;  %v5270_v58 = vpack.c.bf16 %v5114_v3, %v5112_v17 }
 0x55c   :  { %13450 = vst [vmem:[#allocation7_spill] sm:$0xff] %v11585_v29  ;;  %v4779_v36 = vpop.f32.mrf.mxu1  ;;  %v6519_v2 = vmul.f32 1.442695, %v6378_v57  ;;  %v5664_v6 = vpop.f32.mrf.mxu0  ;;  %v6776_v28 = vsel %vm5980_vm1, %v11585_v29, 0.0 }
 0x55d   :  { %v5271_v1 = vpack.c.bf16 %v5115_v30, %v5113_v11  ;;  %v4780_v5 = vadd.f32 %v4779_v36, %v10790_v25  ;;  %v11593_v53 = vadd.f32 %v11447_v60, %v5664_v6  ;;  %6777 = vadd.xlane.f32.xlu1 %v6776_v28  ;;  %6126 = vmax.xlane.f32.xlu0 %v6125_v41  ;;  %v6025_v26 = vpop.xlane.xlu0 %6024 }
 0x55e   :  { %v4781_v44 = vpop.f32.mrf.mxu1  ;;  %7899 = vpow2.f32 %v6519_v2  ;;  %v6379_v48 = vsub.f32 %v11277_v23, %v6025_v26  ;;  %v5666_v11 = vpop.f32.mrf.mxu0  ;;  %v4778_v6 = vadd.f32 %v4777_v32, %v10796_v4 }
 0x55f   :  { %v4782_v7 = vadd.f32 %v4781_v44, %v10796_v4  ;;  %5859 = vmatprep.mubr.bf16.mxu0 %v5271_v1  ;;  %v11597_v30 = vpop.eup %7893  ;;  %v6128_v40 = vsel %vm5980_vm1, %v11593_v53, -inf  ;;  %v5117_v3 = vmax.f32 %v4780_v5, 0.0 }
 0x560   :  { %13451 = vst [vmem:[#allocation6_spill] sm:$0xff] %v11597_v30  ;;  %v4783_v57 = vpop.f32.mrf.mxu1  ;;  %v6521_v36 = vmul.f32 1.442695, %v6379_v48  ;;  %v5669_v28 = vpop.f32.mrf.mxu0  ;;  %5860 = vmatmul.mubr.bf16.gmra.mxu0 %v5270_v58  ;;  %v6779_v23 = vsel %vm5980_vm1, %v11597_v30, 0.0  ;;  %v5116_v5 = vmax.f32 %v4778_v6, 0.0 }
 0x561   :  { %v4784_v41 = vadd.f32 %v4783_v57, %v10790_v25  ;;  %v11606_v17 = vadd.f32 %v11447_v60, %v5669_v28  ;;  %v6028_v1 = vpop.xlane.xlu1 %6027  ;;  %6129 = vmax.xlane.f32.xlu1 %v6128_v40  ;;  %6780 = vadd.xlane.f32.xlu0 %v6779_v23  ;;  %v5118_v26 = vmax.f32 %v4782_v7, 0.0 }
 0x562   :  { %v4787_v2 = vpop.f32.mrf.mxu1  ;;  %7901 = vpow2.f32 %v6521_v36  ;;  %v6380_v32 = vsub.f32 %v11284_v15, %v6028_v1  ;;  %v5671_v48 = vpop.f32.mrf.mxu0 }
 0x563   :  { %v5119_v44 = vmax.f32 %v4784_v41, 0.0  ;;  %v11609_v11 = vpop.eup %7895  ;;  %v6131_v57 = vsel %vm5980_vm1, %v11606_v17, -inf  ;;  %v5272_v23 = vpack.c.bf16 %v5118_v26, %v5116_v5 }
 0x564   :  { %13452 = vst [vmem:[#allocation9_spill] sm:$0xff] %v11609_v11  ;;  %v4789_v58 = vpop.f32.mrf.mxu1  ;;  %v6523_v28 = vmul.f32 1.442695, %v6380_v32  ;;  %v5672_v29 = vpop.f32.mrf.mxu0  ;;  %v6782_v40 = vsel %vm5980_vm1, %v11609_v11, 0.0 }
 0x565   :  { %v5273_v30 = vpack.c.bf16 %v5119_v44, %v5117_v3  ;;  %v4790_v36 = vadd.f32 %v4789_v58, %v10790_v25  ;;  %v11617_v7 = vadd.f32 %v11447_v60, %v5672_v29  ;;  %6783 = vadd.xlane.f32.xlu1 %v6782_v40  ;;  %6132 = vmax.xlane.f32.xlu0 %v6131_v57  ;;  %v6031_v15 = vpop.xlane.xlu0 %6030 }
 0x566   :  { %v4791_v41 = vpop.f32.mrf.mxu1  ;;  %7903 = vpow2.f32 %v6523_v28  ;;  %v6381_v1 = vsub.f32 %v11293_v8, %v6031_v15  ;;  %v5674_v3 = vpop.f32.mrf.mxu0  ;;  %v4788_v29 = vadd.f32 %v4787_v2, %v10796_v4 }
 0x567   :  { %v4792_v6 = vadd.f32 %v4791_v41, %v10796_v4  ;;  %5867 = vmatprep.mubr.bf16.mxu0 %v5273_v30  ;;  %v11621_v44 = vpop.eup %7897  ;;  %v6134_v48 = vsel %vm5980_vm1, %v11617_v7, -inf  ;;  %v5121_v26 = vmax.f32 %v4790_v36, 0.0 }
 0x568   :  { %13453 = vst [vmem:[#allocation8_spill] sm:$0xff] %v11621_v44  ;;  %v4793_v32 = vpop.f32.mrf.mxu1  ;;  %v6525_v58 = vmul.f32 1.442695, %v6381_v1  ;;  %v5677_v40 = vpop.f32.mrf.mxu0  ;;  %5868 = vmatmul.mubr.bf16.gmra.mxu0 %v5272_v23  ;;  %v6785_v8 = vsel %vm5980_vm1, %v11621_v44, 0.0  ;;  %v5120_v36 = vmax.f32 %v4788_v29, 0.0 }
 0x569   :  { %v4794_v57 = vadd.f32 %v4793_v32, %v10790_v25  ;;  %v11630_v5 = vadd.f32 %v11447_v60, %v5677_v40  ;;  %v6034_v30 = vpop.xlane.xlu1 %6033  ;;  %6135 = vmax.xlane.f32.xlu1 %v6134_v48  ;;  %6786 = vadd.xlane.f32.xlu0 %v6785_v8  ;;  %v5122_v15 = vmax.f32 %v4792_v6, 0.0 }
 0x56a   :  { %v4797_v28 = vpop.f32.mrf.mxu1  ;;  %7905 = vpow2.f32 %v6525_v58  ;;  %v6382_v2 = vsub.f32 %v11300_v54, %v6034_v30  ;;  %v5679_v1 = vpop.f32.mrf.mxu0 }
 0x56b   :  { %v5123_v41 = vmax.f32 %v4794_v57, 0.0  ;;  %v11633_v3 = vpop.eup %7899  ;;  %v6137_v32 = vsel %vm5980_vm1, %v11630_v5, -inf  ;;  %v5274_v8 = vpack.c.bf16 %v5122_v15, %v5120_v36 }
 0x56c   :  { %13454 = vst [vmem:[#allocation11_spill] sm:$0xff] %v11633_v3  ;;  %v4799_v23 = vpop.f32.mrf.mxu1  ;;  %v6527_v40 = vmul.f32 1.442695, %v6382_v2  ;;  %v5680_v11 = vpop.f32.mrf.mxu0  ;;  %v6788_v48 = vsel %vm5980_vm1, %v11633_v3, 0.0 }
 0x56d   :  { %v5275_v44 = vpack.c.bf16 %v5123_v41, %v5121_v26  ;;  %v4800_v58 = vadd.f32 %v4799_v23, %v10790_v25  ;;  %v11641_v6 = vadd.f32 %v11447_v60, %v5680_v11  ;;  %6789 = vadd.xlane.f32.xlu1 %v6788_v48  ;;  %6138 = vmax.xlane.f32.xlu0 %v6137_v32  ;;  %v6037_v54 = vpop.xlane.xlu0 %6036 }
 0x56e   :  { %v4801_v57 = vpop.f32.mrf.mxu1  ;;  %7907 = vpow2.f32 %v6527_v40  ;;  %v6383_v30 = vsub.f32 %v11309_v34, %v6037_v54  ;;  %v5682_v26 = vpop.f32.mrf.mxu0  ;;  %v4798_v11 = vadd.f32 %v4797_v28, %v10796_v4 }
 0x56f   :  { %v4802_v29 = vadd.f32 %v4801_v57, %v10796_v4  ;;  %5875 = vmatprep.mubr.bf16.mxu0 %v5275_v44  ;;  %v11645_v41 = vpop.eup %7901  ;;  %v6140_v1 = vsel %vm5980_vm1, %v11641_v6, -inf  ;;  %v5125_v15 = vmax.f32 %v4800_v58, 0.0 }
 0x570   :  { %13455 = vst [vmem:[#allocation10_spill] sm:$0xff] %v11645_v41  ;;  %v4803_v2 = vpop.f32.mrf.mxu1  ;;  %v6529_v23 = vmul.f32 1.442695, %v6383_v30  ;;  %v5685_v48 = vpop.f32.mrf.mxu0  ;;  %5876 = vmatmul.mubr.bf16.gmra.mxu0 %v5274_v8  ;;  %v6791_v34 = vsel %vm5980_vm1, %v11645_v41, 0.0  ;;  %v5124_v58 = vmax.f32 %v4798_v11, 0.0 }
 0x571   :  { %v4804_v32 = vadd.f32 %v4803_v2, %v10790_v25  ;;  %v11654_v36 = vadd.f32 %v11447_v60, %v5685_v48  ;;  %v6040_v44 = vpop.xlane.xlu1 %6039  ;;  %6141 = vmax.xlane.f32.xlu1 %v6140_v1  ;;  %6792 = vadd.xlane.f32.xlu0 %v6791_v34  ;;  %v5126_v54 = vmax.f32 %v4802_v29, 0.0 }
 0x572   :  { %v4807_v40 = vpop.f32.mrf.mxu1  ;;  %7909 = vpow2.f32 %v6529_v23  ;;  %v6384_v28 = vsub.f32 %v11316_v35, %v6040_v44  ;;  %v5687_v30 = vpop.f32.mrf.mxu0 }
 0x573   :  { %v5127_v57 = vmax.f32 %v4804_v32, 0.0  ;;  %v11657_v26 = vpop.eup %7903  ;;  %v6143_v2 = vsel %vm5980_vm1, %v11654_v36, -inf  ;;  %v5276_v34 = vpack.c.bf16 %v5126_v54, %v5124_v58 }
 0x574   :  { %13456 = vst [vmem:[#allocation13_spill] sm:$0xff] %v11657_v26  ;;  %v4809_v8 = vpop.f32.mrf.mxu1  ;;  %v6531_v48 = vmul.f32 1.442695, %v6384_v28  ;;  %v5688_v3 = vpop.f32.mrf.mxu0  ;;  %v6794_v1 = vsel %vm5980_vm1, %v11657_v26, 0.0 }
 0x575   :  { %v5277_v41 = vpack.c.bf16 %v5127_v57, %v5125_v15  ;;  %v4810_v23 = vadd.f32 %v4809_v8, %v10790_v25  ;;  %v11665_v29 = vadd.f32 %v11447_v60, %v5688_v3  ;;  %6795 = vadd.xlane.f32.xlu1 %v6794_v1  ;;  %6144 = vmax.xlane.f32.xlu0 %v6143_v2  ;;  %v6043_v35 = vpop.xlane.xlu0 %6042 }
 0x576   :  { %v4811_v32 = vpop.f32.mrf.mxu1  ;;  %7911 = vpow2.f32 %v6531_v48  ;;  %v6385_v44 = vsub.f32 %v11325_v22, %v6043_v35  ;;  %v5690_v15 = vpop.f32.mrf.mxu0  ;;  %v4808_v3 = vadd.f32 %v4807_v40, %v10796_v4 }
 0x577   :  { %v4812_v11 = vadd.f32 %v4811_v32, %v10796_v4  ;;  %5883 = vmatprep.mubr.bf16.mxu0 %v5277_v41  ;;  %v11669_v57 = vpop.eup %7905  ;;  %v6146_v30 = vsel %vm5980_vm1, %v11665_v29, -inf  ;;  %v5129_v54 = vmax.f32 %v4810_v23, 0.0 }
 0x578   :  { %13457 = vst [vmem:[#allocation12_spill] sm:$0xff] %v11669_v57  ;;  %v4813_v28 = vpop.f32.mrf.mxu1  ;;  %v6533_v8 = vmul.f32 1.442695, %v6385_v44  ;;  %v5693_v1 = vpop.f32.mrf.mxu0  ;;  %5884 = vmatmul.mubr.bf16.gmra.mxu0 %v5276_v34  ;;  %v6797_v22 = vsel %vm5980_vm1, %v11669_v57, 0.0  ;;  %v5128_v23 = vmax.f32 %v4808_v3, 0.0 }
 0x579   :  { %v4814_v2 = vadd.f32 %v4813_v28, %v10790_v25  ;;  %v11678_v58 = vadd.f32 %v11447_v60, %v5693_v1  ;;  %v6046_v41 = vpop.xlane.xlu1 %6045  ;;  %6147 = vmax.xlane.f32.xlu1 %v6146_v30  ;;  %6798 = vadd.xlane.f32.xlu0 %v6797_v22  ;;  %v5130_v35 = vmax.f32 %v4812_v11, 0.0 }
 0x57a   :  { %v4817_v48 = vpop.f32.mrf.mxu1  ;;  %7913 = vpow2.f32 %v6533_v8  ;;  %v6386_v40 = vsub.f32 %v11332_v59, %v6046_v41  ;;  %v5695_v44 = vpop.f32.mrf.mxu0 }
 0x57b   :  { %v5131_v32 = vmax.f32 %v4814_v2, 0.0  ;;  %v11681_v15 = vpop.eup %7907  ;;  %v6149_v28 = vsel %vm5980_vm1, %v11678_v58, -inf  ;;  %v5278_v22 = vpack.c.bf16 %v5130_v35, %v5128_v23 }
 0x57c   :  { %13458 = vst [vmem:[#allocation15_spill] sm:$0xff] %v11681_v15  ;;  %v4819_v34 = vpop.f32.mrf.mxu1  ;;  %v6535_v1 = vmul.f32 1.442695, %v6386_v40  ;;  %v5696_v26 = vpop.f32.mrf.mxu0  ;;  %v6800_v30 = vsel %vm5980_vm1, %v11681_v15, 0.0 }
 0x57d   :  { %v5279_v57 = vpack.c.bf16 %v5131_v32, %v5129_v54  ;;  %v4820_v8 = vadd.f32 %v4819_v34, %v10790_v25  ;;  %v11689_v11 = vadd.f32 %v11447_v60, %v5696_v26  ;;  %6801 = vadd.xlane.f32.xlu1 %v6800_v30  ;;  %6150 = vmax.xlane.f32.xlu0 %v6149_v28  ;;  %v6049_v59 = vpop.xlane.xlu0 %6048 }
 0x57e   :  { %v4821_v2 = vpop.f32.mrf.mxu1  ;;  %7915 = vpow2.f32 %v6535_v1  ;;  %v6387_v41 = vsub.f32 %v11341_v33, %v6049_v59  ;;  %v5698_v54 = vpop.f32.mrf.mxu0  ;;  %v4818_v26 = vadd.f32 %v4817_v48, %v10796_v4 }
 0x57f   :  { %v4822_v3 = vadd.f32 %v4821_v2, %v10796_v4  ;;  %5891 = vmatprep.mubr.bf16.mxu0 %v5279_v57  ;;  %v11693_v32 = vpop.eup %7909  ;;  %v6152_v44 = vsel %vm5980_vm1, %v11689_v11, -inf  ;;  %v5133_v35 = vmax.f32 %v4820_v8, 0.0 }
 0x580   :  { %13459 = vst [vmem:[#allocation14_spill] sm:$0xff] %v11693_v32  ;;  %v4823_v40 = vpop.f32.mrf.mxu1  ;;  %v6537_v34 = vmul.f32 1.442695, %v6387_v41  ;;  %v5701_v30 = vpop.f32.mrf.mxu0  ;;  %5892 = vmatmul.mubr.bf16.gmra.mxu0 %v5278_v22  ;;  %v6803_v33 = vsel %vm5980_vm1, %v11693_v32, 0.0  ;;  %v5132_v8 = vmax.f32 %v4818_v26, 0.0 }
 0x581   :  { %v4824_v28 = vadd.f32 %v4823_v40, %v10790_v25  ;;  %v11702_v23 = vadd.f32 %v11447_v60, %v5701_v30  ;;  %v6052_v57 = vpop.xlane.xlu1 %6051  ;;  %6153 = vmax.xlane.f32.xlu1 %v6152_v44  ;;  %6804 = vadd.xlane.f32.xlu0 %v6803_v33  ;;  %v5134_v59 = vmax.f32 %v4822_v3, 0.0 }
 0x582   :  { %v4827_v1 = vpop.f32.mrf.mxu1  ;;  %7917 = vpow2.f32 %v6537_v34  ;;  %v6388_v48 = vsub.f32 %v11348_v45, %v6052_v57  ;;  %v5703_v41 = vpop.f32.mrf.mxu0 }
 0x583   :  { %v5135_v2 = vmax.f32 %v4824_v28, 0.0  ;;  %v11705_v54 = vpop.eup %7911  ;;  %v6155_v40 = vsel %vm5980_vm1, %v11702_v23, -inf  ;;  %v5280_v33 = vpack.c.bf16 %v5134_v59, %v5132_v8 }
 0x584   :  { %13460 = vst [vmem:[#allocation17_spill] sm:$0xff] %v11705_v54  ;;  %v4829_v22 = vpop.f32.mrf.mxu1  ;;  %v6539_v30 = vmul.f32 1.442695, %v6388_v48  ;;  %v5704_v15 = vpop.f32.mrf.mxu0  ;;  %v6806_v44 = vsel %vm5980_vm1, %v11705_v54, 0.0 }
 0x585   :  { %v5281_v32 = vpack.c.bf16 %v5135_v2, %v5133_v35  ;;  %v4830_v34 = vadd.f32 %v4829_v22, %v10790_v25  ;;  %v11713_v3 = vadd.f32 %v11447_v60, %v5704_v15  ;;  %6807 = vadd.xlane.f32.xlu1 %v6806_v44  ;;  %6156 = vmax.xlane.f32.xlu0 %v6155_v40  ;;  %v6055_v45 = vpop.xlane.xlu0 %6054 }
 0x586   :  { %v4831_v28 = vpop.f32.mrf.mxu1  ;;  %7919 = vpow2.f32 %v6539_v30  ;;  %v6389_v57 = vsub.f32 %v11357_v16, %v6055_v45  ;;  %v5706_v35 = vpop.f32.mrf.mxu0  ;;  %v4828_v15 = vadd.f32 %v4827_v1, %v10796_v4 }
 0x587   :  { %v4832_v26 = vadd.f32 %v4831_v28, %v10796_v4  ;;  %5899 = vmatprep.mubr.bf16.mxu0 %v5281_v32  ;;  %v11717_v2 = vpop.eup %7913  ;;  %v6158_v41 = vsel %vm5980_vm1, %v11713_v3, -inf  ;;  %v5137_v59 = vmax.f32 %v4830_v34, 0.0 }
 0x588   :  { %13461 = vst [vmem:[#allocation16_spill] sm:$0xff] %v11717_v2  ;;  %v4833_v48 = vpop.f32.mrf.mxu1  ;;  %v6541_v22 = vmul.f32 1.442695, %v6389_v57  ;;  %v5709_v44 = vpop.f32.mrf.mxu0  ;;  %5900 = vmatmul.mubr.bf16.gmra.mxu0 %v5280_v33  ;;  %v6809_v16 = vsel %vm5980_vm1, %v11717_v2, 0.0  ;;  %v5136_v34 = vmax.f32 %v4828_v15, 0.0 }
 0x589   :  { %v4834_v40 = vadd.f32 %v4833_v48, %v10790_v25  ;;  %v11726_v8 = vadd.f32 %v11447_v60, %v5709_v44  ;;  %v6058_v32 = vpop.xlane.xlu1 %6057  ;;  %6159 = vmax.xlane.f32.xlu1 %v6158_v41  ;;  %6810 = vadd.xlane.f32.xlu0 %v6809_v16  ;;  %v5138_v45 = vmax.f32 %v4832_v26, 0.0 }
 0x58a   :  { %v4837_v30 = vpop.f32.mrf.mxu1  ;;  %7921 = vpow2.f32 %v6541_v22  ;;  %v6390_v1 = vsub.f32 %v11364_v51, %v6058_v32  ;;  %v5711_v57 = vpop.f32.mrf.mxu0 }
 0x58b   :  { %v5139_v28 = vmax.f32 %v4834_v40, 0.0  ;;  %v11729_v35 = vpop.eup %7915  ;;  %v6161_v48 = vsel %vm5980_vm1, %v11726_v8, -inf  ;;  %v5282_v16 = vpack.c.bf16 %v5138_v45, %v5136_v34 }
 0x58c   :  { %13462 = vst [vmem:[#allocation19_spill] sm:$0xff] %v11729_v35  ;;  %v4839_v33 = vpop.f32.mrf.mxu1  ;;  %v6543_v44 = vmul.f32 1.442695, %v6390_v1  ;;  %v5712_v54 = vpop.f32.mrf.mxu0  ;;  %v6812_v41 = vsel %vm5980_vm1, %v11729_v35, 0.0 }
 0x58d   :  { %v5283_v2 = vpack.c.bf16 %v5139_v28, %v5137_v59  ;;  %v4840_v22 = vadd.f32 %v4839_v33, %v10790_v25  ;;  %v11737_v26 = vadd.f32 %v11447_v60, %v5712_v54  ;;  %6813 = vadd.xlane.f32.xlu1 %v6812_v41  ;;  %6162 = vmax.xlane.f32.xlu0 %v6161_v48  ;;  %v6061_v51 = vpop.xlane.xlu0 %6060 }
 0x58e   :  { %v4841_v40 = vpop.f32.mrf.mxu1  ;;  %7923 = vpow2.f32 %v6543_v44  ;;  %v6391_v32 = vsub.f32 %v11373_v13, %v6061_v51  ;;  %v5714_v59 = vpop.f32.mrf.mxu0  ;;  %v4838_v54 = vadd.f32 %v4837_v30, %v10796_v4 }
 0x58f   :  { %v4842_v15 = vadd.f32 %v4841_v40, %v10796_v4  ;;  %5907 = vmatprep.mubr.bf16.mxu0 %v5283_v2  ;;  %v11741_v28 = vpop.eup %7917  ;;  %v6164_v57 = vsel %vm5980_vm1, %v11737_v26, -inf  ;;  %v5141_v45 = vmax.f32 %v4840_v22, 0.0 }
 0x590   :  { %13463 = vst [vmem:[#allocation18_spill] sm:$0xff] %v11741_v28  ;;  %v4843_v1 = vpop.f32.mrf.mxu1  ;;  %v6545_v33 = vmul.f32 1.442695, %v6391_v32  ;;  %v5717_v41 = vpop.f32.mrf.mxu0  ;;  %5908 = vmatmul.mubr.bf16.gmra.mxu0 %v5282_v16  ;;  %v6815_v13 = vsel %vm5980_vm1, %v11741_v28, 0.0  ;;  %v5140_v22 = vmax.f32 %v4838_v54, 0.0 }
 0x591   :  { %v4844_v48 = vadd.f32 %v4843_v1, %v10790_v25  ;;  %v11750_v34 = vadd.f32 %v11447_v60, %v5717_v41  ;;  %v6064_v2 = vpop.xlane.xlu1 %6063  ;;  %6165 = vmax.xlane.f32.xlu1 %v6164_v57  ;;  %6816 = vadd.xlane.f32.xlu0 %v6815_v13  ;;  %v5142_v51 = vmax.f32 %v4842_v15, 0.0 }
 0x592   :  { %v4847_v44 = vpop.f32.mrf.mxu1  ;;  %7925 = vpow2.f32 %v6545_v33  ;;  %v6392_v30 = vsub.f32 %v11379_v49, %v6064_v2  ;;  %v5719_v32 = vpop.f32.mrf.mxu0  ;;  %v11763_v49 = vld [vmem:[%s13296_s10] ss:$0 sm:$0xff] }
 0x593   :  { %v5143_v40 = vmax.f32 %v4844_v48, 0.0  ;;  %v11753_v59 = vpop.eup %7919  ;;  %v6167_v1 = vsel %vm5980_vm1, %v11750_v34, -inf  ;;  %v5284_v13 = vpack.c.bf16 %v5142_v51, %v5140_v22 }
 0x594   :  { %13464 = vst [vmem:[#allocation21_spill] sm:$0xff] %v11753_v59  ;;  %v4849_v16 = vpop.f32.mrf.mxu1  ;;  %v6547_v60 = vmul.f32 1.442695, %v6392_v30  ;;  %v5720_v41 = vpop.f32.mrf.mxu0  ;;  %v6818_v57 = vsel %vm5980_vm1, %v11753_v59, 0.0 }
 0x595   :  { %v5285_v28 = vpack.c.bf16 %v5143_v40, %v5141_v45  ;;  %v4850_v33 = vadd.f32 %v4849_v16, %v10790_v25  ;;  %v11766_v15 = vadd.f32 %v11763_v49, %v5720_v41  ;;  %6819 = vadd.xlane.f32.xlu1 %v6818_v57  ;;  %6168 = vmax.xlane.f32.xlu0 %v6167_v1  ;;  %v6067_v48 = vpop.xlane.xlu0 %6066 }
 0x596   :  { %v4851_v54 = vpop.f32.mrf.mxu1  ;;  %7927 = vpow2.f32 %v6547_v60  ;;  %v6393_v45 = vsub.f32 %v11388_v62, %v6067_v48  ;;  %v5722_v40 = vpop.f32.mrf.mxu0  ;;  %v4848_v41 = vadd.f32 %v4847_v44, %v10796_v4 }
 0x597   :  { %v4852_v2 = vadd.f32 %v4851_v54, %v10796_v4  ;;  %5915 = vmatprep.mubr.bf16.mxu0 %v5285_v28  ;;  %v11770_v30 = vpop.eup %7921  ;;  %v6170_v16 = vsel %vm5980_vm1, %v11766_v15, -inf  ;;  %v5145_v51 = vmax.f32 %v4850_v33, 0.0 }
 0x598   :  { %13465 = vst [vmem:[#allocation20_spill] sm:$0xff] %v11770_v30  ;;  %v4853_v32 = vpop.f32.mrf.mxu1  ;;  %v6549_v57 = vmul.f32 1.442695, %v6393_v45  ;;  %v5725_v59 = vpop.f32.mrf.mxu0  ;;  %5916 = vmatmul.mubr.bf16.gmra.mxu0 %v5284_v13  ;;  %v6821_v62 = vsel %vm5980_vm1, %v11770_v30, 0.0  ;;  %v5144_v33 = vmax.f32 %v4848_v41, 0.0 }
 0x599   :  { %v4854_v1 = vadd.f32 %v4853_v32, %v10790_v25  ;;  %v11779_v22 = vadd.f32 %v11763_v49, %v5725_v59  ;;  %v6070_v28 = vpop.xlane.xlu1 %6069  ;;  %6171 = vmax.xlane.f32.xlu1 %v6170_v16  ;;  %6822 = vadd.xlane.f32.xlu0 %v6821_v62  ;;  %v5146_v48 = vmax.f32 %v4852_v2, 0.0 }
 0x59a   :  { %v4857_v60 = vpop.f32.mrf.mxu1  ;;  %7929 = vpow2.f32 %v6549_v57  ;;  %v6394_v44 = vsub.f32 %v11393_v61, %v6070_v28  ;;  %v5727_v45 = vpop.f32.mrf.mxu0 }
 0x59b   :  { %v5147_v54 = vmax.f32 %v4854_v1, 0.0  ;;  %v11782_v40 = vpop.eup %7923  ;;  %v6173_v32 = vsel %vm5980_vm1, %v11779_v22, -inf  ;;  %v5286_v62 = vpack.c.bf16 %v5146_v48, %v5144_v33 }
 0x59c   :  { %13466 = vst [vmem:[#allocation23_spill] sm:$0xff] %v11782_v40  ;;  %v4859_v13 = vpop.f32.mrf.mxu1  ;;  %v6551_v59 = vmul.f32 1.442695, %v6394_v44  ;;  %v5728_v35 = vpop.f32.mrf.mxu0  ;;  %v6824_v16 = vsel %vm5980_vm1, %v11782_v40, 0.0 }
 0x59d   :  { %v5287_v30 = vpack.c.bf16 %v5147_v54, %v5145_v51  ;;  %v4860_v57 = vadd.f32 %v4859_v13, %v10790_v25  ;;  %v11790_v2 = vadd.f32 %v11763_v49, %v5728_v35  ;;  %6825 = vadd.xlane.f32.xlu1 %v6824_v16  ;;  %6174 = vmax.xlane.f32.xlu0 %v6173_v32  ;;  %v6073_v61 = vpop.xlane.xlu0 %6072 }
 0x59e   :  { %v4861_v1 = vpop.f32.mrf.mxu1  ;;  %7931 = vpow2.f32 %v6551_v59  ;;  %v6395_v28 = vsub.f32 %v11402_v52, %v6073_v61  ;;  %v5730_v51 = vpop.f32.mrf.mxu0  ;;  %v4858_v35 = vadd.f32 %v4857_v60, %v10796_v4 }
 0x59f   :  { %v4862_v41 = vadd.f32 %v4861_v1, %v10796_v4  ;;  %5923 = vmatprep.mubr.bf16.mxu0 %v5287_v30  ;;  %v11794_v54 = vpop.eup %7925  ;;  %v6176_v45 = vsel %vm5980_vm1, %v11790_v2, -inf  ;;  %v5149_v48 = vmax.f32 %v4860_v57, 0.0 }
 0x5a0   :  { %13467 = vst [vmem:[#allocation22_spill] sm:$0xff] %v11794_v54  ;;  %v4863_v44 = vpop.f32.mrf.mxu1  ;;  %v6553_v13 = vmul.f32 1.442695, %v6395_v28  ;;  %v5733_v16 = vpop.f32.mrf.mxu0  ;;  %5924 = vmatmul.mubr.bf16.gmra.mxu0 %v5286_v62  ;;  %v6827_v52 = vsel %vm5980_vm1, %v11794_v54, 0.0  ;;  %v5148_v57 = vmax.f32 %v4858_v35, 0.0 }
 0x5a1   :  { %v4864_v32 = vadd.f32 %v4863_v44, %v10790_v25  ;;  %v11803_v33 = vadd.f32 %v11763_v49, %v5733_v16  ;;  %v6076_v30 = vpop.xlane.xlu1 %6075  ;;  %6177 = vmax.xlane.f32.xlu1 %v6176_v45  ;;  %6828 = vadd.xlane.f32.xlu0 %v6827_v52  ;;  %v5150_v61 = vmax.f32 %v4862_v41, 0.0 }
 0x5a2   :  { %v4867_v59 = vpop.f32.mrf.mxu1  ;;  %7933 = vpow2.f32 %v6553_v13  ;;  %v6396_v60 = vsub.f32 %v11407_v24, %v6076_v30  ;;  %v5735_v28 = vpop.f32.mrf.mxu0 }
 0x5a3   :  { %v5151_v1 = vmax.f32 %v4864_v32, 0.0  ;;  %v11806_v51 = vpop.eup %7927  ;;  %v6179_v44 = vsel %vm5980_vm1, %v11803_v33, -inf  ;;  %v5288_v52 = vpack.c.bf16 %v5150_v61, %v5148_v57 }
 0x5a4   :  { %13468 = vst [vmem:[#allocation25_spill] sm:$0xff] %v11806_v51  ;;  %v4869_v62 = vpop.f32.mrf.mxu1  ;;  %v6555_v16 = vmul.f32 1.442695, %v6396_v60  ;;  %v5736_v40 = vpop.f32.mrf.mxu0  ;;  %v6830_v45 = vsel %vm5980_vm1, %v11806_v51, 0.0 }
 0x5a5   :  { %v5289_v54 = vpack.c.bf16 %v5151_v1, %v5149_v48  ;;  %v4870_v13 = vadd.f32 %v4869_v62, %v10790_v25  ;;  %v11814_v41 = vadd.f32 %v11763_v49, %v5736_v40  ;;  %6831 = vadd.xlane.f32.xlu1 %v6830_v45  ;;  %6180 = vmax.xlane.f32.xlu0 %v6179_v44  ;;  %v6079_v24 = vpop.xlane.xlu0 %6078 }
 0x5a6   :  { %v4871_v32 = vpop.f32.mrf.mxu1  ;;  %7935 = vpow2.f32 %v6555_v16  ;;  %v6397_v30 = vsub.f32 %v11416_v43, %v6079_v24  ;;  %v5738_v48 = vpop.f32.mrf.mxu0  ;;  %v4868_v40 = vadd.f32 %v4867_v59, %v10796_v4 }
 0x5a7   :  { %v4872_v35 = vadd.f32 %v4871_v32, %v10796_v4  ;;  %5931 = vmatprep.mubr.bf16.mxu0 %v5289_v54  ;;  %v11818_v1 = vpop.eup %7929  ;;  %v6182_v28 = vsel %vm5980_vm1, %v11814_v41, -inf  ;;  %v5153_v61 = vmax.f32 %v4870_v13, 0.0 }
 0x5a8   :  { %13469 = vst [vmem:[#allocation24_spill] sm:$0xff] %v11818_v1  ;;  %v4873_v60 = vpop.f32.mrf.mxu1  ;;  %v6557_v62 = vmul.f32 1.442695, %v6397_v30  ;;  %v5741_v45 = vpop.f32.mrf.mxu0  ;;  %5932 = vmatmul.mubr.bf16.gmra.mxu0 %v5288_v52  ;;  %v6833_v43 = vsel %vm5980_vm1, %v11818_v1, 0.0  ;;  %v5152_v13 = vmax.f32 %v4868_v40, 0.0 }
 0x5a9   :  { %v4874_v44 = vadd.f32 %v4873_v60, %v10790_v25  ;;  %v11827_v57 = vadd.f32 %v11763_v49, %v5741_v45  ;;  %v6082_v54 = vpop.xlane.xlu1 %6081  ;;  %6183 = vmax.xlane.f32.xlu1 %v6182_v28  ;;  %6834 = vadd.xlane.f32.xlu0 %v6833_v43  ;;  %v5154_v24 = vmax.f32 %v4872_v35, 0.0 }
 0x5aa   :  { %v4877_v16 = vpop.f32.mrf.mxu1  ;;  %7937 = vpow2.f32 %v6557_v62  ;;  %v6398_v59 = vsub.f32 %v11421_v42, %v6082_v54  ;;  %v5743_v30 = vpop.f32.mrf.mxu0 }
 0x5ab   :  { %v5155_v32 = vmax.f32 %v4874_v44, 0.0  ;;  %v11830_v48 = vpop.eup %7931  ;;  %v6185_v60 = vsel %vm5980_vm1, %v11827_v57, -inf  ;;  %v5290_v43 = vpack.c.bf16 %v5154_v24, %v5152_v13 }
 0x5ac   :  { %13470 = vst [vmem:[#allocation27_spill] sm:$0xff] %v11830_v48  ;;  %v4879_v52 = vpop.f32.mrf.mxu1  ;;  %v6559_v45 = vmul.f32 1.442695, %v6398_v59  ;;  %v5744_v51 = vpop.f32.mrf.mxu0  ;;  %v6836_v28 = vsel %vm5980_vm1, %v11830_v48, 0.0 }
 0x5ad   :  { %v5291_v1 = vpack.c.bf16 %v5155_v32, %v5153_v61  ;;  %v4880_v62 = vadd.f32 %v4879_v52, %v10790_v25  ;;  %v11838_v35 = vadd.f32 %v11763_v49, %v5744_v51  ;;  %6837 = vadd.xlane.f32.xlu1 %v6836_v28  ;;  %6186 = vmax.xlane.f32.xlu0 %v6185_v60  ;;  %v6085_v42 = vpop.xlane.xlu0 %6084 }
 0x5ae   :  { %v4881_v44 = vpop.f32.mrf.mxu1  ;;  %7939 = vpow2.f32 %v6559_v45  ;;  %v6399_v54 = vsub.f32 %v11430_v19, %v6085_v42  ;;  %v5746_v61 = vpop.f32.mrf.mxu0  ;;  %v4878_v51 = vadd.f32 %v4877_v16, %v10796_v4 }
 0x5af   :  { %v4882_v40 = vadd.f32 %v4881_v44, %v10796_v4  ;;  %5939 = vmatprep.mubr.bf16.mxu0 %v5291_v1  ;;  %v11842_v32 = vpop.eup %7933  ;;  %v6188_v30 = vsel %vm5980_vm1, %v11838_v35, -inf  ;;  %v5157_v24 = vmax.f32 %v4880_v62, 0.0 }
 0x5b0   :  { %13471 = vst [vmem:[#allocation26_spill] sm:$0xff] %v11842_v32  ;;  %v4883_v59 = vpop.f32.mrf.mxu1  ;;  %v6561_v52 = vmul.f32 1.442695, %v6399_v54  ;;  %v5749_v28 = vpop.f32.mrf.mxu0  ;;  %5940 = vmatmul.mubr.bf16.gmra.mxu0 %v5290_v43  ;;  %v6839_v19 = vsel %vm5980_vm1, %v11842_v32, 0.0  ;;  %v5156_v62 = vmax.f32 %v4878_v51, 0.0 }
 0x5b1   :  { %v4884_v60 = vadd.f32 %v4883_v59, %v10790_v25  ;;  %v11851_v13 = vadd.f32 %v11763_v49, %v5749_v28  ;;  %v6088_v1 = vpop.xlane.xlu1 %6087  ;;  %6189 = vmax.xlane.f32.xlu1 %v6188_v30  ;;  %6840 = vadd.xlane.f32.xlu0 %v6839_v19  ;;  %v5158_v42 = vmax.f32 %v4882_v40, 0.0 }
 0x5b2   :  { %v4887_v45 = vpop.f32.mrf.mxu1  ;;  %7941 = vpow2.f32 %v6561_v52  ;;  %v6400_v16 = vsub.f32 %v11436_v50, %v6088_v1  ;;  %v5751_v54 = vpop.f32.mrf.mxu0 }
 0x5b3   :  { %v5159_v44 = vmax.f32 %v4884_v60, 0.0  ;;  %v11854_v61 = vpop.eup %7935  ;;  %v6191_v59 = vsel %vm5980_vm1, %v11851_v13, -inf  ;;  %v5292_v19 = vpack.c.bf16 %v5158_v42, %v5156_v62 }
 0x5b4   :  { %13472 = vst [vmem:[#allocation29_spill] sm:$0xff] %v11854_v61  ;;  %v4889_v43 = vpop.f32.mrf.mxu1  ;;  %v6563_v28 = vmul.f32 1.442695, %v6400_v16  ;;  %v5752_v48 = vpop.f32.mrf.mxu0  ;;  %v6842_v30 = vsel %vm5980_vm1, %v11854_v61, 0.0 }
 0x5b5   :  { %v5293_v32 = vpack.c.bf16 %v5159_v44, %v5157_v24  ;;  %v4890_v52 = vadd.f32 %v4889_v43, %v10790_v25  ;;  %v11862_v40 = vadd.f32 %v11763_v49, %v5752_v48  ;;  %6843 = vadd.xlane.f32.xlu1 %v6842_v30  ;;  %6192 = vmax.xlane.f32.xlu0 %v6191_v59  ;;  %v6091_v50 = vpop.xlane.xlu0 %6090 }
 0x5b6   :  { %v4891_v60 = vpop.f32.mrf.mxu1  ;;  %7943 = vpow2.f32 %v6563_v28  ;;  %v6401_v1 = vsub.f32 %v11450_v14, %v6091_v50  ;;  %v5754_v24 = vpop.f32.mrf.mxu0  ;;  %v4888_v48 = vadd.f32 %v4887_v45, %v10796_v4 }
 0x5b7   :  { %v4892_v51 = vadd.f32 %v4891_v60, %v10796_v4  ;;  %5947 = vmatprep.mubr.bf16.mxu0 %v5293_v32  ;;  %v11866_v44 = vpop.eup %7937  ;;  %v6194_v54 = vsel %vm5980_vm1, %v11862_v40, -inf  ;;  %v5161_v42 = vmax.f32 %v4890_v52, 0.0 }
 0x5b8   :  { %13473 = vst [vmem:[#allocation28_spill] sm:$0xff] %v11866_v44  ;;  %v4893_v16 = vpop.f32.mrf.mxu1  ;;  %v6565_v43 = vmul.f32 1.442695, %v6401_v1  ;;  %v5757_v30 = vpop.f32.mrf.mxu0  ;;  %5948 = vmatmul.mubr.bf16.gmra.mxu0 %v5292_v19  ;;  %v6845_v14 = vsel %vm5980_vm1, %v11866_v44, 0.0  ;;  %v5160_v52 = vmax.f32 %v4888_v48, 0.0 }
 0x5b9   :  { %v4894_v59 = vadd.f32 %v4893_v16, %v10790_v25  ;;  %v11875_v62 = vadd.f32 %v11763_v49, %v5757_v30  ;;  %v6094_v32 = vpop.xlane.xlu1 %6093  ;;  %6195 = vmax.xlane.f32.xlu1 %v6194_v54  ;;  %6846 = vadd.xlane.f32.xlu0 %v6845_v14  ;;  %v5162_v50 = vmax.f32 %v4892_v51, 0.0 }
 0x5ba   :  { %v4897_v28 = vpop.f32.mrf.mxu1  ;;  %7945 = vpow2.f32 %v6565_v43  ;;  %v6402_v45 = vsub.f32 %v11457_v39, %v6094_v32  ;;  %v5759_v1 = vpop.f32.mrf.mxu0 }
 0x5bb   :  { %v5163_v60 = vmax.f32 %v4894_v59, 0.0  ;;  %v11878_v24 = vpop.eup %7939  ;;  %v6197_v16 = vsel %vm5980_vm1, %v11875_v62, -inf  ;;  %v5294_v14 = vpack.c.bf16 %v5162_v50, %v5160_v52 }
 0x5bc   :  { %13474 = vst [vmem:[#allocation31_spill] sm:$0xff] %v11878_v24  ;;  %v4899_v19 = vpop.f32.mrf.mxu1  ;;  %v6567_v30 = vmul.f32 1.442695, %v6402_v45  ;;  %v5760_v61 = vpop.f32.mrf.mxu0  ;;  %v6848_v54 = vsel %vm5980_vm1, %v11878_v24, 0.0 }
 0x5bd   :  { %v5295_v44 = vpack.c.bf16 %v5163_v60, %v5161_v42  ;;  %v4900_v43 = vadd.f32 %v4899_v19, %v10790_v25  ;;  %v11886_v51 = vadd.f32 %v11763_v49, %v5760_v61  ;;  %6849 = vadd.xlane.f32.xlu1 %v6848_v54  ;;  %6198 = vmax.xlane.f32.xlu0 %v6197_v16  ;;  %v6097_v39 = vpop.xlane.xlu0 %6096 }
 0x5be   :  { %v4901_v59 = vpop.f32.mrf.mxu1  ;;  %7947 = vpow2.f32 %v6567_v30  ;;  %v6403_v32 = vsub.f32 %v11466_v27, %v6097_v39  ;;  %v5762_v42 = vpop.f32.mrf.mxu0  ;;  %v4898_v61 = vadd.f32 %v4897_v28, %v10796_v4 }
 0x5bf   :  { %v4902_v48 = vadd.f32 %v4901_v59, %v10796_v4  ;;  %5955 = vmatprep.mubr.bf16.mxu0 %v5295_v44  ;;  %v11890_v60 = vpop.eup %7941  ;;  %v6200_v1 = vsel %vm5980_vm1, %v11886_v51, -inf  ;;  %v5165_v50 = vmax.f32 %v4900_v43, 0.0 }
 0x5c0   :  { %13475 = vst [vmem:[#allocation30_spill] sm:$0xff] %v11890_v60  ;;  %v4903_v45 = vpop.f32.mrf.mxu1  ;;  %v6569_v19 = vmul.f32 1.442695, %v6403_v32  ;;  %v5765_v54 = vpop.f32.mrf.mxu0  ;;  %5956 = vmatmul.mubr.bf16.gmra.mxu0 %v5294_v14  ;;  %v6851_v27 = vsel %vm5980_vm1, %v11890_v60, 0.0 }
 0x5c1   :  { %v4904_v16 = vadd.f32 %v4903_v45, %v10790_v25  ;;  %v11899_v52 = vadd.f32 %v11763_v49, %v5765_v54  ;;  %v6100_v44 = vpop.xlane.xlu1 %6099  ;;  %6201 = vmax.xlane.f32.xlu1 %v6200_v1  ;;  %6852 = vadd.xlane.f32.xlu0 %v6851_v27  ;;  %v5166_v39 = vmax.f32 %v4902_v48, 0.0  ;;  %v5164_v54 = vmax.f32 %v4898_v61, 0.0 }
 0x5c2   :  { %v4907_v30 = vpop.f32.mrf.mxu1  ;;  %7949 = vpow2.f32 %v6569_v19  ;;  %v6404_v28 = vsub.f32 %v11473_v20, %v6100_v44  ;;  %v5767_v32 = vpop.f32.mrf.mxu0 }
 0x5c3   :  { %v5167_v59 = vmax.f32 %v4904_v16, 0.0  ;;  %v6751_v42 = vpop.xlane.xlu0 %6750  ;;  %v11902_v45 = vpop.eup %7943  ;;  %v6203_v43 = vsel %vm5980_vm1, %v11899_v52, -inf  ;;  %v5296_v16 = vpack.c.bf16 %v5166_v39, %v5164_v54 }
 0x5c4   :  { %7951 = vrcp.f32 %v6751_v42  ;;  %v4909_v14 = vpop.f32.mrf.mxu1  ;;  %v6571_v24 = vmul.f32 1.442695, %v6404_v28  ;;  %v5768_v1 = vpop.f32.mrf.mxu0  ;;  %v6854_v19 = vsel %vm5980_vm1, %v11902_v45, 0.0 }
 0x5c5   :  { %v5297_v60 = vpack.c.bf16 %v5167_v59, %v5165_v50  ;;  %v11909_v48 = vadd.f32 %v11763_v49, %v5768_v1  ;;  %6855 = vadd.xlane.f32.xlu1 %v6854_v19  ;;  %6204 = vmax.xlane.f32.xlu0 %v6203_v43  ;;  %v4910_v27 = vadd.f32 %v4909_v14, %v10790_v25 }
 0x5c6   :  { %v4911_v20 = vpop.f32.mrf.mxu1  ;;  %7953 = vpow2.f32 %v6571_v24  ;;  %v5770_v32 = vpop.f32.mrf.mxu0  ;;  %v4908_v43 = vadd.f32 %v4907_v30, %v10796_v4 }
 0x5c7   :  { %v4912_v44 = vadd.f32 %v4911_v20, %v10796_v4  ;;  %v6754_v61 = vpop.xlane.xlu1 %6753  ;;  %5963 = vmatprep.mubr.bf16.mxu0 %v5297_v60  ;;  %v11913_v50 = vpop.eup %7945  ;;  %v6206_v42 = vsel %vm5980_vm1, %v11909_v48, -inf  ;;  %v5169_v1 = vmax.f32 %v4910_v27, 0.0 }
 0x5c8   :  { %7955 = vrcp.f32 %v6754_v61  ;;  %v6103_v59 = vpop.xlane.xlu0 %6102  ;;  %v4913_v28 = vpop.f32.mrf.mxu1  ;;  %5964 = vmatmul.mubr.bf16.gmra.mxu0 %v5296_v16  ;;  %v6857_v54 = vsel %vm5980_vm1, %v11913_v50, 0.0 }
 0x5c9   :  { %v6405_v39 = vsub.f32 %v11486_v21, %v6103_v59  ;;  %v4914_v24 = vadd.f32 %v4913_v28, %v10790_v25  ;;  %v5773_v14 = vpop.f32.mrf.mxu0  ;;  %6207 = vmax.xlane.f32.xlu1 %v6206_v42  ;;  %6858 = vadd.xlane.f32.xlu0 %v6857_v54  ;;  %v5170_v19 = vmax.f32 %v4912_v44, 0.0  ;;  %v5168_v59 = vmax.f32 %v4908_v43, 0.0 }
 0x5ca   :  { %v11923_v60 = vadd.f32 %v11763_v49, %v5773_v14 }
 0x5cb   :  { %v6573_v20 = vmul.f32 1.442695, %v6405_v39  ;;  %v5171_v32 = vmax.f32 %v4914_v24, 0.0  ;;  %v5775_v61 = vpop.f32.mrf.mxu0  ;;  %v6106_v4 = vpop.xlane.xlu1 %6105  ;;  %v5298_v39 = vpack.c.bf16 %v5170_v19, %v5168_v59 }
 0x5cc   :  { %v11925_v30 = vpop.eup %7947  ;;  %v6406_v25 = vsub.f32 %v11497_v9, %v6106_v4  ;;  %v6757_v21 = vpop.xlane.xlu0 %6756  ;;  %v6209_v16 = vsel %vm5980_vm1, %v11923_v60, -inf }
 0x5cd   :  { %7957 = vpow2.f32 %v6573_v20  ;;  %v5299_v28 = vpack.c.bf16 %v5171_v32, %v5169_v1  ;;  %v5776_v14 = vpop.f32.mrf.mxu0  ;;  %v6860_v27 = vsel %vm5980_vm1, %v11925_v30, 0.0  ;;  %6210 = vmax.xlane.f32.xlu0 %v6209_v16 }
 0x5ce   :  { %v6575_v44 = vmul.f32 1.442695, %v6406_v25  ;;  %7959 = vrcp.f32 %v6757_v21  ;;  %v11933_v42 = vadd.f32 %v11763_v49, %v5776_v14  ;;  %6861 = vadd.xlane.f32.xlu1 %v6860_v27 }
 0x5cf   :  { %v5778_v9 = vpop.f32.mrf.mxu0  ;;  %v6760_v24 = vpop.xlane.xlu1 %6759  ;;  %5971 = vmatprep.mubr.bf16.mxu0 %v5299_v28 }
 0x5d0   :  { %v11935_v54 = vpop.eup %7949  ;;  %7961 = vpow2.f32 %v6575_v44  ;;  %v6109_v43 = vpop.xlane.xlu0 %6108  ;;  %v6212_v1 = vsel %vm5980_vm1, %v11933_v42, -inf  ;;  %5972 = vmatmul.mubr.bf16.gmra.mxu0 %v5298_v39 }
 0x5d1   :  { %v7952_v20 = vpop.eup %7951  ;;  %7963 = vrcp.f32 %v6760_v24  ;;  %v6407_v32 = vsub.f32 %v11510_v18, %v6109_v43  ;;  %v5781_v61 = vpop.f32.mrf.mxu0  ;;  %v6863_v4 = vsel %vm5980_vm1, %v11935_v54, 0.0 }
 0x5d2   :  { %v7134_v19 = vmul.f32 %v7952_v20, %v11477_v10  ;;  %v11944_v25 = vadd.f32 %v11763_v49, %v5781_v61  ;;  %6213 = vmax.xlane.f32.xlu1 %v6212_v1  ;;  %6864 = vadd.xlane.f32.xlu0 %v6863_v4 }
 0x5d3   :  { %v6577_v21 = vmul.f32 1.442695, %v6407_v32  ;;  %v5783_v16 = vpop.f32.mrf.mxu0  ;;  %v6112_v59 = vpop.xlane.xlu1 %6111 }
 0x5d4   :  { %v11946_v28 = vpop.eup %7953  ;;  %7389 = vst.msk [vmem:[%s13297_s11] sm:$0xff] %vm5980_vm1, %v7134_v19  ;;  %v6408_v18 = vsub.f32 %v11521_v63, %v6112_v59  ;;  %v6763_v14 = vpop.xlane.xlu0 %6762  ;;  %v6215_v10 = vsel %vm5980_vm1, %v11944_v25, -inf }
 0x5d5   :  { %v7956_v27 = vpop.eup %7955  ;;  %7965 = vpow2.f32 %v6577_v21  ;;  %v5784_v44 = vpop.f32.mrf.mxu0  ;;  %v6866_v39 = vsel %vm5980_vm1, %v11946_v28, 0.0 }
 0x5d6   :  { %v7136_v9 = vmul.f32 %v7956_v27, %v11489_v37  ;;  %v6579_v24 = vmul.f32 1.442695, %v6408_v18  ;;  %7967 = vrcp.f32 %v6763_v14  ;;  %v11959_v43 = vadd.f32 %v11763_v49, %v5784_v44  ;;  %6867 = vadd.xlane.f32.xlu1 %v6866_v39  ;;  %6216 = vmax.xlane.f32.xlu0 %v6215_v10 }
 0x5d7   :  { %v5786_v63 = vpop.f32.mrf.mxu0  ;;  %v6766_v1 = vpop.xlane.xlu1 %6765 }
 0x5d8   :  { %7390 = vst.msk [vmem:[%s13297_s11 + $0x8] sm:$0xff] %vm5980_vm1, %v7136_v9  ;;  %7969 = vpow2.f32 %v6579_v24  ;;  %v6115_v20 = vpop.xlane.xlu0 %6114  ;;  %v6218_v32 = vsel %vm5980_vm1, %v11959_v43, -inf }
 0x5d9   :  { %7971 = vrcp.f32 %v6766_v1  ;;  %v6409_v37 = vsub.f32 %v11534_v0, %v6115_v20  ;;  %v5789_v61 = vpop.f32.mrf.mxu0 }
 0x5da   :  { %v11968_v4 = vpop.eup %7957  ;;  %6219 = vmax.xlane.f32.xlu1 %v6218_v32  ;;  %v11971_v16 = vadd.f32 %v11763_v49, %v5789_v61 }
 0x5db   :  { %v7960_v19 = vpop.eup %7959  ;;  %v6581_v21 = vmul.f32 1.442695, %v6409_v37  ;;  %v5791_v59 = vpop.f32.mrf.mxu0  ;;  %v6869_v14 = vsel %vm5980_vm1, %v11968_v4, 0.0 }
 0x5dc   :  { %v6118_v18 = vpop.xlane.xlu1 %6117  ;;  %v7138_v10 = vmul.f32 %v7960_v19, %v11501_v55  ;;  %6870 = vadd.xlane.f32.xlu0 %v6869_v14  ;;  %v6769_v0 = vpop.xlane.xlu0 %6768  ;;  %v6221_v32 = vsel %vm5980_vm1, %v11971_v16, -inf }
 0x5dd   :  { %v6410_v27 = vsub.f32 %v11545_v46, %v6118_v18  ;;  %v11977_v44 = vpop.eup %7961  ;;  %7973 = vpow2.f32 %v6581_v21  ;;  %v5792_v39 = vpop.f32.mrf.mxu0 }
 0x5de   :  { %v7964_v9 = vpop.eup %7963  ;;  %7391 = vst.msk [vmem:[%s13297_s11 + $0x10] sm:$0xff] %vm5980_vm1, %v7138_v10  ;;  %7975 = vrcp.f32 %v6769_v0  ;;  %v11984_v63 = vadd.f32 %v11763_v49, %v5792_v39  ;;  %v6872_v55 = vsel %vm5980_vm1, %v11977_v44, 0.0 }
 0x5df   :  { %v6583_v24 = vmul.f32 1.442695, %v6410_v27  ;;  %v7140_v46 = vmul.f32 %v7964_v9, %v11513_v12  ;;  %v5794_v1 = vpop.f32.mrf.mxu0  ;;  %6873 = vadd.xlane.f32.xlu1 %v6872_v55 }
 0x5e0   :  { %v6772_v20 = vpop.xlane.xlu1 %6771  ;;  %6222 = vmax.xlane.f32.xlu0 %v6221_v32  ;;  %v6121_v37 = vpop.xlane.xlu0 %6120  ;;  %v6224_v12 = vsel %vm5980_vm1, %v11984_v63, -inf }
 0x5e1   :  { %7977 = vpow2.f32 %v6583_v24  ;;  %7392 = vst.msk [vmem:[%s13297_s11 + $0x18] sm:$0xff] %vm5980_vm1, %v7140_v46  ;;  %v6411_v61 = vsub.f32 %v11558_v38, %v6121_v37  ;;  %v5797_v19 = vpop.f32.mrf.mxu0 }
 0x5e2   :  { %7979 = vrcp.f32 %v6772_v20  ;;  %v11996_v21 = vpop.eup %7965  ;;  %v12001_v14 = vadd.f32 %v11763_v49, %v5797_v19 }
 0x5e3   :  { %v7968_v59 = vpop.eup %7967  ;;  %v6585_v18 = vmul.f32 1.442695, %v6411_v61  ;;  %v5799_v10 = vpop.f32.mrf.mxu0  ;;  %6225 = vmax.xlane.f32.xlu1 %v6224_v12  ;;  %v6875_v0 = vsel %vm5980_vm1, %v11996_v21, 0.0 }
 0x5e4   :  { %v6124_v27 = vpop.xlane.xlu1 %6123  ;;  %v7142_v39 = vmul.f32 %v7968_v59, %v11525_v47  ;;  %6876 = vadd.xlane.f32.xlu0 %v6875_v0  ;;  %v6775_v9 = vpop.xlane.xlu0 %6774  ;;  %v6227_v19 = vsel %vm5980_vm1, %v12001_v14, -inf }
 0x5e5   :  { %v6412_v38 = vsub.f32 %v11569_v31, %v6124_v27  ;;  %v12007_v24 = vpop.eup %7969  ;;  %7981 = vpow2.f32 %v6585_v18  ;;  %v5800_v55 = vpop.f32.mrf.mxu0  ;;  %v13476_v31 = vld [vmem:[#allocation3_spill] sm:$0xff] }
 0x5e6   :  { %v7972_v46 = vpop.eup %7971  ;;  %7393 = vst.msk [vmem:[%s13297_s11 + $0x20] sm:$0xff] %vm5980_vm1, %v7142_v39  ;;  %7983 = vrcp.f32 %v6775_v9  ;;  %v12014_v20 = vadd.f32 %v11763_v49, %v5800_v55  ;;  %v6878_v47 = vsel %vm5980_vm1, %v12007_v24, 0.0 }
 0x5e7   :  { %v6587_v1 = vmul.f32 1.442695, %v6412_v38  ;;  %v7144_v32 = vmul.f32 %v7972_v46, %v13476_v31  ;;  %v5802_v37 = vpop.f32.mrf.mxu0  ;;  %6879 = vadd.xlane.f32.xlu1 %v6878_v47 }
 0x5e8   :  { %v6778_v61 = vpop.xlane.xlu1 %6777  ;;  %6228 = vmax.xlane.f32.xlu0 %v6227_v19  ;;  %v6127_v12 = vpop.xlane.xlu0 %6126  ;;  %v6230_v27 = vsel %vm5980_vm1, %v12014_v20, -inf }
 0x5e9   :  { %7985 = vpow2.f32 %v6587_v1  ;;  %7394 = vst.msk [vmem:[%s13297_s11 + $0x28] sm:$0xff] %vm5980_vm1, %v7144_v32  ;;  %v6413_v59 = vsub.f32 %v11582_v56, %v6127_v12  ;;  %v5805_v18 = vpop.f32.mrf.mxu0  ;;  %v13477_v1 = vld [vmem:[#allocation2_spill] sm:$0xff] }
 0x5ea   :  { %7987 = vrcp.f32 %v6778_v61  ;;  %v12026_v10 = vpop.eup %7973  ;;  %v12031_v38 = vadd.f32 %v11763_v49, %v5805_v18 }
 0x5eb   :  { %v7976_v0 = vpop.eup %7975  ;;  %v6589_v39 = vmul.f32 1.442695, %v6413_v59  ;;  %v5807_v9 = vpop.f32.mrf.mxu0  ;;  %6231 = vmax.xlane.f32.xlu1 %v6230_v27  ;;  %v6881_v46 = vsel %vm5980_vm1, %v12026_v10, 0.0  ;;  %v13478_v59 = vld [vmem:[#allocation5_spill] sm:$0xff] }
 0x5ec   :  { %v6130_v55 = vpop.xlane.xlu1 %6129  ;;  %v7146_v47 = vmul.f32 %v7976_v0, %v13477_v1  ;;  %6882 = vadd.xlane.f32.xlu0 %v6881_v46  ;;  %v6781_v31 = vpop.xlane.xlu0 %6780 }
 0x5ed   :  { %v6414_v56 = vsub.f32 %v11593_v53, %v6130_v55  ;;  %7989 = vpow2.f32 %v6589_v39  ;;  %v5808_v37 = vpop.f32.mrf.mxu0  ;;  %v6233_v39 = vsel %vm5980_vm1, %v12031_v38, -inf }
 0x5ee   :  { %v12037_v32 = vpop.eup %7977  ;;  %7395 = vst.msk [vmem:[%s13297_s11 + $0x30] sm:$0xff] %vm5980_vm1, %v7146_v47  ;;  %7991 = vrcp.f32 %v6781_v31  ;;  %v12044_v12 = vadd.f32 %v11763_v49, %v5808_v37 }
 0x5ef   :  { %v7980_v61 = vpop.eup %7979  ;;  %v6591_v19 = vmul.f32 1.442695, %v6414_v56  ;;  %v6884_v53 = vsel %vm5980_vm1, %v12037_v32, 0.0  ;;  %v5810_v27 = vpop.f32.mrf.mxu0 }
 0x5f0   :  { %v7148_v18 = vmul.f32 %v7980_v61, %v13478_v59  ;;  %6885 = vadd.xlane.f32.xlu1 %v6884_v53  ;;  %v6784_v0 = vpop.xlane.xlu1 %6783  ;;  %6234 = vmax.xlane.f32.xlu0 %v6233_v39  ;;  %v6133_v9 = vpop.xlane.xlu0 %6132  ;;  %v6236_v47 = vsel %vm5980_vm1, %v12044_v12, -inf  ;;  %v13479_v59 = vld [vmem:[#allocation4_spill] sm:$0xff] }
 0x5f1   :  { %7993 = vpow2.f32 %v6591_v19  ;;  %v6415_v55 = vsub.f32 %v11606_v17, %v6133_v9  ;;  %v5813_v46 = vpop.f32.mrf.mxu0 }
 0x5f2   :  { %7396 = vst.msk [vmem:[%s13297_s11 + $0x38] sm:$0xff] %vm5980_vm1, %v7148_v18  ;;  %7995 = vrcp.f32 %v6784_v0  ;;  %v12056_v1 = vpop.eup %7981  ;;  %v12061_v37 = vadd.f32 %v11763_v49, %v5813_v46 }
 0x5f3   :  { %v7984_v56 = vpop.eup %7983  ;;  %v6593_v31 = vmul.f32 1.442695, %v6415_v55  ;;  %v5815_v61 = vpop.f32.mrf.mxu0  ;;  %v6887_v53 = vsel %vm5980_vm1, %v12056_v1, 0.0 }
 0x5f4   :  { %6237 = vmax.xlane.f32.xlu1 %v6236_v47  ;;  %v6136_v19 = vpop.xlane.xlu1 %6135  ;;  %v7150_v18 = vmul.f32 %v7984_v56, %v13479_v59  ;;  %6888 = vadd.xlane.f32.xlu0 %v6887_v53  ;;  %v6787_v27 = vpop.xlane.xlu0 %6786  ;;  %v13481_v47 = vld [vmem:[#allocation7_spill] sm:$0xff] }
 0x5f5   :  { %v6416_v17 = vsub.f32 %v11617_v7, %v6136_v19  ;;  %7997 = vpow2.f32 %v6593_v31  ;;  %v5816_v39 = vpop.f32.mrf.mxu0  ;;  %v6239_v19 = vsel %vm5980_vm1, %v12061_v37, -inf }
 0x5f6   :  { %v12067_v0 = vpop.eup %7985  ;;  %7397 = vst.msk [vmem:[%s13297_s11 + $0x40] sm:$0xff] %vm5980_vm1, %v7150_v18  ;;  %7999 = vrcp.f32 %v6787_v27  ;;  %v12074_v46 = vadd.f32 %v11763_v49, %v5816_v39 }
 0x5f7   :  { %13480 = vst [vmem:[#allocation33_spill] sm:$0xff] %v12067_v0  ;;  %v7988_v9 = vpop.eup %7987  ;;  %v6595_v55 = vmul.f32 1.442695, %v6416_v17  ;;  %v6890_v7 = vsel %vm5980_vm1, %v12067_v0, 0.0  ;;  %v5818_v61 = vpop.f32.mrf.mxu0 }
 0x5f8   :  { %v7152_v56 = vmul.f32 %v7988_v9, %v13481_v47  ;;  %6891 = vadd.xlane.f32.xlu1 %v6890_v7  ;;  %v6790_v31 = vpop.xlane.xlu1 %6789  ;;  %6240 = vmax.xlane.f32.xlu0 %v6239_v19  ;;  %v6139_v53 = vpop.xlane.xlu0 %6138  ;;  %v6242_v27 = vsel %vm5980_vm1, %v12074_v46, -inf  ;;  %v13483_v61 = vld [vmem:[#allocation6_spill] sm:$0xff] }
 0x5f9   :  { %8001 = vpow2.f32 %v6595_v55  ;;  %v6417_v59 = vsub.f32 %v11630_v5, %v6139_v53  ;;  %v5821_v18 = vpop.f32.mrf.mxu0 }
 0x5fa   :  { %7398 = vst.msk [vmem:[%s13297_s11 + $0x48] sm:$0xff] %vm5980_vm1, %v7152_v56  ;;  %8003 = vrcp.f32 %v6790_v31  ;;  %v12086_v17 = vpop.eup %7989  ;;  %v12091_v55 = vadd.f32 %v11763_v49, %v5821_v18 }
 0x5fb   :  { %13482 = vst [vmem:[#allocation32_spill] sm:$0xff] %v12086_v17  ;;  %v7992_v39 = vpop.eup %7991  ;;  %v6597_v9 = vmul.f32 1.442695, %v6417_v59  ;;  %v5823_v7 = vpop.f32.mrf.mxu0  ;;  %v6893_v56 = vsel %vm5980_vm1, %v12086_v17, 0.0 }
 0x5fc   :  { %6243 = vmax.xlane.f32.xlu1 %v6242_v27  ;;  %v6142_v47 = vpop.xlane.xlu1 %6141  ;;  %v7154_v31 = vmul.f32 %v7992_v39, %v13483_v61  ;;  %6894 = vadd.xlane.f32.xlu0 %v6893_v56  ;;  %v6793_v19 = vpop.xlane.xlu0 %6792  ;;  %v13485_v39 = vld [vmem:[#allocation9_spill] sm:$0xff]  ;;  %v6245_v56 = vsel %vm5980_vm1, %v12091_v55, -inf }
 0x5fd   :  { %v6418_v5 = vsub.f32 %v11641_v6, %v6142_v47  ;;  %8005 = vpow2.f32 %v6597_v9  ;;  %v5824_v0 = vpop.f32.mrf.mxu0 }
 0x5fe   :  { %v12097_v53 = vpop.eup %7993  ;;  %7399 = vst.msk [vmem:[%s13297_s11 + $0x50] sm:$0xff] %vm5980_vm1, %v7154_v31  ;;  %8007 = vrcp.f32 %v6793_v19  ;;  %v12104_v27 = vadd.f32 %v11763_v49, %v5824_v0 }
 0x5ff   :  { %13484 = vst [vmem:[#allocation35_spill] sm:$0xff] %v12097_v53  ;;  %v7996_v59 = vpop.eup %7995  ;;  %v6599_v18 = vmul.f32 1.442695, %v6418_v5  ;;  %v6896_v6 = vsel %vm5980_vm1, %v12097_v53, 0.0  ;;  %v5826_v47 = vpop.f32.mrf.mxu0 }
 0x600   :  { %v7156_v7 = vmul.f32 %v7996_v59, %v13485_v39  ;;  %6897 = vadd.xlane.f32.xlu1 %v6896_v6  ;;  %v6796_v9 = vpop.xlane.xlu1 %6795  ;;  %6246 = vmax.xlane.f32.xlu0 %v6245_v56  ;;  %v6145_v61 = vpop.xlane.xlu0 %6144  ;;  %v6248_v19 = vsel %vm5980_vm1, %v12104_v27, -inf }
 0x601   :  { %8009 = vpow2.f32 %v6599_v18  ;;  %v6419_v0 = vsub.f32 %v11654_v36, %v6145_v61  ;;  %v5829_v31 = vpop.f32.mrf.mxu0 }
 0x602   :  { %7400 = vst.msk [vmem:[%s13297_s11 + $0x58] sm:$0xff] %vm5980_vm1, %v7156_v7  ;;  %8011 = vrcp.f32 %v6796_v9  ;;  %v12116_v5 = vpop.eup %7997  ;;  %v12121_v18 = vadd.f32 %v11763_v49, %v5829_v31  ;;  %v13487_v9 = vld [vmem:[#allocation8_spill] sm:$0xff]  ;;  %v12136_v31 = vld [vmem:[%s13296_s10] ss:$0 sm:$0xff] }
 0x603   :  { %13486 = vst [vmem:[#allocation34_spill] sm:$0xff] %v12116_v5  ;;  %v8000_v59 = vpop.eup %7999  ;;  %v6601_v6 = vmul.f32 1.442695, %v6419_v0  ;;  %v5831_v39 = vpop.f32.mrf.mxu0  ;;  %v6899_v7 = vsel %vm5980_vm1, %v12116_v5, 0.0 }
 0x604   :  { %6249 = vmax.xlane.f32.xlu1 %v6248_v19  ;;  %v6148_v47 = vpop.xlane.xlu1 %6147  ;;  %v7158_v56 = vmul.f32 %v8000_v59, %v13487_v9  ;;  %6900 = vadd.xlane.f32.xlu0 %v6899_v7  ;;  %v6799_v61 = vpop.xlane.xlu0 %6798  ;;  %v13489_v59 = vld [vmem:[#allocation11_spill] sm:$0xff]  ;;  %v6251_v7 = vsel %vm5980_vm1, %v12121_v18, -inf }
 0x605   :  { %v6420_v36 = vsub.f32 %v11665_v29, %v6148_v47  ;;  %8013 = vpow2.f32 %v6601_v6  ;;  %v5832_v17 = vpop.f32.mrf.mxu0 }
 0x606   :  { %v12127_v53 = vpop.eup %8001  ;;  %7401 = vst.msk [vmem:[%s13297_s11 + $0x60] sm:$0xff] %vm5980_vm1, %v7158_v56  ;;  %8015 = vrcp.f32 %v6799_v61  ;;  %v12139_v29 = vadd.f32 %v12136_v31, %v5832_v17 }
 0x607   :  { %13488 = vst [vmem:[#allocation36_spill] sm:$0xff] %v12127_v53  ;;  %v8004_v0 = vpop.eup %8003  ;;  %v6603_v49 = vmul.f32 1.442695, %v6420_v36  ;;  %v6902_v19 = vsel %vm5980_vm1, %v12127_v53, 0.0  ;;  %v5834_v39 = vpop.f32.mrf.mxu0 }
 0x608   :  { %v7160_v6 = vmul.f32 %v8004_v0, %v13489_v59  ;;  %6903 = vadd.xlane.f32.xlu1 %v6902_v19  ;;  %v6802_v47 = vpop.xlane.xlu1 %6801  ;;  %6252 = vmax.xlane.f32.xlu0 %v6251_v7  ;;  %v6151_v9 = vpop.xlane.xlu0 %6150  ;;  %v6254_v61 = vsel %vm5980_vm1, %v12139_v29, -inf }
 0x609   :  { %8017 = vpow2.f32 %v6603_v49  ;;  %v6421_v17 = vsub.f32 %v11678_v58, %v6151_v9  ;;  %v5837_v56 = vpop.f32.mrf.mxu0 }
 0x60a   :  { %7402 = vst.msk [vmem:[%s13297_s11 + $0x68] sm:$0xff] %vm5980_vm1, %v7160_v6  ;;  %8019 = vrcp.f32 %v6802_v47  ;;  %v12151_v36 = vpop.eup %8005  ;;  %v12156_v49 = vadd.f32 %v12136_v31, %v5837_v56  ;;  %v13491_v47 = vld [vmem:[#allocation10_spill] sm:$0xff] }
 0x60b   :  { %13490 = vst [vmem:[#allocation38_spill] sm:$0xff] %v12151_v36  ;;  %v8008_v0 = vpop.eup %8007  ;;  %v6605_v19 = vmul.f32 1.442695, %v6421_v17  ;;  %v5839_v59 = vpop.f32.mrf.mxu0  ;;  %v6905_v6 = vsel %vm5980_vm1, %v12151_v36, 0.0 }
 0x60c   :  { %6255 = vmax.xlane.f32.xlu1 %v6254_v61  ;;  %v6154_v39 = vpop.xlane.xlu1 %6153  ;;  %v7162_v7 = vmul.f32 %v8008_v0, %v13491_v47  ;;  %6906 = vadd.xlane.f32.xlu0 %v6905_v6  ;;  %v6805_v9 = vpop.xlane.xlu0 %6804  ;;  %v13493_v0 = vld [vmem:[#allocation13_spill] sm:$0xff]  ;;  %v6257_v6 = vsel %vm5980_vm1, %v12156_v49, -inf }
 0x60d   :  { %v6422_v58 = vsub.f32 %v11689_v11, %v6154_v39  ;;  %8021 = vpow2.f32 %v6605_v19  ;;  %v5840_v5 = vpop.f32.mrf.mxu0 }
 0x60e   :  { %v12162_v53 = vpop.eup %8009  ;;  %7403 = vst.msk [vmem:[%s13297_s11 + $0x70] sm:$0xff] %vm5980_vm1, %v7162_v7  ;;  %8023 = vrcp.f32 %v6805_v9  ;;  %v12169_v61 = vadd.f32 %v12136_v31, %v5840_v5 }
 0x60f   :  { %13492 = vst [vmem:[#allocation37_spill] sm:$0xff] %v12162_v53  ;;  %v8012_v17 = vpop.eup %8011  ;;  %v6607_v56 = vmul.f32 1.442695, %v6422_v58  ;;  %v6908_v11 = vsel %vm5980_vm1, %v12162_v53, 0.0  ;;  %v5842_v39 = vpop.f32.mrf.mxu0 }
 0x610   :  { %v7164_v59 = vmul.f32 %v8012_v17, %v13493_v0  ;;  %6909 = vadd.xlane.f32.xlu1 %v6908_v11  ;;  %v6808_v19 = vpop.xlane.xlu1 %6807  ;;  %6258 = vmax.xlane.f32.xlu0 %v6257_v6  ;;  %v6157_v47 = vpop.xlane.xlu0 %6156  ;;  %v6260_v9 = vsel %vm5980_vm1, %v12169_v61, -inf }
 0x611   :  { %8025 = vpow2.f32 %v6607_v56  ;;  %v6423_v5 = vsub.f32 %v11702_v23, %v6157_v47  ;;  %v5845_v7 = vpop.f32.mrf.mxu0 }
 0x612   :  { %7404 = vst.msk [vmem:[%s13297_s11 + $0x78] sm:$0xff] %vm5980_vm1, %v7164_v59  ;;  %8027 = vrcp.f32 %v6808_v19  ;;  %v12181_v58 = vpop.eup %8013  ;;  %v12186_v56 = vadd.f32 %v12136_v31, %v5845_v7  ;;  %v13495_v19 = vld [vmem:[#allocation12_spill] sm:$0xff] }
 0x613   :  { %13494 = vst [vmem:[#allocation40_spill] sm:$0xff] %v12181_v58  ;;  %v8016_v17 = vpop.eup %8015  ;;  %v6609_v11 = vmul.f32 1.442695, %v6423_v5  ;;  %v5847_v0 = vpop.f32.mrf.mxu0  ;;  %v6911_v59 = vsel %vm5980_vm1, %v12181_v58, 0.0 }
 0x614   :  { %6261 = vmax.xlane.f32.xlu1 %v6260_v9  ;;  %v6160_v39 = vpop.xlane.xlu1 %6159  ;;  %v7166_v6 = vmul.f32 %v8016_v17, %v13495_v19  ;;  %6912 = vadd.xlane.f32.xlu0 %v6911_v59  ;;  %v6811_v47 = vpop.xlane.xlu0 %6810  ;;  %v13497_v17 = vld [vmem:[#allocation15_spill] sm:$0xff]  ;;  %v6263_v59 = vsel %vm5980_vm1, %v12186_v56, -inf }
 0x615   :  { %v6424_v23 = vsub.f32 %v11713_v3, %v6160_v39  ;;  %8029 = vpow2.f32 %v6609_v11  ;;  %v5848_v36 = vpop.f32.mrf.mxu0 }
 0x616   :  { %v12192_v53 = vpop.eup %8017  ;;  %7405 = vst.msk [vmem:[%s13297_s11 + $0x80] sm:$0xff] %vm5980_vm1, %v7166_v6  ;;  %8031 = vrcp.f32 %v6811_v47  ;;  %v12199_v9 = vadd.f32 %v12136_v31, %v5848_v36 }
 0x617   :  { %13496 = vst [vmem:[#allocation39_spill] sm:$0xff] %v12192_v53  ;;  %v8020_v5 = vpop.eup %8019  ;;  %v6611_v7 = vmul.f32 1.442695, %v6424_v23  ;;  %v6914_v3 = vsel %vm5980_vm1, %v12192_v53, 0.0  ;;  %v5850_v39 = vpop.f32.mrf.mxu0 }
 0x618   :  { %v7168_v0 = vmul.f32 %v8020_v5, %v13497_v17  ;;  %6915 = vadd.xlane.f32.xlu1 %v6914_v3  ;;  %v6814_v11 = vpop.xlane.xlu1 %6813  ;;  %6264 = vmax.xlane.f32.xlu0 %v6263_v59  ;;  %v6163_v19 = vpop.xlane.xlu0 %6162  ;;  %v6266_v47 = vsel %vm5980_vm1, %v12199_v9, -inf }
 0x619   :  { %8033 = vpow2.f32 %v6611_v7  ;;  %v6425_v36 = vsub.f32 %v11726_v8, %v6163_v19  ;;  %v5853_v6 = vpop.f32.mrf.mxu0 }
 0x61a   :  { %7406 = vst.msk [vmem:[%s13297_s11 + $0x88] sm:$0xff] %vm5980_vm1, %v7168_v0  ;;  %8035 = vrcp.f32 %v6814_v11  ;;  %v12211_v23 = vpop.eup %8021  ;;  %v12216_v7 = vadd.f32 %v12136_v31, %v5853_v6  ;;  %v13499_v11 = vld [vmem:[#allocation14_spill] sm:$0xff] }
 0x61b   :  { %13498 = vst [vmem:[#allocation41_spill] sm:$0xff] %v12211_v23  ;;  %v8024_v5 = vpop.eup %8023  ;;  %v6613_v3 = vmul.f32 1.442695, %v6425_v36  ;;  %v5855_v17 = vpop.f32.mrf.mxu0  ;;  %v6917_v0 = vsel %vm5980_vm1, %v12211_v23, 0.0 }
 0x61c   :  { %6267 = vmax.xlane.f32.xlu1 %v6266_v47  ;;  %v6166_v39 = vpop.xlane.xlu1 %6165  ;;  %v7170_v59 = vmul.f32 %v8024_v5, %v13499_v11  ;;  %6918 = vadd.xlane.f32.xlu0 %v6917_v0  ;;  %v6817_v19 = vpop.xlane.xlu0 %6816  ;;  %v13501_v5 = vld [vmem:[#allocation17_spill] sm:$0xff]  ;;  %v6269_v0 = vsel %vm5980_vm1, %v12216_v7, -inf }
 0x61d   :  { %v6426_v8 = vsub.f32 %v11737_v26, %v6166_v39  ;;  %8037 = vpow2.f32 %v6613_v3  ;;  %v5856_v58 = vpop.f32.mrf.mxu0 }
 0x61e   :  { %v12222_v53 = vpop.eup %8025  ;;  %7407 = vst.msk [vmem:[%s13297_s11 + $0x90] sm:$0xff] %vm5980_vm1, %v7170_v59  ;;  %8039 = vrcp.f32 %v6817_v19  ;;  %v12229_v47 = vadd.f32 %v12136_v31, %v5856_v58 }
 0x61f   :  { %13500 = vst [vmem:[#allocation43_spill] sm:$0xff] %v12222_v53  ;;  %v8028_v36 = vpop.eup %8027  ;;  %v6615_v6 = vmul.f32 1.442695, %v6426_v8  ;;  %v6920_v26 = vsel %vm5980_vm1, %v12222_v53, 0.0  ;;  %v5858_v39 = vpop.f32.mrf.mxu0 }
 0x620   :  { %v7172_v17 = vmul.f32 %v8028_v36, %v13501_v5  ;;  %6921 = vadd.xlane.f32.xlu1 %v6920_v26  ;;  %v6820_v3 = vpop.xlane.xlu1 %6819  ;;  %6270 = vmax.xlane.f32.xlu0 %v6269_v0  ;;  %v6169_v11 = vpop.xlane.xlu0 %6168  ;;  %v6272_v19 = vsel %vm5980_vm1, %v12229_v47, -inf }
 0x621   :  { %8041 = vpow2.f32 %v6615_v6  ;;  %v6427_v58 = vsub.f32 %v11750_v34, %v6169_v11  ;;  %v5861_v59 = vpop.f32.mrf.mxu0 }
 0x622   :  { %7408 = vst.msk [vmem:[%s13297_s11 + $0x98] sm:$0xff] %vm5980_vm1, %v7172_v17  ;;  %8043 = vrcp.f32 %v6820_v3  ;;  %v12241_v8 = vpop.eup %8029  ;;  %v12246_v6 = vadd.f32 %v12136_v31, %v5861_v59  ;;  %v13503_v3 = vld [vmem:[#allocation16_spill] sm:$0xff] }
 0x623   :  { %13502 = vst [vmem:[#allocation42_spill] sm:$0xff] %v12241_v8  ;;  %v8032_v36 = vpop.eup %8031  ;;  %v6617_v26 = vmul.f32 1.442695, %v6427_v58  ;;  %v5863_v5 = vpop.f32.mrf.mxu0  ;;  %v6923_v17 = vsel %vm5980_vm1, %v12241_v8, 0.0 }
 0x624   :  { %6273 = vmax.xlane.f32.xlu1 %v6272_v19  ;;  %v6172_v39 = vpop.xlane.xlu1 %6171  ;;  %v7174_v0 = vmul.f32 %v8032_v36, %v13503_v3  ;;  %6924 = vadd.xlane.f32.xlu0 %v6923_v17  ;;  %v6823_v11 = vpop.xlane.xlu0 %6822  ;;  %v13505_v36 = vld [vmem:[#allocation19_spill] sm:$0xff]  ;;  %v6275_v17 = vsel %vm5980_vm1, %v12246_v6, -inf }
 0x625   :  { %v6428_v34 = vsub.f32 %v11766_v15, %v6172_v39  ;;  %8045 = vpow2.f32 %v6617_v26  ;;  %v5864_v23 = vpop.f32.mrf.mxu0 }
 0x626   :  { %v12252_v53 = vpop.eup %8033  ;;  %7409 = vst.msk [vmem:[%s13297_s11 + $0xa0] sm:$0xff] %vm5980_vm1, %v7174_v0  ;;  %8047 = vrcp.f32 %v6823_v11  ;;  %v12259_v19 = vadd.f32 %v12136_v31, %v5864_v23 }
 0x627   :  { %13504 = vst [vmem:[#allocation3_spill] sm:$0xff] %v12252_v53  ;;  %v8036_v58 = vpop.eup %8035  ;;  %v6619_v59 = vmul.f32 1.442695, %v6428_v34  ;;  %v6926_v15 = vsel %vm5980_vm1, %v12252_v53, 0.0  ;;  %v5866_v39 = vpop.f32.mrf.mxu0 }
 0x628   :  { %v7176_v5 = vmul.f32 %v8036_v58, %v13505_v36  ;;  %6927 = vadd.xlane.f32.xlu1 %v6926_v15  ;;  %v6826_v26 = vpop.xlane.xlu1 %6825  ;;  %6276 = vmax.xlane.f32.xlu0 %v6275_v17  ;;  %v6175_v3 = vpop.xlane.xlu0 %6174  ;;  %v6278_v11 = vsel %vm5980_vm1, %v12259_v19, -inf }
 0x629   :  { %8049 = vpow2.f32 %v6619_v59  ;;  %v6429_v23 = vsub.f32 %v11779_v22, %v6175_v3  ;;  %v5869_v0 = vpop.f32.mrf.mxu0 }
 0x62a   :  { %7410 = vst.msk [vmem:[%s13297_s11 + $0xa8] sm:$0xff] %vm5980_vm1, %v7176_v5  ;;  %8051 = vrcp.f32 %v6826_v26  ;;  %v12271_v34 = vpop.eup %8037  ;;  %v12276_v59 = vadd.f32 %v12136_v31, %v5869_v0  ;;  %v13507_v26 = vld [vmem:[#allocation18_spill] sm:$0xff] }
 0x62b   :  { %13506 = vst [vmem:[#allocation2_spill] sm:$0xff] %v12271_v34  ;;  %v8040_v58 = vpop.eup %8039  ;;  %v6621_v15 = vmul.f32 1.442695, %v6429_v23  ;;  %v5871_v36 = vpop.f32.mrf.mxu0  ;;  %v6929_v5 = vsel %vm5980_vm1, %v12271_v34, 0.0 }
 0x62c   :  { %6279 = vmax.xlane.f32.xlu1 %v6278_v11  ;;  %v6178_v39 = vpop.xlane.xlu1 %6177  ;;  %v7178_v17 = vmul.f32 %v8040_v58, %v13507_v26  ;;  %6930 = vadd.xlane.f32.xlu0 %v6929_v5  ;;  %v6829_v3 = vpop.xlane.xlu0 %6828  ;;  %v13509_v58 = vld [vmem:[#allocation21_spill] sm:$0xff]  ;;  %v6281_v5 = vsel %vm5980_vm1, %v12276_v59, -inf }
 0x62d   :  { %v6430_v22 = vsub.f32 %v11790_v2, %v6178_v39  ;;  %8053 = vpow2.f32 %v6621_v15  ;;  %v5872_v8 = vpop.f32.mrf.mxu0 }
 0x62e   :  { %v12282_v53 = vpop.eup %8041  ;;  %7411 = vst.msk [vmem:[%s13297_s11 + $0xb0] sm:$0xff] %vm5980_vm1, %v7178_v17  ;;  %8055 = vrcp.f32 %v6829_v3  ;;  %v12289_v11 = vadd.f32 %v12136_v31, %v5872_v8 }
 0x62f   :  { %13508 = vst [vmem:[#allocation5_spill] sm:$0xff] %v12282_v53  ;;  %v8044_v23 = vpop.eup %8043  ;;  %v6623_v0 = vmul.f32 1.442695, %v6430_v22  ;;  %v6932_v2 = vsel %vm5980_vm1, %v12282_v53, 0.0  ;;  %v5874_v39 = vpop.f32.mrf.mxu0 }
 0x630   :  { %v7180_v36 = vmul.f32 %v8044_v23, %v13509_v58  ;;  %6933 = vadd.xlane.f32.xlu1 %v6932_v2  ;;  %v6832_v15 = vpop.xlane.xlu1 %6831  ;;  %6282 = vmax.xlane.f32.xlu0 %v6281_v5  ;;  %v6181_v26 = vpop.xlane.xlu0 %6180  ;;  %v6284_v3 = vsel %vm5980_vm1, %v12289_v11, -inf }
 0x631   :  { %8057 = vpow2.f32 %v6623_v0  ;;  %v6431_v8 = vsub.f32 %v11803_v33, %v6181_v26  ;;  %v5877_v17 = vpop.f32.mrf.mxu0 }
 0x632   :  { %7412 = vst.msk [vmem:[%s13297_s11 + $0xb8] sm:$0xff] %vm5980_vm1, %v7180_v36  ;;  %8059 = vrcp.f32 %v6832_v15  ;;  %v12301_v22 = vpop.eup %8045  ;;  %v12306_v0 = vadd.f32 %v12136_v31, %v5877_v17  ;;  %v13511_v15 = vld [vmem:[#allocation20_spill] sm:$0xff] }
 0x633   :  { %13510 = vst [vmem:[#allocation4_spill] sm:$0xff] %v12301_v22  ;;  %v8048_v23 = vpop.eup %8047  ;;  %v6625_v2 = vmul.f32 1.442695, %v6431_v8  ;;  %v5879_v58 = vpop.f32.mrf.mxu0  ;;  %v6935_v36 = vsel %vm5980_vm1, %v12301_v22, 0.0 }
 0x634   :  { %6285 = vmax.xlane.f32.xlu1 %v6284_v3  ;;  %v6184_v39 = vpop.xlane.xlu1 %6183  ;;  %v7182_v5 = vmul.f32 %v8048_v23, %v13511_v15  ;;  %6936 = vadd.xlane.f32.xlu0 %v6935_v36  ;;  %v6835_v26 = vpop.xlane.xlu0 %6834  ;;  %v13513_v23 = vld [vmem:[#allocation23_spill] sm:$0xff]  ;;  %v6287_v36 = vsel %vm5980_vm1, %v12306_v0, -inf }
 0x635   :  { %v6432_v33 = vsub.f32 %v11814_v41, %v6184_v39  ;;  %8061 = vpow2.f32 %v6625_v2  ;;  %v5880_v34 = vpop.f32.mrf.mxu0 }
 0x636   :  { %v12312_v53 = vpop.eup %8049  ;;  %7413 = vst.msk [vmem:[%s13297_s11 + $0xc0] sm:$0xff] %vm5980_vm1, %v7182_v5  ;;  %8063 = vrcp.f32 %v6835_v26  ;;  %v12319_v3 = vadd.f32 %v12136_v31, %v5880_v34 }
 0x637   :  { %13512 = vst [vmem:[#allocation7_spill] sm:$0xff] %v12312_v53  ;;  %v8052_v8 = vpop.eup %8051  ;;  %v6627_v17 = vmul.f32 1.442695, %v6432_v33  ;;  %v6938_v41 = vsel %vm5980_vm1, %v12312_v53, 0.0  ;;  %v5882_v39 = vpop.f32.mrf.mxu0 }
 0x638   :  { %v7184_v58 = vmul.f32 %v8052_v8, %v13513_v23  ;;  %6939 = vadd.xlane.f32.xlu1 %v6938_v41  ;;  %v6838_v2 = vpop.xlane.xlu1 %6837  ;;  %6288 = vmax.xlane.f32.xlu0 %v6287_v36  ;;  %v6187_v15 = vpop.xlane.xlu0 %6186  ;;  %v6290_v26 = vsel %vm5980_vm1, %v12319_v3, -inf }
 0x639   :  { %8065 = vpow2.f32 %v6627_v17  ;;  %v6433_v34 = vsub.f32 %v11827_v57, %v6187_v15  ;;  %v5885_v5 = vpop.f32.mrf.mxu0 }
 0x63a   :  { %7414 = vst.msk [vmem:[%s13297_s11 + $0xc8] sm:$0xff] %vm5980_vm1, %v7184_v58  ;;  %8067 = vrcp.f32 %v6838_v2  ;;  %v12331_v33 = vpop.eup %8053  ;;  %v12336_v17 = vadd.f32 %v12136_v31, %v5885_v5  ;;  %v13515_v2 = vld [vmem:[#allocation22_spill] sm:$0xff] }
 0x63b   :  { %13514 = vst [vmem:[#allocation6_spill] sm:$0xff] %v12331_v33  ;;  %v8056_v8 = vpop.eup %8055  ;;  %v6629_v41 = vmul.f32 1.442695, %v6433_v34  ;;  %v5887_v23 = vpop.f32.mrf.mxu0  ;;  %v6941_v58 = vsel %vm5980_vm1, %v12331_v33, 0.0 }
 0x63c   :  { %6291 = vmax.xlane.f32.xlu1 %v6290_v26  ;;  %v6190_v39 = vpop.xlane.xlu1 %6189  ;;  %v7186_v36 = vmul.f32 %v8056_v8, %v13515_v2  ;;  %6942 = vadd.xlane.f32.xlu0 %v6941_v58  ;;  %v6841_v15 = vpop.xlane.xlu0 %6840  ;;  %v13517_v8 = vld [vmem:[#allocation25_spill] sm:$0xff]  ;;  %v6293_v58 = vsel %vm5980_vm1, %v12336_v17, -inf }
 0x63d   :  { %v6434_v57 = vsub.f32 %v11838_v35, %v6190_v39  ;;  %8069 = vpow2.f32 %v6629_v41  ;;  %v5888_v22 = vpop.f32.mrf.mxu0 }
 0x63e   :  { %v12342_v53 = vpop.eup %8057  ;;  %7415 = vst.msk [vmem:[%s13297_s11 + $0xd0] sm:$0xff] %vm5980_vm1, %v7186_v36  ;;  %8071 = vrcp.f32 %v6841_v15  ;;  %v12349_v26 = vadd.f32 %v12136_v31, %v5888_v22 }
 0x63f   :  { %13516 = vst [vmem:[#allocation9_spill] sm:$0xff] %v12342_v53  ;;  %v8060_v34 = vpop.eup %8059  ;;  %v6631_v5 = vmul.f32 1.442695, %v6434_v57  ;;  %v6944_v35 = vsel %vm5980_vm1, %v12342_v53, 0.0  ;;  %v5890_v39 = vpop.f32.mrf.mxu0 }
 0x640   :  { %v7188_v23 = vmul.f32 %v8060_v34, %v13517_v8  ;;  %6945 = vadd.xlane.f32.xlu1 %v6944_v35  ;;  %v6844_v41 = vpop.xlane.xlu1 %6843  ;;  %6294 = vmax.xlane.f32.xlu0 %v6293_v58  ;;  %v6193_v2 = vpop.xlane.xlu0 %6192  ;;  %v6296_v15 = vsel %vm5980_vm1, %v12349_v26, -inf }
 0x641   :  { %8073 = vpow2.f32 %v6631_v5  ;;  %v6435_v22 = vsub.f32 %v11851_v13, %v6193_v2  ;;  %v5893_v36 = vpop.f32.mrf.mxu0 }
 0x642   :  { %7416 = vst.msk [vmem:[%s13297_s11 + $0xd8] sm:$0xff] %vm5980_vm1, %v7188_v23  ;;  %8075 = vrcp.f32 %v6844_v41  ;;  %v12361_v57 = vpop.eup %8061  ;;  %v12366_v5 = vadd.f32 %v12136_v31, %v5893_v36  ;;  %v13519_v41 = vld [vmem:[#allocation24_spill] sm:$0xff] }
 0x643   :  { %13518 = vst [vmem:[#allocation8_spill] sm:$0xff] %v12361_v57  ;;  %v8064_v34 = vpop.eup %8063  ;;  %v6633_v35 = vmul.f32 1.442695, %v6435_v22  ;;  %v5895_v8 = vpop.f32.mrf.mxu0  ;;  %v6947_v23 = vsel %vm5980_vm1, %v12361_v57, 0.0 }
 0x644   :  { %6297 = vmax.xlane.f32.xlu1 %v6296_v15  ;;  %v6196_v39 = vpop.xlane.xlu1 %6195  ;;  %v7190_v58 = vmul.f32 %v8064_v34, %v13519_v41  ;;  %6948 = vadd.xlane.f32.xlu0 %v6947_v23  ;;  %v6847_v2 = vpop.xlane.xlu0 %6846  ;;  %v13521_v34 = vld [vmem:[#allocation27_spill] sm:$0xff]  ;;  %v6299_v23 = vsel %vm5980_vm1, %v12366_v5, -inf }
 0x645   :  { %v6436_v13 = vsub.f32 %v11862_v40, %v6196_v39  ;;  %8077 = vpow2.f32 %v6633_v35  ;;  %v5896_v33 = vpop.f32.mrf.mxu0 }
 0x646   :  { %v12372_v53 = vpop.eup %8065  ;;  %7417 = vst.msk [vmem:[%s13297_s11 + $0xe0] sm:$0xff] %vm5980_vm1, %v7190_v58  ;;  %8079 = vrcp.f32 %v6847_v2  ;;  %v12379_v15 = vadd.f32 %v12136_v31, %v5896_v33 }
 0x647   :  { %13520 = vst [vmem:[#allocation11_spill] sm:$0xff] %v12372_v53  ;;  %v8068_v22 = vpop.eup %8067  ;;  %v6635_v36 = vmul.f32 1.442695, %v6436_v13  ;;  %v6950_v40 = vsel %vm5980_vm1, %v12372_v53, 0.0  ;;  %v5898_v39 = vpop.f32.mrf.mxu0 }
 0x648   :  { %v7192_v8 = vmul.f32 %v8068_v22, %v13521_v34  ;;  %6951 = vadd.xlane.f32.xlu1 %v6950_v40  ;;  %v6850_v35 = vpop.xlane.xlu1 %6849  ;;  %6300 = vmax.xlane.f32.xlu0 %v6299_v23  ;;  %v6199_v41 = vpop.xlane.xlu0 %6198  ;;  %v6302_v2 = vsel %vm5980_vm1, %v12379_v15, -inf }
 0x649   :  { %8081 = vpow2.f32 %v6635_v36  ;;  %v6437_v33 = vsub.f32 %v11875_v62, %v6199_v41  ;;  %v5901_v58 = vpop.f32.mrf.mxu0 }
 0x64a   :  { %7418 = vst.msk [vmem:[%s13297_s11 + $0xe8] sm:$0xff] %vm5980_vm1, %v7192_v8  ;;  %8083 = vrcp.f32 %v6850_v35  ;;  %v12391_v13 = vpop.eup %8069  ;;  %v12396_v36 = vadd.f32 %v12136_v31, %v5901_v58  ;;  %v13523_v35 = vld [vmem:[#allocation26_spill] sm:$0xff] }
 0x64b   :  { %13522 = vst [vmem:[#allocation10_spill] sm:$0xff] %v12391_v13  ;;  %v8072_v22 = vpop.eup %8071  ;;  %v6637_v40 = vmul.f32 1.442695, %v6437_v33  ;;  %v5903_v34 = vpop.f32.mrf.mxu0  ;;  %v6953_v8 = vsel %vm5980_vm1, %v12391_v13, 0.0 }
 0x64c   :  { %6303 = vmax.xlane.f32.xlu1 %v6302_v2  ;;  %v6202_v39 = vpop.xlane.xlu1 %6201  ;;  %v7194_v23 = vmul.f32 %v8072_v22, %v13523_v35  ;;  %6954 = vadd.xlane.f32.xlu0 %v6953_v8  ;;  %v6853_v41 = vpop.xlane.xlu0 %6852  ;;  %v13525_v22 = vld [vmem:[#allocation29_spill] sm:$0xff]  ;;  %v6305_v8 = vsel %vm5980_vm1, %v12396_v36, -inf }
 0x64d   :  { %v6438_v62 = vsub.f32 %v11886_v51, %v6202_v39  ;;  %8085 = vpow2.f32 %v6637_v40  ;;  %v5904_v57 = vpop.f32.mrf.mxu0 }
 0x64e   :  { %v12402_v53 = vpop.eup %8073  ;;  %7419 = vst.msk [vmem:[%s13297_s11 + $0xf0] sm:$0xff] %vm5980_vm1, %v7194_v23  ;;  %8087 = vrcp.f32 %v6853_v41  ;;  %v12409_v2 = vadd.f32 %v12136_v31, %v5904_v57 }
 0x64f   :  { %13524 = vst [vmem:[#allocation13_spill] sm:$0xff] %v12402_v53  ;;  %v8076_v33 = vpop.eup %8075  ;;  %v6639_v58 = vmul.f32 1.442695, %v6438_v62  ;;  %v6956_v51 = vsel %vm5980_vm1, %v12402_v53, 0.0  ;;  %v5906_v39 = vpop.f32.mrf.mxu0 }
 0x650   :  { %v7196_v34 = vmul.f32 %v8076_v33, %v13525_v22  ;;  %6957 = vadd.xlane.f32.xlu1 %v6956_v51  ;;  %v6856_v40 = vpop.xlane.xlu1 %6855  ;;  %6306 = vmax.xlane.f32.xlu0 %v6305_v8  ;;  %v6205_v35 = vpop.xlane.xlu0 %6204  ;;  %v6308_v41 = vsel %vm5980_vm1, %v12409_v2, -inf }
 0x651   :  { %8089 = vpow2.f32 %v6639_v58  ;;  %v6439_v57 = vsub.f32 %v11899_v52, %v6205_v35  ;;  %v5909_v23 = vpop.f32.mrf.mxu0 }
 0x652   :  { %7420 = vst.msk [vmem:[%s13297_s11 + $0xf8] sm:$0xff] %vm5980_vm1, %v7196_v34  ;;  %8091 = vrcp.f32 %v6856_v40  ;;  %v12421_v62 = vpop.eup %8077  ;;  %v12426_v58 = vadd.f32 %v12136_v31, %v5909_v23  ;;  %v13527_v40 = vld [vmem:[#allocation28_spill] sm:$0xff] }
 0x653   :  { %13526 = vst [vmem:[#allocation12_spill] sm:$0xff] %v12421_v62  ;;  %v8080_v33 = vpop.eup %8079  ;;  %v6641_v51 = vmul.f32 1.442695, %v6439_v57  ;;  %v5911_v22 = vpop.f32.mrf.mxu0  ;;  %v6959_v34 = vsel %vm5980_vm1, %v12421_v62, 0.0 }
 0x654   :  { %6309 = vmax.xlane.f32.xlu1 %v6308_v41  ;;  %v6208_v39 = vpop.xlane.xlu1 %6207  ;;  %v7198_v8 = vmul.f32 %v8080_v33, %v13527_v40  ;;  %6960 = vadd.xlane.f32.xlu0 %v6959_v34  ;;  %v6859_v35 = vpop.xlane.xlu0 %6858  ;;  %v13529_v33 = vld [vmem:[#allocation31_spill] sm:$0xff]  ;;  %v6311_v34 = vsel %vm5980_vm1, %v12426_v58, -inf }
 0x655   :  { %v6440_v52 = vsub.f32 %v11909_v48, %v6208_v39  ;;  %8093 = vpow2.f32 %v6641_v51  ;;  %v5912_v13 = vpop.f32.mrf.mxu0 }
 0x656   :  { %v12432_v53 = vpop.eup %8081  ;;  %7421 = vst.msk [vmem:[%s13297_s11 + $0x100] sm:$0xff] %vm5980_vm1, %v7198_v8  ;;  %8095 = vrcp.f32 %v6859_v35  ;;  %v12439_v41 = vadd.f32 %v12136_v31, %v5912_v13 }
 0x657   :  { %13528 = vst [vmem:[#allocation15_spill] sm:$0xff] %v12432_v53  ;;  %v8084_v57 = vpop.eup %8083  ;;  %v6643_v23 = vmul.f32 1.442695, %v6440_v52  ;;  %v6962_v48 = vsel %vm5980_vm1, %v12432_v53, 0.0  ;;  %v5914_v39 = vpop.f32.mrf.mxu0 }
 0x658   :  { %v7200_v22 = vmul.f32 %v8084_v57, %v13529_v33  ;;  %6963 = vadd.xlane.f32.xlu1 %v6962_v48  ;;  %v6862_v51 = vpop.xlane.xlu1 %6861  ;;  %6312 = vmax.xlane.f32.xlu0 %v6311_v34  ;;  %v6211_v40 = vpop.xlane.xlu0 %6210  ;;  %v6314_v35 = vsel %vm5980_vm1, %v12439_v41, -inf }
 0x659   :  { %8097 = vpow2.f32 %v6643_v23  ;;  %v6441_v13 = vsub.f32 %v11923_v60, %v6211_v40  ;;  %v5917_v8 = vpop.f32.mrf.mxu0 }
 0x65a   :  { %7422 = vst.msk [vmem:[%s13297_s11 + $0x108] sm:$0xff] %vm5980_vm1, %v7200_v22  ;;  %8099 = vrcp.f32 %v6862_v51  ;;  %v12451_v52 = vpop.eup %8085  ;;  %v12456_v23 = vadd.f32 %v12136_v31, %v5917_v8  ;;  %v13530_v51 = vld [vmem:[#allocation30_spill] sm:$0xff] }
 0x65b   :  { %v8088_v57 = vpop.eup %8087  ;;  %v6645_v48 = vmul.f32 1.442695, %v6441_v13  ;;  %v5919_v33 = vpop.f32.mrf.mxu0  ;;  %v6965_v22 = vsel %vm5980_vm1, %v12451_v52, 0.0 }
 0x65c   :  { %6315 = vmax.xlane.f32.xlu1 %v6314_v35  ;;  %v6214_v39 = vpop.xlane.xlu1 %6213  ;;  %v7202_v34 = vmul.f32 %v8088_v57, %v13530_v51  ;;  %6966 = vadd.xlane.f32.xlu0 %v6965_v22  ;;  %v6865_v40 = vpop.xlane.xlu0 %6864 }
 0x65d   :  { %v6442_v60 = vsub.f32 %v11933_v42, %v6214_v39  ;;  %8101 = vpow2.f32 %v6645_v48  ;;  %v5920_v62 = vpop.f32.mrf.mxu0  ;;  %v6317_v39 = vsel %vm5980_vm1, %v12456_v23, -inf }
 0x65e   :  { %v12462_v53 = vpop.eup %8089  ;;  %7423 = vst.msk [vmem:[%s13297_s11 + $0x110] sm:$0xff] %vm5980_vm1, %v7202_v34  ;;  %8103 = vrcp.f32 %v6865_v40  ;;  %v12469_v35 = vadd.f32 %v12136_v31, %v5920_v62 }
 0x65f   :  { %v8092_v13 = vpop.eup %8091  ;;  %v6647_v8 = vmul.f32 1.442695, %v6442_v60  ;;  %v6968_v42 = vsel %vm5980_vm1, %v12462_v53, 0.0  ;;  %v5922_v33 = vpop.f32.mrf.mxu0 }
 0x660   :  { %v7204_v57 = vmul.f32 %v8092_v13, %v11902_v45  ;;  %6969 = vadd.xlane.f32.xlu1 %v6968_v42  ;;  %v6868_v48 = vpop.xlane.xlu1 %6867  ;;  %6318 = vmax.xlane.f32.xlu0 %v6317_v39  ;;  %v6217_v22 = vpop.xlane.xlu0 %6216  ;;  %v6320_v45 = vsel %vm5980_vm1, %v12469_v35, -inf }
 0x661   :  { %8105 = vpow2.f32 %v6647_v8  ;;  %v6443_v62 = vsub.f32 %v11944_v25, %v6217_v22  ;;  %v5925_v51 = vpop.f32.mrf.mxu0 }
 0x662   :  { %7424 = vst.msk [vmem:[%s13297_s11 + $0x118] sm:$0xff] %vm5980_vm1, %v7204_v57  ;;  %8107 = vrcp.f32 %v6868_v48  ;;  %v12481_v34 = vpop.eup %8093  ;;  %v12486_v13 = vadd.f32 %v12136_v31, %v5925_v51 }
 0x663   :  { %v8096_v60 = vpop.eup %8095  ;;  %v6649_v40 = vmul.f32 1.442695, %v6443_v62  ;;  %v5927_v8 = vpop.f32.mrf.mxu0  ;;  %v6971_v57 = vsel %vm5980_vm1, %v12481_v34, 0.0 }
 0x664   :  { %6321 = vmax.xlane.f32.xlu1 %v6320_v45  ;;  %v6220_v42 = vpop.xlane.xlu1 %6219  ;;  %v7206_v33 = vmul.f32 %v8096_v60, %v11913_v50  ;;  %6972 = vadd.xlane.f32.xlu0 %v6971_v57 }
 0x665   :  { %v6444_v25 = vsub.f32 %v11959_v43, %v6220_v42  ;;  %8109 = vpow2.f32 %v6649_v40  ;;  %v6871_v39 = vpop.xlane.xlu0 %6870  ;;  %v5928_v22 = vpop.f32.mrf.mxu0  ;;  %v6323_v40 = vsel %vm5980_vm1, %v12486_v13, -inf }
 0x666   :  { %v12492_v48 = vpop.eup %8097  ;;  %7425 = vst.msk [vmem:[%s13297_s11 + $0x120] sm:$0xff] %vm5980_vm1, %v7206_v33  ;;  %8111 = vrcp.f32 %v6871_v39  ;;  %v12499_v45 = vadd.f32 %v12136_v31, %v5928_v22 }
 0x667   :  { %13531 = vst [vmem:[#allocation14_spill] sm:$0xff] %v12492_v48  ;;  %v8100_v62 = vpop.eup %8099  ;;  %v6651_v51 = vmul.f32 1.442695, %v6444_v25  ;;  %v6974_v50 = vsel %vm5980_vm1, %v12492_v48, 0.0  ;;  %v5930_v60 = vpop.f32.mrf.mxu0 }
 0x668   :  { %v7208_v43 = vmul.f32 %v8100_v62, %v11925_v30  ;;  %6975 = vadd.xlane.f32.xlu1 %v6974_v50  ;;  %6324 = vmax.xlane.f32.xlu0 %v6323_v40  ;;  %v6874_v8 = vpop.xlane.xlu1 %6873  ;;  %v6326_v25 = vsel %vm5980_vm1, %v12499_v45, -inf }
 0x669   :  { %8113 = vpow2.f32 %v6651_v51  ;;  %v6223_v42 = vpop.xlane.xlu0 %6222  ;;  %v5933_v57 = vpop.f32.mrf.mxu0 }
 0x66a   :  { %7426 = vst.msk [vmem:[%s13297_s11 + $0x128] sm:$0xff] %vm5980_vm1, %v7208_v43  ;;  %8115 = vrcp.f32 %v6874_v8  ;;  %v12510_v33 = vpop.eup %8101  ;;  %v6445_v30 = vsub.f32 %v11971_v16, %v6223_v42  ;;  %v12516_v22 = vadd.f32 %v12136_v31, %v5933_v57 }
 0x66b   :  { %v8104_v39 = vpop.eup %8103  ;;  %v5935_v62 = vpop.f32.mrf.mxu0  ;;  %v6977_v51 = vsel %vm5980_vm1, %v12510_v33, 0.0 }
 0x66c   :  { %6327 = vmax.xlane.f32.xlu1 %v6326_v25  ;;  %v7210_v50 = vmul.f32 %v8104_v39, %v11935_v54  ;;  %v6653_v43 = vmul.f32 1.442695, %v6445_v30  ;;  %6978 = vadd.xlane.f32.xlu0 %v6977_v51  ;;  %v6226_v60 = vpop.xlane.xlu1 %6225  ;;  %v6329_v39 = vsel %vm5980_vm1, %v12516_v22, -inf }
 0x66d   :  { %v6446_v16 = vsub.f32 %v11984_v63, %v6226_v60  ;;  %v6877_v8 = vpop.xlane.xlu0 %6876  ;;  %v5936_v42 = vpop.f32.mrf.mxu0 }
 0x66e   :  { %v12521_v40 = vpop.eup %8105  ;;  %7427 = vst.msk [vmem:[%s13297_s11 + $0x130] sm:$0xff] %vm5980_vm1, %v7210_v50  ;;  %8117 = vpow2.f32 %v6653_v43  ;;  %v12529_v57 = vadd.f32 %v12136_v31, %v5936_v42 }
 0x66f   :  { %13532 = vst [vmem:[#allocation17_spill] sm:$0xff] %v12521_v40  ;;  %v8108_v48 = vpop.eup %8107  ;;  %v6980_v54 = vsel %vm5980_vm1, %v12521_v40, 0.0  ;;  %v6655_v25 = vmul.f32 1.442695, %v6446_v16  ;;  %8119 = vrcp.f32 %v6877_v8  ;;  %v5938_v63 = vpop.f32.mrf.mxu0 }
 0x670   :  { %v7212_v30 = vmul.f32 %v8108_v48, %v11946_v28  ;;  %6981 = vadd.xlane.f32.xlu1 %v6980_v54  ;;  %6330 = vmax.xlane.f32.xlu0 %v6329_v39  ;;  %v6880_v62 = vpop.xlane.xlu1 %6879  ;;  %v6332_v28 = vsel %vm5980_vm1, %v12529_v57, -inf }
 0x671   :  { %8121 = vpow2.f32 %v6655_v25  ;;  %v6229_v51 = vpop.xlane.xlu0 %6228  ;;  %v5941_v50 = vpop.f32.mrf.mxu0 }
 0x672   :  { %7428 = vst.msk [vmem:[%s13297_s11 + $0x138] sm:$0xff] %vm5980_vm1, %v7212_v30  ;;  %v12540_v43 = vpop.eup %8109  ;;  %8123 = vrcp.f32 %v6880_v62  ;;  %v12545_v60 = vadd.f32 %v12136_v31, %v5941_v50  ;;  %v6447_v40 = vsub.f32 %v12001_v14, %v6229_v51 }
 0x673   :  { %13533 = vst [vmem:[#allocation16_spill] sm:$0xff] %v12540_v43  ;;  %v8112_v48 = vpop.eup %8111  ;;  %v5943_v16 = vpop.f32.mrf.mxu0  ;;  %v6983_v8 = vsel %vm5980_vm1, %v12540_v43, 0.0 }
 0x674   :  { %6333 = vmax.xlane.f32.xlu1 %v6332_v28  ;;  %v7214_v42 = vmul.f32 %v8112_v48, %v11968_v4  ;;  %6984 = vadd.xlane.f32.xlu0 %v6983_v8  ;;  %v12550_v54 = vpop.xlane.xlu1 %6231  ;;  %v6335_v48 = vsel %vm5980_vm1, %v12545_v60, -inf }
 0x675   :  { %v6883_v25 = vpop.xlane.xlu0 %6882  ;;  %v5944_v63 = vpop.f32.mrf.mxu0 }
 0x676   :  { %v12552_v30 = vpop.eup %8113  ;;  %7429 = vst.msk [vmem:[%s13297_s11 + $0x140] sm:$0xff] %vm5980_vm1, %v7214_v42  ;;  %v12559_v62 = vadd.f32 %v12136_v31, %v5944_v63  ;;  %8125 = vrcp.f32 %v6883_v25 }
 0x677   :  { %13534 = vst [vmem:[#allocation19_spill] sm:$0xff] %v12552_v30  ;;  %v8116_v39 = vpop.eup %8115  ;;  %v6986_v50 = vsel %vm5980_vm1, %v12552_v30, 0.0  ;;  %v5946_v28 = vpop.f32.mrf.mxu0 }
 0x678   :  { %13535 = vst [vmem:[#allocation18_spill] sm:$0xff] %v12559_v62  ;;  %v7216_v4 = vmul.f32 %v8116_v39, %v11977_v44  ;;  %6987 = vadd.xlane.f32.xlu1 %v6986_v50  ;;  %6336 = vmax.xlane.f32.xlu0 %v6335_v48  ;;  %v6338_v63 = vsel %vm5980_vm1, %v12559_v62, -inf }
 0x679   :  { %v6886_v16 = vpop.xlane.xlu1 %6885  ;;  %v6235_v8 = vpop.xlane.xlu0 %6234 }
 0x67a   :  { %7430 = vst.msk [vmem:[%s13297_s11 + $0x148] sm:$0xff] %vm5980_vm1, %v7216_v4  ;;  %v5949_v42 = vpop.f32.mrf.mxu0  ;;  %8127 = vrcp.f32 %v6886_v16 }
 0x67b   :  { %v12572_v44 = vpop.eup %8117  ;;  %v12575_v50 = vadd.f32 %v12136_v31, %v5949_v42 }
 0x67c   :  { %v5951_v25 = vpop.f32.mrf.mxu0  ;;  %6339 = vmax.xlane.f32.xlu1 %v6338_v63  ;;  %v8120_v39 = vpop.eup %8119  ;;  %v6989_v48 = vsel %vm5980_vm1, %v12572_v44, 0.0 }
 0x67d   :  { %v6238_v28 = vpop.xlane.xlu1 %6237  ;;  %v7218_v4 = vmul.f32 %v8120_v39, %v11996_v21  ;;  %6990 = vadd.xlane.f32.xlu0 %v6989_v48  ;;  %v6889_v30 = vpop.xlane.xlu0 %6888  ;;  %v6341_v14 = vsel %vm5980_vm1, %v12575_v50, -inf }
 0x67e   :  { %v5952_v16 = vpop.f32.mrf.mxu0  ;;  %v12580_v43 = vpop.eup %8121  ;;  %8129 = vrcp.f32 %v6889_v30  ;;  %v12602_v30 = vld [vmem:[%s13296_s10] ss:$0 sm:$0xff] }
 0x67f   :  { %13536 = vst [vmem:[#allocation21_spill] sm:$0xff] %v12580_v43  ;;  %v8124_v62 = vpop.eup %8123  ;;  %7431 = vst.msk [vmem:[%s13297_s11 + $0x150] sm:$0xff] %vm5980_vm1, %v7218_v4  ;;  %v12588_v42 = vadd.f32 %v12136_v31, %v5952_v16  ;;  %v6992_v21 = vsel %vm5980_vm1, %v12580_v43, 0.0  ;;  %v6657_v31 = vmul.f32 1.442695, %v6447_v40 }
 0x680   :  { %v5954_v63 = vpop.f32.mrf.mxu0  ;;  %v7220_v25 = vmul.f32 %v8124_v62, %v12007_v24  ;;  %6993 = vadd.xlane.f32.xlu1 %v6992_v21  ;;  %v6448_v62 = vsub.f32 %v12014_v20, %v12550_v54  ;;  %v6449_v21 = vsub.f32 %v12031_v38, %v6235_v8  ;;  %v6450_v20 = vsub.f32 %v12044_v12, %v6238_v28 }
 0x681   :  { %v6892_v39 = vpop.xlane.xlu1 %6891  ;;  %6342 = vmax.xlane.f32.xlu0 %v6341_v14  ;;  %v6241_v51 = vpop.xlane.xlu0 %6240  ;;  %v6344_v16 = vsel %vm5980_vm1, %v12588_v42, -inf }
 0x682   :  { %v5957_v48 = vpop.f32.mrf.mxu0  ;;  %7432 = vst.msk [vmem:[%s13297_s11 + $0x158] sm:$0xff] %vm5980_vm1, %v7220_v25  ;;  %8131 = vrcp.f32 %v6892_v39  ;;  %v6659_v43 = vmul.f32 1.442695, %v6448_v62  ;;  %v6661_v8 = vmul.f32 1.442695, %v6449_v21 }
 0x683   :  { %v12605_v24 = vadd.f32 %v12602_v30, %v5957_v48  ;;  %v8126_v63 = vpop.eup %8125  ;;  %8133 = vpow2.f32 %v6657_v31  ;;  %v6663_v62 = vmul.f32 1.442695, %v6450_v20 }
 0x684   :  { %v5959_v4 = vpop.f32.mrf.mxu0  ;;  %6345 = vmax.xlane.f32.xlu1 %v6344_v16  ;;  %v7222_v39 = vmul.f32 %v8126_v63, %v12026_v10  ;;  %v6451_v16 = vsub.f32 %v12061_v37, %v6241_v51 }
 0x685   :  { %v6244_v40 = vpop.xlane.xlu1 %6243  ;;  %v6347_v25 = vsel %vm5980_vm1, %v12605_v24, -inf  ;;  %v6895_v14 = vpop.xlane.xlu0 %6894 }
 0x686   :  { %v5960_v48 = vpop.f32.mrf.mxu0  ;;  %6348 = vmax.xlane.f32.xlu0 %v6347_v25  ;;  %7433 = vst.msk [vmem:[%s13297_s11 + $0x160] sm:$0xff] %vm5980_vm1, %v7222_v39  ;;  %8135 = vrcp.f32 %v6895_v14  ;;  %v6665_v21 = vmul.f32 1.442695, %v6451_v16 }
 0x687   :  { %v12617_v54 = vadd.f32 %v12602_v30, %v5960_v48  ;;  %v8128_v4 = vpop.eup %8127 }
 0x688   :  { %v5962_v38 = vpop.f32.mrf.mxu0  ;;  %v7224_v10 = vmul.f32 %v8128_v4, %v12037_v32  ;;  %v6452_v32 = vsub.f32 %v12074_v46, %v6244_v40 }
 0x689   :  { %v6898_v31 = vpop.xlane.xlu1 %6897  ;;  %v6350_v12 = vsel %vm5980_vm1, %v12617_v54, -inf  ;;  %v6247_v28 = vpop.xlane.xlu0 %6246 }
 0x68a   :  { %v5965_v63 = vpop.f32.mrf.mxu0  ;;  %6351 = vmax.xlane.f32.xlu1 %v6350_v12  ;;  %7434 = vst.msk [vmem:[%s13297_s11 + $0x168] sm:$0xff] %vm5980_vm1, %v7224_v10  ;;  %8137 = vrcp.f32 %v6898_v31  ;;  %v6453_v39 = vsub.f32 %v12091_v55, %v6247_v28  ;;  %v6667_v55 = vmul.f32 1.442695, %v6452_v32 }
 0x68b   :  { %v12632_v25 = vadd.f32 %v12602_v30, %v5965_v63  ;;  %8139 = vpow2.f32 %v6659_v43  ;;  %v8130_v51 = vpop.eup %8129 }
 0x68c   :  { %v5967_v37 = vpop.f32.mrf.mxu0  ;;  %8141 = vpow2.f32 %v6661_v8  ;;  %v7226_v4 = vmul.f32 %v8130_v51, %v12056_v1  ;;  %v13537_v8 = vld [vmem:[#allocation33_spill] sm:$0xff]  ;;  %v6669_v16 = vmul.f32 1.442695, %v6453_v39 }
 0x68d   :  { %v6250_v14 = vpop.xlane.xlu1 %6249  ;;  %v6353_v48 = vsel %vm5980_vm1, %v12632_v25, -inf  ;;  %v6901_v20 = vpop.xlane.xlu0 %6900  ;;  %8143 = vpow2.f32 %v6663_v62 }
 0x68e   :  { %v5968_v38 = vpop.f32.mrf.mxu0  ;;  %6354 = vmax.xlane.f32.xlu0 %v6353_v48  ;;  %v6454_v43 = vsub.f32 %v12104_v27, %v6250_v14  ;;  %7435 = vst.msk [vmem:[%s13297_s11 + $0x170] sm:$0xff] %vm5980_vm1, %v7226_v4  ;;  %8145 = vrcp.f32 %v6901_v20  ;;  %v13538_v4 = vld [vmem:[#allocation32_spill] sm:$0xff] }
 0x68f   :  { %v12641_v46 = vadd.f32 %v12602_v30, %v5968_v38  ;;  %v8132_v40 = vpop.eup %8131  ;;  %8147 = vpow2.f32 %v6665_v21 }
 0x690   :  { %v5970_v10 = vpop.f32.mrf.mxu0  ;;  %v7228_v1 = vmul.f32 %v8132_v40, %v13537_v8  ;;  %v6671_v63 = vmul.f32 1.442695, %v6454_v43  ;;  %v12658_v37 = vpop.eup %8133 }
 0x691   :  { %v6904_v31 = vpop.xlane.xlu1 %6903  ;;  %v6356_v27 = vsel %vm5980_vm1, %v12641_v46, -inf  ;;  %v6253_v12 = vpop.xlane.xlu0 %6252  ;;  %v6995_v8 = vsel %vm5980_vm1, %v12658_v37, 0.0 }
 0x692   :  { %v5973_v28 = vpop.f32.mrf.mxu0  ;;  %6357 = vmax.xlane.f32.xlu1 %v6356_v27  ;;  %7436 = vst.msk [vmem:[%s13297_s11 + $0x178] sm:$0xff] %vm5980_vm1, %v7228_v1  ;;  %8149 = vrcp.f32 %v6904_v31  ;;  %v6455_v62 = vsub.f32 %v12121_v18, %v6253_v12 }
 0x693   :  { %v12656_v32 = vadd.f32 %v12602_v30, %v5973_v28  ;;  %8151 = vpow2.f32 %v6667_v55  ;;  %v8136_v21 = vpop.eup %8135 }
 0x694   :  { %v5975_v51 = vpop.f32.mrf.mxu0  ;;  %8153 = vpow2.f32 %v6669_v16  ;;  %v6673_v39 = vmul.f32 1.442695, %v6455_v62  ;;  %v7230_v20 = vmul.f32 %v8136_v21, %v13538_v4 }
 0x695   :  { %v6256_v14 = vpop.xlane.xlu1 %6255  ;;  %v6359_v48 = vsel %vm5980_vm1, %v12656_v32, -inf  ;;  %v6907_v43 = vpop.xlane.xlu0 %6906  ;;  %8155 = vpow2.f32 %v6671_v63 }
 0x696   :  { %v6456_v38 = vsub.f32 %v12139_v29, %v6256_v14  ;;  %v5976_v18 = vpop.f32.mrf.mxu0  ;;  %6360 = vmax.xlane.f32.xlu0 %v6359_v48  ;;  %7437 = vst.msk [vmem:[%s13297_s11 + $0x180] sm:$0xff] %vm5980_vm1, %v7230_v20  ;;  %8157 = vrcp.f32 %v6907_v43  ;;  %v13539_v29 = vld [vmem:[#allocation35_spill] sm:$0xff]  ;;  %v13540_v20 = vld [vmem:[#allocation34_spill] sm:$0xff] }
 0x697   :  { %v12665_v40 = vadd.f32 %v12602_v30, %v5976_v18  ;;  %v8138_v55 = vpop.eup %8137  ;;  %8159 = vpow2.f32 %v6673_v39 }
 0x698   :  { %v5978_v10 = vpop.f32.mrf.mxu0  ;;  %v12673_v1 = vpop.eup %8139  ;;  %v7232_v16 = vmul.f32 %v8138_v55, %v13539_v29  ;;  %v6675_v31 = vmul.f32 1.442695, %v6456_v38 }
 0x699   :  { %v6910_v27 = vpop.xlane.xlu1 %6909  ;;  %v6362_v30 = vsel %vm5980_vm1, %v12665_v40, -inf  ;;  %v12678_v12 = vpop.eup %8141  ;;  %v6998_v14 = vsel %vm5980_vm1, %v12673_v1, 0.0 }
 0x69a   :  { %v6259_v28 = vpop.xlane.xlu0 %6258  ;;  %6363 = vmax.xlane.f32.xlu1 %v6362_v30  ;;  %6996 = vadd.xlane.f32.xlu0 %v6995_v8  ;;  %7438 = vst.msk [vmem:[%s13297_s11 + $0x188] sm:$0xff] %vm5980_vm1, %v7232_v16  ;;  %8161 = vrcp.f32 %v6910_v27  ;;  %v12685_v62 = vpop.eup %8143  ;;  %v7001_v48 = vsel %vm5980_vm1, %v12678_v12, 0.0  ;;  %v13541_v8 = vld [vmem:[#allocation36_spill] sm:$0xff] }
 0x69b   :  { %v6457_v63 = vsub.f32 %v12156_v49, %v6259_v28  ;;  %v8146_v51 = vpop.eup %8145  ;;  %8163 = vpow2.f32 %v6675_v31 }
 0x69c   :  { %v12691_v4 = vpop.eup %8147  ;;  %v7234_v38 = vmul.f32 %v8146_v51, %v13540_v20 }
 0x69d   :  { %v6677_v21 = vmul.f32 1.442695, %v6457_v63  ;;  %v6262_v39 = vpop.xlane.xlu1 %6261  ;;  %v7007_v31 = vsel %vm5980_vm1, %v12691_v4, 0.0 }
 0x69e   :  { %v6458_v43 = vsub.f32 %v12169_v61, %v6262_v39  ;;  %v6913_v18 = vpop.xlane.xlu0 %6912  ;;  %6999 = vadd.xlane.f32.xlu1 %v6998_v14  ;;  %7002 = vadd.xlane.f32.xlu0 %v7001_v48  ;;  %7439 = vst.msk [vmem:[%s13297_s11 + $0x190] sm:$0xff] %vm5980_vm1, %v7234_v38  ;;  %v7004_v61 = vsel %vm5980_vm1, %v12685_v62, 0.0  ;;  %v13542_v38 = vld [vmem:[#allocation38_spill] sm:$0xff] }
 0x69f   :  { %8165 = vpow2.f32 %v6677_v21  ;;  %v8150_v49 = vpop.eup %8149 }
 0x6a0   :  { %v6679_v55 = vmul.f32 1.442695, %v6458_v43  ;;  %8167 = vrcp.f32 %v6913_v18  ;;  %v12699_v10 = vpop.eup %8151  ;;  %v7236_v29 = vmul.f32 %v8150_v49, %v13541_v8  ;;  %v13543_v8 = vld [vmem:[#allocation37_spill] sm:$0xff] }
 0x6a1   :  { %v6916_v16 = vpop.xlane.xlu1 %6915  ;;  %v12706_v27 = vpop.eup %8153  ;;  %v7010_v14 = vsel %vm5980_vm1, %v12699_v10, 0.0 }
 0x6a2   :  { %8169 = vpow2.f32 %v6679_v55  ;;  %v6265_v30 = vpop.xlane.xlu0 %6264  ;;  %7005 = vadd.xlane.f32.xlu1 %v7004_v61  ;;  %7008 = vadd.xlane.f32.xlu0 %v7007_v31  ;;  %7440 = vst.msk [vmem:[%s13297_s11 + $0x198] sm:$0xff] %vm5980_vm1, %v7236_v29  ;;  %v12713_v63 = vpop.eup %8155  ;;  %v7013_v48 = vsel %vm5980_vm1, %v12706_v27, 0.0 }
 0x6a3   :  { %8171 = vrcp.f32 %v6916_v16  ;;  %v6459_v28 = vsub.f32 %v12186_v56, %v6265_v30  ;;  %v8158_v51 = vpop.eup %8157  ;;  %v7016_v61 = vsel %vm5980_vm1, %v12713_v63, 0.0 }
 0x6a4   :  { %v12719_v20 = vpop.eup %8159  ;;  %v7238_v43 = vmul.f32 %v8158_v51, %v13542_v38 }
 0x6a5   :  { %v6681_v21 = vmul.f32 1.442695, %v6459_v28  ;;  %v6268_v39 = vpop.xlane.xlu1 %6267 }
 0x6a6   :  { %v6460_v18 = vsub.f32 %v12199_v9, %v6268_v39  ;;  %v6919_v49 = vpop.xlane.xlu0 %6918  ;;  %7011 = vadd.xlane.f32.xlu1 %v7010_v14  ;;  %7014 = vadd.xlane.f32.xlu0 %v7013_v48  ;;  %7441 = vst.msk [vmem:[%s13297_s11 + $0x1a0] sm:$0xff] %vm5980_vm1, %v7238_v43  ;;  %v7019_v9 = vsel %vm5980_vm1, %v12719_v20, 0.0  ;;  %v13544_v43 = vld [vmem:[#allocation40_spill] sm:$0xff] }
 0x6a7   :  { %8173 = vpow2.f32 %v6681_v21  ;;  %v8162_v56 = vpop.eup %8161 }
 0x6a8   :  { %v6683_v55 = vmul.f32 1.442695, %v6460_v18  ;;  %8175 = vrcp.f32 %v6919_v49  ;;  %v7240_v29 = vmul.f32 %v8162_v56, %v13543_v8  ;;  %v12732_v31 = vpop.eup %8163 }
 0x6a9   :  { %v6922_v16 = vpop.xlane.xlu1 %6921  ;;  %v7022_v48 = vsel %vm5980_vm1, %v12732_v31, 0.0 }
 0x6aa   :  { %8177 = vpow2.f32 %v6683_v55  ;;  %v6271_v30 = vpop.xlane.xlu0 %6270  ;;  %7017 = vadd.xlane.f32.xlu1 %v7016_v61  ;;  %7020 = vadd.xlane.f32.xlu0 %v7019_v9  ;;  %7442 = vst.msk [vmem:[%s13297_s11 + $0x1a8] sm:$0xff] %vm5980_vm1, %v7240_v29 }
 0x6ab   :  { %8179 = vrcp.f32 %v6922_v16  ;;  %v6461_v28 = vsub.f32 %v12216_v7, %v6271_v30  ;;  %v13545_v16 = vld [vmem:[#allocation39_spill] sm:$0xff] }
 0x6ac   :  { %v12739_v51 = vpop.eup %8165 }
 0x6ad   :  { %v8168_v21 = vpop.eup %8167  ;;  %v6685_v39 = vmul.f32 1.442695, %v6461_v28  ;;  %v6274_v14 = vpop.xlane.xlu1 %6273  ;;  %v7025_v38 = vsel %vm5980_vm1, %v12739_v51, 0.0 }
 0x6ae   :  { %v7242_v18 = vmul.f32 %v8168_v21, %v13544_v43  ;;  %v6462_v49 = vsub.f32 %v12229_v47, %v6274_v14  ;;  %v6925_v56 = vpop.xlane.xlu0 %6924  ;;  %7023 = vadd.xlane.f32.xlu1 %v7022_v48  ;;  %7026 = vadd.xlane.f32.xlu0 %v7025_v38  ;;  %v13546_v38 = vld [vmem:[#allocation41_spill] sm:$0xff] }
 0x6af   :  { %v12747_v55 = vpop.eup %8169  ;;  %8181 = vpow2.f32 %v6685_v39 }
 0x6b0   :  { %v8172_v7 = vpop.eup %8171  ;;  %7443 = vst.msk [vmem:[%s13297_s11 + $0x1b0] sm:$0xff] %vm5980_vm1, %v7242_v18  ;;  %v6687_v8 = vmul.f32 1.442695, %v6462_v49  ;;  %8183 = vrcp.f32 %v6925_v56  ;;  %v7028_v29 = vsel %vm5980_vm1, %v12747_v55, 0.0 }
 0x6b1   :  { %v7244_v61 = vmul.f32 %v8172_v7, %v13545_v16  ;;  %v6928_v47 = vpop.xlane.xlu1 %6927 }
 0x6b2   :  { %8185 = vpow2.f32 %v6687_v8  ;;  %v6277_v9 = vpop.xlane.xlu0 %6276  ;;  %7029 = vadd.xlane.f32.xlu1 %v7028_v29  ;;  %v13547_v29 = vld [vmem:[#allocation43_spill] sm:$0xff] }
 0x6b3   :  { %7444 = vst.msk [vmem:[%s13297_s11 + $0x1b8] sm:$0xff] %vm5980_vm1, %v7244_v61  ;;  %8187 = vrcp.f32 %v6928_v47  ;;  %v6463_v30 = vsub.f32 %v12246_v6, %v6277_v9 }
 0x6b4   :  { %v12761_v28 = vpop.eup %8173 }
 0x6b5   :  { %v8176_v21 = vpop.eup %8175  ;;  %v6689_v39 = vmul.f32 1.442695, %v6463_v30  ;;  %v6280_v14 = vpop.xlane.xlu1 %6279  ;;  %v7031_v48 = vsel %vm5980_vm1, %v12761_v28, 0.0 }
 0x6b6   :  { %v7246_v43 = vmul.f32 %v8176_v21, %v13546_v38  ;;  %v6464_v18 = vsub.f32 %v12259_v19, %v6280_v14  ;;  %7032 = vadd.xlane.f32.xlu0 %v7031_v48  ;;  %v6931_v49 = vpop.xlane.xlu0 %6930  ;;  %v13548_v48 = vld [vmem:[#allocation42_spill] sm:$0xff] }
 0x6b7   :  { %v12767_v56 = vpop.eup %8177  ;;  %8189 = vpow2.f32 %v6689_v39 }
 0x6b8   :  { %v8180_v7 = vpop.eup %8179  ;;  %7445 = vst.msk [vmem:[%s13297_s11 + $0x1c0] sm:$0xff] %vm5980_vm1, %v7246_v43  ;;  %v6691_v6 = vmul.f32 1.442695, %v6464_v18  ;;  %8191 = vrcp.f32 %v6931_v49  ;;  %v7034_v8 = vsel %vm5980_vm1, %v12767_v56, 0.0 }
 0x6b9   :  { %v7248_v16 = vmul.f32 %v8180_v7, %v13547_v29  ;;  %7035 = vadd.xlane.f32.xlu1 %v7034_v8  ;;  %v6934_v19 = vpop.xlane.xlu1 %6933  ;;  %v13549_v8 = vld [vmem:[#allocation3_spill] sm:$0xff] }
 0x6ba   :  { %8193 = vpow2.f32 %v6691_v6  ;;  %v6283_v61 = vpop.xlane.xlu0 %6282 }
 0x6bb   :  { %7446 = vst.msk [vmem:[%s13297_s11 + $0x1c8] sm:$0xff] %vm5980_vm1, %v7248_v16  ;;  %8195 = vrcp.f32 %v6934_v19  ;;  %v6465_v47 = vsub.f32 %v12276_v59, %v6283_v61 }
 0x6bc   :  { %v12781_v9 = vpop.eup %8181 }
 0x6bd   :  { %v8184_v30 = vpop.eup %8183  ;;  %v6693_v21 = vmul.f32 1.442695, %v6465_v47  ;;  %v6286_v39 = vpop.xlane.xlu1 %6285  ;;  %v7037_v14 = vsel %vm5980_vm1, %v12781_v9, 0.0 }
 0x6be   :  { %v7250_v38 = vmul.f32 %v8184_v30, %v13548_v48  ;;  %v6466_v43 = vsub.f32 %v12289_v11, %v6286_v39  ;;  %7038 = vadd.xlane.f32.xlu0 %v7037_v14  ;;  %v6937_v18 = vpop.xlane.xlu0 %6936  ;;  %v13550_v14 = vld [vmem:[#allocation2_spill] sm:$0xff] }
 0x6bf   :  { %v12787_v49 = vpop.eup %8185  ;;  %8197 = vpow2.f32 %v6693_v21 }
 0x6c0   :  { %v8188_v7 = vpop.eup %8187  ;;  %7447 = vst.msk [vmem:[%s13297_s11 + $0x1d0] sm:$0xff] %vm5980_vm1, %v7250_v38  ;;  %v6695_v59 = vmul.f32 1.442695, %v6466_v43  ;;  %8199 = vrcp.f32 %v6937_v18  ;;  %v7040_v6 = vsel %vm5980_vm1, %v12787_v49, 0.0 }
 0x6c1   :  { %v7252_v29 = vmul.f32 %v8188_v7, %v13549_v8  ;;  %7041 = vadd.xlane.f32.xlu1 %v7040_v6  ;;  %v6940_v11 = vpop.xlane.xlu1 %6939  ;;  %v13551_v6 = vld [vmem:[#allocation5_spill] sm:$0xff] }
 0x6c2   :  { %8201 = vpow2.f32 %v6695_v59  ;;  %v6289_v16 = vpop.xlane.xlu0 %6288 }
 0x6c3   :  { %7448 = vst.msk [vmem:[%s13297_s11 + $0x1d8] sm:$0xff] %vm5980_vm1, %v7252_v29  ;;  %8203 = vrcp.f32 %v6940_v11  ;;  %v6467_v19 = vsub.f32 %v12306_v0, %v6289_v16 }
 0x6c4   :  { %v12801_v61 = vpop.eup %8189 }
 0x6c5   :  { %v8192_v47 = vpop.eup %8191  ;;  %v6697_v30 = vmul.f32 1.442695, %v6467_v19  ;;  %v6292_v21 = vpop.xlane.xlu1 %6291  ;;  %v7043_v39 = vsel %vm5980_vm1, %v12801_v61, 0.0 }
 0x6c6   :  { %v7254_v48 = vmul.f32 %v8192_v47, %v13550_v14  ;;  %v6468_v38 = vsub.f32 %v12319_v3, %v6292_v21  ;;  %7044 = vadd.xlane.f32.xlu0 %v7043_v39  ;;  %v6943_v43 = vpop.xlane.xlu0 %6942  ;;  %v13552_v39 = vld [vmem:[#allocation4_spill] sm:$0xff] }
 0x6c7   :  { %v12807_v18 = vpop.eup %8193  ;;  %8205 = vpow2.f32 %v6697_v30 }
 0x6c8   :  { %v8196_v7 = vpop.eup %8195  ;;  %7449 = vst.msk [vmem:[%s13297_s11 + $0x1e0] sm:$0xff] %vm5980_vm1, %v7254_v48  ;;  %v6699_v0 = vmul.f32 1.442695, %v6468_v38  ;;  %8207 = vrcp.f32 %v6943_v43  ;;  %v7046_v59 = vsel %vm5980_vm1, %v12807_v18, 0.0 }
 0x6c9   :  { %v7256_v8 = vmul.f32 %v8196_v7, %v13551_v6  ;;  %7047 = vadd.xlane.f32.xlu1 %v7046_v59  ;;  %v6946_v3 = vpop.xlane.xlu1 %6945  ;;  %v13553_v59 = vld [vmem:[#allocation7_spill] sm:$0xff] }
 0x6ca   :  { %8209 = vpow2.f32 %v6699_v0  ;;  %v6295_v29 = vpop.xlane.xlu0 %6294 }
 0x6cb   :  { %7450 = vst.msk [vmem:[%s13297_s11 + $0x1e8] sm:$0xff] %vm5980_vm1, %v7256_v8  ;;  %8211 = vrcp.f32 %v6946_v3  ;;  %v6469_v11 = vsub.f32 %v12336_v17, %v6295_v29 }
 0x6cc   :  { %v12821_v16 = vpop.eup %8197 }
 0x6cd   :  { %v8200_v19 = vpop.eup %8199  ;;  %v6701_v47 = vmul.f32 1.442695, %v6469_v11  ;;  %v6298_v30 = vpop.xlane.xlu1 %6297  ;;  %v7049_v21 = vsel %vm5980_vm1, %v12821_v16, 0.0 }
 0x6ce   :  { %v7258_v14 = vmul.f32 %v8200_v19, %v13552_v39  ;;  %v6470_v48 = vsub.f32 %v12349_v26, %v6298_v30  ;;  %7050 = vadd.xlane.f32.xlu0 %v7049_v21  ;;  %v6949_v38 = vpop.xlane.xlu0 %6948  ;;  %v13554_v21 = vld [vmem:[#allocation6_spill] sm:$0xff] }
 0x6cf   :  { %v12827_v43 = vpop.eup %8201  ;;  %8213 = vpow2.f32 %v6701_v47 }
 0x6d0   :  { %v8204_v7 = vpop.eup %8203  ;;  %7451 = vst.msk [vmem:[%s13297_s11 + $0x1f0] sm:$0xff] %vm5980_vm1, %v7258_v14  ;;  %v6703_v17 = vmul.f32 1.442695, %v6470_v48  ;;  %8215 = vrcp.f32 %v6949_v38  ;;  %v7052_v0 = vsel %vm5980_vm1, %v12827_v43, 0.0 }
 0x6d1   :  { %v7260_v6 = vmul.f32 %v8204_v7, %v13553_v59  ;;  %7053 = vadd.xlane.f32.xlu1 %v7052_v0  ;;  %v6952_v26 = vpop.xlane.xlu1 %6951  ;;  %v13555_v0 = vld [vmem:[#allocation9_spill] sm:$0xff] }
 0x6d2   :  { %8217 = vpow2.f32 %v6703_v17  ;;  %v6301_v8 = vpop.xlane.xlu0 %6300 }
 0x6d3   :  { %7452 = vst.msk [vmem:[%s13297_s11 + $0x1f8] sm:$0xff] %vm5980_vm1, %v7260_v6  ;;  %8219 = vrcp.f32 %v6952_v26  ;;  %v6471_v3 = vsub.f32 %v12366_v5, %v6301_v8 }
 0x6d4   :  { %v12841_v29 = vpop.eup %8205 }
 0x6d5   :  { %v8208_v11 = vpop.eup %8207  ;;  %v6705_v19 = vmul.f32 1.442695, %v6471_v3  ;;  %v6304_v47 = vpop.xlane.xlu1 %6303  ;;  %v7055_v30 = vsel %vm5980_vm1, %v12841_v29, 0.0 }
 0x6d6   :  { %v7262_v39 = vmul.f32 %v8208_v11, %v13554_v21  ;;  %v6472_v14 = vsub.f32 %v12379_v15, %v6304_v47  ;;  %7056 = vadd.xlane.f32.xlu0 %v7055_v30  ;;  %v6955_v48 = vpop.xlane.xlu0 %6954  ;;  %v13556_v30 = vld [vmem:[#allocation8_spill] sm:$0xff] }
 0x6d7   :  { %v12847_v38 = vpop.eup %8209  ;;  %8221 = vpow2.f32 %v6705_v19 }
 0x6d8   :  { %v8212_v7 = vpop.eup %8211  ;;  %7453 = vst.msk [vmem:[%s13297_s11 + $0x200] sm:$0xff] %vm5980_vm1, %v7262_v39  ;;  %v6707_v5 = vmul.f32 1.442695, %v6472_v14  ;;  %8223 = vrcp.f32 %v6955_v48  ;;  %v7058_v17 = vsel %vm5980_vm1, %v12847_v38, 0.0 }
 0x6d9   :  { %v7264_v59 = vmul.f32 %v8212_v7, %v13555_v0  ;;  %7059 = vadd.xlane.f32.xlu1 %v7058_v17  ;;  %v6958_v15 = vpop.xlane.xlu1 %6957  ;;  %v13557_v17 = vld [vmem:[#allocation11_spill] sm:$0xff] }
 0x6da   :  { %8225 = vpow2.f32 %v6707_v5  ;;  %v6307_v6 = vpop.xlane.xlu0 %6306 }
 0x6db   :  { %7454 = vst.msk [vmem:[%s13297_s11 + $0x208] sm:$0xff] %vm5980_vm1, %v7264_v59  ;;  %8227 = vrcp.f32 %v6958_v15  ;;  %v6473_v26 = vsub.f32 %v12396_v36, %v6307_v6 }
 0x6dc   :  { %v12861_v8 = vpop.eup %8213 }
 0x6dd   :  { %v8216_v3 = vpop.eup %8215  ;;  %v6709_v11 = vmul.f32 1.442695, %v6473_v26  ;;  %v6310_v19 = vpop.xlane.xlu1 %6309  ;;  %v7061_v47 = vsel %vm5980_vm1, %v12861_v8, 0.0 }
 0x6de   :  { %v7266_v21 = vmul.f32 %v8216_v3, %v13556_v30  ;;  %v6474_v39 = vsub.f32 %v12409_v2, %v6310_v19  ;;  %7062 = vadd.xlane.f32.xlu0 %v7061_v47  ;;  %v6961_v14 = vpop.xlane.xlu0 %6960  ;;  %v13558_v47 = vld [vmem:[#allocation10_spill] sm:$0xff] }
 0x6df   :  { %v12867_v48 = vpop.eup %8217  ;;  %8229 = vpow2.f32 %v6709_v11 }
 0x6e0   :  { %v8220_v7 = vpop.eup %8219  ;;  %7455 = vst.msk [vmem:[%s13297_s11 + $0x210] sm:$0xff] %vm5980_vm1, %v7266_v21  ;;  %v6711_v36 = vmul.f32 1.442695, %v6474_v39  ;;  %8231 = vrcp.f32 %v6961_v14  ;;  %v7064_v5 = vsel %vm5980_vm1, %v12867_v48, 0.0 }
 0x6e1   :  { %v7268_v0 = vmul.f32 %v8220_v7, %v13557_v17  ;;  %7065 = vadd.xlane.f32.xlu1 %v7064_v5  ;;  %v6964_v2 = vpop.xlane.xlu1 %6963  ;;  %v13559_v5 = vld [vmem:[#allocation13_spill] sm:$0xff] }
 0x6e2   :  { %8233 = vpow2.f32 %v6711_v36  ;;  %v6313_v59 = vpop.xlane.xlu0 %6312 }
 0x6e3   :  { %7456 = vst.msk [vmem:[%s13297_s11 + $0x218] sm:$0xff] %vm5980_vm1, %v7268_v0  ;;  %8235 = vrcp.f32 %v6964_v2  ;;  %v6475_v15 = vsub.f32 %v12426_v58, %v6313_v59 }
 0x6e4   :  { %v12881_v6 = vpop.eup %8221 }
 0x6e5   :  { %v8224_v26 = vpop.eup %8223  ;;  %v6713_v3 = vmul.f32 1.442695, %v6475_v15  ;;  %v6316_v11 = vpop.xlane.xlu1 %6315  ;;  %v7067_v19 = vsel %vm5980_vm1, %v12881_v6, 0.0 }
 0x6e6   :  { %v7270_v30 = vmul.f32 %v8224_v26, %v13558_v47  ;;  %v6476_v21 = vsub.f32 %v12439_v41, %v6316_v11  ;;  %7068 = vadd.xlane.f32.xlu0 %v7067_v19  ;;  %v6967_v39 = vpop.xlane.xlu0 %6966  ;;  %v13560_v19 = vld [vmem:[#allocation12_spill] sm:$0xff] }
 0x6e7   :  { %v12887_v14 = vpop.eup %8225  ;;  %8237 = vpow2.f32 %v6713_v3 }
 0x6e8   :  { %v8228_v7 = vpop.eup %8227  ;;  %7457 = vst.msk [vmem:[%s13297_s11 + $0x220] sm:$0xff] %vm5980_vm1, %v7270_v30  ;;  %v6715_v58 = vmul.f32 1.442695, %v6476_v21  ;;  %8239 = vrcp.f32 %v6967_v39  ;;  %v7070_v36 = vsel %vm5980_vm1, %v12887_v14, 0.0 }
 0x6e9   :  { %v7272_v17 = vmul.f32 %v8228_v7, %v13559_v5  ;;  %7071 = vadd.xlane.f32.xlu1 %v7070_v36  ;;  %v6970_v41 = vpop.xlane.xlu1 %6969  ;;  %v13561_v36 = vld [vmem:[#allocation15_spill] sm:$0xff] }
 0x6ea   :  { %8241 = vpow2.f32 %v6715_v58  ;;  %v6319_v0 = vpop.xlane.xlu0 %6318 }
 0x6eb   :  { %7458 = vst.msk [vmem:[%s13297_s11 + $0x228] sm:$0xff] %vm5980_vm1, %v7272_v17  ;;  %8243 = vrcp.f32 %v6970_v41  ;;  %v6477_v2 = vsub.f32 %v12456_v23, %v6319_v0 }
 0x6ec   :  { %v12901_v59 = vpop.eup %8229 }
 0x6ed   :  { %v8232_v15 = vpop.eup %8231  ;;  %v6717_v26 = vmul.f32 1.442695, %v6477_v2  ;;  %v6322_v3 = vpop.xlane.xlu1 %6321  ;;  %v7073_v11 = vsel %vm5980_vm1, %v12901_v59, 0.0 }
 0x6ee   :  { %v7274_v47 = vmul.f32 %v8232_v15, %v13560_v19  ;;  %v6478_v30 = vsub.f32 %v12469_v35, %v6322_v3  ;;  %7074 = vadd.xlane.f32.xlu0 %v7073_v11  ;;  %v6973_v21 = vpop.xlane.xlu0 %6972 }
 0x6ef   :  { %v12907_v39 = vpop.eup %8233  ;;  %8245 = vpow2.f32 %v6717_v26 }
 0x6f0   :  { %v8236_v7 = vpop.eup %8235  ;;  %7459 = vst.msk [vmem:[%s13297_s11 + $0x230] sm:$0xff] %vm5980_vm1, %v7274_v47  ;;  %v6719_v23 = vmul.f32 1.442695, %v6478_v30  ;;  %8247 = vrcp.f32 %v6973_v21  ;;  %v7076_v58 = vsel %vm5980_vm1, %v12907_v39, 0.0 }
 0x6f1   :  { %v7276_v5 = vmul.f32 %v8236_v7, %v13561_v36  ;;  %7077 = vadd.xlane.f32.xlu1 %v7076_v58  ;;  %v6976_v35 = vpop.xlane.xlu1 %6975 }
 0x6f2   :  { %8249 = vpow2.f32 %v6719_v23  ;;  %v6325_v17 = vpop.xlane.xlu0 %6324 }
 0x6f3   :  { %7460 = vst.msk [vmem:[%s13297_s11 + $0x238] sm:$0xff] %vm5980_vm1, %v7276_v5  ;;  %8251 = vrcp.f32 %v6976_v35  ;;  %v6479_v41 = vsub.f32 %v12486_v13, %v6325_v17 }
 0x6f4   :  { %v12921_v0 = vpop.eup %8237 }
 0x6f5   :  { %v8240_v2 = vpop.eup %8239  ;;  %v6721_v15 = vmul.f32 1.442695, %v6479_v41  ;;  %v6328_v26 = vpop.xlane.xlu1 %6327  ;;  %v7079_v3 = vsel %vm5980_vm1, %v12921_v0, 0.0 }
 0x6f6   :  { %v7278_v11 = vmul.f32 %v8240_v2, %v12451_v52  ;;  %v6480_v19 = vsub.f32 %v12499_v45, %v6328_v26  ;;  %7080 = vadd.xlane.f32.xlu0 %v7079_v3  ;;  %v6979_v47 = vpop.xlane.xlu0 %6978 }
 0x6f7   :  { %v12927_v30 = vpop.eup %8241  ;;  %8253 = vpow2.f32 %v6721_v15 }
 0x6f8   :  { %v8244_v21 = vpop.eup %8243  ;;  %7461 = vst.msk [vmem:[%s13297_s11 + $0x240] sm:$0xff] %vm5980_vm1, %v7278_v11  ;;  %v6723_v13 = vmul.f32 1.442695, %v6480_v19  ;;  %8255 = vrcp.f32 %v6979_v47  ;;  %v7082_v7 = vsel %vm5980_vm1, %v12927_v30, 0.0  ;;  %v13562_v19 = vld [vmem:[#allocation14_spill] sm:$0xff] }
 0x6f9   :  { %v7280_v52 = vmul.f32 %v8244_v21, %v12462_v53  ;;  %7083 = vadd.xlane.f32.xlu1 %v7082_v7  ;;  %v6982_v45 = vpop.xlane.xlu1 %6981 }
 0x6fa   :  { %8257 = vpow2.f32 %v6723_v13  ;;  %v6331_v23 = vpop.xlane.xlu0 %6330 }
 0x6fb   :  { %7462 = vst.msk [vmem:[%s13297_s11 + $0x248] sm:$0xff] %vm5980_vm1, %v7280_v52  ;;  %8259 = vrcp.f32 %v6982_v45  ;;  %v6481_v58 = vsub.f32 %v12516_v22, %v6331_v23 }
 0x6fc   :  { %v12941_v36 = vpop.eup %8245 }
 0x6fd   :  { %v8248_v5 = vpop.eup %8247  ;;  %v6725_v35 = vmul.f32 1.442695, %v6481_v58  ;;  %v6334_v17 = vpop.xlane.xlu1 %6333  ;;  %v7085_v53 = vsel %vm5980_vm1, %v12941_v36, 0.0 }
 0x6fe   :  { %v7282_v41 = vmul.f32 %v8248_v5, %v12481_v34  ;;  %v6482_v2 = vsub.f32 %v12529_v57, %v6334_v17  ;;  %7086 = vadd.xlane.f32.xlu0 %v7085_v53  ;;  %v6985_v15 = vpop.xlane.xlu0 %6984  ;;  %v13563_v5 = vld [vmem:[#allocation18_spill] sm:$0xff] }
 0x6ff   :  { %v12947_v26 = vpop.eup %8249  ;;  %8261 = vpow2.f32 %v6725_v35 }
 0x700   :  { %v8252_v3 = vpop.eup %8251  ;;  %7463 = vst.msk [vmem:[%s13297_s11 + $0x250] sm:$0xff] %vm5980_vm1, %v7282_v41  ;;  %v6727_v22 = vmul.f32 1.442695, %v6482_v2  ;;  %8263 = vrcp.f32 %v6985_v15  ;;  %v7088_v11 = vsel %vm5980_vm1, %v12947_v26, 0.0  ;;  %v13564_v15 = vld [vmem:[#allocation17_spill] sm:$0xff] }
 0x701   :  { %v7284_v34 = vmul.f32 %v8252_v3, %v13562_v19  ;;  %7089 = vadd.xlane.f32.xlu1 %v7088_v11  ;;  %v6988_v57 = vpop.xlane.xlu1 %6987 }
 0x702   :  { %8265 = vpow2.f32 %v6727_v22  ;;  %v6337_v47 = vpop.xlane.xlu0 %6336 }
 0x703   :  { %7464 = vst.msk [vmem:[%s13297_s11 + $0x258] sm:$0xff] %vm5980_vm1, %v7284_v34  ;;  %8267 = vrcp.f32 %v6988_v57  ;;  %v6483_v21 = vsub.f32 %v12545_v60, %v6337_v47  ;;  %v13565_v47 = vld [vmem:[#allocation16_spill] sm:$0xff] }
 0x704   :  { %v12961_v13 = vpop.eup %8253 }
 0x705   :  { %v8256_v7 = vpop.eup %8255  ;;  %v6729_v52 = vmul.f32 1.442695, %v6483_v21  ;;  %v6340_v45 = vpop.xlane.xlu1 %6339  ;;  %v7091_v23 = vsel %vm5980_vm1, %v12961_v13, 0.0 }
 0x706   :  { %v7286_v58 = vmul.f32 %v8256_v7, %v12510_v33  ;;  %v6484_v35 = vsub.f32 %v13563_v5, %v6340_v45  ;;  %7092 = vadd.xlane.f32.xlu0 %v7091_v23  ;;  %v6991_v53 = vpop.xlane.xlu0 %6990 }
 0x707   :  { %v12967_v17 = vpop.eup %8257  ;;  %8269 = vpow2.f32 %v6729_v52 }
 0x708   :  { %v8260_v41 = vpop.eup %8259  ;;  %7465 = vst.msk [vmem:[%s13297_s11 + $0x260] sm:$0xff] %vm5980_vm1, %v7286_v58  ;;  %v6731_v60 = vmul.f32 1.442695, %v6484_v35  ;;  %8271 = vrcp.f32 %v6991_v53  ;;  %v7094_v2 = vsel %vm5980_vm1, %v12967_v17, 0.0  ;;  %v13566_v53 = vld [vmem:[#allocation19_spill] sm:$0xff] }
 0x709   :  { %v7288_v33 = vmul.f32 %v8260_v41, %v13564_v15  ;;  %7095 = vadd.xlane.f32.xlu1 %v7094_v2  ;;  %v6994_v3 = vpop.xlane.xlu1 %6993 }
 0x70a   :  { %8273 = vpow2.f32 %v6731_v60  ;;  %v6343_v22 = vpop.xlane.xlu0 %6342 }
 0x70b   :  { %7466 = vst.msk [vmem:[%s13297_s11 + $0x268] sm:$0xff] %vm5980_vm1, %v7288_v33  ;;  %8275 = vrcp.f32 %v6994_v3  ;;  %v6485_v19 = vsub.f32 %v12575_v50, %v6343_v22 }
 0x70c   :  { %v12980_v11 = vpop.eup %8261 }
 0x70d   :  { %v8264_v34 = vpop.eup %8263  ;;  %v7097_v57 = vsel %vm5980_vm1, %v12980_v11, 0.0  ;;  %v6733_v7 = vmul.f32 1.442695, %v6485_v19  ;;  %v6346_v52 = vpop.xlane.xlu1 %6345 }
 0x70e   :  { %v7290_v21 = vmul.f32 %v8264_v34, %v13565_v47  ;;  %7098 = vadd.xlane.f32.xlu0 %v7097_v57  ;;  %v6486_v23 = vsub.f32 %v12588_v42, %v6346_v52 }
 0x70f   :  { %v12986_v45 = vpop.eup %8265  ;;  %v6349_v58 = vpop.xlane.xlu0 %6348  ;;  %8277 = vpow2.f32 %v6733_v7  ;;  %v13567_v7 = vld [vmem:[#allocation21_spill] sm:$0xff] }
 0x710   :  { %v8268_v5 = vpop.eup %8267  ;;  %7467 = vst.msk [vmem:[%s13297_s11 + $0x270] sm:$0xff] %vm5980_vm1, %v7290_v21  ;;  %v6487_v50 = vsub.f32 %v12605_v24, %v6349_v58  ;;  %v7100_v35 = vsel %vm5980_vm1, %v12986_v45, 0.0  ;;  %v6735_v60 = vmul.f32 1.442695, %v6486_v23 }
 0x711   :  { %v7292_v41 = vmul.f32 %v8268_v5, %v13566_v53  ;;  %7101 = vadd.xlane.f32.xlu1 %v7100_v35 }
 0x712   :  { %v6737_v2 = vmul.f32 1.442695, %v6487_v50  ;;  %8279 = vpow2.f32 %v6735_v60 }
 0x713   :  { %7468 = vst.msk [vmem:[%s13297_s11 + $0x278] sm:$0xff] %vm5980_vm1, %v7292_v41  ;;  %v6352_v42 = vpop.xlane.xlu1 %6351 }
 0x714   :  { %v13001_v15 = vpop.eup %8269  ;;  %8281 = vpow2.f32 %v6737_v2  ;;  %v6488_v24 = vsub.f32 %v12617_v54, %v6352_v42 }
 0x715   :  { %v8272_v33 = vpop.eup %8271  ;;  %v7103_v3 = vsel %vm5980_vm1, %v13001_v15, 0.0 }
 0x716   :  { %v7294_v22 = vmul.f32 %v8272_v33, %v12572_v44  ;;  %v6739_v19 = vmul.f32 1.442695, %v6488_v24  ;;  %7104 = vadd.xlane.f32.xlu0 %v7103_v3 }
 0x717   :  { %v13007_v34 = vpop.eup %8273  ;;  %v6355_v57 = vpop.xlane.xlu0 %6354 }
 0x718   :  { %v8276_v47 = vpop.eup %8275  ;;  %7469 = vst.msk [vmem:[%s13297_s11 + $0x280] sm:$0xff] %vm5980_vm1, %v7294_v22  ;;  %8283 = vpow2.f32 %v6739_v19  ;;  %v6489_v54 = vsub.f32 %v12632_v25, %v6355_v57  ;;  %v7106_v21 = vsel %vm5980_vm1, %v13007_v34, 0.0 }
 0x719   :  { %v7296_v52 = vmul.f32 %v8276_v47, %v13567_v7  ;;  %7107 = vadd.xlane.f32.xlu1 %v7106_v21 }
 0x71a   :  { %v6741_v44 = vmul.f32 1.442695, %v6489_v54 }
 0x71b   :  { %7470 = vst.msk [vmem:[%s13297_s11 + $0x288] sm:$0xff] %vm5980_vm1, %v7296_v52  ;;  %v6358_v23 = vpop.xlane.xlu1 %6357 }
 0x71c   :  { %8285 = vpow2.f32 %v6741_v44  ;;  %v6490_v58 = vsub.f32 %v12641_v46, %v6358_v23  ;;  %v13022_v5 = vpop.eup %8277 }
 0x71d   :  { %v7109_v25 = vsel %vm5980_vm1, %v13022_v5, 0.0 }
 0x71e   :  { %v6743_v50 = vmul.f32 1.442695, %v6490_v58  ;;  %7110 = vadd.xlane.f32.xlu0 %v7109_v25 }
 0x71f   :  { %v6361_v35 = vpop.xlane.xlu0 %6360  ;;  %v13026_v53 = vpop.eup %8279 }
 0x720   :  { %8287 = vpow2.f32 %v6743_v50  ;;  %v6491_v41 = vsub.f32 %v12656_v32, %v6361_v35  ;;  %v7112_v2 = vsel %vm5980_vm1, %v13026_v53, 0.0 }
 0x721   :  { %v13029_v60 = vpop.eup %8281  ;;  %7113 = vadd.xlane.f32.xlu1 %v7112_v2 }
 0x722   :  { %v6745_v42 = vmul.f32 1.442695, %v6491_v41  ;;  %v7115_v46 = vsel %vm5980_vm1, %v13029_v60, 0.0 }
 0x723   :  { %v6364_v24 = vpop.xlane.xlu1 %6363  ;;  %7116 = vadd.xlane.f32.xlu0 %v7115_v46  ;;  %v6997_v33 = vpop.xlane.xlu0 %6996 }
 0x724   :  { %8289 = vpow2.f32 %v6745_v42  ;;  %v6492_v3 = vsub.f32 %v12665_v40, %v6364_v24 }
 0x725   :  { %v13036_v22 = vpop.eup %8283  ;;  %8291 = vrcp.f32 %v6997_v33 }
 0x726   :  { %v6747_v32 = vmul.f32 1.442695, %v6492_v3  ;;  %v7118_v19 = vsel %vm5980_vm1, %v13036_v22, 0.0 }
 0x727   :  { %7119 = vadd.xlane.f32.xlu1 %v7118_v19  ;;  %v7000_v57 = vpop.xlane.xlu1 %6999  ;;  %v7003_v47 = vpop.xlane.xlu0 %7002 }
 0x728   :  { %8293 = vpow2.f32 %v6747_v32 }
 0x729   :  { %v13040_v54 = vpop.eup %8285  ;;  %8295 = vrcp.f32 %v7000_v57 }
 0x72a   :  { %8297 = vrcp.f32 %v7003_v47  ;;  %v7121_v21 = vsel %vm5980_vm1, %v13040_v54, 0.0 }
 0x72b   :  { %v7006_v7 = vpop.xlane.xlu1 %7005  ;;  %7122 = vadd.xlane.f32.xlu0 %v7121_v21  ;;  %v7009_v40 = vpop.xlane.xlu0 %7008 }
 0x72c   :  { %8299 = vrcp.f32 %v7006_v7 }
 0x72d   :  { %v13044_v52 = vpop.eup %8287  ;;  %8301 = vrcp.f32 %v7009_v40 }
 0x72e   :  { %v7124_v44 = vsel %vm5980_vm1, %v13044_v52, 0.0 }
 0x72f   :  { %7125 = vadd.xlane.f32.xlu1 %v7124_v44  ;;  %v7012_v23 = vpop.xlane.xlu1 %7011  ;;  %v7015_v58 = vpop.xlane.xlu0 %7014 }
 0x730   :  { %8303 = vrcp.f32 %v7012_v23 }
 0x731   :  { %v13048_v50 = vpop.eup %8289  ;;  %8305 = vrcp.f32 %v7015_v58 }
 0x732   :  { %v8292_v25 = vpop.eup %8291  ;;  %v7127_v35 = vsel %vm5980_vm1, %v13048_v50, 0.0 }
 0x733   :  { %v7298_v41 = vmul.f32 %v8292_v25, %v12658_v37  ;;  %v7018_v2 = vpop.xlane.xlu1 %7017  ;;  %7128 = vadd.xlane.f32.xlu0 %v7127_v35  ;;  %v7021_v42 = vpop.xlane.xlu0 %7020 }
 0x734   :  { %8307 = vrcp.f32 %v7018_v2 }
 0x735   :  { %v13053_v46 = vpop.eup %8293  ;;  %7471 = vst.msk [vmem:[%s13297_s11 + $0x290] sm:$0xff] %vm5980_vm1, %v7298_v41  ;;  %8309 = vrcp.f32 %v7021_v42 }
 0x736   :  { %v8296_v24 = vpop.eup %8295  ;;  %v7130_v33 = vsel %vm5980_vm1, %v13053_v46, 0.0 }
 0x737   :  { %v8298_v3 = vpop.eup %8297  ;;  %v7300_v32 = vmul.f32 %v8296_v24, %v12673_v1  ;;  %7131 = vadd.xlane.f32.xlu1 %v7130_v33  ;;  %v7024_v37 = vpop.xlane.xlu1 %7023 }
 0x738   :  { %v7027_v19 = vpop.xlane.xlu0 %7026  ;;  %v7302_v57 = vmul.f32 %v8298_v3, %v12678_v12  ;;  %8311 = vrcp.f32 %v7024_v37 }
 0x739   :  { %v8300_v47 = vpop.eup %8299  ;;  %7472 = vst.msk [vmem:[%s13297_s11 + $0x298] sm:$0xff] %vm5980_vm1, %v7300_v32  ;;  %8313 = vrcp.f32 %v7027_v19 }
 0x73a   :  { %v8302_v21 = vpop.eup %8301  ;;  %7473 = vst.msk [vmem:[%s13297_s11 + $0x2a0] sm:$0xff] %vm5980_vm1, %v7302_v57  ;;  %v7304_v1 = vmul.f32 %v8300_v47, %v12685_v62 }
 0x73b   :  { %v7306_v7 = vmul.f32 %v8302_v21, %v12691_v4  ;;  %v7030_v40 = vpop.xlane.xlu1 %7029 }
 0x73c   :  { %7474 = vst.msk [vmem:[%s13297_s11 + $0x2a8] sm:$0xff] %vm5980_vm1, %v7304_v1  ;;  %8315 = vrcp.f32 %v7030_v40 }
 0x73d   :  { %v8304_v12 = vpop.eup %8303  ;;  %7475 = vst.msk [vmem:[%s13297_s11 + $0x2b0] sm:$0xff] %vm5980_vm1, %v7306_v7 }
 0x73e   :  { %v8306_v44 = vpop.eup %8305  ;;  %v7308_v23 = vmul.f32 %v8304_v12, %v12699_v10 }
 0x73f   :  { %v7310_v62 = vmul.f32 %v8306_v44, %v12706_v27  ;;  %v7033_v58 = vpop.xlane.xlu0 %7032 }
 0x740   :  { %7476 = vst.msk [vmem:[%s13297_s11 + $0x2b8] sm:$0xff] %vm5980_vm1, %v7308_v23  ;;  %8317 = vrcp.f32 %v7033_v58 }
 0x741   :  { %v8308_v4 = vpop.eup %8307  ;;  %7477 = vst.msk [vmem:[%s13297_s11 + $0x2c0] sm:$0xff] %vm5980_vm1, %v7310_v62 }
 0x742   :  { %v8310_v25 = vpop.eup %8309  ;;  %v7312_v35 = vmul.f32 %v8308_v4, %v12713_v63  ;;  %v7036_v41 = vpop.xlane.xlu1 %7035 }
 0x743   :  { %v7314_v10 = vmul.f32 %v8310_v25, %v12719_v20  ;;  %8319 = vrcp.f32 %v7036_v41 }
 0x744   :  { %7478 = vst.msk [vmem:[%s13297_s11 + $0x2c8] sm:$0xff] %vm5980_vm1, %v7312_v35 }
 0x745   :  { %v8312_v27 = vpop.eup %8311  ;;  %7479 = vst.msk [vmem:[%s13297_s11 + $0x2d0] sm:$0xff] %vm5980_vm1, %v7314_v10 }
 0x746   :  { %v8314_v2 = vpop.eup %8313  ;;  %v7316_v42 = vmul.f32 %v8312_v27, %v12732_v31 }
 0x747   :  { %v7318_v63 = vmul.f32 %v8314_v2, %v12739_v51  ;;  %v7039_v24 = vpop.xlane.xlu0 %7038 }
 0x748   :  { %7480 = vst.msk [vmem:[%s13297_s11 + $0x2d8] sm:$0xff] %vm5980_vm1, %v7316_v42  ;;  %8321 = vrcp.f32 %v7039_v24 }
 0x749   :  { %v8316_v20 = vpop.eup %8315  ;;  %7481 = vst.msk [vmem:[%s13297_s11 + $0x2e0] sm:$0xff] %vm5980_vm1, %v7318_v63 }
 0x74a   :  { %v7320_v33 = vmul.f32 %v8316_v20, %v12747_v55  ;;  %v7042_v3 = vpop.xlane.xlu1 %7041 }
 0x74b   :  { %8323 = vrcp.f32 %v7042_v3 }
 0x74c   :  { %7482 = vst.msk [vmem:[%s13297_s11 + $0x2e8] sm:$0xff] %vm5980_vm1, %v7320_v33 }
 0x74d   :  { %v8318_v31 = vpop.eup %8317 }
 0x74e   :  { %v7322_v51 = vmul.f32 %v8318_v31, %v12761_v28 }
 0x74f   :  { %v7045_v32 = vpop.xlane.xlu0 %7044 }
 0x750   :  { %v8320_v37 = vpop.eup %8319  ;;  %7483 = vst.msk [vmem:[%s13297_s11 + $0x2f0] sm:$0xff] %vm5980_vm1, %v7322_v51  ;;  %8325 = vrcp.f32 %v7045_v32 }
 0x751   :  { %v7324_v55 = vmul.f32 %v8320_v37, %v12767_v56 }
 0x752   :  { %v7048_v19 = vpop.xlane.xlu1 %7047 }
 0x753   :  { %7484 = vst.msk [vmem:[%s13297_s11 + $0x2f8] sm:$0xff] %vm5980_vm1, %v7324_v55  ;;  %8327 = vrcp.f32 %v7048_v19 }
 0x755   :  { %v8322_v57 = vpop.eup %8321 }
 0x756   :  { %v7326_v28 = vmul.f32 %v8322_v57, %v12781_v9 }
 0x757   :  { %v7051_v47 = vpop.xlane.xlu0 %7050 }
 0x758   :  { %v8324_v21 = vpop.eup %8323  ;;  %7485 = vst.msk [vmem:[%s13297_s11 + $0x300] sm:$0xff] %vm5980_vm1, %v7326_v28  ;;  %8329 = vrcp.f32 %v7051_v47 }
 0x759   :  { %v7328_v56 = vmul.f32 %v8324_v21, %v12787_v49 }
 0x75a   :  { %v7054_v1 = vpop.xlane.xlu1 %7053 }
 0x75b   :  { %7486 = vst.msk [vmem:[%s13297_s11 + $0x308] sm:$0xff] %vm5980_vm1, %v7328_v56  ;;  %8331 = vrcp.f32 %v7054_v1 }
 0x75d   :  { %v8326_v7 = vpop.eup %8325 }
 0x75e   :  { %v7330_v9 = vmul.f32 %v8326_v7, %v12801_v61 }
 0x75f   :  { %v7057_v40 = vpop.xlane.xlu0 %7056 }
 0x760   :  { %v8328_v12 = vpop.eup %8327  ;;  %7487 = vst.msk [vmem:[%s13297_s11 + $0x310] sm:$0xff] %vm5980_vm1, %v7330_v9  ;;  %8333 = vrcp.f32 %v7057_v40 }
 0x761   :  { %v7332_v49 = vmul.f32 %v8328_v12, %v12807_v18 }
 0x762   :  { %v7060_v44 = vpop.xlane.xlu1 %7059 }
 0x763   :  { %7488 = vst.msk [vmem:[%s13297_s11 + $0x318] sm:$0xff] %vm5980_vm1, %v7332_v49  ;;  %8335 = vrcp.f32 %v7060_v44 }
 0x765   :  { %v8330_v23 = vpop.eup %8329 }
 0x766   :  { %v7334_v61 = vmul.f32 %v8330_v23, %v12821_v16 }
 0x767   :  { %v7063_v62 = vpop.xlane.xlu0 %7062 }
 0x768   :  { %v8332_v58 = vpop.eup %8331  ;;  %7489 = vst.msk [vmem:[%s13297_s11 + $0x320] sm:$0xff] %vm5980_vm1, %v7334_v61  ;;  %8337 = vrcp.f32 %v7063_v62 }
 0x769   :  { %v7336_v18 = vmul.f32 %v8332_v58, %v12827_v43 }
 0x76a   :  { %v7066_v4 = vpop.xlane.xlu1 %7065 }
 0x76b   :  { %7490 = vst.msk [vmem:[%s13297_s11 + $0x328] sm:$0xff] %vm5980_vm1, %v7336_v18  ;;  %8339 = vrcp.f32 %v7066_v4 }
 0x76d   :  { %v8334_v25 = vpop.eup %8333 }
 0x76e   :  { %v7338_v16 = vmul.f32 %v8334_v25, %v12841_v29 }
 0x76f   :  { %v7069_v35 = vpop.xlane.xlu0 %7068 }
 0x770   :  { %v8336_v41 = vpop.eup %8335  ;;  %7491 = vst.msk [vmem:[%s13297_s11 + $0x330] sm:$0xff] %vm5980_vm1, %v7338_v16  ;;  %8341 = vrcp.f32 %v7069_v35 }
 0x771   :  { %v7340_v43 = vmul.f32 %v8336_v41, %v12847_v38 }
 0x772   :  { %v7072_v10 = vpop.xlane.xlu1 %7071 }
 0x773   :  { %7492 = vst.msk [vmem:[%s13297_s11 + $0x338] sm:$0xff] %vm5980_vm1, %v7340_v43  ;;  %8343 = vrcp.f32 %v7072_v10 }
 0x775   :  { %v8338_v27 = vpop.eup %8337 }
 0x776   :  { %v7342_v29 = vmul.f32 %v8338_v27, %v12861_v8 }
 0x777   :  { %v7075_v2 = vpop.xlane.xlu0 %7074 }
 0x778   :  { %v8340_v42 = vpop.eup %8339  ;;  %7493 = vst.msk [vmem:[%s13297_s11 + $0x340] sm:$0xff] %vm5980_vm1, %v7342_v29  ;;  %8345 = vrcp.f32 %v7075_v2 }
 0x779   :  { %v7344_v38 = vmul.f32 %v8340_v42, %v12867_v48 }
 0x77a   :  { %v7078_v63 = vpop.xlane.xlu1 %7077 }
 0x77b   :  { %7494 = vst.msk [vmem:[%s13297_s11 + $0x348] sm:$0xff] %vm5980_vm1, %v7344_v38  ;;  %8347 = vrcp.f32 %v7078_v63 }
 0x77d   :  { %v8342_v24 = vpop.eup %8341 }
 0x77e   :  { %v7346_v8 = vmul.f32 %v8342_v24, %v12881_v6 }
 0x77f   :  { %v7081_v20 = vpop.xlane.xlu0 %7080 }
 0x780   :  { %v8344_v33 = vpop.eup %8343  ;;  %7495 = vst.msk [vmem:[%s13297_s11 + $0x350] sm:$0xff] %vm5980_vm1, %v7346_v8  ;;  %8349 = vrcp.f32 %v7081_v20 }
 0x781   :  { %v7348_v48 = vmul.f32 %v8344_v33, %v12887_v14 }
 0x782   :  { %v7084_v3 = vpop.xlane.xlu1 %7083 }
 0x783   :  { %7496 = vst.msk [vmem:[%s13297_s11 + $0x358] sm:$0xff] %vm5980_vm1, %v7348_v48  ;;  %8351 = vrcp.f32 %v7084_v3 }
 0x785   :  { %v8346_v31 = vpop.eup %8345 }
 0x786   :  { %v7350_v6 = vmul.f32 %v8346_v31, %v12901_v59 }
 0x787   :  { %v7087_v51 = vpop.xlane.xlu0 %7086 }
 0x788   :  { %v8348_v32 = vpop.eup %8347  ;;  %7497 = vst.msk [vmem:[%s13297_s11 + $0x360] sm:$0xff] %vm5980_vm1, %v7350_v6  ;;  %8353 = vrcp.f32 %v7087_v51 }
 0x789   :  { %v7352_v14 = vmul.f32 %v8348_v32, %v12907_v39 }
 0x78a   :  { %v7090_v37 = vpop.xlane.xlu1 %7089 }
 0x78b   :  { %7498 = vst.msk [vmem:[%s13297_s11 + $0x368] sm:$0xff] %vm5980_vm1, %v7352_v14  ;;  %8355 = vrcp.f32 %v7090_v37 }
 0x78d   :  { %v8350_v55 = vpop.eup %8349 }
 0x78e   :  { %v7354_v59 = vmul.f32 %v8350_v55, %v12921_v0 }
 0x78f   :  { %v7093_v19 = vpop.xlane.xlu0 %7092 }
 0x790   :  { %v8352_v57 = vpop.eup %8351  ;;  %7499 = vst.msk [vmem:[%s13297_s11 + $0x370] sm:$0xff] %vm5980_vm1, %v7354_v59  ;;  %8357 = vrcp.f32 %v7093_v19 }
 0x791   :  { %v7356_v39 = vmul.f32 %v8352_v57, %v12927_v30 }
 0x792   :  { %v7096_v28 = vpop.xlane.xlu1 %7095 }
 0x793   :  { %7500 = vst.msk [vmem:[%s13297_s11 + $0x378] sm:$0xff] %vm5980_vm1, %v7356_v39  ;;  %8359 = vrcp.f32 %v7096_v28 }
 0x795   :  { %v8354_v47 = vpop.eup %8353 }
 0x796   :  { %v7358_v0 = vmul.f32 %v8354_v47, %v12941_v36 }
 0x797   :  { %v7099_v21 = vpop.xlane.xlu0 %7098 }
 0x798   :  { %v8356_v56 = vpop.eup %8355  ;;  %7501 = vst.msk [vmem:[%s13297_s11 + $0x380] sm:$0xff] %vm5980_vm1, %v7358_v0  ;;  %8361 = vrcp.f32 %v7099_v21 }
 0x799   :  { %v7360_v30 = vmul.f32 %v8356_v56, %v12947_v26 }
 0x79a   :  { %v7102_v1 = vpop.xlane.xlu1 %7101 }
 0x79b   :  { %7502 = vst.msk [vmem:[%s13297_s11 + $0x388] sm:$0xff] %vm5980_vm1, %v7360_v30  ;;  %8363 = vrcp.f32 %v7102_v1 }
 0x79d   :  { %v8358_v7 = vpop.eup %8357 }
 0x79e   :  { %v7362_v36 = vmul.f32 %v8358_v7, %v12961_v13 }
 0x79f   :  { %v7105_v9 = vpop.xlane.xlu0 %7104 }
 0x7a0   :  { %v8360_v40 = vpop.eup %8359  ;;  %7503 = vst.msk [vmem:[%s13297_s11 + $0x390] sm:$0xff] %vm5980_vm1, %v7362_v36  ;;  %8365 = vrcp.f32 %v7105_v9 }
 0x7a1   :  { %v7364_v26 = vmul.f32 %v8360_v40, %v12967_v17 }
 0x7a2   :  { %v7108_v12 = vpop.xlane.xlu1 %7107 }
 0x7a3   :  { %7504 = vst.msk [vmem:[%s13297_s11 + $0x398] sm:$0xff] %vm5980_vm1, %v7364_v26  ;;  %8367 = vrcp.f32 %v7108_v12 }
 0x7a5   :  { %v8362_v49 = vpop.eup %8361 }
 0x7a6   :  { %v7366_v13 = vmul.f32 %v8362_v49, %v12980_v11 }
 0x7a7   :  { %v7111_v23 = vpop.xlane.xlu0 %7110 }
 0x7a8   :  { %v8364_v44 = vpop.eup %8363  ;;  %7505 = vst.msk [vmem:[%s13297_s11 + $0x3a0] sm:$0xff] %vm5980_vm1, %v7366_v13  ;;  %8369 = vrcp.f32 %v7111_v23 }
 0x7a9   :  { %v7368_v61 = vmul.f32 %v8364_v44, %v12986_v45 }
 0x7aa   :  { %v7114_v17 = vpop.xlane.xlu1 %7113 }
 0x7ab   :  { %7506 = vst.msk [vmem:[%s13297_s11 + $0x3a8] sm:$0xff] %vm5980_vm1, %v7368_v61  ;;  %8371 = vrcp.f32 %v7114_v17 }
 0x7ac   :  { %v7117_v62 = vpop.xlane.xlu0 %7116 }
 0x7ad   :  { %v8366_v58 = vpop.eup %8365  ;;  %8373 = vrcp.f32 %v7117_v62 }
 0x7ae   :  { %v7370_v11 = vmul.f32 %v8366_v58, %v13001_v15 }
 0x7b0   :  { %v8368_v18 = vpop.eup %8367  ;;  %7507 = vst.msk [vmem:[%s13297_s11 + $0x3b0] sm:$0xff] %vm5980_vm1, %v7370_v11  ;;  %v7120_v45 = vpop.xlane.xlu1 %7119 }
 0x7b1   :  { %v7372_v4 = vmul.f32 %v8368_v18, %v13007_v34  ;;  %8375 = vrcp.f32 %v7120_v45 }
 0x7b3   :  { %7508 = vst.msk [vmem:[%s13297_s11 + $0x3b8] sm:$0xff] %vm5980_vm1, %v7372_v4 }
 0x7b4   :  { %v7123_v25 = vpop.xlane.xlu0 %7122 }
 0x7b5   :  { %8377 = vrcp.f32 %v7123_v25  ;;  %v8370_v16 = vpop.eup %8369 }
 0x7b6   :  { %v7374_v15 = vmul.f32 %v8370_v16, %v13022_v5 }
 0x7b8   :  { %v7126_v35 = vpop.xlane.xlu1 %7125  ;;  %v8372_v41 = vpop.eup %8371  ;;  %7509 = vst.msk [vmem:[%s13297_s11 + $0x3c0] sm:$0xff] %vm5980_vm1, %v7374_v15 }
 0x7b9   :  { %8379 = vrcp.f32 %v7126_v35  ;;  %v7376_v43 = vmul.f32 %v8372_v41, %v13026_v53 }
 0x7ba   :  { %v8374_v34 = vpop.eup %8373 }
 0x7bb   :  { %v7378_v10 = vmul.f32 %v8374_v34, %v13029_v60  ;;  %7510 = vst.msk [vmem:[%s13297_s11 + $0x3c8] sm:$0xff] %vm5980_vm1, %v7376_v43 }
 0x7bc   :  { %v7129_v27 = vpop.xlane.xlu0 %7128 }
 0x7bd   :  { %7511 = vst.msk [vmem:[%s13297_s11 + $0x3d0] sm:$0xff] %vm5980_vm1, %v7378_v10  ;;  %8381 = vrcp.f32 %v7129_v27 }
 0x7be   :  { %v8376_v5 = vpop.eup %8375 }
 0x7bf   :  { %v7380_v29 = vmul.f32 %v8376_v5, %v13036_v22 }
 0x7c0   :  { %v7132_v2 = vpop.xlane.xlu1 %7131 }
 0x7c1   :  { %7512 = vst.msk [vmem:[%s13297_s11 + $0x3d8] sm:$0xff] %vm5980_vm1, %v7380_v29  ;;  %8383 = vrcp.f32 %v7132_v2 }
 0x7c2   :  { %v8378_v53 = vpop.eup %8377 }
 0x7c3   :  { %v7382_v60 = vmul.f32 %v8378_v53, %v13040_v54 }
 0x7c5   :  { %7513 = vst.msk [vmem:[%s13297_s11 + $0x3e0] sm:$0xff] %vm5980_vm1, %v7382_v60 }
 0x7c6   :  { %v8380_v42 = vpop.eup %8379 }
 0x7c7   :  { %v7384_v38 = vmul.f32 %v8380_v42, %v13044_v52 }
 0x7c9   :  { %7514 = vst.msk [vmem:[%s13297_s11 + $0x3e8] sm:$0xff] %vm5980_vm1, %v7384_v38 }
 0x7ca   :  { %v8382_v22 = vpop.eup %8381 }
 0x7cb   :  { %v7386_v63 = vmul.f32 %v8382_v22, %v13048_v50 }
 0x7cd   :  { %7515 = vst.msk [vmem:[%s13297_s11 + $0x3f0] sm:$0xff] %vm5980_vm1, %v7386_v63 }
 0x7ce   :  { %v8384_v54 = vpop.eup %8383 }
 0x7cf   :  { %v7388_v24 = vmul.f32 %v8384_v54, %v13053_v46 }
 0x7d1   :  { %7516 = vst.msk [vmem:[%s13297_s11 + $0x3f8] sm:$0xff] %vm5980_vm1, %v7388_v24 }

</bundles_post_ra>
